<compile_context>
chip_gen: v5e
topology: v5e:2x2
jax: 0.10.0
libtpu: 0.0.40
codegen_flags: <defaults>
</compile_context>

<pallas_src>
import functools

import jax
import jax.numpy as jnp
from jax import lax
from jax.experimental import pallas as pl
from jax.experimental.pallas import tpu as pltpu

EPS = 1e-5
LANE = 128
K_CAP = 2048  # max K handled as a single resident full-K weight block


def _round_up(x, m):
    return (x + m - 1) // m * m


def _cdiv(a, b):
    return -(-a // b)


# ---------------------------------------------------------------------------
# Per-generation tuning (VMEM budget, tile caps, Cout alignment).
# ---------------------------------------------------------------------------
def _tpu_tuning():
    kind = ""
    try:
        kind = jax.devices()[0].device_kind.lower()
    except Exception:
        pass
    if ("v5" in kind) or ("v6" in kind):
        # 128 MiB VMEM generations: big M tiles, resident full-K weights.
        return {"vmem_limit": 96 * 1024 * 1024, "tm_cap": 2048,
                "wide_cout": "v6" in kind}
    # v7x (64 MiB VMEM, 2 TensorCores) and unknown chips: conservative VMEM
    # budget, smaller tiles so the parallel M axis keeps >= 2 tiles per chip.
    return {"vmem_limit": 44 * 1024 * 1024, "tm_cap": 768, "wide_cout": True}


_CFG = _tpu_tuning()


def _cout_pad(planes):
    if _CFG["wide_cout"] and planes >= 128:
        return _round_up(planes, 256)  # fill the 256-wide MXU N dim on v6e/v7x
    return _round_up(planes, LANE)


def _pick_m_tiling(m, cap):
    """Pick (tm, m_pad). A full-M single block when it fits (no padding and no
    (8,128) constraint since the block equals the array dim); otherwise the
    largest multiple-of-8 divisor of m <= cap; otherwise pad."""
    cap = max(256, cap)
    if m <= cap:
        return m, m
    t = (cap // 8) * 8
    while t >= 256:
        if m % t == 0:
            return t, m
        t -= 8
    tm = (cap // 8) * 8
    return tm, _round_up(m, tm)


# ---------------------------------------------------------------------------
# Fused stride-1 3x3 conv: in-kernel gather (9 shifted in-VMEM slices + dots),
# bf16 output + f32 BN partials. Grid over the batch; weights stay resident.
# ---------------------------------------------------------------------------
def _make_conv3x3_kernel(ho, wo, cin):
    def kernel(x_ref, w_ref, y_ref, sum_ref, sq_ref):
        x = x_ref[0]                                     # (ho+2, wo+2, cin) bf16
        acc = jnp.zeros(y_ref.shape[1:], jnp.float32)    # (ho*wo, cout_p)
        for dh in range(3):
            for dw in range(3):
                xs = x[dh:dh + ho, dw:dw + wo, :].reshape(ho * wo, cin)
                acc = acc + jnp.dot(xs, w_ref[dh * 3 + dw],
                                    preferred_element_type=jnp.float32)
        y_ref[0] = acc.astype(y_ref.dtype)               # bf16 writeback
        sum_ref[0] = jnp.sum(acc, axis=0, keepdims=True)
        sq_ref[0] = jnp.sum(acc * acc, axis=0, keepdims=True)
    return kernel


def _fused_conv_fits(h, w, cin, cout_p):
    m = h * w
    need = (2 * (h + 2) * (w + 2) * cin * 2    # double-buffered bf16 input image
            + 9 * cin * cout_p * 2             # resident weights
            + 2 * m * cout_p * 2               # double-buffered bf16 y block
            + 2 * m * cout_p * 4               # f32 accumulator + dot temps
            + 4 * m * cin * 2                  # shifted-slice temporaries
            + 4 * cout_p * 4)
    return need <= _CFG["vmem_limit"] // 2


def conv3x3_fused(x_bf, w_torch, cout_p):
    n, h, w, cin = x_bf.shape
    ho, wo = h, w
    cout = w_torch.shape[0]
    xp = jnp.pad(x_bf, ((0, 0), (1, 1), (1, 1), (0, 0)))
    wk = jnp.transpose(w_torch, (2, 3, 1, 0)).reshape(9, cin, cout)
    wk = jnp.pad(wk.astype(jnp.bfloat16), ((0, 0), (0, 0), (0, cout_p - cout)))

    cost = pl.CostEstimate(
        flops=2 * n * ho * wo * 9 * cin * cout_p, transcendentals=0,
        bytes_accessed=int(xp.size * 2 + wk.size * 2
                           + n * ho * wo * cout_p * 2 + 2 * n * cout_p * 4))

    y, sums, sqs = pl.pallas_call(
        _make_conv3x3_kernel(ho, wo, cin),
        out_shape=(
            jax.ShapeDtypeStruct((n, ho * wo, cout_p), jnp.bfloat16),
            jax.ShapeDtypeStruct((n, 1, cout_p), jnp.float32),
            jax.ShapeDtypeStruct((n, 1, cout_p), jnp.float32),
        ),
        grid_spec=pltpu.PrefetchScalarGridSpec(
            num_scalar_prefetch=0,
            grid=(n,),
            in_specs=[
                pl.BlockSpec((1, h + 2, w + 2, cin), lambda i: (i, 0, 0, 0)),
                pl.BlockSpec((9, cin, cout_p), lambda i: (0, 0, 0)),
            ],
            out_specs=(
                pl.BlockSpec((1, ho * wo, cout_p), lambda i: (i, 0, 0)),
                pl.BlockSpec((1, 1, cout_p), lambda i: (i, 0, 0)),
                pl.BlockSpec((1, 1, cout_p), lambda i: (i, 0, 0)),
            ),
        ),
        compiler_params=pltpu.CompilerParams(
            dimension_semantics=("parallel",),
            vmem_limit_bytes=_CFG["vmem_limit"]),
        cost_estimate=cost,
    )(xp, wk)
    return y.reshape(n * ho * wo, cout_p), sums, sqs


# ---------------------------------------------------------------------------
# Fallback: tiled conv-as-matmul over im2col patches (bf16 MXU, f32 acc)
# + per-M-tile BN partial statistics.  Full-K resident weight block when
# K <= K_CAP (no K padding); 128-aligned near-equal K tiles otherwise.
# ---------------------------------------------------------------------------
def _matmul_stats_kernel(p_ref, w_ref, y_ref, sum_ref, sq_ref, acc_ref):
    k = pl.program_id(1)

    @pl.when(k == 0)
    def _init():
        acc_ref[...] = jnp.zeros_like(acc_ref)

    acc_ref[...] += jnp.dot(p_ref[...], w_ref[...],
                            preferred_element_type=jnp.float32)

    @pl.when(k == pl.num_programs(1) - 1)
    def _finalize():
        acc = acc_ref[...]
        y_ref[...] = acc.astype(y_ref.dtype)            # bf16 writeback
        sum_ref[...] = jnp.sum(acc, axis=0, keepdims=True)[None]
        sq_ref[...] = jnp.sum(acc * acc, axis=0, keepdims=True)[None]


def conv_matmul_stats(patches, w, cout_p):
    """(M, K) @ (K, cout) -> bf16 y (m_pad, cout_p) + f32 BN partials."""
    m, k = patches.shape
    cout = w.shape[1]
    tm, m_pad = _pick_m_tiling(m, _CFG["tm_cap"])
    k128 = _round_up(k, 128)
    if k128 <= K_CAP:
        tk, k_pad = k, k                 # single resident full-K block, unpadded
    else:
        k_tiles = _cdiv(k128, K_CAP)
        tk = _round_up(_cdiv(k, k_tiles), 128)
        k_pad = tk * k_tiles
    m_tiles, k_tiles = m_pad // tm, k_pad // tk

    p = patches.astype(jnp.bfloat16)
    if (m_pad, k_pad) != (m, k):
        p = jnp.pad(p, ((0, m_pad - m), (0, k_pad - k)))
    wp = w.astype(jnp.bfloat16)
    if (k_pad, cout_p) != (k, cout):
        wp = jnp.pad(wp, ((0, k_pad - k), (0, cout_p - cout)))

    w_streams = m_tiles if k_tiles > 1 else 1   # weights re-DMA'd per M tile
    cost = pl.CostEstimate(
        flops=2 * m_pad * k_pad * cout_p, transcendentals=0,
        bytes_accessed=int(p.size * 2 + wp.size * 2 * w_streams
                           + m_pad * cout_p * 2 + 2 * m_tiles * cout_p * 4))

    y, sums, sqs = pl.pallas_call(
        _matmul_stats_kernel,
        out_shape=(
            jax.ShapeDtypeStruct((m_pad, cout_p), jnp.bfloat16),
            jax.ShapeDtypeStruct((m_tiles, 1, cout_p), jnp.float32),
            jax.ShapeDtypeStruct((m_tiles, 1, cout_p), jnp.float32),
        ),
        grid_spec=pltpu.PrefetchScalarGridSpec(
            num_scalar_prefetch=0,
            grid=(m_tiles, k_tiles),
            in_specs=[
                pl.BlockSpec((tm, tk), lambda i, j: (i, j)),
                pl.BlockSpec((tk, cout_p), lambda i, j: (j, 0)),
            ],
            out_specs=(
                pl.BlockSpec((tm, cout_p), lambda i, j: (i, 0)),
                pl.BlockSpec((1, 1, cout_p), lambda i, j: (i, 0, 0)),
                pl.BlockSpec((1, 1, cout_p), lambda i, j: (i, 0, 0)),
            ),
            scratch_shapes=[pltpu.VMEM((tm, cout_p), jnp.float32)],
        ),
        compiler_params=pltpu.CompilerParams(
            dimension_semantics=("parallel", "arbitrary"),
            vmem_limit_bytes=_CFG["vmem_limit"]),
        cost_estimate=cost,
    )(p, wp)
    return y, sums, sqs


# ---------------------------------------------------------------------------
# Fold global BN stats into per-channel scale/shift (tiny, plain JAX).
# ---------------------------------------------------------------------------
def _fold_bn(sums, sqs, m_real, gamma, beta, cout_p):
    s = jnp.sum(sums[:, 0, :], axis=0)
    sq = jnp.sum(sqs[:, 0, :], axis=0)
    mean = s / m_real
    # TODO(synk): single-pass E[x^2]-E[x]^2 can cancel for |mean|>>std; a
    # Welford-style per-tile combine would be more robust for huge batches.
    var = jnp.maximum(sq / m_real - mean * mean, 0.0)  # biased, training-mode BN
    inv = lax.rsqrt(var + EPS)
    g = jnp.pad(gamma.reshape(-1).astype(jnp.float32), (0, cout_p - gamma.size))
    b = jnp.pad(beta.reshape(-1).astype(jnp.float32), (0, cout_p - beta.size))
    scale = g * inv
    shift = b - mean * scale
    return scale.reshape(1, cout_p), shift.reshape(1, cout_p)


# ---------------------------------------------------------------------------
# Pass-2 kernels: folded BN (+ folded-BN residual) + ReLU epilogue.
# ---------------------------------------------------------------------------
def _bn_act_kernel(y_ref, s_ref, b_ref, o_ref):
    o_ref[...] = jnp.maximum(
        y_ref[...] * s_ref[...] + b_ref[...], 0.0).astype(o_ref.dtype)


def _bn_add_act_kernel(y_ref, s_ref, b_ref, r_ref, rs_ref, rb_ref, o_ref):
    out = (y_ref[...] * s_ref[...] + b_ref[...]
           + r_ref[...] * rs_ref[...] + rb_ref[...])
    o_ref[...] = jnp.maximum(out, 0.0).astype(o_ref.dtype)


def bn_act(y, scale, shift, residual=None, res_scale=None, res_shift=None,
           *, out_dtype):
    m, cout_p = y.shape
    tm, m_pad = _pick_m_tiling(m, _CFG["tm_cap"])
    if m_pad != m:
        y = jnp.pad(y, ((0, m_pad - m), (0, 0)))
        if residual is not None:
            residual = jnp.pad(residual, ((0, m_pad - m), (0, 0)))
    m_tiles = m_pad // tm
    row_spec = pl.BlockSpec((tm, cout_p), lambda i: (i, 0))
    vec_spec = pl.BlockSpec((1, cout_p), lambda i: (0, 0))
    if residual is None:
        kernel = _bn_act_kernel
        args = (y, scale, shift)
        in_specs = [row_spec, vec_spec, vec_spec]
    else:
        kernel = _bn_add_act_kernel
        args = (y, scale, shift, residual, res_scale, res_shift)
        in_specs = [row_spec, vec_spec, vec_spec, row_spec, vec_spec, vec_spec]

    bytes_accessed = int(sum(a.size * a.dtype.itemsize for a in args)
                         + m_pad * cout_p * jnp.dtype(out_dtype).itemsize)
    out = pl.pallas_call(
        kernel,
        out_shape=jax.ShapeDtypeStruct((m_pad, cout_p), out_dtype),
        grid_spec=pltpu.PrefetchScalarGridSpec(
            num_scalar_prefetch=0,
            grid=(m_tiles,),
            in_specs=in_specs,
            out_specs=row_spec,
        ),
        compiler_params=pltpu.CompilerParams(
            dimension_semantics=("parallel",),
            vmem_limit_bytes=_CFG["vmem_limit"]),
        cost_estimate=pl.CostEstimate(flops=6 * m_pad * cout_p,
                                      transcendentals=0,
                                      bytes_accessed=bytes_accessed),
    )(*args)
    return out[:m]


# ---------------------------------------------------------------------------
# JAX glue: im2col fallback (3x3, pad=1), torch-weight reordering, dispatcher.
# ---------------------------------------------------------------------------
def im2col_3x3(x_nhwc, stride):
    n, h, w, c = x_nhwc.shape
    xp = jnp.pad(x_nhwc, ((0, 0), (1, 1), (1, 1), (0, 0)))
    ho = (h - 1) // stride + 1
    wo = (w - 1) // stride + 1
    cols = []
    for dh in range(3):
        for dw in range(3):
            cols.append(xp[:, dh:dh + (ho - 1) * stride + 1:stride,
                           dw:dw + (wo - 1) * stride + 1:stride, :])
    patches = jnp.concatenate(cols, axis=-1)          # (n, ho, wo, 9*c)
    return patches.reshape(n * ho * wo, 9 * c), (ho, wo)


def _torch_w_to_matmul(w):
    """(Cout, Cin, KH, KW) -> (KH*KW*Cin, Cout), matching im2col ordering."""
    cout = w.shape[0]
    return jnp.transpose(w, (2, 3, 1, 0)).reshape(-1, cout)


def conv3x3_bn_stats(x_bf, w_torch, cout_p, stride):
    n, h, w, cin = x_bf.shape
    ho = (h - 1) // stride + 1
    wo = (w - 1) // stride + 1
    m = n * ho * wo
    if stride == 1 and _fused_conv_fits(h, w, cin, cout_p):
        y, sums, sqs = conv3x3_fused(x_bf, w_torch, cout_p)
    else:
        # TODO(synk): strided convs / oversized feature maps still go through
        # the HBM im2col path; a space-to-depth pre-split (stride) or a
        # row-tiled halo DMA (large H*W) would let them use the fused gather.
        patches, _ = im2col_3x3(x_bf, stride)
        y, sums, sqs = conv_matmul_stats(patches, _torch_w_to_matmul(w_torch),
                                         cout_p)
        y = y[:m]
    return y, sums, sqs, m, (ho, wo)


# ---------------------------------------------------------------------------
# BasicBlock forward (NCHW in / NCHW out, PyTorch training-mode BN semantics).
# ---------------------------------------------------------------------------
@functools.partial(jax.jit, static_argnames=("stride",))
def basic_block_forward(x_nchw, params, *, stride):
    # NCHW -> NHWC once, in bf16 (no f32 copy of the input is materialized).
    x_bf = jnp.transpose(x_nchw, (0, 2, 3, 1)).astype(jnp.bfloat16)
    n, h, w, cin = x_bf.shape
    planes = params["conv1_w"].shape[0]
    cout_p = _cout_pad(planes)

    # conv1 -> bn1 -> relu
    y1, s1, q1, m, (ho, wo) = conv3x3_bn_stats(x_bf, params["conv1_w"], cout_p,
                                               stride)
    sc1, sh1 = _fold_bn(s1, q1, m, params["bn1_gamma"], params["bn1_beta"],
                        cout_p)
    out1 = bn_act(y1, sc1, sh1, out_dtype=jnp.bfloat16)
    out1_img = out1[:, :planes].reshape(n, ho, wo, planes)

    # conv2 -> bn2 statistics
    y2, s2, q2, _, _ = conv3x3_bn_stats(out1_img, params["conv2_w"], cout_p, 1)
    sc2, sh2 = _fold_bn(s2, q2, m, params["bn2_gamma"], params["bn2_beta"],
                        cout_p)

    # shortcut: identity or 1x1-conv + BN (residual stream stays bf16)
    if stride != 1 or cin != planes:
        xs = x_bf[:, ::stride, ::stride, :].reshape(m, cin)
        ysc, ss, qs = conv_matmul_stats(xs, _torch_w_to_matmul(params["sc_w"]),
                                        cout_p)
        scs, shs = _fold_bn(ss, qs, m, params["sc_gamma"], params["sc_beta"],
                            cout_p)
        res = ysc[:m]
    else:
        res = jnp.pad(x_bf.reshape(m, cin), ((0, 0), (0, cout_p - cin)))
        scs = jnp.ones((1, cout_p), jnp.float32)
        shs = jnp.zeros((1, cout_p), jnp.float32)

    # bn2 + shortcut-BN + residual add + relu (single fused epilogue)
    out = bn_act(y2, sc2, sh2, res, scs, shs, out_dtype=jnp.float32)
    out = out[:, :planes].reshape(n, ho, wo, planes)
    return jnp.transpose(out, (0, 3, 1, 2))  # NHWC -> NCHW


# ---------------------------------------------------------------------------
# Pure-JAX reference (lax.conv).  conv_dtype=bf16 mirrors the kernel's casts.
# ---------------------------------------------------------------------------
def basic_block_reference(x, params, stride, conv_dtype=jnp.float32):
    def conv(a, w, s, pad):
        return lax.conv_general_dilated(
            a.astype(conv_dtype), w.astype(conv_dtype), (s, s),
            ((pad, pad), (pad, pad)),
            dimension_numbers=("NCHW", "OIHW", "NCHW"),
            preferred_element_type=jnp.float32)

    def bn(y, gamma, beta):
        mean = jnp.mean(y, axis=(0, 2, 3), keepdims=True)
        var = jnp.mean((y - mean) ** 2, axis=(0, 2, 3), keepdims=True)
        return ((y - mean) * lax.rsqrt(var + EPS) * gamma.reshape(1, -1, 1, 1)
                + beta.reshape(1, -1, 1, 1))

    cin = x.shape[1]
    planes = params["conv1_w"].shape[0]
    out = jax.nn.relu(bn(conv(x, params["conv1_w"], stride, 1),
                         params["bn1_gamma"], params["bn1_beta"]))
    out = bn(conv(out, params["conv2_w"], 1, 1),
             params["bn2_gamma"], params["bn2_beta"])
    if stride != 1 or cin != planes:
        sc = bn(conv(x, params["sc_w"], stride, 0),
                params["sc_gamma"], params["sc_beta"])
    else:
        sc = x
    return jax.nn.relu(out + sc)


# ---------------------------------------------------------------------------
# Deterministic parameter construction (shapes from BasicBlock.__init__).
# ---------------------------------------------------------------------------
def make_params(key, in_planes, planes):
    ks = jax.random.split(key, 8)
    return {
        "conv1_w": 0.2 * jax.random.normal(ks[0], (planes, in_planes, 3, 3), jnp.float32),
        "bn1_gamma": 1.0 + 0.1 * jax.random.normal(ks[1], (planes,), jnp.float32),
        "bn1_beta": 0.1 * jax.random.normal(ks[2], (planes,), jnp.float32),
        "conv2_w": 0.2 * jax.random.normal(ks[3], (planes, planes, 3, 3), jnp.float32),
        "bn2_gamma": 1.0 + 0.1 * jax.random.normal(ks[4], (planes,), jnp.float32),
        "bn2_beta": 0.1 * jax.random.normal(ks[5], (planes,), jnp.float32),
        "sc_w": 0.2 * jax.random.normal(ks[6], (planes, in_planes, 1, 1), jnp.float32),
        "sc_gamma": 1.0 + 0.05 * jax.random.normal(ks[7], (planes,), jnp.float32),
        "sc_beta": jnp.zeros((planes,), jnp.float32),
    }


if __name__ == "__main__":
    key = jax.random.PRNGKey(0)
    k1, k2, k3, k4 = jax.random.split(key, 4)

    def check(x, params, stride):
        out = jax.block_until_ready(basic_block_forward(x, params, stride=stride))
        ref_m = jax.block_until_ready(
            basic_block_reference(x, params, stride, conv_dtype=jnp.bfloat16))
        ref_f = jax.block_until_ready(
            basic_block_reference(x, params, stride, conv_dtype=jnp.float32))
        assert out.shape == ref_f.shape, (out.shape, ref_f.shape)
        err_m = float(jnp.max(jnp.abs(out - ref_m)))
        err_f = float(jnp.max(jnp.abs(out - ref_f)))
        assert err_m < 5e-2, f"mismatch vs bf16-matched reference: {err_m}"
        assert err_f < 2e-1, f"mismatch vs f32 reference: {err_f}"

    # Case 1: projection shortcut (in_planes != planes), stride 1 -> fused conv.
    x = jax.random.normal(k1, (2, 4, 16, 16), jnp.float32)
    check(x, make_params(k2, 4, 8), stride=1)

    # Case 2: identity shortcut (in_planes == planes), stride 1 -> fused conv.
    x2 = jax.random.normal(k3, (2, 8, 16, 16), jnp.float32)
    check(x2, make_params(k4, 8, 8), stride=1)

    # Case 3: strided projection shortcut -> exercises the im2col fallback.
    check(x, make_params(k2, 4, 8), stride=2)

    print("KERNEL_OK")
</pallas_src>

<mosaic_0001>
module attributes {stable_mosaic.version = 11 : i64} {
  func.func @_matmul_stats_kernel(%arg0: i32, %arg1: i32, %arg2: memref<512x4xbf16, #tpu.memory_space<vmem>>, %arg3: memref<4x128xbf16, #tpu.memory_space<vmem>>, %arg4: memref<512x128xbf16, #tpu.memory_space<vmem>>, %arg5: memref<1x1x128xf32, #tpu.memory_space<vmem>>, %arg6: memref<1x1x128xf32, #tpu.memory_space<vmem>>, %arg7: memref<512x128xf32, #tpu.memory_space<vmem>>) attributes {dimension_semantics = [#tpu.dimension_semantics<parallel>, #tpu.dimension_semantics<arbitrary>], iteration_bounds = array<i64: 1, 1>, scalar_prefetch = 0 : i64, scratch_operands = 1 : i64, tpu.core_type = #tpu.core_type<tc>, window_params = [{transform_indices = @transform_0, window_bounds = array<i64: 512, 4>}, {transform_indices = @transform_1, window_bounds = array<i64: 4, 128>}, {transform_indices = @transform_2, window_bounds = array<i64: 512, 128>}, {transform_indices = @transform_3, window_bounds = array<i64: 1, 1, 128>}, {transform_indices = @transform_4, window_bounds = array<i64: 1, 1, 128>}]} {
    %c0_i32 = arith.constant 0 : i32
    %0 = arith.cmpi eq, %arg1, %c0_i32 : i32
    %1 = arith.extui %0 : i1 to i32
    %c0_i32_0 = arith.constant 0 : i32
    %2 = arith.cmpi ne, %1, %c0_i32_0 : i32
    scf.if %2 {
      %cst_10 = arith.constant 0.000000e+00 : f32
      %12 = vector.broadcast %cst_10 : f32 to vector<512x128xf32>
      %c0_11 = arith.constant 0 : index
      %c0_12 = arith.constant 0 : index
      %13 = vector.load %arg7[%c0_11, %c0_12] : memref<512x128xf32, #tpu.memory_space<vmem>>, vector<512x128xf32>
      tpu.vector_store %arg7[%c0_11, %c0_12], %12 {strides = array<i32>} : memref<512x128xf32, #tpu.memory_space<vmem>>, vector<512x128xf32>,
    } else {
    }
    %c0 = arith.constant 0 : index
    %c0_1 = arith.constant 0 : index
    %3 = vector.load %arg7[%c0, %c0_1] : memref<512x128xf32, #tpu.memory_space<vmem>>, vector<512x128xf32>
    %c0_2 = arith.constant 0 : index
    %c0_3 = arith.constant 0 : index
    %4 = vector.load %arg2[%c0_2, %c0_3] : memref<512x4xbf16, #tpu.memory_space<vmem>>, vector<512x4xbf16>
    %c0_4 = arith.constant 0 : index
    %c0_5 = arith.constant 0 : index
    %5 = vector.load %arg3[%c0_4, %c0_5] : memref<4x128xbf16, #tpu.memory_space<vmem>>, vector<4x128xbf16>
    %cst = arith.constant dense<0.000000e+00> : vector<512x128xf32>
    %6 = tpu.matmul %4, %5, %cst {dimension_numbers = #tpu.dot_dimension_numbers<[1], [0], [0], [1], [0, 0, 1, 1], [], []>} : vector<512x4xbf16>, vector<4x128xbf16>, vector<512x128xf32> -> vector<512x128xf32>
    %7 = arith.addf %3, %6 : vector<512x128xf32>
    %c0_6 = arith.constant 0 : index
    %c0_7 = arith.constant 0 : index
    %8 = vector.load %arg7[%c0_6, %c0_7] : memref<512x128xf32, #tpu.memory_space<vmem>>, vector<512x128xf32>
    tpu.vector_store %arg7[%c0_6, %c0_7], %7 {strides = array<i32>} : memref<512x128xf32, #tpu.memory_space<vmem>>, vector<512x128xf32>,
    %c0_i32_8 = arith.constant 0 : i32
    %9 = arith.cmpi eq, %arg1, %c0_i32_8 : i32
    %10 = arith.extui %9 : i1 to i32
    %c0_i32_9 = arith.constant 0 : i32
    %11 = arith.cmpi ne, %10, %c0_i32_9 : i32
    scf.if %11 {
      %c0_10 = arith.constant 0 : index
      %c0_11 = arith.constant 0 : index
      %12 = vector.load %arg7[%c0_10, %c0_11] : memref<512x128xf32, #tpu.memory_space<vmem>>, vector<512x128xf32>
      %13 = arith.truncf %12 : vector<512x128xf32> to vector<512x128xbf16>
      %c0_12 = arith.constant 0 : index
      %c0_13 = arith.constant 0 : index
      %14 = vector.load %arg4[%c0_12, %c0_13] : memref<512x128xbf16, #tpu.memory_space<vmem>>, vector<512x128xbf16>
      tpu.vector_store %arg4[%c0_12, %c0_13], %13 {strides = array<i32>} : memref<512x128xbf16, #tpu.memory_space<vmem>>, vector<512x128xbf16>,
      %cst_14 = arith.constant dense<0.000000e+00> : vector<128xf32>
      %15 = vector.multi_reduction <add>, %12, %cst_14 [0] : vector<512x128xf32> to vector<128xf32>
      %16 = vector.shape_cast %15 : vector<128xf32> to vector<1x128xf32>
      %17 = vector.shape_cast %16 : vector<1x128xf32> to vector<1x1x128xf32>
      %c0_15 = arith.constant 0 : index
      %c0_16 = arith.constant 0 : index
      %c0_17 = arith.constant 0 : index
      %18 = vector.load %arg5[%c0_15, %c0_16, %c0_17] : memref<1x1x128xf32, #tpu.memory_space<vmem>>, vector<1x1x128xf32>
      tpu.vector_store %arg5[%c0_15, %c0_16, %c0_17], %17 {strides = array<i32>} : memref<1x1x128xf32, #tpu.memory_space<vmem>>, vector<1x1x128xf32>,
      %19 = arith.mulf %12, %12 : vector<512x128xf32>
      %cst_18 = arith.constant dense<0.000000e+00> : vector<128xf32>
      %20 = vector.multi_reduction <add>, %19, %cst_18 [0] : vector<512x128xf32> to vector<128xf32>
      %21 = vector.shape_cast %20 : vector<128xf32> to vector<1x128xf32>
      %22 = vector.shape_cast %21 : vector<1x128xf32> to vector<1x1x128xf32>
      %c0_19 = arith.constant 0 : index
      %c0_20 = arith.constant 0 : index
      %c0_21 = arith.constant 0 : index
      %23 = vector.load %arg6[%c0_19, %c0_20, %c0_21] : memref<1x1x128xf32, #tpu.memory_space<vmem>>, vector<1x1x128xf32>
      tpu.vector_store %arg6[%c0_19, %c0_20, %c0_21], %22 {strides = array<i32>} : memref<1x1x128xf32, #tpu.memory_space<vmem>>, vector<1x1x128xf32>,
    } else {
    }
    return
  }
  func.func @transform_0(%arg0: i32, %arg1: i32) -> (i32, i32) {
    %c0_i32 = arith.constant 0 : i32
    return %arg0, %arg1 : i32, i32
  }
  func.func @transform_1(%arg0: i32, %arg1: i32) -> (i32, i32) {
    %c0_i32 = arith.constant 0 : i32
    %c0_i32_0 = arith.constant 0 : i32
    return %arg1, %c0_i32 : i32, i32
  }
  func.func @transform_2(%arg0: i32, %arg1: i32) -> (i32, i32) {
    %c0_i32 = arith.constant 0 : i32
    %c0_i32_0 = arith.constant 0 : i32
    return %arg0, %c0_i32 : i32, i32
  }
  func.func @transform_3(%arg0: i32, %arg1: i32) -> (i32, i32, i32) {
    %c0_i32 = arith.constant 0 : i32
    %c0_i32_0 = arith.constant 0 : i32
    %c0_i32_1 = arith.constant 0 : i32
    return %arg0, %c0_i32, %c0_i32_0 : i32, i32, i32
  }
  func.func @transform_4(%arg0: i32, %arg1: i32) -> (i32, i32, i32) {
    %c0_i32 = arith.constant 0 : i32
    %c0_i32_0 = arith.constant 0 : i32
    %c0_i32_1 = arith.constant 0 : i32
    return %arg0, %c0_i32, %c0_i32_0 : i32, i32, i32
  }
}

module attributes {stable_mosaic.version = 11 : i64} {
  func.func @kernel(%arg0: i32, %arg1: memref<1x18x18x4xbf16, #tpu.memory_space<vmem>>, %arg2: memref<9x4x128xbf16, #tpu.memory_space<vmem>>, %arg3: memref<1x256x128xbf16, #tpu.memory_space<vmem>>, %arg4: memref<1x1x128xf32, #tpu.memory_space<vmem>>, %arg5: memref<1x1x128xf32, #tpu.memory_space<vmem>>) attributes {dimension_semantics = [#tpu.dimension_semantics<parallel>], iteration_bounds = array<i64: 2>, scalar_prefetch = 0 : i64, scratch_operands = 0 : i64, tpu.core_type = #tpu.core_type<tc>, window_params = [{transform_indices = @transform_0, window_bounds = array<i64: 1, 18, 18, 4>}, {pipeline_mode = #tpu.pipeline_mode<synchronous>, transform_indices = @transform_1, window_bounds = array<i64: 9, 4, 128>}, {transform_indices = @transform_2, window_bounds = array<i64: 1, 256, 128>}, {transform_indices = @transform_3, window_bounds = array<i64: 1, 1, 128>}, {transform_indices = @transform_4, window_bounds = array<i64: 1, 1, 128>}]} {
    %c0 = arith.constant 0 : index
    %c0_0 = arith.constant 0 : index
    %c0_1 = arith.constant 0 : index
    %c0_2 = arith.constant 0 : index
    %0 = vector.load %arg1[%c0, %c0_0, %c0_1, %c0_2] : memref<1x18x18x4xbf16, #tpu.memory_space<vmem>>, vector<1x18x18x4xbf16>
    %1 = vector.shape_cast %0 : vector<1x18x18x4xbf16> to vector<18x18x4xbf16>
    %cst = arith.constant 0.000000e+00 : f32
    %2 = vector.broadcast %cst : f32 to vector<256x128xf32>
    %3 = vector.extract_strided_slice %1 {offsets = [0, 0, 0], sizes = [16, 16, 4], strides = [1, 1, 1]} : vector<18x18x4xbf16> to vector<16x16x4xbf16>
    %4 = vector.shape_cast %3 : vector<16x16x4xbf16> to vector<256x4xbf16>
    %c0_3 = arith.constant 0 : index
    %c0_4 = arith.constant 0 : index
    %c0_5 = arith.constant 0 : index
    %5 = vector.load %arg2[%c0_3, %c0_4, %c0_5] : memref<9x4x128xbf16, #tpu.memory_space<vmem>>, vector<1x4x128xbf16>
    %6 = vector.shape_cast %5 : vector<1x4x128xbf16> to vector<4x128xbf16>
    %cst_6 = arith.constant dense<0.000000e+00> : vector<256x128xf32>
    %7 = tpu.matmul %4, %6, %cst_6 {dimension_numbers = #tpu.dot_dimension_numbers<[1], [0], [0], [1], [0, 0, 1, 1], [], []>} : vector<256x4xbf16>, vector<4x128xbf16>, vector<256x128xf32> -> vector<256x128xf32>
    %8 = arith.addf %2, %7 : vector<256x128xf32>
    %9 = vector.extract_strided_slice %1 {offsets = [0, 1, 0], sizes = [16, 16, 4], strides = [1, 1, 1]} : vector<18x18x4xbf16> to vector<16x16x4xbf16>
    %10 = vector.shape_cast %9 : vector<16x16x4xbf16> to vector<256x4xbf16>
    %c1 = arith.constant 1 : index
    %c0_7 = arith.constant 0 : index
    %c0_8 = arith.constant 0 : index
    %11 = vector.load %arg2[%c1, %c0_7, %c0_8] : memref<9x4x128xbf16, #tpu.memory_space<vmem>>, vector<1x4x128xbf16>
    %12 = vector.shape_cast %11 : vector<1x4x128xbf16> to vector<4x128xbf16>
    %cst_9 = arith.constant dense<0.000000e+00> : vector<256x128xf32>
    %13 = tpu.matmul %10, %12, %cst_9 {dimension_numbers = #tpu.dot_dimension_numbers<[1], [0], [0], [1], [0, 0, 1, 1], [], []>} : vector<256x4xbf16>, vector<4x128xbf16>, vector<256x128xf32> -> vector<256x128xf32>
    %14 = arith.addf %8, %13 : vector<256x128xf32>
    %15 = vector.extract_strided_slice %1 {offsets = [0, 2, 0], sizes = [16, 16, 4], strides = [1, 1, 1]} : vector<18x18x4xbf16> to vector<16x16x4xbf16>
    %16 = vector.shape_cast %15 : vector<16x16x4xbf16> to vector<256x4xbf16>
    %c2 = arith.constant 2 : index
    %c0_10 = arith.constant 0 : index
    %c0_11 = arith.constant 0 : index
    %17 = vector.load %arg2[%c2, %c0_10, %c0_11] : memref<9x4x128xbf16, #tpu.memory_space<vmem>>, vector<1x4x128xbf16>
    %18 = vector.shape_cast %17 : vector<1x4x128xbf16> to vector<4x128xbf16>
    %cst_12 = arith.constant dense<0.000000e+00> : vector<256x128xf32>
    %19 = tpu.matmul %16, %18, %cst_12 {dimension_numbers = #tpu.dot_dimension_numbers<[1], [0], [0], [1], [0, 0, 1, 1], [], []>} : vector<256x4xbf16>, vector<4x128xbf16>, vector<256x128xf32> -> vector<256x128xf32>
    %20 = arith.addf %14, %19 : vector<256x128xf32>
    %21 = vector.extract_strided_slice %1 {offsets = [1, 0, 0], sizes = [16, 16, 4], strides = [1, 1, 1]} : vector<18x18x4xbf16> to vector<16x16x4xbf16>
    %22 = vector.shape_cast %21 : vector<16x16x4xbf16> to vector<256x4xbf16>
    %c3 = arith.constant 3 : index
    %c0_13 = arith.constant 0 : index
    %c0_14 = arith.constant 0 : index
    %23 = vector.load %arg2[%c3, %c0_13, %c0_14] : memref<9x4x128xbf16, #tpu.memory_space<vmem>>, vector<1x4x128xbf16>
    %24 = vector.shape_cast %23 : vector<1x4x128xbf16> to vector<4x128xbf16>
    %cst_15 = arith.constant dense<0.000000e+00> : vector<256x128xf32>
    %25 = tpu.matmul %22, %24, %cst_15 {dimension_numbers = #tpu.dot_dimension_numbers<[1], [0], [0], [1], [0, 0, 1, 1], [], []>} : vector<256x4xbf16>, vector<4x128xbf16>, vector<256x128xf32> -> vector<256x128xf32>
    %26 = arith.addf %20, %25 : vector<256x128xf32>
    %27 = vector.extract_strided_slice %1 {offsets = [1, 1, 0], sizes = [16, 16, 4], strides = [1, 1, 1]} : vector<18x18x4xbf16> to vector<16x16x4xbf16>
    %28 = vector.shape_cast %27 : vector<16x16x4xbf16> to vector<256x4xbf16>
    %c4 = arith.constant 4 : index
    %c0_16 = arith.constant 0 : index
    %c0_17 = arith.constant 0 : index
    %29 = vector.load %arg2[%c4, %c0_16, %c0_17] : memref<9x4x128xbf16, #tpu.memory_space<vmem>>, vector<1x4x128xbf16>
    %30 = vector.shape_cast %29 : vector<1x4x128xbf16> to vector<4x128xbf16>
    %cst_18 = arith.constant dense<0.000000e+00> : vector<256x128xf32>
    %31 = tpu.matmul %28, %30, %cst_18 {dimension_numbers = #tpu.dot_dimension_numbers<[1], [0], [0], [1], [0, 0, 1, 1], [], []>} : vector<256x4xbf16>, vector<4x128xbf16>, vector<256x128xf32> -> vector<256x128xf32>
    %32 = arith.addf %26, %31 : vector<256x128xf32>
    %33 = vector.extract_strided_slice %1 {offsets = [1, 2, 0], sizes = [16, 16, 4], strides = [1, 1, 1]} : vector<18x18x4xbf16> to vector<16x16x4xbf16>
    %34 = vector.shape_cast %33 : vector<16x16x4xbf16> to vector<256x4xbf16>
    %c5 = arith.constant 5 : index
    %c0_19 = arith.constant 0 : index
    %c0_20 = arith.constant 0 : index
    %35 = vector.load %arg2[%c5, %c0_19, %c0_20] : memref<9x4x128xbf16, #tpu.memory_space<vmem>>, vector<1x4x128xbf16>
    %36 = vector.shape_cast %35 : vector<1x4x128xbf16> to vector<4x128xbf16>
    %cst_21 = arith.constant dense<0.000000e+00> : vector<256x128xf32>
    %37 = tpu.matmul %34, %36, %cst_21 {dimension_numbers = #tpu.dot_dimension_numbers<[1], [0], [0], [1], [0, 0, 1, 1], [], []>} : vector<256x4xbf16>, vector<4x128xbf16>, vector<256x128xf32> -> vector<256x128xf32>
    %38 = arith.addf %32, %37 : vector<256x128xf32>
    %39 = vector.extract_strided_slice %1 {offsets = [2, 0, 0], sizes = [16, 16, 4], strides = [1, 1, 1]} : vector<18x18x4xbf16> to vector<16x16x4xbf16>
    %40 = vector.shape_cast %39 : vector<16x16x4xbf16> to vector<256x4xbf16>
    %c6 = arith.constant 6 : index
    %c0_22 = arith.constant 0 : index
    %c0_23 = arith.constant 0 : index
    %41 = vector.load %arg2[%c6, %c0_22, %c0_23] : memref<9x4x128xbf16, #tpu.memory_space<vmem>>, vector<1x4x128xbf16>
    %42 = vector.shape_cast %41 : vector<1x4x128xbf16> to vector<4x128xbf16>
    %cst_24 = arith.constant dense<0.000000e+00> : vector<256x128xf32>
    %43 = tpu.matmul %40, %42, %cst_24 {dimension_numbers = #tpu.dot_dimension_numbers<[1], [0], [0], [1], [0, 0, 1, 1], [], []>} : vector<256x4xbf16>, vector<4x128xbf16>, vector<256x128xf32> -> vector<256x128xf32>
    %44 = arith.addf %38, %43 : vector<256x128xf32>
    %45 = vector.extract_strided_slice %1 {offsets = [2, 1, 0], sizes = [16, 16, 4], strides = [1, 1, 1]} : vector<18x18x4xbf16> to vector<16x16x4xbf16>
    %46 = vector.shape_cast %45 : vector<16x16x4xbf16> to vector<256x4xbf16>
    %c7 = arith.constant 7 : index
    %c0_25 = arith.constant 0 : index
    %c0_26 = arith.constant 0 : index
    %47 = vector.load %arg2[%c7, %c0_25, %c0_26] : memref<9x4x128xbf16, #tpu.memory_space<vmem>>, vector<1x4x128xbf16>
    %48 = vector.shape_cast %47 : vector<1x4x128xbf16> to vector<4x128xbf16>
    %cst_27 = arith.constant dense<0.000000e+00> : vector<256x128xf32>
    %49 = tpu.matmul %46, %48, %cst_27 {dimension_numbers = #tpu.dot_dimension_numbers<[1], [0], [0], [1], [0, 0, 1, 1], [], []>} : vector<256x4xbf16>, vector<4x128xbf16>, vector<256x128xf32> -> vector<256x128xf32>
    %50 = arith.addf %44, %49 : vector<256x128xf32>
    %51 = vector.extract_strided_slice %1 {offsets = [2, 2, 0], sizes = [16, 16, 4], strides = [1, 1, 1]} : vector<18x18x4xbf16> to vector<16x16x4xbf16>
    %52 = vector.shape_cast %51 : vector<16x16x4xbf16> to vector<256x4xbf16>
    %c8 = arith.constant 8 : index
    %c0_28 = arith.constant 0 : index
    %c0_29 = arith.constant 0 : index
    %53 = vector.load %arg2[%c8, %c0_28, %c0_29] : memref<9x4x128xbf16, #tpu.memory_space<vmem>>, vector<1x4x128xbf16>
    %54 = vector.shape_cast %53 : vector<1x4x128xbf16> to vector<4x128xbf16>
    %cst_30 = arith.constant dense<0.000000e+00> : vector<256x128xf32>
    %55 = tpu.matmul %52, %54, %cst_30 {dimension_numbers = #tpu.dot_dimension_numbers<[1], [0], [0], [1], [0, 0, 1, 1], [], []>} : vector<256x4xbf16>, vector<4x128xbf16>, vector<256x128xf32> -> vector<256x128xf32>
    %56 = arith.addf %50, %55 : vector<256x128xf32>
    %57 = arith.truncf %56 : vector<256x128xf32> to vector<256x128xbf16>
    %c0_31 = arith.constant 0 : index
    %c0_32 = arith.constant 0 : index
    %c0_33 = arith.constant 0 : index
    %58 = vector.load %arg3[%c0_31, %c0_32, %c0_33] : memref<1x256x128xbf16, #tpu.memory_space<vmem>>, vector<1x256x128xbf16>
    %59 = vector.shape_cast %58 : vector<1x256x128xbf16> to vector<256x128xbf16>
    %60 = vector.shape_cast %57 : vector<256x128xbf16> to vector<1x256x128xbf16>
    tpu.vector_store %arg3[%c0_31, %c0_32, %c0_33], %60 {strides = array<i32>} : memref<1x256x128xbf16, #tpu.memory_space<vmem>>, vector<1x256x128xbf16>,
    %cst_34 = arith.constant dense<0.000000e+00> : vector<128xf32>
    %61 = vector.multi_reduction <add>, %56, %cst_34 [0] : vector<256x128xf32> to vector<128xf32>
    %62 = vector.shape_cast %61 : vector<128xf32> to vector<1x128xf32>
    %c0_35 = arith.constant 0 : index
    %c0_36 = arith.constant 0 : index
    %c0_37 = arith.constant 0 : index
    %63 = vector.load %arg4[%c0_35, %c0_36, %c0_37] : memref<1x1x128xf32, #tpu.memory_space<vmem>>, vector<1x1x128xf32>
    %64 = vector.shape_cast %63 : vector<1x1x128xf32> to vector<1x128xf32>
    %65 = vector.shape_cast %62 : vector<1x128xf32> to vector<1x1x128xf32>
    tpu.vector_store %arg4[%c0_35, %c0_36, %c0_37], %65 {strides = array<i32>} : memref<1x1x128xf32, #tpu.memory_space<vmem>>, vector<1x1x128xf32>,
    %66 = arith.mulf %56, %56 : vector<256x128xf32>
    %cst_38 = arith.constant dense<0.000000e+00> : vector<128xf32>
    %67 = vector.multi_reduction <add>, %66, %cst_38 [0] : vector<256x128xf32> to vector<128xf32>
    %68 = vector.shape_cast %67 : vector<128xf32> to vector<1x128xf32>
    %c0_39 = arith.constant 0 : index
    %c0_40 = arith.constant 0 : index
    %c0_41 = arith.constant 0 : index
    %69 = vector.load %arg5[%c0_39, %c0_40, %c0_41] : memref<1x1x128xf32, #tpu.memory_space<vmem>>, vector<1x1x128xf32>
    %70 = vector.shape_cast %69 : vector<1x1x128xf32> to vector<1x128xf32>
    %71 = vector.shape_cast %68 : vector<1x128xf32> to vector<1x1x128xf32>
    tpu.vector_store %arg5[%c0_39, %c0_40, %c0_41], %71 {strides = array<i32>} : memref<1x1x128xf32, #tpu.memory_space<vmem>>, vector<1x1x128xf32>,
    return
  }
  func.func @transform_0(%arg0: i32) -> (i32, i32, i32, i32) {
    %c0_i32 = arith.constant 0 : i32
    %c0_i32_0 = arith.constant 0 : i32
    %c0_i32_1 = arith.constant 0 : i32
    %c0_i32_2 = arith.constant 0 : i32
    return %arg0, %c0_i32, %c0_i32_0, %c0_i32_1 : i32, i32, i32, i32
  }
  func.func @transform_1(%arg0: i32) -> (i32, i32, i32) {
    %c0_i32 = arith.constant 0 : i32
    %c0_i32_0 = arith.constant 0 : i32
    %c0_i32_1 = arith.constant 0 : i32
    %c0_i32_2 = arith.constant 0 : i32
    return %c0_i32, %c0_i32_0, %c0_i32_1 : i32, i32, i32
  }
  func.func @transform_2(%arg0: i32) -> (i32, i32, i32) {
    %c0_i32 = arith.constant 0 : i32
    %c0_i32_0 = arith.constant 0 : i32
    %c0_i32_1 = arith.constant 0 : i32
    return %arg0, %c0_i32, %c0_i32_0 : i32, i32, i32
  }
  func.func @transform_3(%arg0: i32) -> (i32, i32, i32) {
    %c0_i32 = arith.constant 0 : i32
    %c0_i32_0 = arith.constant 0 : i32
    %c0_i32_1 = arith.constant 0 : i32
    return %arg0, %c0_i32, %c0_i32_0 : i32, i32, i32
  }
  func.func @transform_4(%arg0: i32) -> (i32, i32, i32) {
    %c0_i32 = arith.constant 0 : i32
    %c0_i32_0 = arith.constant 0 : i32
    %c0_i32_1 = arith.constant 0 : i32
    return %arg0, %c0_i32, %c0_i32_0 : i32, i32, i32
  }
}

module attributes {stable_mosaic.version = 11 : i64} {
  func.func @_bn_act_kernel(%arg0: i32, %arg1: memref<512x128xbf16, #tpu.memory_space<vmem>>, %arg2: memref<1x128xf32, #tpu.memory_space<vmem>>, %arg3: memref<1x128xf32, #tpu.memory_space<vmem>>, %arg4: memref<512x128xbf16, #tpu.memory_space<vmem>>) attributes {dimension_semantics = [#tpu.dimension_semantics<parallel>], iteration_bounds = array<i64: 1>, scalar_prefetch = 0 : i64, scratch_operands = 0 : i64, tpu.core_type = #tpu.core_type<tc>, window_params = [{transform_indices = @transform_0, window_bounds = array<i64: 512, 128>}, {pipeline_mode = #tpu.pipeline_mode<synchronous>, transform_indices = @transform_1, window_bounds = array<i64: 1, 128>}, {pipeline_mode = #tpu.pipeline_mode<synchronous>, transform_indices = @transform_2, window_bounds = array<i64: 1, 128>}, {transform_indices = @transform_3, window_bounds = array<i64: 512, 128>}]} {
    %c0 = arith.constant 0 : index
    %c0_0 = arith.constant 0 : index
    %0 = vector.load %arg1[%c0, %c0_0] : memref<512x128xbf16, #tpu.memory_space<vmem>>, vector<512x128xbf16>
    %c0_1 = arith.constant 0 : index
    %c0_2 = arith.constant 0 : index
    %1 = vector.load %arg2[%c0_1, %c0_2] : memref<1x128xf32, #tpu.memory_space<vmem>>, vector<1x128xf32>
    %2 = arith.extf %0 : vector<512x128xbf16> to vector<512x128xf32>
    %3 = vector.broadcast %1 : vector<1x128xf32> to vector<512x128xf32>
    %4 = arith.mulf %2, %3 : vector<512x128xf32>
    %c0_3 = arith.constant 0 : index
    %c0_4 = arith.constant 0 : index
    %5 = vector.load %arg3[%c0_3, %c0_4] : memref<1x128xf32, #tpu.memory_space<vmem>>, vector<1x128xf32>
    %6 = vector.broadcast %5 : vector<1x128xf32> to vector<512x128xf32>
    %7 = arith.addf %4, %6 : vector<512x128xf32>
    %cst = arith.constant 0.000000e+00 : f32
    %8 = vector.broadcast %cst : f32 to vector<512x128xf32>
    %9 = arith.maximumf %7, %8 : vector<512x128xf32>
    %10 = arith.truncf %9 : vector<512x128xf32> to vector<512x128xbf16>
    %c0_5 = arith.constant 0 : index
    %c0_6 = arith.constant 0 : index
    %11 = vector.load %arg4[%c0_5, %c0_6] : memref<512x128xbf16, #tpu.memory_space<vmem>>, vector<512x128xbf16>
    tpu.vector_store %arg4[%c0_5, %c0_6], %10 {strides = array<i32>} : memref<512x128xbf16, #tpu.memory_space<vmem>>, vector<512x128xbf16>,
    return
  }
  func.func @transform_0(%arg0: i32) -> (i32, i32) {
    %c0_i32 = arith.constant 0 : i32
    %c0_i32_0 = arith.constant 0 : i32
    return %arg0, %c0_i32 : i32, i32
  }
  func.func @transform_1(%arg0: i32) -> (i32, i32) {
    %c0_i32 = arith.constant 0 : i32
    %c0_i32_0 = arith.constant 0 : i32
    %c0_i32_1 = arith.constant 0 : i32
    return %c0_i32, %c0_i32_0 : i32, i32
  }
  func.func @transform_2(%arg0: i32) -> (i32, i32) {
    %c0_i32 = arith.constant 0 : i32
    %c0_i32_0 = arith.constant 0 : i32
    %c0_i32_1 = arith.constant 0 : i32
    return %c0_i32, %c0_i32_0 : i32, i32
  }
  func.func @transform_3(%arg0: i32) -> (i32, i32) {
    %c0_i32 = arith.constant 0 : i32
    %c0_i32_0 = arith.constant 0 : i32
    return %arg0, %c0_i32 : i32, i32
  }
}

module attributes {stable_mosaic.version = 11 : i64} {
  func.func @kernel(%arg0: i32, %arg1: memref<1x18x18x8xbf16, #tpu.memory_space<vmem>>, %arg2: memref<9x8x128xbf16, #tpu.memory_space<vmem>>, %arg3: memref<1x256x128xbf16, #tpu.memory_space<vmem>>, %arg4: memref<1x1x128xf32, #tpu.memory_space<vmem>>, %arg5: memref<1x1x128xf32, #tpu.memory_space<vmem>>) attributes {dimension_semantics = [#tpu.dimension_semantics<parallel>], iteration_bounds = array<i64: 2>, scalar_prefetch = 0 : i64, scratch_operands = 0 : i64, tpu.core_type = #tpu.core_type<tc>, window_params = [{transform_indices = @transform_0, window_bounds = array<i64: 1, 18, 18, 8>}, {pipeline_mode = #tpu.pipeline_mode<synchronous>, transform_indices = @transform_1, window_bounds = array<i64: 9, 8, 128>}, {transform_indices = @transform_2, window_bounds = array<i64: 1, 256, 128>}, {transform_indices = @transform_3, window_bounds = array<i64: 1, 1, 128>}, {transform_indices = @transform_4, window_bounds = array<i64: 1, 1, 128>}]} {
    %c0 = arith.constant 0 : index
    %c0_0 = arith.constant 0 : index
    %c0_1 = arith.constant 0 : index
    %c0_2 = arith.constant 0 : index
    %0 = vector.load %arg1[%c0, %c0_0, %c0_1, %c0_2] : memref<1x18x18x8xbf16, #tpu.memory_space<vmem>>, vector<1x18x18x8xbf16>
    %1 = vector.shape_cast %0 : vector<1x18x18x8xbf16> to vector<18x18x8xbf16>
    %cst = arith.constant 0.000000e+00 : f32
    %2 = vector.broadcast %cst : f32 to vector<256x128xf32>
    %3 = vector.extract_strided_slice %1 {offsets = [0, 0, 0], sizes = [16, 16, 8], strides = [1, 1, 1]} : vector<18x18x8xbf16> to vector<16x16x8xbf16>
    %4 = vector.shape_cast %3 : vector<16x16x8xbf16> to vector<256x8xbf16>
    %c0_3 = arith.constant 0 : index
    %c0_4 = arith.constant 0 : index
    %c0_5 = arith.constant 0 : index
    %5 = vector.load %arg2[%c0_3, %c0_4, %c0_5] : memref<9x8x128xbf16, #tpu.memory_space<vmem>>, vector<1x8x128xbf16>
    %6 = vector.shape_cast %5 : vector<1x8x128xbf16> to vector<8x128xbf16>
    %cst_6 = arith.constant dense<0.000000e+00> : vector<256x128xf32>
    %7 = tpu.matmul %4, %6, %cst_6 {dimension_numbers = #tpu.dot_dimension_numbers<[1], [0], [0], [1], [0, 0, 1, 1], [], []>} : vector<256x8xbf16>, vector<8x128xbf16>, vector<256x128xf32> -> vector<256x128xf32>
    %8 = arith.addf %2, %7 : vector<256x128xf32>
    %9 = vector.extract_strided_slice %1 {offsets = [0, 1, 0], sizes = [16, 16, 8], strides = [1, 1, 1]} : vector<18x18x8xbf16> to vector<16x16x8xbf16>
    %10 = vector.shape_cast %9 : vector<16x16x8xbf16> to vector<256x8xbf16>
    %c1 = arith.constant 1 : index
    %c0_7 = arith.constant 0 : index
    %c0_8 = arith.constant 0 : index
    %11 = vector.load %arg2[%c1, %c0_7, %c0_8] : memref<9x8x128xbf16, #tpu.memory_space<vmem>>, vector<1x8x128xbf16>
    %12 = vector.shape_cast %11 : vector<1x8x128xbf16> to vector<8x128xbf16>
    %cst_9 = arith.constant dense<0.000000e+00> : vector<256x128xf32>
    %13 = tpu.matmul %10, %12, %cst_9 {dimension_numbers = #tpu.dot_dimension_numbers<[1], [0], [0], [1], [0, 0, 1, 1], [], []>} : vector<256x8xbf16>, vector<8x128xbf16>, vector<256x128xf32> -> vector<256x128xf32>
    %14 = arith.addf %8, %13 : vector<256x128xf32>
    %15 = vector.extract_strided_slice %1 {offsets = [0, 2, 0], sizes = [16, 16, 8], strides = [1, 1, 1]} : vector<18x18x8xbf16> to vector<16x16x8xbf16>
    %16 = vector.shape_cast %15 : vector<16x16x8xbf16> to vector<256x8xbf16>
    %c2 = arith.constant 2 : index
    %c0_10 = arith.constant 0 : index
    %c0_11 = arith.constant 0 : index
    %17 = vector.load %arg2[%c2, %c0_10, %c0_11] : memref<9x8x128xbf16, #tpu.memory_space<vmem>>, vector<1x8x128xbf16>
    %18 = vector.shape_cast %17 : vector<1x8x128xbf16> to vector<8x128xbf16>
    %cst_12 = arith.constant dense<0.000000e+00> : vector<256x128xf32>
    %19 = tpu.matmul %16, %18, %cst_12 {dimension_numbers = #tpu.dot_dimension_numbers<[1], [0], [0], [1], [0, 0, 1, 1], [], []>} : vector<256x8xbf16>, vector<8x128xbf16>, vector<256x128xf32> -> vector<256x128xf32>
    %20 = arith.addf %14, %19 : vector<256x128xf32>
    %21 = vector.extract_strided_slice %1 {offsets = [1, 0, 0], sizes = [16, 16, 8], strides = [1, 1, 1]} : vector<18x18x8xbf16> to vector<16x16x8xbf16>
    %22 = vector.shape_cast %21 : vector<16x16x8xbf16> to vector<256x8xbf16>
    %c3 = arith.constant 3 : index
    %c0_13 = arith.constant 0 : index
    %c0_14 = arith.constant 0 : index
    %23 = vector.load %arg2[%c3, %c0_13, %c0_14] : memref<9x8x128xbf16, #tpu.memory_space<vmem>>, vector<1x8x128xbf16>
    %24 = vector.shape_cast %23 : vector<1x8x128xbf16> to vector<8x128xbf16>
    %cst_15 = arith.constant dense<0.000000e+00> : vector<256x128xf32>
    %25 = tpu.matmul %22, %24, %cst_15 {dimension_numbers = #tpu.dot_dimension_numbers<[1], [0], [0], [1], [0, 0, 1, 1], [], []>} : vector<256x8xbf16>, vector<8x128xbf16>, vector<256x128xf32> -> vector<256x128xf32>
    %26 = arith.addf %20, %25 : vector<256x128xf32>
    %27 = vector.extract_strided_slice %1 {offsets = [1, 1, 0], sizes = [16, 16, 8], strides = [1, 1, 1]} : vector<18x18x8xbf16> to vector<16x16x8xbf16>
    %28 = vector.shape_cast %27 : vector<16x16x8xbf16> to vector<256x8xbf16>
    %c4 = arith.constant 4 : index
    %c0_16 = arith.constant 0 : index
    %c0_17 = arith.constant 0 : index
    %29 = vector.load %arg2[%c4, %c0_16, %c0_17] : memref<9x8x128xbf16, #tpu.memory_space<vmem>>, vector<1x8x128xbf16>
    %30 = vector.shape_cast %29 : vector<1x8x128xbf16> to vector<8x128xbf16>
    %cst_18 = arith.constant dense<0.000000e+00> : vector<256x128xf32>
    %31 = tpu.matmul %28, %30, %cst_18 {dimension_numbers = #tpu.dot_dimension_numbers<[1], [0], [0], [1], [0, 0, 1, 1], [], []>} : vector<256x8xbf16>, vector<8x128xbf16>, vector<256x128xf32> -> vector<256x128xf32>
    %32 = arith.addf %26, %31 : vector<256x128xf32>
    %33 = vector.extract_strided_slice %1 {offsets = [1, 2, 0], sizes = [16, 16, 8], strides = [1, 1, 1]} : vector<18x18x8xbf16> to vector<16x16x8xbf16>
    %34 = vector.shape_cast %33 : vector<16x16x8xbf16> to vector<256x8xbf16>
    %c5 = arith.constant 5 : index
    %c0_19 = arith.constant 0 : index
    %c0_20 = arith.constant 0 : index
    %35 = vector.load %arg2[%c5, %c0_19, %c0_20] : memref<9x8x128xbf16, #tpu.memory_space<vmem>>, vector<1x8x128xbf16>
    %36 = vector.shape_cast %35 : vector<1x8x128xbf16> to vector<8x128xbf16>
    %cst_21 = arith.constant dense<0.000000e+00> : vector<256x128xf32>
    %37 = tpu.matmul %34, %36, %cst_21 {dimension_numbers = #tpu.dot_dimension_numbers<[1], [0], [0], [1], [0, 0, 1, 1], [], []>} : vector<256x8xbf16>, vector<8x128xbf16>, vector<256x128xf32> -> vector<256x128xf32>
    %38 = arith.addf %32, %37 : vector<256x128xf32>
    %39 = vector.extract_strided_slice %1 {offsets = [2, 0, 0], sizes = [16, 16, 8], strides = [1, 1, 1]} : vector<18x18x8xbf16> to vector<16x16x8xbf16>
    %40 = vector.shape_cast %39 : vector<16x16x8xbf16> to vector<256x8xbf16>
    %c6 = arith.constant 6 : index
    %c0_22 = arith.constant 0 : index
    %c0_23 = arith.constant 0 : index
    %41 = vector.load %arg2[%c6, %c0_22, %c0_23] : memref<9x8x128xbf16, #tpu.memory_space<vmem>>, vector<1x8x128xbf16>
    %42 = vector.shape_cast %41 : vector<1x8x128xbf16> to vector<8x128xbf16>
    %cst_24 = arith.constant dense<0.000000e+00> : vector<256x128xf32>
    %43 = tpu.matmul %40, %42, %cst_24 {dimension_numbers = #tpu.dot_dimension_numbers<[1], [0], [0], [1], [0, 0, 1, 1], [], []>} : vector<256x8xbf16>, vector<8x128xbf16>, vector<256x128xf32> -> vector<256x128xf32>
    %44 = arith.addf %38, %43 : vector<256x128xf32>
    %45 = vector.extract_strided_slice %1 {offsets = [2, 1, 0], sizes = [16, 16, 8], strides = [1, 1, 1]} : vector<18x18x8xbf16> to vector<16x16x8xbf16>
    %46 = vector.shape_cast %45 : vector<16x16x8xbf16> to vector<256x8xbf16>
    %c7 = arith.constant 7 : index
    %c0_25 = arith.constant 0 : index
    %c0_26 = arith.constant 0 : index
    %47 = vector.load %arg2[%c7, %c0_25, %c0_26] : memref<9x8x128xbf16, #tpu.memory_space<vmem>>, vector<1x8x128xbf16>
    %48 = vector.shape_cast %47 : vector<1x8x128xbf16> to vector<8x128xbf16>
    %cst_27 = arith.constant dense<0.000000e+00> : vector<256x128xf32>
    %49 = tpu.matmul %46, %48, %cst_27 {dimension_numbers = #tpu.dot_dimension_numbers<[1], [0], [0], [1], [0, 0, 1, 1], [], []>} : vector<256x8xbf16>, vector<8x128xbf16>, vector<256x128xf32> -> vector<256x128xf32>
    %50 = arith.addf %44, %49 : vector<256x128xf32>
    %51 = vector.extract_strided_slice %1 {offsets = [2, 2, 0], sizes = [16, 16, 8], strides = [1, 1, 1]} : vector<18x18x8xbf16> to vector<16x16x8xbf16>
    %52 = vector.shape_cast %51 : vector<16x16x8xbf16> to vector<256x8xbf16>
    %c8 = arith.constant 8 : index
    %c0_28 = arith.constant 0 : index
    %c0_29 = arith.constant 0 : index
    %53 = vector.load %arg2[%c8, %c0_28, %c0_29] : memref<9x8x128xbf16, #tpu.memory_space<vmem>>, vector<1x8x128xbf16>
    %54 = vector.shape_cast %53 : vector<1x8x128xbf16> to vector<8x128xbf16>
    %cst_30 = arith.constant dense<0.000000e+00> : vector<256x128xf32>
    %55 = tpu.matmul %52, %54, %cst_30 {dimension_numbers = #tpu.dot_dimension_numbers<[1], [0], [0], [1], [0, 0, 1, 1], [], []>} : vector<256x8xbf16>, vector<8x128xbf16>, vector<256x128xf32> -> vector<256x128xf32>
    %56 = arith.addf %50, %55 : vector<256x128xf32>
    %57 = arith.truncf %56 : vector<256x128xf32> to vector<256x128xbf16>
    %c0_31 = arith.constant 0 : index
    %c0_32 = arith.constant 0 : index
    %c0_33 = arith.constant 0 : index
    %58 = vector.load %arg3[%c0_31, %c0_32, %c0_33] : memref<1x256x128xbf16, #tpu.memory_space<vmem>>, vector<1x256x128xbf16>
    %59 = vector.shape_cast %58 : vector<1x256x128xbf16> to vector<256x128xbf16>
    %60 = vector.shape_cast %57 : vector<256x128xbf16> to vector<1x256x128xbf16>
    tpu.vector_store %arg3[%c0_31, %c0_32, %c0_33], %60 {strides = array<i32>} : memref<1x256x128xbf16, #tpu.memory_space<vmem>>, vector<1x256x128xbf16>,
    %cst_34 = arith.constant dense<0.000000e+00> : vector<128xf32>
    %61 = vector.multi_reduction <add>, %56, %cst_34 [0] : vector<256x128xf32> to vector<128xf32>
    %62 = vector.shape_cast %61 : vector<128xf32> to vector<1x128xf32>
    %c0_35 = arith.constant 0 : index
    %c0_36 = arith.constant 0 : index
    %c0_37 = arith.constant 0 : index
    %63 = vector.load %arg4[%c0_35, %c0_36, %c0_37] : memref<1x1x128xf32, #tpu.memory_space<vmem>>, vector<1x1x128xf32>
    %64 = vector.shape_cast %63 : vector<1x1x128xf32> to vector<1x128xf32>
    %65 = vector.shape_cast %62 : vector<1x128xf32> to vector<1x1x128xf32>
    tpu.vector_store %arg4[%c0_35, %c0_36, %c0_37], %65 {strides = array<i32>} : memref<1x1x128xf32, #tpu.memory_space<vmem>>, vector<1x1x128xf32>,
    %66 = arith.mulf %56, %56 : vector<256x128xf32>
    %cst_38 = arith.constant dense<0.000000e+00> : vector<128xf32>
    %67 = vector.multi_reduction <add>, %66, %cst_38 [0] : vector<256x128xf32> to vector<128xf32>
    %68 = vector.shape_cast %67 : vector<128xf32> to vector<1x128xf32>
    %c0_39 = arith.constant 0 : index
    %c0_40 = arith.constant 0 : index
    %c0_41 = arith.constant 0 : index
    %69 = vector.load %arg5[%c0_39, %c0_40, %c0_41] : memref<1x1x128xf32, #tpu.memory_space<vmem>>, vector<1x1x128xf32>
    %70 = vector.shape_cast %69 : vector<1x1x128xf32> to vector<1x128xf32>
    %71 = vector.shape_cast %68 : vector<1x128xf32> to vector<1x1x128xf32>
    tpu.vector_store %arg5[%c0_39, %c0_40, %c0_41], %71 {strides = array<i32>} : memref<1x1x128xf32, #tpu.memory_space<vmem>>, vector<1x1x128xf32>,
    return
  }
  func.func @transform_0(%arg0: i32) -> (i32, i32, i32, i32) {
    %c0_i32 = arith.constant 0 : i32
    %c0_i32_0 = arith.constant 0 : i32
    %c0_i32_1 = arith.constant 0 : i32
    %c0_i32_2 = arith.constant 0 : i32
    return %arg0, %c0_i32, %c0_i32_0, %c0_i32_1 : i32, i32, i32, i32
  }
  func.func @transform_1(%arg0: i32) -> (i32, i32, i32) {
    %c0_i32 = arith.constant 0 : i32
    %c0_i32_0 = arith.constant 0 : i32
    %c0_i32_1 = arith.constant 0 : i32
    %c0_i32_2 = arith.constant 0 : i32
    return %c0_i32, %c0_i32_0, %c0_i32_1 : i32, i32, i32
  }
  func.func @transform_2(%arg0: i32) -> (i32, i32, i32) {
    %c0_i32 = arith.constant 0 : i32
    %c0_i32_0 = arith.constant 0 : i32
    %c0_i32_1 = arith.constant 0 : i32
    return %arg0, %c0_i32, %c0_i32_0 : i32, i32, i32
  }
  func.func @transform_3(%arg0: i32) -> (i32, i32, i32) {
    %c0_i32 = arith.constant 0 : i32
    %c0_i32_0 = arith.constant 0 : i32
    %c0_i32_1 = arith.constant 0 : i32
    return %arg0, %c0_i32, %c0_i32_0 : i32, i32, i32
  }
  func.func @transform_4(%arg0: i32) -> (i32, i32, i32) {
    %c0_i32 = arith.constant 0 : i32
    %c0_i32_0 = arith.constant 0 : i32
    %c0_i32_1 = arith.constant 0 : i32
    return %arg0, %c0_i32, %c0_i32_0 : i32, i32, i32
  }
}

module attributes {stable_mosaic.version = 11 : i64} {
  func.func @_bn_add_act_kernel(%arg0: i32, %arg1: memref<512x128xbf16, #tpu.memory_space<vmem>>, %arg2: memref<1x128xf32, #tpu.memory_space<vmem>>, %arg3: memref<1x128xf32, #tpu.memory_space<vmem>>, %arg4: memref<512x128xbf16, #tpu.memory_space<vmem>>, %arg5: memref<1x128xf32, #tpu.memory_space<vmem>>, %arg6: memref<1x128xf32, #tpu.memory_space<vmem>>, %arg7: memref<512x128xf32, #tpu.memory_space<vmem>>) attributes {dimension_semantics = [#tpu.dimension_semantics<parallel>], iteration_bounds = array<i64: 1>, scalar_prefetch = 0 : i64, scratch_operands = 0 : i64, tpu.core_type = #tpu.core_type<tc>, window_params = [{transform_indices = @transform_0, window_bounds = array<i64: 512, 128>}, {pipeline_mode = #tpu.pipeline_mode<synchronous>, transform_indices = @transform_1, window_bounds = array<i64: 1, 128>}, {pipeline_mode = #tpu.pipeline_mode<synchronous>, transform_indices = @transform_2, window_bounds = array<i64: 1, 128>}, {transform_indices = @transform_3, window_bounds = array<i64: 512, 128>}, {pipeline_mode = #tpu.pipeline_mode<synchronous>, transform_indices = @transform_4, window_bounds = array<i64: 1, 128>}, {pipeline_mode = #tpu.pipeline_mode<synchronous>, transform_indices = @transform_5, window_bounds = array<i64: 1, 128>}, {transform_indices = @transform_6, window_bounds = array<i64: 512, 128>}]} {
    %c0 = arith.constant 0 : index
    %c0_0 = arith.constant 0 : index
    %0 = vector.load %arg1[%c0, %c0_0] : memref<512x128xbf16, #tpu.memory_space<vmem>>, vector<512x128xbf16>
    %c0_1 = arith.constant 0 : index
    %c0_2 = arith.constant 0 : index
    %1 = vector.load %arg2[%c0_1, %c0_2] : memref<1x128xf32, #tpu.memory_space<vmem>>, vector<1x128xf32>
    %2 = arith.extf %0 : vector<512x128xbf16> to vector<512x128xf32>
    %3 = vector.broadcast %1 : vector<1x128xf32> to vector<512x128xf32>
    %4 = arith.mulf %2, %3 : vector<512x128xf32>
    %c0_3 = arith.constant 0 : index
    %c0_4 = arith.constant 0 : index
    %5 = vector.load %arg3[%c0_3, %c0_4] : memref<1x128xf32, #tpu.memory_space<vmem>>, vector<1x128xf32>
    %6 = vector.broadcast %5 : vector<1x128xf32> to vector<512x128xf32>
    %7 = arith.addf %4, %6 : vector<512x128xf32>
    %c0_5 = arith.constant 0 : index
    %c0_6 = arith.constant 0 : index
    %8 = vector.load %arg4[%c0_5, %c0_6] : memref<512x128xbf16, #tpu.memory_space<vmem>>, vector<512x128xbf16>
    %c0_7 = arith.constant 0 : index
    %c0_8 = arith.constant 0 : index
    %9 = vector.load %arg5[%c0_7, %c0_8] : memref<1x128xf32, #tpu.memory_space<vmem>>, vector<1x128xf32>
    %10 = arith.extf %8 : vector<512x128xbf16> to vector<512x128xf32>
    %11 = vector.broadcast %9 : vector<1x128xf32> to vector<512x128xf32>
    %12 = arith.mulf %10, %11 : vector<512x128xf32>
    %13 = arith.addf %7, %12 : vector<512x128xf32>
    %c0_9 = arith.constant 0 : index
    %c0_10 = arith.constant 0 : index
    %14 = vector.load %arg6[%c0_9, %c0_10] : memref<1x128xf32, #tpu.memory_space<vmem>>, vector<1x128xf32>
    %15 = vector.broadcast %14 : vector<1x128xf32> to vector<512x128xf32>
    %16 = arith.addf %13, %15 : vector<512x128xf32>
    %cst = arith.constant 0.000000e+00 : f32
    %17 = vector.broadcast %cst : f32 to vector<512x128xf32>
    %18 = arith.maximumf %16, %17 : vector<512x128xf32>
    %c0_11 = arith.constant 0 : index
    %c0_12 = arith.constant 0 : index
    %19 = vector.load %arg7[%c0_11, %c0_12] : memref<512x128xf32, #tpu.memory_space<vmem>>, vector<512x128xf32>
    tpu.vector_store %arg7[%c0_11, %c0_12], %18 {strides = array<i32>} : memref<512x128xf32, #tpu.memory_space<vmem>>, vector<512x128xf32>,
    return
  }
  func.func @transform_0(%arg0: i32) -> (i32, i32) {
    %c0_i32 = arith.constant 0 : i32
    %c0_i32_0 = arith.constant 0 : i32
    return %arg0, %c0_i32 : i32, i32
  }
  func.func @transform_1(%arg0: i32) -> (i32, i32) {
    %c0_i32 = arith.constant 0 : i32
    %c0_i32_0 = arith.constant 0 : i32
    %c0_i32_1 = arith.constant 0 : i32
    return %c0_i32, %c0_i32_0 : i32, i32
  }
  func.func @transform_2(%arg0: i32) -> (i32, i32) {
    %c0_i32 = arith.constant 0 : i32
    %c0_i32_0 = arith.constant 0 : i32
    %c0_i32_1 = arith.constant 0 : i32
    return %c0_i32, %c0_i32_0 : i32, i32
  }
  func.func @transform_3(%arg0: i32) -> (i32, i32) {
    %c0_i32 = arith.constant 0 : i32
    %c0_i32_0 = arith.constant 0 : i32
    return %arg0, %c0_i32 : i32, i32
  }
  func.func @transform_4(%arg0: i32) -> (i32, i32) {
    %c0_i32 = arith.constant 0 : i32
    %c0_i32_0 = arith.constant 0 : i32
    %c0_i32_1 = arith.constant 0 : i32
    return %c0_i32, %c0_i32_0 : i32, i32
  }
  func.func @transform_5(%arg0: i32) -> (i32, i32) {
    %c0_i32 = arith.constant 0 : i32
    %c0_i32_0 = arith.constant 0 : i32
    %c0_i32_1 = arith.constant 0 : i32
    return %c0_i32, %c0_i32_0 : i32, i32
  }
  func.func @transform_6(%arg0: i32) -> (i32, i32) {
    %c0_i32 = arith.constant 0 : i32
    %c0_i32_0 = arith.constant 0 : i32
    return %arg0, %c0_i32 : i32, i32
  }
}

</mosaic_0001>

<bundles_post_ra>
// kernel: basic_block_forward.6
= control target key start
LH: loop header
LB: loop body
LE: loop exit
PB: predicated region body
PF: predicated region fallthrough
CT: control target
= control target key end

     0   :  { %s1176_s0 = inlined_call_operand.vmem [shape: bf16[512,128], index: 0, kind: input, shape index: {}]   ;;  %s1177_s1 = inlined_call_operand.vmem [shape: f32[1,128], index: 1, kind: input, shape index: {}]   ;;  %s1178_s2 = inlined_call_operand.vmem [shape: f32[1,128], index: 2, kind: input, shape index: {}]   ;;  %s1179_s3 = inlined_call_operand.vmem [shape: bf16[512,128], index: 3, kind: output, shape index: {}]  }
   0x1   :  { %v475_v0 = vld [vmem:[%s1176_s0] sm:$0xff]   ;;  %v762_v5 = vld [vmem:[%s1176_s0 + $0x8] sm:$0xff]   ;;  %v763_v8 = vld [vmem:[%s1176_s0 + $0x10] sm:$0xff]  }
   0x2   :  { %v852_v1 = vld [vmem:[%s1177_s1] ss:$0 sm:$0xff]  ;;  %v476_v2 = vunpack.c.l.bf16 %v475_v0  ;;  %v477_v3 = vunpack.c.h.bf16 %v475_v0  ;;  %v480_v6 = vunpack.c.l.bf16 %v762_v5  ;;  %v481_v7 = vunpack.c.h.bf16 %v762_v5  ;;  %v764_v9 = vld [vmem:[%s1176_s0 + $0x18] sm:$0xff]   ;;  %v766_v35 = vld [vmem:[%s1176_s0 + $0x28] sm:$0xff]  }
   0x3   :  { %v857_v4 = vld [vmem:[%s1178_s2] ss:$0 sm:$0xff]  ;;  %v484_v12 = vunpack.c.l.bf16 %v763_v8  ;;  %v485_v13 = vunpack.c.h.bf16 %v763_v8  ;;  %v488_v16 = vunpack.c.l.bf16 %v764_v9  ;;  %v489_v17 = vunpack.c.h.bf16 %v764_v9  ;;  %v767_v40 = vld [vmem:[%s1176_s0 + $0x30] sm:$0xff]   ;;  %v768_v45 = vld [vmem:[%s1176_s0 + $0x38] sm:$0xff]  }
   0x4   :  { %v146_v10 = vmul.f32 %v852_v1, %v476_v2  ;;  %v147_v11 = vmul.f32 %v852_v1, %v477_v3  ;;  %v148_v14 = vmul.f32 %v852_v1, %v480_v6  ;;  %v149_v15 = vmul.f32 %v852_v1, %v481_v7  ;;  %v765_v26 = vld [vmem:[%s1176_s0 + $0x20] sm:$0xff]  }
   0x5   :  { %v150_v20 = vmul.f32 %v852_v1, %v484_v12  ;;  %v151_v21 = vmul.f32 %v852_v1, %v485_v13  ;;  %v152_v24 = vmul.f32 %v852_v1, %v488_v16  ;;  %v153_v25 = vmul.f32 %v852_v1, %v489_v17  ;;  %v769_v62 = vld [vmem:[%s1176_s0 + $0x40] sm:$0xff]   ;;  %v770_v13 = vld [vmem:[%s1176_s0 + $0x48] sm:$0xff]  }
   0x6   :  { %v214_v18 = vadd.f32 %v857_v4, %v146_v10  ;;  %v215_v19 = vadd.f32 %v857_v4, %v147_v11  ;;  %v216_v22 = vadd.f32 %v857_v4, %v148_v14  ;;  %v217_v23 = vadd.f32 %v857_v4, %v149_v15 }
   0x7   :  { %v218_v29 = vadd.f32 %v857_v4, %v150_v20  ;;  %v219_v30 = vadd.f32 %v857_v4, %v151_v21  ;;  %v220_v33 = vadd.f32 %v857_v4, %v152_v24  ;;  %v221_v34 = vadd.f32 %v857_v4, %v153_v25 }
   0x8   :  { %v278_v27 = vmax.f32 %v214_v18, 0.0  ;;  %v279_v28 = vmax.f32 %v215_v19, 0.0  ;;  %v280_v31 = vmax.f32 %v216_v22, 0.0  ;;  %v281_v32 = vmax.f32 %v217_v23, 0.0  ;;  %v771_v18 = vld [vmem:[%s1176_s0 + $0x50] sm:$0xff]   ;;  %v772_v23 = vld [vmem:[%s1176_s0 + $0x58] sm:$0xff]  }
   0x9   :  { %v282_v37 = vmax.f32 %v218_v29, 0.0  ;;  %v283_v38 = vmax.f32 %v219_v30, 0.0  ;;  %v492_v39 = vunpack.c.l.bf16 %v765_v26  ;;  %v284_v42 = vmax.f32 %v220_v33, 0.0 }
   0xa   :  { %v605_v36 = vpack.c.bf16 %v279_v28, %v278_v27  ;;  %v610_v41 = vpack.c.bf16 %v281_v32, %v280_v31  ;;  %v285_v43 = vmax.f32 %v221_v34, 0.0  ;;  %v493_v44 = vunpack.c.h.bf16 %v765_v26 }
   0xb   :  { %v615_v46 = vpack.c.bf16 %v283_v38, %v282_v37  ;;  %v154_v47 = vmul.f32 %v852_v1, %v492_v39  ;;  %v496_v48 = vunpack.c.l.bf16 %v766_v35  ;;  %v497_v49 = vunpack.c.h.bf16 %v766_v35 }
   0xc   :  { %606 = vst [vmem:[%s1179_s3] sm:$0xff] %v605_v36   ;;  %v620_v50 = vpack.c.bf16 %v285_v43, %v284_v42  ;;  %v155_v51 = vmul.f32 %v852_v1, %v493_v44  ;;  %v500_v52 = vunpack.c.l.bf16 %v767_v40  ;;  %v501_v53 = vunpack.c.h.bf16 %v767_v40  ;;  %v773_v36 = vld [vmem:[%s1176_s0 + $0x60] sm:$0xff]  }
   0xd   :  { %793 = vst [vmem:[%s1179_s3 + $0x8] sm:$0xff] %v610_v41   ;;  %v222_v54 = vadd.f32 %v857_v4, %v154_v47  ;;  %v156_v55 = vmul.f32 %v852_v1, %v496_v48  ;;  %v157_v56 = vmul.f32 %v852_v1, %v497_v49  ;;  %v504_v57 = vunpack.c.l.bf16 %v768_v45 }
   0xe   :  { %794 = vst [vmem:[%s1179_s3 + $0x10] sm:$0xff] %v615_v46   ;;  %v223_v58 = vadd.f32 %v857_v4, %v155_v51  ;;  %v158_v59 = vmul.f32 %v852_v1, %v500_v52  ;;  %v159_v60 = vmul.f32 %v852_v1, %v501_v53  ;;  %v505_v61 = vunpack.c.h.bf16 %v768_v45  ;;  %v774_v53 = vld [vmem:[%s1176_s0 + $0x68] sm:$0xff]  }
   0xf   :  { %795 = vst [vmem:[%s1179_s3 + $0x18] sm:$0xff] %v620_v50   ;;  %v286_v63 = vmax.f32 %v222_v54, 0.0  ;;  %v224_v0 = vadd.f32 %v857_v4, %v156_v55  ;;  %v225_v2 = vadd.f32 %v857_v4, %v157_v56  ;;  %v160_v3 = vmul.f32 %v852_v1, %v504_v57 }
  0x10   :  { %v287_v5 = vmax.f32 %v223_v58, 0.0  ;;  %v226_v6 = vadd.f32 %v857_v4, %v158_v59  ;;  %v227_v7 = vadd.f32 %v857_v4, %v159_v60  ;;  %v161_v8 = vmul.f32 %v852_v1, %v505_v61  ;;  %v775_v58 = vld [vmem:[%s1176_s0 + $0x70] sm:$0xff]  }
  0x11   :  { %v288_v9 = vmax.f32 %v224_v0, 0.0  ;;  %v289_v10 = vmax.f32 %v225_v2, 0.0  ;;  %v228_v11 = vadd.f32 %v857_v4, %v160_v3  ;;  %v508_v12 = vunpack.c.l.bf16 %v769_v62 }
  0x12   :  { %v625_v14 = vpack.c.bf16 %v287_v5, %v286_v63  ;;  %v290_v15 = vmax.f32 %v226_v6, 0.0  ;;  %v291_v16 = vmax.f32 %v227_v7, 0.0  ;;  %v229_v17 = vadd.f32 %v857_v4, %v161_v8  ;;  %v776_v63 = vld [vmem:[%s1176_s0 + $0x78] sm:$0xff]  }
  0x13   :  { %v630_v19 = vpack.c.bf16 %v289_v10, %v288_v9  ;;  %v292_v20 = vmax.f32 %v228_v11, 0.0  ;;  %v509_v21 = vunpack.c.h.bf16 %v769_v62  ;;  %v162_v22 = vmul.f32 %v852_v1, %v508_v12 }
  0x14   :  { %796 = vst [vmem:[%s1179_s3 + $0x20] sm:$0xff] %v625_v14   ;;  %v635_v24 = vpack.c.bf16 %v291_v16, %v290_v15  ;;  %v293_v25 = vmax.f32 %v229_v17, 0.0  ;;  %v512_v26 = vunpack.c.l.bf16 %v770_v13  ;;  %v513_v27 = vunpack.c.h.bf16 %v770_v13  ;;  %v777_v14 = vld [vmem:[%s1176_s0 + $0x80] sm:$0xff]  }
  0x15   :  { %797 = vst [vmem:[%s1179_s3 + $0x28] sm:$0xff] %v630_v19   ;;  %v163_v28 = vmul.f32 %v852_v1, %v509_v21  ;;  %v230_v29 = vadd.f32 %v857_v4, %v162_v22  ;;  %v516_v30 = vunpack.c.l.bf16 %v771_v18  ;;  %v517_v31 = vunpack.c.h.bf16 %v771_v18 }
  0x16   :  { %798 = vst [vmem:[%s1179_s3 + $0x30] sm:$0xff] %v635_v24   ;;  %v640_v32 = vpack.c.bf16 %v293_v25, %v292_v20  ;;  %v164_v33 = vmul.f32 %v852_v1, %v512_v26  ;;  %v165_v34 = vmul.f32 %v852_v1, %v513_v27  ;;  %v520_v35 = vunpack.c.l.bf16 %v772_v23  ;;  %v778_v27 = vld [vmem:[%s1176_s0 + $0x88] sm:$0xff]  }
  0x17   :  { %v231_v37 = vadd.f32 %v857_v4, %v163_v28  ;;  %v294_v38 = vmax.f32 %v230_v29, 0.0  ;;  %v166_v39 = vmul.f32 %v852_v1, %v516_v30  ;;  %v167_v40 = vmul.f32 %v852_v1, %v517_v31 }
  0x18   :  { %799 = vst [vmem:[%s1179_s3 + $0x38] sm:$0xff] %v640_v32   ;;  %v232_v41 = vadd.f32 %v857_v4, %v164_v33  ;;  %v233_v42 = vadd.f32 %v857_v4, %v165_v34  ;;  %v521_v43 = vunpack.c.h.bf16 %v772_v23  ;;  %v168_v44 = vmul.f32 %v852_v1, %v520_v35 }
  0x19   :  { %v295_v45 = vmax.f32 %v231_v37, 0.0  ;;  %v234_v46 = vadd.f32 %v857_v4, %v166_v39  ;;  %v235_v47 = vadd.f32 %v857_v4, %v167_v40  ;;  %v524_v48 = vunpack.c.l.bf16 %v773_v36 }
  0x1a   :  { %v296_v49 = vmax.f32 %v232_v41, 0.0  ;;  %v297_v50 = vmax.f32 %v233_v42, 0.0  ;;  %v169_v51 = vmul.f32 %v852_v1, %v521_v43  ;;  %v236_v52 = vadd.f32 %v857_v4, %v168_v44  ;;  %v780_v41 = vld [vmem:[%s1176_s0 + $0x98] sm:$0xff]  }
  0x1b   :  { %v645_v54 = vpack.c.bf16 %v295_v45, %v294_v38  ;;  %v298_v55 = vmax.f32 %v234_v46, 0.0  ;;  %v299_v56 = vmax.f32 %v235_v47, 0.0  ;;  %v525_v57 = vunpack.c.h.bf16 %v773_v36  ;;  %v779_v36 = vld [vmem:[%s1176_s0 + $0x90] sm:$0xff]  }
  0x1c   :  { %v650_v59 = vpack.c.bf16 %v297_v50, %v296_v49  ;;  %v237_v60 = vadd.f32 %v857_v4, %v169_v51  ;;  %v300_v61 = vmax.f32 %v236_v52, 0.0  ;;  %v170_v62 = vmul.f32 %v852_v1, %v524_v48 }
  0x1d   :  { %800 = vst [vmem:[%s1179_s3 + $0x40] sm:$0xff] %v645_v54   ;;  %v655_v0 = vpack.c.bf16 %v299_v56, %v298_v55  ;;  %v171_v2 = vmul.f32 %v852_v1, %v525_v57  ;;  %v528_v3 = vunpack.c.l.bf16 %v774_v53  ;;  %v529_v5 = vunpack.c.h.bf16 %v774_v53  ;;  %v781_v54 = vld [vmem:[%s1176_s0 + $0xa0] sm:$0xff]  }
  0x1e   :  { %801 = vst [vmem:[%s1179_s3 + $0x48] sm:$0xff] %v650_v59   ;;  %v301_v6 = vmax.f32 %v237_v60, 0.0  ;;  %v238_v7 = vadd.f32 %v857_v4, %v170_v62  ;;  %v532_v8 = vunpack.c.l.bf16 %v775_v58  ;;  %v533_v9 = vunpack.c.h.bf16 %v775_v58 }
  0x1f   :  { %802 = vst [vmem:[%s1179_s3 + $0x50] sm:$0xff] %v655_v0   ;;  %v239_v10 = vadd.f32 %v857_v4, %v171_v2  ;;  %v172_v11 = vmul.f32 %v852_v1, %v528_v3  ;;  %v173_v12 = vmul.f32 %v852_v1, %v529_v5  ;;  %v536_v13 = vunpack.c.l.bf16 %v776_v63  ;;  %v782_v5 = vld [vmem:[%s1176_s0 + $0xa8] sm:$0xff]  }
  0x20   :  { %v660_v15 = vpack.c.bf16 %v301_v6, %v300_v61  ;;  %v302_v16 = vmax.f32 %v238_v7, 0.0  ;;  %v174_v17 = vmul.f32 %v852_v1, %v532_v8  ;;  %v175_v18 = vmul.f32 %v852_v1, %v533_v9 }
  0x21   :  { %v303_v19 = vmax.f32 %v239_v10, 0.0  ;;  %v240_v20 = vadd.f32 %v857_v4, %v172_v11  ;;  %v241_v21 = vadd.f32 %v857_v4, %v173_v12  ;;  %v537_v22 = vunpack.c.h.bf16 %v776_v63 }
  0x22   :  { %803 = vst [vmem:[%s1179_s3 + $0x58] sm:$0xff] %v660_v15   ;;  %v242_v23 = vadd.f32 %v857_v4, %v174_v17  ;;  %v243_v24 = vadd.f32 %v857_v4, %v175_v18  ;;  %v176_v25 = vmul.f32 %v852_v1, %v536_v13  ;;  %v540_v26 = vunpack.c.l.bf16 %v777_v14 }
  0x23   :  { %v665_v28 = vpack.c.bf16 %v303_v19, %v302_v16  ;;  %v304_v29 = vmax.f32 %v240_v20, 0.0  ;;  %v305_v30 = vmax.f32 %v241_v21, 0.0  ;;  %v177_v31 = vmul.f32 %v852_v1, %v537_v22 }
  0x24   :  { %v306_v32 = vmax.f32 %v242_v23, 0.0  ;;  %v307_v33 = vmax.f32 %v243_v24, 0.0  ;;  %v244_v34 = vadd.f32 %v857_v4, %v176_v25  ;;  %v541_v35 = vunpack.c.h.bf16 %v777_v14  ;;  %v783_v14 = vld [vmem:[%s1176_s0 + $0xb0] sm:$0xff]   ;;  %v784_v23 = vld [vmem:[%s1176_s0 + $0xb8] sm:$0xff]  }
  0x25   :  { %804 = vst [vmem:[%s1179_s3 + $0x60] sm:$0xff] %v665_v28   ;;  %v670_v37 = vpack.c.bf16 %v305_v30, %v304_v29  ;;  %v245_v38 = vadd.f32 %v857_v4, %v177_v31  ;;  %v178_v39 = vmul.f32 %v852_v1, %v540_v26  ;;  %v544_v40 = vunpack.c.l.bf16 %v778_v27 }
  0x26   :  { %v675_v42 = vpack.c.bf16 %v307_v33, %v306_v32  ;;  %v308_v43 = vmax.f32 %v244_v34, 0.0  ;;  %v179_v44 = vmul.f32 %v852_v1, %v541_v35  ;;  %v545_v45 = vunpack.c.h.bf16 %v778_v27  ;;  %v785_v32 = vld [vmem:[%s1176_s0 + $0xc0] sm:$0xff]  }
  0x27   :  { %805 = vst [vmem:[%s1179_s3 + $0x68] sm:$0xff] %v670_v37   ;;  %v309_v46 = vmax.f32 %v245_v38, 0.0  ;;  %v246_v47 = vadd.f32 %v857_v4, %v178_v39  ;;  %v180_v48 = vmul.f32 %v852_v1, %v544_v40  ;;  %v548_v49 = vunpack.c.l.bf16 %v779_v36 }
  0x28   :  { %806 = vst [vmem:[%s1179_s3 + $0x70] sm:$0xff] %v675_v42   ;;  %v247_v50 = vadd.f32 %v857_v4, %v179_v44  ;;  %v181_v51 = vmul.f32 %v852_v1, %v545_v45  ;;  %v549_v52 = vunpack.c.h.bf16 %v779_v36  ;;  %v552_v53 = vunpack.c.l.bf16 %v780_v41  ;;  %v786_v45 = vld [vmem:[%s1176_s0 + $0xc8] sm:$0xff]  }
  0x29   :  { %v680_v55 = vpack.c.bf16 %v309_v46, %v308_v43  ;;  %v310_v56 = vmax.f32 %v246_v47, 0.0  ;;  %v248_v57 = vadd.f32 %v857_v4, %v180_v48  ;;  %v182_v58 = vmul.f32 %v852_v1, %v548_v49 }
  0x2a   :  { %v311_v59 = vmax.f32 %v247_v50, 0.0  ;;  %v249_v60 = vadd.f32 %v857_v4, %v181_v51  ;;  %v183_v61 = vmul.f32 %v852_v1, %v549_v52  ;;  %v553_v62 = vunpack.c.h.bf16 %v780_v41 }
  0x2b   :  { %807 = vst [vmem:[%s1179_s3 + $0x78] sm:$0xff] %v680_v55   ;;  %v312_v63 = vmax.f32 %v248_v57, 0.0  ;;  %v250_v0 = vadd.f32 %v857_v4, %v182_v58  ;;  %v184_v2 = vmul.f32 %v852_v1, %v552_v53  ;;  %v556_v3 = vunpack.c.l.bf16 %v781_v54 }
  0x2c   :  { %v685_v6 = vpack.c.bf16 %v311_v59, %v310_v56  ;;  %v313_v7 = vmax.f32 %v249_v60, 0.0  ;;  %v251_v8 = vadd.f32 %v857_v4, %v183_v61  ;;  %v185_v9 = vmul.f32 %v852_v1, %v553_v62 }
  0x2d   :  { %v314_v10 = vmax.f32 %v250_v0, 0.0  ;;  %v252_v11 = vadd.f32 %v857_v4, %v184_v2  ;;  %v557_v12 = vunpack.c.h.bf16 %v781_v54  ;;  %v186_v13 = vmul.f32 %v852_v1, %v556_v3  ;;  %v787_v54 = vld [vmem:[%s1176_s0 + $0xd0] sm:$0xff]  }
  0x2e   :  { %808 = vst [vmem:[%s1179_s3 + $0x80] sm:$0xff] %v685_v6   ;;  %v690_v15 = vpack.c.bf16 %v313_v7, %v312_v63  ;;  %v315_v16 = vmax.f32 %v251_v8, 0.0  ;;  %v253_v17 = vadd.f32 %v857_v4, %v185_v9  ;;  %v560_v18 = vunpack.c.l.bf16 %v782_v5  ;;  %v788_v63 = vld [vmem:[%s1176_s0 + $0xd8] sm:$0xff]  }
  0x2f   :  { %v316_v19 = vmax.f32 %v252_v11, 0.0  ;;  %v187_v20 = vmul.f32 %v852_v1, %v557_v12  ;;  %v254_v21 = vadd.f32 %v857_v4, %v186_v13  ;;  %v561_v22 = vunpack.c.h.bf16 %v782_v5 }
  0x30   :  { %809 = vst [vmem:[%s1179_s3 + $0x88] sm:$0xff] %v690_v15   ;;  %v695_v24 = vpack.c.bf16 %v315_v16, %v314_v10  ;;  %v317_v25 = vmax.f32 %v253_v17, 0.0  ;;  %v188_v26 = vmul.f32 %v852_v1, %v560_v18  ;;  %v564_v27 = vunpack.c.l.bf16 %v783_v14  ;;  %v789_v10 = vld [vmem:[%s1176_s0 + $0xe0] sm:$0xff]  }
  0x31   :  { %v255_v28 = vadd.f32 %v857_v4, %v187_v20  ;;  %v318_v29 = vmax.f32 %v254_v21, 0.0  ;;  %v189_v30 = vmul.f32 %v852_v1, %v561_v22  ;;  %v565_v31 = vunpack.c.h.bf16 %v783_v14 }
  0x32   :  { %810 = vst [vmem:[%s1179_s3 + $0x90] sm:$0xff] %v695_v24   ;;  %v700_v33 = vpack.c.bf16 %v317_v25, %v316_v19  ;;  %v256_v34 = vadd.f32 %v857_v4, %v188_v26  ;;  %v190_v35 = vmul.f32 %v852_v1, %v564_v27  ;;  %v568_v36 = vunpack.c.l.bf16 %v784_v23 }
  0x33   :  { %v319_v37 = vmax.f32 %v255_v28, 0.0  ;;  %v257_v38 = vadd.f32 %v857_v4, %v189_v30  ;;  %v191_v39 = vmul.f32 %v852_v1, %v565_v31  ;;  %v569_v40 = vunpack.c.h.bf16 %v784_v23  ;;  %v790_v23 = vld [vmem:[%s1176_s0 + $0xe8] sm:$0xff]  }
  0x34   :  { %811 = vst [vmem:[%s1179_s3 + $0x98] sm:$0xff] %v700_v33   ;;  %v320_v41 = vmax.f32 %v256_v34, 0.0  ;;  %v258_v42 = vadd.f32 %v857_v4, %v190_v35  ;;  %v192_v43 = vmul.f32 %v852_v1, %v568_v36  ;;  %v572_v44 = vunpack.c.l.bf16 %v785_v32 }
  0x35   :  { %v705_v46 = vpack.c.bf16 %v319_v37, %v318_v29  ;;  %v321_v47 = vmax.f32 %v257_v38, 0.0  ;;  %v259_v48 = vadd.f32 %v857_v4, %v191_v39  ;;  %v193_v49 = vmul.f32 %v852_v1, %v569_v40 }
  0x36   :  { %v322_v50 = vmax.f32 %v258_v42, 0.0  ;;  %v260_v51 = vadd.f32 %v857_v4, %v192_v43  ;;  %v573_v52 = vunpack.c.h.bf16 %v785_v32  ;;  %v194_v53 = vmul.f32 %v852_v1, %v572_v44  ;;  %v791_v32 = vld [vmem:[%s1176_s0 + $0xf0] sm:$0xff]  }
  0x37   :  { %812 = vst [vmem:[%s1179_s3 + $0xa0] sm:$0xff] %v705_v46   ;;  %v710_v55 = vpack.c.bf16 %v321_v47, %v320_v41  ;;  %v323_v56 = vmax.f32 %v259_v48, 0.0  ;;  %v261_v57 = vadd.f32 %v857_v4, %v193_v49  ;;  %v576_v58 = vunpack.c.l.bf16 %v786_v45  ;;  %v792_v41 = vld [vmem:[%s1176_s0 + $0xf8] sm:$0xff]  }
  0x38   :  { %v324_v59 = vmax.f32 %v260_v51, 0.0  ;;  %v195_v60 = vmul.f32 %v852_v1, %v573_v52  ;;  %v262_v61 = vadd.f32 %v857_v4, %v194_v53  ;;  %v577_v62 = vunpack.c.h.bf16 %v786_v45 }
  0x39   :  { %813 = vst [vmem:[%s1179_s3 + $0xa8] sm:$0xff] %v710_v55   ;;  %v715_v0 = vpack.c.bf16 %v323_v56, %v322_v50  ;;  %v325_v2 = vmax.f32 %v261_v57, 0.0  ;;  %v196_v3 = vmul.f32 %v852_v1, %v576_v58  ;;  %v580_v5 = vunpack.c.l.bf16 %v787_v54 }
  0x3a   :  { %v263_v6 = vadd.f32 %v857_v4, %v195_v60  ;;  %v326_v7 = vmax.f32 %v262_v61, 0.0  ;;  %v197_v8 = vmul.f32 %v852_v1, %v577_v62  ;;  %v581_v9 = vunpack.c.h.bf16 %v787_v54 }
  0x3b   :  { %814 = vst [vmem:[%s1179_s3 + $0xb0] sm:$0xff] %v715_v0   ;;  %v720_v11 = vpack.c.bf16 %v325_v2, %v324_v59  ;;  %v264_v12 = vadd.f32 %v857_v4, %v196_v3  ;;  %v198_v13 = vmul.f32 %v852_v1, %v580_v5  ;;  %v584_v14 = vunpack.c.l.bf16 %v788_v63 }
  0x3c   :  { %v327_v15 = vmax.f32 %v263_v6, 0.0  ;;  %v265_v16 = vadd.f32 %v857_v4, %v197_v8  ;;  %v199_v17 = vmul.f32 %v852_v1, %v581_v9  ;;  %v585_v18 = vunpack.c.h.bf16 %v788_v63 }
  0x3d   :  { %815 = vst [vmem:[%s1179_s3 + $0xb8] sm:$0xff] %v720_v11   ;;  %v328_v19 = vmax.f32 %v264_v12, 0.0  ;;  %v266_v20 = vadd.f32 %v857_v4, %v198_v13  ;;  %v200_v21 = vmul.f32 %v852_v1, %v584_v14  ;;  %v588_v22 = vunpack.c.l.bf16 %v789_v10 }
  0x3e   :  { %v725_v24 = vpack.c.bf16 %v327_v15, %v326_v7  ;;  %v329_v25 = vmax.f32 %v265_v16, 0.0  ;;  %v267_v26 = vadd.f32 %v857_v4, %v199_v17  ;;  %v201_v27 = vmul.f32 %v852_v1, %v585_v18 }
  0x3f   :  { %v330_v28 = vmax.f32 %v266_v20, 0.0  ;;  %v268_v29 = vadd.f32 %v857_v4, %v200_v21  ;;  %v589_v30 = vunpack.c.h.bf16 %v789_v10  ;;  %v202_v31 = vmul.f32 %v852_v1, %v588_v22 }
  0x40   :  { %816 = vst [vmem:[%s1179_s3 + $0xc0] sm:$0xff] %v725_v24   ;;  %v730_v33 = vpack.c.bf16 %v329_v25, %v328_v19  ;;  %v331_v34 = vmax.f32 %v267_v26, 0.0  ;;  %v269_v35 = vadd.f32 %v857_v4, %v201_v27  ;;  %v592_v36 = vunpack.c.l.bf16 %v790_v23 }
  0x41   :  { %v332_v37 = vmax.f32 %v268_v29, 0.0  ;;  %v203_v38 = vmul.f32 %v852_v1, %v589_v30  ;;  %v270_v39 = vadd.f32 %v857_v4, %v202_v31  ;;  %v593_v40 = vunpack.c.h.bf16 %v790_v23 }
  0x42   :  { %817 = vst [vmem:[%s1179_s3 + $0xc8] sm:$0xff] %v730_v33   ;;  %v735_v42 = vpack.c.bf16 %v331_v34, %v330_v28  ;;  %v333_v43 = vmax.f32 %v269_v35, 0.0  ;;  %v204_v44 = vmul.f32 %v852_v1, %v592_v36  ;;  %v596_v45 = vunpack.c.l.bf16 %v791_v32 }
  0x43   :  { %v271_v46 = vadd.f32 %v857_v4, %v203_v38  ;;  %v334_v47 = vmax.f32 %v270_v39, 0.0  ;;  %v205_v48 = vmul.f32 %v852_v1, %v593_v40  ;;  %v597_v49 = vunpack.c.h.bf16 %v791_v32 }
  0x44   :  { %818 = vst [vmem:[%s1179_s3 + $0xd0] sm:$0xff] %v735_v42   ;;  %v740_v50 = vpack.c.bf16 %v333_v43, %v332_v37  ;;  %v272_v51 = vadd.f32 %v857_v4, %v204_v44  ;;  %v206_v52 = vmul.f32 %v852_v1, %v596_v45  ;;  %v600_v53 = vunpack.c.l.bf16 %v792_v41 }
  0x45   :  { %v335_v54 = vmax.f32 %v271_v46, 0.0  ;;  %v273_v55 = vadd.f32 %v857_v4, %v205_v48  ;;  %v207_v56 = vmul.f32 %v852_v1, %v597_v49  ;;  %v601_v57 = vunpack.c.h.bf16 %v792_v41 }
  0x46   :  { %819 = vst [vmem:[%s1179_s3 + $0xd8] sm:$0xff] %v740_v50   ;;  %v336_v58 = vmax.f32 %v272_v51, 0.0  ;;  %v274_v59 = vadd.f32 %v857_v4, %v206_v52  ;;  %v208_v60 = vmul.f32 %v852_v1, %v600_v53 }
  0x47   :  { %v745_v61 = vpack.c.bf16 %v335_v54, %v334_v47  ;;  %v337_v62 = vmax.f32 %v273_v55, 0.0  ;;  %v275_v63 = vadd.f32 %v857_v4, %v207_v56  ;;  %v209_v0 = vmul.f32 %v852_v1, %v601_v57 }
  0x48   :  { %v338_v2 = vmax.f32 %v274_v59, 0.0  ;;  %v276_v3 = vadd.f32 %v857_v4, %v208_v60 }
  0x49   :  { %820 = vst [vmem:[%s1179_s3 + $0xe0] sm:$0xff] %v745_v61   ;;  %v750_v5 = vpack.c.bf16 %v337_v62, %v336_v58  ;;  %v339_v6 = vmax.f32 %v275_v63, 0.0  ;;  %v277_v7 = vadd.f32 %v857_v4, %v209_v0 }
  0x4a   :  { %v340_v8 = vmax.f32 %v276_v3, 0.0 }
  0x4b   :  { %821 = vst [vmem:[%s1179_s3 + $0xe8] sm:$0xff] %v750_v5   ;;  %v755_v9 = vpack.c.bf16 %v339_v6, %v338_v2  ;;  %v341_v10 = vmax.f32 %v277_v7, 0.0 }
  0x4d   :  { %822 = vst [vmem:[%s1179_s3 + $0xf0] sm:$0xff] %v755_v9   ;;  %v760_v1 = vpack.c.bf16 %v341_v10, %v340_v8 }
  0x4f   :  { %823 = vst [vmem:[%s1179_s3 + $0xf8] sm:$0xff] %v760_v1  }

// kernel: basic_block_forward.8
= control target key start
LH: loop header
LB: loop body
LE: loop exit
PB: predicated region body
PF: predicated region fallthrough
CT: control target
= control target key end

     0   :  { %vm469_vm0 = vcmask 1041408   ;;  %vm372_vm1 = vcmask 31744   ;;  %s2113_s1 = inlined_call_operand.vmem [shape: bf16[4,128], index: 1, kind: input, shape index: {}]   ;;  %s2114_s0 = inlined_call_operand.vmem [shape: bf16[512,4], index: 0, kind: input, shape index: {}]   ;;  %s2115_s2 = inlined_call_operand.vmem [shape: bf16[512,128], index: 2, kind: output, shape index: {0}]   ;;  %s2116_s3 = inlined_call_operand.vmem [shape: f32[1,1,128], index: 3, kind: output, shape index: {1}]   ;;  %s2117_s4 = inlined_call_operand.vmem [shape: f32[1,1,128], index: 4, kind: output, shape index: {2}]  }
   0x1   :  { %v211_v0 = vld [vmem:[%s2113_s1] sm:$0x3]  ;;  %v1342_v4 = vld [vmem:[%s2114_s0 + $0x8] sm:$0xff]  ;;  %v1343_v7 = vld [vmem:[%s2114_s0 + $0x10] sm:$0xff] }
   0x2   :  { %v471_v1 = vsel %vm469_vm0, %v211_v0, 0  ;;  %v1341_v2 = vld [vmem:[%s2114_s0] sm:$0xff]  ;;  %v1350_v5 = vld [vmem:[%s2114_s0 + $0x48] sm:$0xff]  ;;  %v1351_v8 = vld [vmem:[%s2114_s0 + $0x50] sm:$0xff] }
   0x3   :  { %v1349_v3 = vld [vmem:[%s2114_s0 + $0x40] sm:$0xff]  ;;  %480 = vmatpush.bf16.msra.mxu0 %v471_v1  ;;  %1564 = vmatpush.bf16.msra.mxu1 %v471_v1  ;;  %v1358_v9 = vld [vmem:[%s2114_s0 + $0x88] sm:$0xff]  ;;  %v1344_v10 = vld [vmem:[%s2114_s0 + $0x18] sm:$0xff] }
   0x4   :  { %1565 = vmatpush.bf16.msra.mxu2 %v471_v1  ;;  %1566 = vmatpush.bf16.msra.mxu3 %v471_v1  ;;  %v1357_v6 = vld [vmem:[%s2114_s0 + $0x80] sm:$0xff]  ;;  %v1352_v11 = vld [vmem:[%s2114_s0 + $0x58] sm:$0xff]  ;;  %v1359_v12 = vld [vmem:[%s2114_s0 + $0x90] sm:$0xff] }
   0x5   :  { %v1365_v13 = vld [vmem:[%s2114_s0 + $0xc0] sm:$0xff]  ;;  %v1360_v16 = vld [vmem:[%s2114_s0 + $0x98] sm:$0xff]  ;;  %v1366_v17 = vld [vmem:[%s2114_s0 + $0xc8] sm:$0xff] }
   0x6   :  { %1309 = vmatmul.msk.bf16.vlgmr.msra.gmra.mxu0 %vm372_vm1, %v1341_v2  ;;  %1317 = vmatmul.msk.bf16.vlgmr.msra.gmra.mxu1 %vm372_vm1, %v1349_v3  ;;  %v1345_v14 = vld [vmem:[%s2114_s0 + $0x20] sm:$0xff]  ;;  %v1346_v18 = vld [vmem:[%s2114_s0 + $0x28] sm:$0xff]  ;;  %v1367_v21 = vld [vmem:[%s2114_s0 + $0xd0] sm:$0xff] }
   0x7   :  { %1325 = vmatmul.msk.bf16.vlgmr.msra.gmra.mxu2 %vm372_vm1, %v1357_v6  ;;  %1333 = vmatmul.msk.bf16.vlgmr.msra.gmra.mxu3 %vm372_vm1, %v1365_v13  ;;  %v1353_v15 = vld [vmem:[%s2114_s0 + $0x60] sm:$0xff]  ;;  %v1354_v19 = vld [vmem:[%s2114_s0 + $0x68] sm:$0xff]  ;;  %v1347_v22 = vld [vmem:[%s2114_s0 + $0x30] sm:$0xff] }
   0x8   :  { %v1361_v20 = vld [vmem:[%s2114_s0 + $0xa0] sm:$0xff]  ;;  %v1355_v23 = vld [vmem:[%s2114_s0 + $0x70] sm:$0xff]  ;;  %v1362_v24 = vld [vmem:[%s2114_s0 + $0xa8] sm:$0xff] }
   0x9   :  { %v1368_v25 = vld [vmem:[%s2114_s0 + $0xd8] sm:$0xff]  ;;  %v1363_v28 = vld [vmem:[%s2114_s0 + $0xb0] sm:$0xff]  ;;  %v1369_v29 = vld [vmem:[%s2114_s0 + $0xe0] sm:$0xff] }
   0xa   :  { %v1348_v26 = vld [vmem:[%s2114_s0 + $0x38] sm:$0xff]  ;;  %v1370_v33 = vld [vmem:[%s2114_s0 + $0xe8] sm:$0xff]  ;;  %v1371_v47 = vld [vmem:[%s2114_s0 + $0xf0] sm:$0xff] }
   0xb   :  { %v1356_v27 = vld [vmem:[%s2114_s0 + $0x78] sm:$0xff] }
   0xc   :  { %v1364_v32 = vld [vmem:[%s2114_s0 + $0xb8] sm:$0xff] }
   0xd   :  { %v1372_v63 = vld [vmem:[%s2114_s0 + $0xf8] sm:$0xff] }
  0x16   :  { %1310 = vmatmul.msk.bf16.gmra.mxu0 %vm372_vm1, %v1342_v4  ;;  %1318 = vmatmul.msk.bf16.gmra.mxu1 %vm372_vm1, %v1350_v5 }
  0x17   :  { %1326 = vmatmul.msk.bf16.gmra.mxu2 %vm372_vm1, %v1358_v9  ;;  %1334 = vmatmul.msk.bf16.gmra.mxu3 %vm372_vm1, %v1366_v17 }
  0x26   :  { %1311 = vmatmul.msk.bf16.gmra.mxu0 %vm372_vm1, %v1343_v7  ;;  %1319 = vmatmul.msk.bf16.gmra.mxu1 %vm372_vm1, %v1351_v8 }
  0x27   :  { %1327 = vmatmul.msk.bf16.gmra.mxu2 %vm372_vm1, %v1359_v12  ;;  %1335 = vmatmul.msk.bf16.gmra.mxu3 %vm372_vm1, %v1367_v21 }
  0x36   :  { %1312 = vmatmul.msk.bf16.gmra.mxu0 %vm372_vm1, %v1344_v10  ;;  %1320 = vmatmul.msk.bf16.gmra.mxu1 %vm372_vm1, %v1352_v11 }
  0x37   :  { %1328 = vmatmul.msk.bf16.gmra.mxu2 %vm372_vm1, %v1360_v16  ;;  %1336 = vmatmul.msk.bf16.gmra.mxu3 %vm372_vm1, %v1368_v25 }
  0x46   :  { %1313 = vmatmul.msk.bf16.gmra.mxu0 %vm372_vm1, %v1345_v14  ;;  %1321 = vmatmul.msk.bf16.gmra.mxu1 %vm372_vm1, %v1353_v15 }
  0x47   :  { %1329 = vmatmul.msk.bf16.gmra.mxu2 %vm372_vm1, %v1361_v20  ;;  %1337 = vmatmul.msk.bf16.gmra.mxu3 %vm372_vm1, %v1369_v29 }
  0x56   :  { %1314 = vmatmul.msk.bf16.gmra.mxu0 %vm372_vm1, %v1346_v18  ;;  %1322 = vmatmul.msk.bf16.gmra.mxu1 %vm372_vm1, %v1354_v19 }
  0x57   :  { %1330 = vmatmul.msk.bf16.gmra.mxu2 %vm372_vm1, %v1362_v24  ;;  %1338 = vmatmul.msk.bf16.gmra.mxu3 %vm372_vm1, %v1370_v33 }
  0x66   :  { %1315 = vmatmul.msk.bf16.gmra.mxu0 %vm372_vm1, %v1347_v22  ;;  %1323 = vmatmul.msk.bf16.gmra.mxu1 %vm372_vm1, %v1355_v23 }
  0x67   :  { %1331 = vmatmul.msk.bf16.gmra.mxu2 %vm372_vm1, %v1363_v28  ;;  %1339 = vmatmul.msk.bf16.gmra.mxu3 %vm372_vm1, %v1371_v47 }
  0x76   :  { %1316 = vmatmul.msk.bf16.gmra.mxu0 %vm372_vm1, %v1348_v26  ;;  %1324 = vmatmul.msk.bf16.gmra.mxu1 %vm372_vm1, %v1356_v27 }
  0x77   :  { %1332 = vmatmul.msk.bf16.gmra.mxu2 %vm372_vm1, %v1364_v32  ;;  %1340 = vmatmul.msk.bf16.gmra.mxu3 %vm372_vm1, %v1372_v63 }
  0x83   :  { %v482_v30 = vpop.f32.mrf.mxu0  ;;  %v1707_v31 = vpop.f32.mrf.mxu1 }
  0x84   :  { %v1035_v34 = vmul.f32 %v482_v30, %v482_v30 }
  0x8a   :  { %v1737_v54 = vpop.f32.mrf.mxu2  ;;  %v1789_v14 = vpop.f32.mrf.mxu3 }
  0x8b   :  { %v484_v35 = vpop.f32.mrf.mxu0  ;;  %v1717_v36 = vpop.f32.mrf.mxu1 }
  0x8c   :  { %v1376_v37 = vpack.c.bf16 %v484_v35, %v482_v30  ;;  %v965_v38 = vadd.f32 %v484_v35, %v482_v30  ;;  %v1036_v39 = vmul.f32 %v484_v35, %v484_v35  ;;  %v1416_v40 = vpack.c.bf16 %v1717_v36, %v1707_v31 }
  0x8e   :  { %1377 = vst [vmem:[%s2115_s2] sm:$0xff] %v1376_v37   ;;  %v1099_v41 = vadd.f32 %v1036_v39, %v1035_v34 }
  0x8f   :  { %1540 = vst [vmem:[%s2115_s2 + $0x40] sm:$0xff] %v1416_v40  }
  0x92   :  { %v1749_v60 = vpop.f32.mrf.mxu2  ;;  %v1801_v18 = vpop.f32.mrf.mxu3 }
  0x93   :  { %v487_v42 = vpop.f32.mrf.mxu0  ;;  %v1727_v43 = vpop.f32.mrf.mxu1  ;;  %v1456_v61 = vpack.c.bf16 %v1749_v60, %v1737_v54  ;;  %v1496_v20 = vpack.c.bf16 %v1801_v18, %v1789_v14 }
  0x94   :  { %v966_v44 = vadd.f32 %v965_v38, %v487_v42  ;;  %v1037_v45 = vmul.f32 %v487_v42, %v487_v42 }
  0x95   :  { %1548 = vst [vmem:[%s2115_s2 + $0x80] sm:$0xff] %v1456_v61  }
  0x96   :  { %v1100_v46 = vadd.f32 %v1099_v41, %v1037_v45  ;;  %1556 = vst [vmem:[%s2115_s2 + $0xc0] sm:$0xff] %v1496_v20  }
  0x9a   :  { %v1766_v4 = vpop.f32.mrf.mxu2  ;;  %v1819_v26 = vpop.f32.mrf.mxu3 }
  0x9b   :  { %v489_v48 = vpop.f32.mrf.mxu0  ;;  %v1733_v49 = vpop.f32.mrf.mxu1 }
  0x9c   :  { %v1381_v50 = vpack.c.bf16 %v489_v48, %v487_v42  ;;  %v967_v51 = vadd.f32 %v966_v44, %v489_v48  ;;  %v1038_v52 = vmul.f32 %v489_v48, %v489_v48  ;;  %v1421_v53 = vpack.c.bf16 %v1733_v49, %v1727_v43 }
  0x9e   :  { %1533 = vst [vmem:[%s2115_s2 + $0x8] sm:$0xff] %v1381_v50   ;;  %v1101_v55 = vadd.f32 %v1100_v46, %v1038_v52 }
  0x9f   :  { %1541 = vst [vmem:[%s2115_s2 + $0x48] sm:$0xff] %v1421_v53  }
  0xa2   :  { %v1776_v7 = vpop.f32.mrf.mxu2  ;;  %v1831_v30 = vpop.f32.mrf.mxu3 }
  0xa3   :  { %v492_v56 = vpop.f32.mrf.mxu0  ;;  %v1745_v57 = vpop.f32.mrf.mxu1  ;;  %v1461_v8 = vpack.c.bf16 %v1776_v7, %v1766_v4  ;;  %v1501_v33 = vpack.c.bf16 %v1831_v30, %v1819_v26 }
  0xa4   :  { %v1747_v58 = vadd.f32 %v967_v51, %v492_v56  ;;  %v1039_v59 = vmul.f32 %v492_v56, %v492_v56 }
  0xa5   :  { %1549 = vst [vmem:[%s2115_s2 + $0x88] sm:$0xff] %v1461_v8  }
  0xa6   :  { %v1753_v62 = vadd.f32 %v1101_v55, %v1039_v59  ;;  %1557 = vst [vmem:[%s2115_s2 + $0xc8] sm:$0xff] %v1501_v33  }
  0xaa   :  { %v1787_v13 = vpop.f32.mrf.mxu2  ;;  %v1849_v40 = vpop.f32.mrf.mxu3 }
  0xab   :  { %v494_v0 = vpop.f32.mrf.mxu0  ;;  %v1762_v1 = vpop.f32.mrf.mxu1 }
  0xac   :  { %v1386_v2 = vpack.c.bf16 %v494_v0, %v492_v56  ;;  %v1426_v3 = vpack.c.bf16 %v1762_v1, %v1745_v57  ;;  %v1040_v46 = vmul.f32 %v494_v0, %v494_v0  ;;  %v969_v51 = vadd.f32 %v1747_v58, %v494_v0 }
  0xae   :  { %1534 = vst [vmem:[%s2115_s2 + $0x10] sm:$0xff] %v1386_v2   ;;  %v1103_v52 = vadd.f32 %v1753_v62, %v1040_v46 }
  0xaf   :  { %1542 = vst [vmem:[%s2115_s2 + $0x50] sm:$0xff] %v1426_v3  }
  0xb2   :  { %v1799_v17 = vpop.f32.mrf.mxu2  ;;  %v1861_v45 = vpop.f32.mrf.mxu3 }
  0xb3   :  { %v497_v5 = vpop.f32.mrf.mxu0  ;;  %v1774_v6 = vpop.f32.mrf.mxu1  ;;  %v1466_v19 = vpack.c.bf16 %v1799_v17, %v1787_v13  ;;  %v1506_v48 = vpack.c.bf16 %v1861_v45, %v1849_v40 }
  0xb4   :  { %v1041_v50 = vmul.f32 %v497_v5, %v497_v5  ;;  %v970_v55 = vadd.f32 %v969_v51, %v497_v5 }
  0xb5   :  { %1550 = vst [vmem:[%s2115_s2 + $0x90] sm:$0xff] %v1466_v19  }
  0xb6   :  { %1558 = vst [vmem:[%s2115_s2 + $0xd0] sm:$0xff] %v1506_v48   ;;  %v1104_v56 = vadd.f32 %v1103_v52, %v1041_v50 }
  0xba   :  { %v1817_v25 = vpop.f32.mrf.mxu2  ;;  %v1881_v58 = vpop.f32.mrf.mxu3 }
  0xbb   :  { %v499_v9 = vpop.f32.mrf.mxu0  ;;  %v1783_v10 = vpop.f32.mrf.mxu1 }
  0xbc   :  { %v1391_v11 = vpack.c.bf16 %v499_v9, %v497_v5  ;;  %v1431_v12 = vpack.c.bf16 %v1783_v10, %v1774_v6  ;;  %v1042_v53 = vmul.f32 %v499_v9, %v499_v9  ;;  %v971_v2 = vadd.f32 %v970_v55, %v499_v9 }
  0xbe   :  { %1535 = vst [vmem:[%s2115_s2 + $0x18] sm:$0xff] %v1391_v11   ;;  %v1105_v0 = vadd.f32 %v1104_v56, %v1042_v53 }
  0xbf   :  { %1543 = vst [vmem:[%s2115_s2 + $0x58] sm:$0xff] %v1431_v12  }
  0xc2   :  { %v1829_v29 = vpop.f32.mrf.mxu2 }
  0xc3   :  { %v502_v15 = vpop.f32.mrf.mxu0  ;;  %v1797_v16 = vpop.f32.mrf.mxu1  ;;  %v1471_v32 = vpack.c.bf16 %v1829_v29, %v1817_v25 }
  0xc4   :  { %v1043_v59 = vmul.f32 %v502_v15, %v502_v15  ;;  %v972_v19 = vadd.f32 %v971_v2, %v502_v15 }
  0xc5   :  { %1551 = vst [vmem:[%s2115_s2 + $0x98] sm:$0xff] %v1471_v32  }
  0xc6   :  { %v1106_v62 = vadd.f32 %v1105_v0, %v1043_v59 }
  0xca   :  { %v1847_v39 = vpop.f32.mrf.mxu2 }
  0xcb   :  { %v504_v21 = vpop.f32.mrf.mxu0  ;;  %v1813_v22 = vpop.f32.mrf.mxu1 }
  0xcc   :  { %v1396_v23 = vpack.c.bf16 %v504_v21, %v502_v15  ;;  %v1436_v24 = vpack.c.bf16 %v1813_v22, %v1797_v16  ;;  %v1044_v12 = vmul.f32 %v504_v21, %v504_v21  ;;  %v973_v9 = vadd.f32 %v972_v19, %v504_v21 }
  0xce   :  { %1536 = vst [vmem:[%s2115_s2 + $0x20] sm:$0xff] %v1396_v23   ;;  %v1107_v20 = vadd.f32 %v1106_v62, %v1044_v12 }
  0xcf   :  { %1544 = vst [vmem:[%s2115_s2 + $0x60] sm:$0xff] %v1436_v24  }
  0xd2   :  { %v1859_v44 = vpop.f32.mrf.mxu2 }
  0xd3   :  { %v507_v27 = vpop.f32.mrf.mxu0  ;;  %v1827_v28 = vpop.f32.mrf.mxu1  ;;  %v1476_v47 = vpack.c.bf16 %v1859_v44, %v1847_v39 }
  0xd4   :  { %v1045_v5 = vmul.f32 %v507_v27, %v507_v27  ;;  %v974_v24 = vadd.f32 %v973_v9, %v507_v27 }
  0xd5   :  { %1552 = vst [vmem:[%s2115_s2 + $0xa0] sm:$0xff] %v1476_v47   ;;  %v1893_v47 = vpop.f32.mrf.mxu3 }
  0xd6   :  { %v1108_v32 = vadd.f32 %v1107_v20, %v1045_v5  ;;  %v1511_v21 = vpack.c.bf16 %v1893_v47, %v1881_v58  ;;  %v1052_v20 = vmul.f32 %v1717_v36, %v1717_v36 }
  0xd8   :  { %1559 = vst [vmem:[%s2115_s2 + $0xd8] sm:$0xff] %v1511_v21  }
  0xda   :  { %v1879_v11 = vpop.f32.mrf.mxu2 }
  0xdb   :  { %v509_v34 = vpop.f32.mrf.mxu0  ;;  %v1843_v35 = vpop.f32.mrf.mxu1 }
  0xdc   :  { %v1401_v37 = vpack.c.bf16 %v509_v34, %v507_v27  ;;  %v1441_v38 = vpack.c.bf16 %v1843_v35, %v1827_v28  ;;  %v1046_v23 = vmul.f32 %v509_v34, %v509_v34  ;;  %v975_v15 = vadd.f32 %v974_v24, %v509_v34 }
  0xdd   :  { %v1911_v62 = vpop.f32.mrf.mxu3 }
  0xde   :  { %1537 = vst [vmem:[%s2115_s2 + $0x28] sm:$0xff] %v1401_v37   ;;  %v1109_v48 = vadd.f32 %v1108_v32, %v1046_v23  ;;  %v1053_v32 = vmul.f32 %v1727_v43, %v1727_v43 }
  0xdf   :  { %1545 = vst [vmem:[%s2115_s2 + $0x68] sm:$0xff] %v1441_v38  }
  0xe2   :  { %v1891_v46 = vpop.f32.mrf.mxu2 }
  0xe3   :  { %v512_v41 = vpop.f32.mrf.mxu0  ;;  %v1857_v42 = vpop.f32.mrf.mxu1  ;;  %v1481_v51 = vpack.c.bf16 %v1891_v46, %v1879_v11 }
  0xe4   :  { %v1047_v33 = vmul.f32 %v512_v41, %v512_v41  ;;  %v976_v52 = vadd.f32 %v975_v15, %v512_v41 }
  0xe5   :  { %1553 = vst [vmem:[%s2115_s2 + $0xa8] sm:$0xff] %v1481_v51   ;;  %v1933_v51 = vpop.f32.mrf.mxu3 }
  0xe6   :  { %v1110_v27 = vadd.f32 %v1109_v48, %v1047_v33  ;;  %v1516_v21 = vpack.c.bf16 %v1933_v51, %v1911_v62 }
  0xe8   :  { %1560 = vst [vmem:[%s2115_s2 + $0xe0] sm:$0xff] %v1516_v21  }
  0xea   :  { %v1909_v19 = vpop.f32.mrf.mxu2 }
  0xeb   :  { %v514_v61 = vpop.f32.mrf.mxu0  ;;  %v1875_v63 = vpop.f32.mrf.mxu1 }
  0xec   :  { %v1406_v3 = vpack.c.bf16 %v514_v61, %v512_v41  ;;  %v1446_v8 = vpack.c.bf16 %v1875_v63, %v1857_v42  ;;  %v1048_v50 = vmul.f32 %v514_v61, %v514_v61  ;;  %v977_v34 = vadd.f32 %v976_v52, %v514_v61 }
  0xed   :  { %v1051_v61 = vmul.f32 %v1707_v31, %v1707_v31  ;;  %v1064_v21 = vmul.f32 %v1875_v63, %v1875_v63 }
  0xee   :  { %1538 = vst [vmem:[%s2115_s2 + $0x30] sm:$0xff] %v1406_v3   ;;  %v1111_v55 = vadd.f32 %v1110_v27, %v1048_v50 }
  0xef   :  { %1546 = vst [vmem:[%s2115_s2 + $0x70] sm:$0xff] %v1446_v8  }
  0xf2   :  { %v1931_v50 = vpop.f32.mrf.mxu2 }
  0xf3   :  { %v517_v37 = vpop.f32.mrf.mxu0  ;;  %v1889_v38 = vpop.f32.mrf.mxu1 }
  0xf4   :  { %v1049_v53 = vmul.f32 %v517_v37, %v517_v37  ;;  %v978_v56 = vadd.f32 %v977_v34, %v517_v37 }
  0xf6   :  { %v1112_v59 = vadd.f32 %v1111_v55, %v1049_v53  ;;  %v1057_v55 = vmul.f32 %v1774_v6, %v1774_v6 }
  0xfb   :  { %v519_v2 = vpop.f32.mrf.mxu0  ;;  %v1905_v3 = vpop.f32.mrf.mxu1 }
  0xfc   :  { %v1411_v8 = vpack.c.bf16 %v519_v2, %v517_v37  ;;  %v979_v0 = vadd.f32 %v978_v56, %v519_v2  ;;  %v1050_v41 = vmul.f32 %v519_v2, %v519_v2  ;;  %v1451_v12 = vpack.c.bf16 %v1905_v3, %v1889_v38 }
  0xfe   :  { %1539 = vst [vmem:[%s2115_s2 + $0x38] sm:$0xff] %v1411_v8   ;;  %v980_v5 = vadd.f32 %v979_v0, %v1707_v31  ;;  %v1113_v9 = vadd.f32 %v1112_v59, %v1050_v41  ;;  %v1054_v31 = vmul.f32 %v1733_v49, %v1733_v49  ;;  %v1058_v59 = vmul.f32 %v1783_v10, %v1783_v10  ;;  %v1957_v0 = vpop.f32.mrf.mxu2 }
  0xff   :  { %1547 = vst [vmem:[%s2115_s2 + $0x78] sm:$0xff] %v1451_v12   ;;  %v1059_v41 = vmul.f32 %v1797_v16, %v1797_v16 }
 0x100   :  { %v981_v23 = vadd.f32 %v980_v5, %v1717_v36  ;;  %v1114_v24 = vadd.f32 %v1113_v9, %v1051_v61  ;;  %v1486_v36 = vpack.c.bf16 %v1931_v50, %v1909_v19  ;;  %v1060_v5 = vmul.f32 %v1813_v22, %v1813_v22 }
 0x102   :  { %v982_v33 = vadd.f32 %v981_v23, %v1727_v43  ;;  %v1115_v37 = vadd.f32 %v1114_v24, %v1052_v20  ;;  %v1055_v43 = vmul.f32 %v1745_v57, %v1745_v57  ;;  %1554 = vst [vmem:[%s2115_s2 + $0xb0] sm:$0xff] %v1486_v36   ;;  %v1062_v24 = vmul.f32 %v1843_v35, %v1843_v35 }
 0x104   :  { %v983_v15 = vadd.f32 %v982_v33, %v1733_v49  ;;  %v1116_v48 = vadd.f32 %v1115_v37, %v1053_v32  ;;  %v1056_v49 = vmul.f32 %v1762_v1, %v1762_v1 }
 0x106   :  { %v984_v52 = vadd.f32 %v983_v15, %v1745_v57  ;;  %v1117_v27 = vadd.f32 %v1116_v48, %v1054_v31 }
 0x108   :  { %v985_v53 = vadd.f32 %v984_v52, %v1762_v1  ;;  %v1118_v34 = vadd.f32 %v1117_v27, %v1055_v43  ;;  %v1959_v1 = vpop.f32.mrf.mxu3 }
 0x10a   :  { %v1119_v56 = vadd.f32 %v1118_v34, %v1056_v49  ;;  %v986_v57 = vadd.f32 %v985_v53, %v1774_v6  ;;  %v1066_v53 = vmul.f32 %v1905_v3, %v1905_v3 }
 0x10c   :  { %v987_v2 = vadd.f32 %v986_v57, %v1783_v10  ;;  %v1120_v8 = vadd.f32 %v1119_v56, %v1057_v55  ;;  %v1061_v10 = vmul.f32 %v1827_v28, %v1827_v28  ;;  %v1068_v57 = vmul.f32 %v1749_v60, %v1749_v60 }
 0x10e   :  { %v988_v12 = vadd.f32 %v987_v2, %v1797_v16  ;;  %v1121_v61 = vadd.f32 %v1120_v8, %v1058_v59  ;;  %v1973_v16 = vpop.f32.mrf.mxu2  ;;  %v1069_v2 = vmul.f32 %v1766_v4, %v1766_v4 }
 0x110   :  { %v989_v6 = vadd.f32 %v988_v12, %v1813_v22  ;;  %v1122_v9 = vadd.f32 %v1121_v61, %v1059_v41  ;;  %v1975_v37 = vpop.f32.mrf.mxu3  ;;  %v1491_v22 = vpack.c.bf16 %v1973_v16, %v1957_v0  ;;  %v1070_v41 = vmul.f32 %v1776_v7, %v1776_v7 }
 0x111   :  { %v1521_v31 = vpack.c.bf16 %v1975_v37, %v1959_v1 }
 0x112   :  { %v990_v20 = vadd.f32 %v989_v6, %v1827_v28  ;;  %v1123_v23 = vadd.f32 %v1122_v9, %v1060_v5  ;;  %v1063_v28 = vmul.f32 %v1857_v42, %v1857_v42  ;;  %1555 = vst [vmem:[%s2115_s2 + $0xb8] sm:$0xff] %v1491_v22  }
 0x113   :  { %1561 = vst [vmem:[%s2115_s2 + $0xe8] sm:$0xff] %v1521_v31   ;;  %v1075_v31 = vmul.f32 %v1847_v39, %v1847_v39 }
 0x114   :  { %v991_v32 = vadd.f32 %v990_v20, %v1843_v35  ;;  %v1124_v33 = vadd.f32 %v1123_v23, %v1061_v10  ;;  %v1073_v20 = vmul.f32 %v1817_v25, %v1817_v25 }
 0x116   :  { %v992_v15 = vadd.f32 %v991_v32, %v1857_v42  ;;  %v1125_v48 = vadd.f32 %v1124_v33, %v1062_v24  ;;  %v1065_v42 = vmul.f32 %v1889_v38, %v1889_v38 }
 0x118   :  { %v1126_v35 = vadd.f32 %v1125_v48, %v1063_v28  ;;  %v993_v36 = vadd.f32 %v992_v15, %v1875_v63  ;;  %v1999_v34 = vpop.f32.mrf.mxu3  ;;  %v1067_v63 = vmul.f32 %v1737_v54, %v1737_v54  ;;  %v1076_v28 = vmul.f32 %v1859_v44, %v1859_v44 }
 0x11a   :  { %v1127_v43 = vadd.f32 %v1126_v35, %v1064_v21  ;;  %v994_v52 = vadd.f32 %v993_v36, %v1889_v38  ;;  %v1077_v35 = vmul.f32 %v1879_v11, %v1879_v11 }
 0x11c   :  { %v1128_v27 = vadd.f32 %v1127_v43, %v1065_v42  ;;  %v995_v49 = vadd.f32 %v994_v52, %v1905_v3  ;;  %v1078_v43 = vmul.f32 %v1891_v46, %v1891_v46 }
 0x11e   :  { %v996_v55 = vadd.f32 %v995_v49, %v1737_v54  ;;  %v1129_v56 = vadd.f32 %v1128_v27, %v1066_v53 }
 0x120   :  { %v997_v59 = vadd.f32 %v996_v55, %v1749_v60  ;;  %v1130_v38 = vadd.f32 %v1129_v56, %v1067_v63  ;;  %v2013_v54 = vpop.f32.mrf.mxu3  ;;  %v1071_v60 = vmul.f32 %v1787_v13, %v1787_v13  ;;  %v1081_v56 = vmul.f32 %v1957_v0, %v1957_v0 }
 0x121   :  { %v1526_v5 = vpack.c.bf16 %v2013_v54, %v1999_v34 }
 0x122   :  { %v998_v8 = vadd.f32 %v997_v59, %v1766_v4  ;;  %v1131_v3 = vadd.f32 %v1130_v38, %v1068_v57  ;;  %v1072_v4 = vmul.f32 %v1799_v17, %v1799_v17  ;;  %v1083_v38 = vmul.f32 %v1789_v14, %v1789_v14 }
 0x123   :  { %1562 = vst [vmem:[%s2115_s2 + $0xf0] sm:$0xff] %v1526_v5  }
 0x124   :  { %v999_v12 = vadd.f32 %v998_v8, %v1776_v7  ;;  %v1132_v61 = vadd.f32 %v1131_v3, %v1069_v2 }
 0x126   :  { %v1000_v6 = vadd.f32 %v999_v12, %v1787_v13  ;;  %v1133_v9 = vadd.f32 %v1132_v61, %v1070_v41  ;;  %v1074_v13 = vmul.f32 %v1829_v29, %v1829_v29 }
 0x128   :  { %v1001_v7 = vadd.f32 %v1000_v6, %v1799_v17  ;;  %v1134_v10 = vadd.f32 %v1133_v9, %v1071_v60  ;;  %v2032_v22 = vpop.f32.mrf.mxu3 }
 0x12a   :  { %v1135_v23 = vadd.f32 %v1134_v10, %v1072_v4  ;;  %v1002_v24 = vadd.f32 %v1001_v7, %v1817_v25 }
 0x12c   :  { %v1003_v32 = vadd.f32 %v1002_v24, %v1829_v29  ;;  %v1136_v33 = vadd.f32 %v1135_v23, %v1073_v20 }
 0x12e   :  { %v1004_v17 = vadd.f32 %v1003_v32, %v1847_v39  ;;  %v1137_v15 = vadd.f32 %v1136_v33, %v1074_v13 }
 0x130   :  { %v1005_v48 = vadd.f32 %v1004_v17, %v1859_v44  ;;  %v1138_v25 = vadd.f32 %v1137_v15, %v1075_v31  ;;  %v639_v39 = vpop.f32.mrf.mxu3  ;;  %v1079_v44 = vmul.f32 %v1909_v19, %v1909_v19 }
 0x131   :  { %v1531_v42 = vpack.c.bf16 %v639_v39, %v2032_v22 }
 0x132   :  { %v1006_v29 = vadd.f32 %v1005_v48, %v1879_v11  ;;  %v1139_v36 = vadd.f32 %v1138_v25, %v1076_v28  ;;  %v1094_v28 = vmul.f32 %v1975_v37, %v1975_v37 }
 0x133   :  { %1563 = vst [vmem:[%s2115_s2 + $0xf8] sm:$0xff] %v1531_v42   ;;  %v1098_v42 = vmul.f32 %v639_v39, %v639_v39 }
 0x134   :  { %v1007_v21 = vadd.f32 %v1006_v29, %v1891_v46  ;;  %v1140_v52 = vadd.f32 %v1139_v36, %v1077_v35  ;;  %v1080_v46 = vmul.f32 %v1931_v50, %v1931_v50  ;;  %v1095_v35 = vmul.f32 %v1999_v34, %v1999_v34 }
 0x135   :  { %v1096_v36 = vmul.f32 %v2013_v54, %v2013_v54 }
 0x136   :  { %v1141_v27 = vadd.f32 %v1140_v52, %v1078_v43  ;;  %v1008_v49 = vadd.f32 %v1007_v21, %v1909_v19  ;;  %v1082_v19 = vmul.f32 %v1973_v16, %v1973_v16  ;;  %v1097_v43 = vmul.f32 %v2032_v22, %v2032_v22 }
 0x138   :  { %v1142_v11 = vadd.f32 %v1141_v27, %v1079_v44  ;;  %v1009_v53 = vadd.f32 %v1008_v49, %v1931_v50  ;;  %v1084_v50 = vmul.f32 %v1801_v18, %v1801_v18 }
 0x13a   :  { %v1143_v63 = vadd.f32 %v1142_v11, %v1080_v46  ;;  %v1010_v55 = vadd.f32 %v1009_v53, %v1957_v0  ;;  %v1085_v0 = vmul.f32 %v1819_v26, %v1819_v26 }
 0x13c   :  { %v1144_v57 = vadd.f32 %v1143_v63, %v1081_v56  ;;  %v1011_v59 = vadd.f32 %v1010_v55, %v1973_v16  ;;  %v1086_v16 = vmul.f32 %v1831_v30, %v1831_v30 }
 0x13e   :  { %v1012_v2 = vadd.f32 %v1011_v59, %v1789_v14  ;;  %v1145_v8 = vadd.f32 %v1144_v57, %v1082_v19  ;;  %v1087_v14 = vmul.f32 %v1849_v40, %v1849_v40 }
 0x140   :  { %v1013_v3 = vadd.f32 %v1012_v2, %v1801_v18  ;;  %v1146_v41 = vadd.f32 %v1145_v8, %v1083_v38  ;;  %v1088_v18 = vmul.f32 %v1861_v45, %v1861_v45 }
 0x142   :  { %v1014_v12 = vadd.f32 %v1013_v3, %v1819_v26  ;;  %v1147_v61 = vadd.f32 %v1146_v41, %v1084_v50  ;;  %v1089_v26 = vmul.f32 %v1881_v58, %v1881_v58 }
 0x144   :  { %v1015_v5 = vadd.f32 %v1014_v12, %v1831_v30  ;;  %v1148_v60 = vadd.f32 %v1147_v61, %v1085_v0  ;;  %v1090_v30 = vmul.f32 %v1893_v47, %v1893_v47 }
 0x146   :  { %v1016_v6 = vadd.f32 %v1015_v5, %v1849_v40  ;;  %v1149_v9 = vadd.f32 %v1148_v60, %v1086_v16  ;;  %v1091_v40 = vmul.f32 %v1911_v62, %v1911_v62 }
 0x148   :  { %v1017_v4 = vadd.f32 %v1016_v6, %v1861_v45  ;;  %v1150_v7 = vadd.f32 %v1149_v9, %v1087_v14  ;;  %v1092_v45 = vmul.f32 %v1933_v51, %v1933_v51 }
 0x14a   :  { %v1151_v10 = vadd.f32 %v1150_v7, %v1088_v18  ;;  %v1018_v20 = vadd.f32 %v1017_v4, %v1881_v58  ;;  %v1093_v58 = vmul.f32 %v1959_v1, %v1959_v1 }
 0x14c   :  { %v1019_v23 = vadd.f32 %v1018_v20, %v1893_v47  ;;  %v1152_v24 = vadd.f32 %v1151_v10, %v1089_v26 }
 0x14e   :  { %v1020_v13 = vadd.f32 %v1019_v23, %v1911_v62  ;;  %v1153_v32 = vadd.f32 %v1152_v24, %v1090_v30 }
 0x150   :  { %v1021_v33 = vadd.f32 %v1020_v13, %v1933_v51  ;;  %v1154_v31 = vadd.f32 %v1153_v32, %v1091_v40 }
 0x152   :  { %v1022_v17 = vadd.f32 %v1021_v33, %v1959_v1  ;;  %v1155_v15 = vadd.f32 %v1154_v31, %v1092_v45 }
 0x154   :  { %v1023_v47 = vadd.f32 %v1022_v17, %v1975_v37  ;;  %v1156_v48 = vadd.f32 %v1155_v15, %v1093_v58 }
 0x156   :  { %v1157_v62 = vadd.f32 %v1156_v48, %v1094_v28  ;;  %v1024_v25 = vadd.f32 %v1023_v47, %v1999_v34 }
 0x158   :  { %v1158_v51 = vadd.f32 %v1157_v62, %v1095_v35  ;;  %v1025_v29 = vadd.f32 %v1024_v25, %v2013_v54 }
 0x15a   :  { %v1159_v1 = vadd.f32 %v1158_v51, %v1096_v36  ;;  %v1026_v21 = vadd.f32 %v1025_v29, %v2032_v22 }
 0x15c   :  { %v1160_v37 = vadd.f32 %v1159_v1, %v1097_v43  ;;  %v1027_v52 = vadd.f32 %v1026_v21, %v639_v39 }
 0x15e   :  { %v1028_v27 = vrot.slane %v1027_v52, 4  ;;  %v1161_v49 = vadd.f32 %v1160_v37, %v1098_v42 }
 0x160   :  { %v1029_v44 = vadd.f32 %v1028_v27, %v1027_v52  ;;  %v1162_v11 = vrot.slane %v1161_v49, 4 }
 0x162   :  { %v1030_v34 = vrot.slane %v1029_v44, 2  ;;  %v1163_v53 = vadd.f32 %v1162_v11, %v1161_v49 }
 0x164   :  { %v1031_v46 = vadd.f32 %v1030_v34, %v1029_v44  ;;  %v1164_v63 = vrot.slane %v1163_v53, 2 }
 0x166   :  { %v1032_v55 = vrot.slane %v1031_v46, 1  ;;  %v1165_v56 = vadd.f32 %v1164_v63, %v1163_v53 }
 0x168   :  { %v1033_v54 = vadd.f32 %v1032_v55, %v1031_v46  ;;  %v1166_v57 = vrot.slane %v1165_v56, 1 }
 0x16a   :  { %1034 = vst [vmem:[%s2116_s3] sm:$0x1] %v1033_v54  ;;  %v1167_v22 = vadd.f32 %v1166_v57, %v1165_v56 }
 0x16c   :  { %1168 = vst [vmem:[%s2117_s4] sm:$0x1] %v1167_v22 }

// kernel: basic_block_forward.5
= control target key start
LH: loop header
LB: loop body
LE: loop exit
PB: predicated region body
PF: predicated region fallthrough
CT: control target
= control target key end

     0   :  { %s2979_s15 = smov 0   ;;  %s4071_s0 = inlined_call_operand.vmem [shape: bf16[2,18,18,4], index: 0, kind: input, shape index: {}]   ;;  %s4072_s1 = inlined_call_operand.vmem [shape: bf16[9,4,128], index: 1, kind: input, shape index: {}]   ;;  %s4073_s2 = inlined_call_operand.vmem [shape: bf16[2,256,128], index: 2, kind: output, shape index: {0}]   ;;  %s4074_s3 = inlined_call_operand.vmem [shape: f32[2,1,128], index: 3, kind: output, shape index: {1}]   ;;  %s4075_s4 = inlined_call_operand.vmem [shape: f32[2,1,128], index: 4, kind: output, shape index: {2}]  }
   0x1 LB: > { %s2560_s16 = sadd.s32 4294967295, %s2952_s15   ;;  %p2564_p0 = scmp.ge.s32.totalorder %s2952_s15, 1  ;;  %s2952_s15 = sphi %s2979_s15, %s15_s15  }
   0x2   : > { %p167_p1 = scmp.lt.s32.totalorder %s2952_s15, 3 }
   0x4   : > { %p168_p2 = pnand %p2564_p0, %p167_p1 }
   0x6   : > { %171 = sbr.rel (%p168_p2) target bundleno = 770 (0x302), region = 28 }
   0xb   : > { %v2568_v0 = vld [vmem:[%s4072_s1 + $0x2] sm:$0x3]  ;;  %vm757_vm0 = vcmask 1041408   ;;  %p199_p3 = scmp.lt.s32.totalorder %s2560_s16, 1  ;;  %v2681_v2 = vld [vmem:[%s4072_s1 + $0x4] sm:$0x3] }
   0xc   : > { %v759_v1 = vsel %vm757_vm0, %v2568_v0, 0  ;;  %v1300_v3 = vsel %vm757_vm0, %v2681_v2, 0  ;;  %v2698_v4 = vld [vmem:[%s4072_s1 + $0x6] sm:$0x3]  ;;  %v270_v5 = vld [vmem:[%s4072_s1] sm:$0x3] }
   0xd   : > { %2926 = vmatpush.bf16.msra.mxu1 %v759_v1  ;;  %2927 = vmatpush.bf16.msra.mxu2 %v759_v1  ;;  %s4215_s16 = smov (!%p199_p3, %s2560_s16), 1  ;;  %v2719_v6 = vld [vmem:[%s4072_s1 + $0x8] sm:$0x3]  ;;  %v1434_v7 = vsel %vm757_vm0, %v2698_v4, 0  ;;  %v979_v8 = vsel %vm757_vm0, %v270_v5, 0  ;;  %vm708_vm4 = vcmask 31744  }
   0xe   : > { %2928 = vmatpush.bf16.msra.mxu3 %v759_v1  ;;  %768 = vmatpush.bf16.msra.mxu0 %v759_v1  ;;  %s2929_s27 = smul.u32 216, %s4215_s16  ;;  %v1590_v9 = vsel %vm757_vm0, %v2719_v6, 0  ;;  %vm271_vm1 = vsmask.f32 3328  ;;  %vm272_vm2 = vsmask.f32 7440  ;;  %s211_s21 = scalar_lea.vmem %s4074_s3, %s4215_s16 }
   0xf   : > { %vm3040_vm3 = vmor %vm271_vm1, %vm272_vm2  ;;  %vm1086_vm5 = vcmask 1042432   ;;  %vm1087_vm6 = vcmask 1046532   ;;  %s2812_s13 = sshll.u32 %s4215_s16, 7  ;;  %s214_s24 = scalar_lea.vmem %s4075_s4, %s4215_s16 }
  0x10   : > { %s3013_s30 = scalar_lea.vmem %s4071_s0, %s2929_s27  ;;  %vm3343_vm7 = vmor %vm1086_vm5, %vm1087_vm6  ;;  %s3937_s18 = scalar_lea.vmem %s4073_s2, %s2812_s13 }
  0x11   : > { %1309 = vmatpush.bf16.msrb.mxu2 %v1300_v3  ;;  %988 = vmatpush.bf16.msrb.mxu1 %v979_v8  ;;  %v3016_v10 = vld [vmem:[%s3013_s30 + $0x30] sm:$0xf]  ;;  %v3019_v11 = vld [vmem:[%s3013_s30 + $0x34] sm:$0xf]  ;;  %v3022_v12 = vld [vmem:[%s3013_s30 + $0x38] sm:$0x1] }
  0x12   : > { %1443 = vmatpush.bf16.msrb.mxu3 %v1434_v7  ;;  %1599 = vmatpush.bf16.msrb.mxu0 %v1590_v9  ;;  %v371_v13 = vshrl.u32 %v3016_v10, 16  ;;  %v374_v14 = vshll.u32 %v3016_v10, 16  ;;  %v380_v15 = vshll.u32 %v3019_v11, 16  ;;  %v384_v16 = vshrl.u32 %v3019_v11, 16  ;;  %v240_v17 = vld [vmem:[%s3013_s30 + $0x60] sm:$0xf] }
  0x13   : > { %v390_v18 = vshll.u32 %v3022_v12, 16  ;;  %v3031_v19 = vld [vmem:[%s3013_s30 + $0x64] sm:$0xf]  ;;  %v242_v20 = vld [vmem:[%s3013_s30 + $0x68] sm:$0x1]  ;;  %v467_v21 = vshrl.u32 %v240_v17, 16 }
  0x14   : > { %v373_v22 = vrot.slane %v371_v13, 4  ;;  %v376_v23 = vrot.slane %v374_v14, 5  ;;  %v382_v24 = vrot.slane %v380_v15, 5  ;;  %v386_v25 = vrot.slane %v384_v16, 4  ;;  %v252_v26 = vld [vmem:[%s3013_s30 + $0x90] sm:$0xf] }
  0x15   : > { %v392_v27 = vrot.slane %v390_v18, 5  ;;  %v469_v28 = vrot.slane %v467_v21, 4  ;;  %v470_v29 = vshll.u32 %v240_v17, 16  ;;  %v476_v30 = vshll.u32 %v3031_v19, 16  ;;  %v253_v35 = vld [vmem:[%s3013_s30 + $0x94] sm:$0xf] }
  0x16   : > { %v377_v31 = vor.u32 %v376_v23, %v373_v22  ;;  %v387_v32 = vor.u32 %v386_v25, %v382_v24  ;;  %v480_v33 = vshrl.u32 %v3031_v19, 16  ;;  %v486_v34 = vshll.u32 %v242_v20, 16  ;;  %v254_v45 = vld [vmem:[%s3013_s30 + $0x98] sm:$0x1]  ;;  %v3050_v61 = vld [vmem:[%s3013_s30] sm:$0xf] }
  0x17   : > { %v472_v37 = vrot.slane %v470_v29, 5  ;;  %v478_v38 = vrot.slane %v476_v30, 5  ;;  %v563_v39 = vshrl.u32 %v252_v26, 16  ;;  %v566_v47 = vshll.u32 %v252_v26, 16  ;;  %v3057_v1 = vld [vmem:[%s3013_s30 + $0x4] sm:$0xf] }
  0x18   : > { %v378_v40 = vrot.slane %v377_v31, 4  ;;  %v388_v41 = vrot.slane %v387_v32, 4  ;;  %v482_v42 = vrot.slane %v480_v33, 4  ;;  %v488_v43 = vrot.slane %v486_v34, 5  ;;  %v3060_v2 = vld [vmem:[%s3013_s30 + $0x8] sm:$0x1] }
  0x19   : > { %v473_v44 = vor.u32 %v472_v37, %v469_v28  ;;  %v565_v46 = vrot.slane %v563_v39, 4  ;;  %v572_v48 = vshll.u32 %v253_v35, 16  ;;  %v576_v52 = vshrl.u32 %v253_v35, 16  ;;  %v3076_v23 = vld [vmem:[%s3013_s30 + $0x3c] sm:$0xf] }
  0x1a   : > { %v383_v49 = vsel %vm3040_vm3, %v378_v40, %v382_v24  ;;  %v393_v50 = vsel %vm3040_vm3, %v388_v41, %v392_v27  ;;  %v483_v51 = vor.u32 %v482_v42, %v478_v38  ;;  %v568_v56 = vrot.slane %v566_v47, 5  ;;  %v3079_v24 = vld [vmem:[%s3013_s30 + $0x40] sm:$0xf]  ;;  %v3084_v29 = vld [vmem:[%s3013_s30 + $0x44] sm:$0x1] }
  0x1b   : > { %v668_v53 = vunpack.c.l.b16 %v383_v49  ;;  %v669_v54 = vunpack.c.l.b16 %v393_v50  ;;  %v474_v55 = vrot.slane %v473_v44, 4  ;;  %v574_v58 = vrot.slane %v572_v48, 5  ;;  %v3099_v47 = vld [vmem:[%s3013_s30 + $0x70] sm:$0xf] }
  0x1c   : > { %v484_v57 = vrot.slane %v483_v51, 4  ;;  %v578_v59 = vrot.slane %v576_v52, 4  ;;  %v582_v60 = vshll.u32 %v254_v45, 16  ;;  %v569_v0 = vor.u32 %v568_v56, %v565_v46  ;;  %v3106_v51 = vld [vmem:[%s3013_s30 + $0x74] sm:$0x1] }
  0x1d   : > { %v3052_v62 = vpack.c.b16 %v669_v54, %v668_v53  ;;  %v479_v63 = vsel %vm3040_vm3, %v474_v55, %v478_v38  ;;  %v275_v9 = vshrl.u32 %v3050_v61, 16  ;;  %v278_v13 = vshll.u32 %v3050_v61, 16  ;;  %v3092_v38 = vld [vmem:[%s3013_s30 + $0x6c] sm:$0xf] }
  0x1e   : > { %v489_v3 = vsel %vm3040_vm3, %v484_v57, %v488_v43  ;;  %v676_v4 = vunpack.c.l.b16 %v479_v63  ;;  %v579_v5 = vor.u32 %v578_v59, %v574_v58  ;;  %v584_v6 = vrot.slane %v582_v60, 5 }
  0x1f   : > { %2573 = vmatmul.msk.bf16.vlgmr.msra.gmra.mxu1 %vm708_vm4, %v3052_v62  ;;  %v677_v7 = vunpack.c.l.b16 %v489_v3  ;;  %v570_v8 = vrot.slane %v569_v0, 4  ;;  %v284_v15 = vshll.u32 %v3057_v1, 16  ;;  %v288_v16 = vshrl.u32 %v3057_v1, 16 }
  0x20   : > { %v580_v14 = vrot.slane %v579_v5, 4  ;;  %v294_v17 = vshll.u32 %v3060_v2, 16  ;;  %v277_v21 = vrot.slane %v275_v9, 4  ;;  %v280_v22 = vrot.slane %v278_v13, 5  ;;  %v255_v5 = vld [vmem:[%s3013_s30 + $0x9c] sm:$0xf] }
  0x21   : > { %v3071_v18 = vpack.c.b16 %v677_v7, %v676_v4  ;;  %v575_v20 = vsel %vm3040_vm3, %v570_v8, %v574_v58  ;;  %v286_v27 = vrot.slane %v284_v15, 5  ;;  %v290_v28 = vrot.slane %v288_v16, 4  ;;  %v256_v9 = vld [vmem:[%s3013_s30 + $0xa0] sm:$0xf] }
  0x22   : > { %v585_v25 = vsel %vm3040_vm3, %v580_v14, %v584_v6  ;;  %v684_v26 = vunpack.c.l.b16 %v575_v20  ;;  %v281_v31 = vor.u32 %v280_v22, %v277_v21  ;;  %v296_v32 = vrot.slane %v294_v17, 5  ;;  %v257_v17 = vld [vmem:[%s3013_s30 + $0xa4] sm:$0x1] }
  0x23   : > { %4118 = vst [vmem:[#allocation2_spill] sm:$0xff] %v3071_v18  ;;  %2577 = vmatmul.msk.bf16.vlgmr.msra.gmra.mxu2 %vm708_vm4, %v3071_v18  ;;  %v685_v30 = vunpack.c.l.b16 %v585_v25  ;;  %v291_v33 = vor.u32 %v290_v28, %v286_v27  ;;  %v395_v34 = vshrl.u32 %v3076_v23, 16  ;;  %v398_v35 = vshll.u32 %v3076_v23, 16 }
  0x24   : > { %v404_v37 = vshll.u32 %v3079_v24, 16  ;;  %v282_v40 = vrot.slane %v281_v31, 4  ;;  %v408_v41 = vshrl.u32 %v3079_v24, 16  ;;  %v414_v42 = vshll.u32 %v3084_v29, 16 }
  0x25   : > { %v3094_v39 = vpack.c.b16 %v685_v30, %v684_v26  ;;  %v292_v43 = vrot.slane %v291_v33, 4  ;;  %v397_v44 = vrot.slane %v395_v34, 4  ;;  %v400_v45 = vrot.slane %v398_v35, 5  ;;  %v3124_v35 = vld [vmem:[%s3013_s30 + $0xc] sm:$0xf] }
  0x26   : > { %v406_v46 = vrot.slane %v404_v37, 5  ;;  %v287_v48 = vsel %vm3040_vm3, %v282_v40, %v286_v27  ;;  %v410_v49 = vrot.slane %v408_v41, 4  ;;  %v416_v50 = vrot.slane %v414_v42, 5 }
  0x27   : > { %4119 = vst [vmem:[#allocation3_spill] sm:$0xff] %v3094_v39  ;;  %2581 = vmatmul.msk.bf16.vlgmr.msra.gmra.mxu3 %vm708_vm4, %v3094_v39  ;;  %v491_v52 = vshrl.u32 %v3092_v38, 16  ;;  %v297_v53 = vsel %vm3040_vm3, %v292_v43, %v296_v32  ;;  %v660_v54 = vunpack.c.l.b16 %v287_v48  ;;  %v401_v55 = vor.u32 %v400_v45, %v397_v44  ;;  %v3131_v43 = vld [vmem:[%s3013_s30 + $0x10] sm:$0xf]  ;;  %v3134_v48 = vld [vmem:[%s3013_s30 + $0x14] sm:$0x1] }
  0x28   : > { %v494_v56 = vshll.u32 %v3092_v38, 16  ;;  %v661_v57 = vunpack.c.l.b16 %v297_v53  ;;  %v411_v58 = vor.u32 %v410_v49, %v406_v46  ;;  %v500_v60 = vshll.u32 %v3099_v47, 16  ;;  %v3311_v39 = vld [vmem:[%s3013_s30 + $0x2c] sm:$0x1] }
  0x29   : > { %v493_v59 = vrot.slane %v491_v52, 4  ;;  %v402_v63 = vrot.slane %v401_v55, 4  ;;  %v504_v3 = vshrl.u32 %v3099_v47, 16  ;;  %v510_v4 = vshll.u32 %v3106_v51, 16 }
  0x2a   : > { %v496_v0 = vrot.slane %v494_v56, 5  ;;  %v692_v6 = vpack.c.b16 %v661_v57, %v660_v54  ;;  %v412_v7 = vrot.slane %v411_v58, 4  ;;  %v502_v8 = vrot.slane %v500_v60, 5  ;;  %v3144_v58 = vld [vmem:[%s3013_s30 + $0x48] sm:$0xf] }
  0x2b   : > { %v407_v13 = vsel %vm3040_vm3, %v402_v63, %v406_v46  ;;  %v506_v15 = vrot.slane %v504_v3, 4  ;;  %v512_v16 = vrot.slane %v510_v4, 5  ;;  %v587_v22 = vshrl.u32 %v255_v5, 16  ;;  %v3149_v3 = vld [vmem:[%s3013_s30 + $0x4c] sm:$0xf] }
  0x2c   : > { %v497_v14 = vor.u32 %v496_v0, %v493_v59  ;;  %2569 = vmatmul.msk.bf16.vlgmr.msra.gmra.mxu0 %vm708_vm4, %v692_v6  ;;  %v417_v20 = vsel %vm3040_vm3, %v412_v7, %v416_v50  ;;  %v670_v21 = vunpack.c.l.b16 %v407_v13  ;;  %v590_v25 = vshll.u32 %v255_v5, 16 }
  0x2d   : > { %v671_v26 = vunpack.c.l.b16 %v417_v20  ;;  %v507_v28 = vor.u32 %v506_v15, %v502_v8  ;;  %v596_v30 = vshll.u32 %v256_v9, 16  ;;  %v589_v31 = vrot.slane %v587_v22, 4  ;;  %v3156_v15 = vld [vmem:[%s3013_s30 + $0x50] sm:$0x1] }
  0x2e   : > { %v498_v27 = vrot.slane %v497_v14, 4  ;;  %v592_v32 = vrot.slane %v590_v25, 5  ;;  %v600_v33 = vshrl.u32 %v256_v9, 16  ;;  %v606_v34 = vshll.u32 %v257_v17, 16 }
  0x2f   : > { %v3126_v37 = vpack.c.b16 %v671_v26, %v670_v21  ;;  %v508_v41 = vrot.slane %v507_v28, 4  ;;  %v598_v42 = vrot.slane %v596_v30, 5  ;;  %v299_v52 = vshrl.u32 %v3124_v35, 16  ;;  %v3167_v28 = vld [vmem:[%s3013_s30 + $0x78] sm:$0xf] }
  0x30   : > { %v503_v40 = vsel %vm3040_vm3, %v498_v27, %v502_v8  ;;  %v593_v45 = vor.u32 %v592_v32, %v589_v31  ;;  %v602_v46 = vrot.slane %v600_v33, 4  ;;  %v608_v50 = vrot.slane %v606_v34, 5  ;;  %v3171_v34 = vld [vmem:[%s3013_s30 + $0x7c] sm:$0xf] }
  0x31   : > { %v678_v44 = vunpack.c.l.b16 %v503_v40  ;;  %2574 = vmatmul.msk.bf16.gmra.mxu1 %vm708_vm4, %v3126_v37  ;;  %v513_v49 = vsel %vm3040_vm3, %v508_v41, %v512_v16  ;;  %v302_v53 = vshll.u32 %v3124_v35, 16  ;;  %v308_v57 = vshll.u32 %v3131_v43, 16 }
  0x32   : > { %v679_v54 = vunpack.c.l.b16 %v513_v49  ;;  %v594_v55 = vrot.slane %v593_v45, 4  ;;  %v603_v56 = vor.u32 %v602_v46, %v598_v42  ;;  %v301_v59 = vrot.slane %v299_v52, 4 }
  0x33   : > { %v304_v60 = vrot.slane %v302_v53, 5  ;;  %v312_v63 = vshrl.u32 %v3131_v43, 16  ;;  %v318_v0 = vshll.u32 %v3134_v48, 16  ;;  %v310_v7 = vrot.slane %v308_v57, 5 }
  0x34   : > { %v3151_v4 = vpack.c.b16 %v679_v54, %v678_v44  ;;  %v599_v5 = vsel %vm3040_vm3, %v594_v55, %v598_v42  ;;  %v604_v6 = vrot.slane %v603_v56, 4  ;;  %v419_v17 = vshrl.u32 %v3144_v58, 16 }
  0x35   : > { %v686_v8 = vunpack.c.l.b16 %v599_v5  ;;  %v305_v9 = vor.u32 %v304_v60, %v301_v59  ;;  %v314_v13 = vrot.slane %v312_v63, 4  ;;  %v320_v14 = vrot.slane %v318_v0, 5 }
  0x36   : > { %2578 = vmatmul.msk.bf16.gmra.mxu2 %vm708_vm4, %v3151_v4  ;;  %v609_v16 = vsel %vm3040_vm3, %v604_v6, %v608_v50  ;;  %v422_v20 = vshll.u32 %v3144_v58, 16  ;;  %v428_v21 = vshll.u32 %v3149_v3, 16  ;;  %v432_v27 = vshrl.u32 %v3149_v3, 16  ;;  %v3178_v50 = vld [vmem:[%s3013_s30 + $0x80] sm:$0x1] }
  0x37   : > { %v687_v22 = vunpack.c.l.b16 %v609_v16  ;;  %v306_v25 = vrot.slane %v305_v9, 4  ;;  %v315_v26 = vor.u32 %v314_v13, %v310_v7  ;;  %v421_v30 = vrot.slane %v419_v17, 4  ;;  %v3197_v16 = vld [vmem:[%s3013_s30 + $0xac] sm:$0xf]  ;;  %v3200_v17 = vld [vmem:[%s3013_s30 + $0xb0] sm:$0x1] }
  0x38   : > { %v424_v31 = vrot.slane %v422_v20, 5  ;;  %v430_v32 = vrot.slane %v428_v21, 5  ;;  %v438_v33 = vshll.u32 %v3156_v15, 16  ;;  %v434_v44 = vrot.slane %v432_v27, 4  ;;  %4122 = vst [vmem:[#allocation6_spill] sm:$0xff] %v3197_v16 }
  0x39   : > { %v3173_v40 = vpack.c.b16 %v687_v22, %v686_v8  ;;  %v311_v41 = vsel %vm3040_vm3, %v306_v25, %v310_v7  ;;  %v316_v42 = vrot.slane %v315_v26, 4  ;;  %v515_v52 = vshrl.u32 %v3167_v28, 16  ;;  %v3190_v8 = vld [vmem:[%s3013_s30 + $0xa8] sm:$0xf]  ;;  %4123 = vst [vmem:[#allocation7_spill] sm:$0xff] %v3200_v17 }
  0x3a   : > { %v662_v45 = vunpack.c.l.b16 %v311_v41  ;;  %v425_v46 = vor.u32 %v424_v31, %v421_v30  ;;  %v440_v49 = vrot.slane %v438_v33, 5  ;;  %v435_v54 = vor.u32 %v434_v44, %v430_v32  ;;  %4121 = vst [vmem:[#allocation5_spill] sm:$0xff] %v3190_v8 }
  0x3b   : > { %4120 = vst [vmem:[#allocation4_spill] sm:$0xff] %v3173_v40  ;;  %2582 = vmatmul.msk.bf16.gmra.mxu3 %vm708_vm4, %v3173_v40  ;;  %v321_v53 = vsel %vm3040_vm3, %v316_v42, %v320_v14  ;;  %v518_v55 = vshll.u32 %v3167_v28, 16  ;;  %v524_v56 = vshll.u32 %v3171_v34, 16  ;;  %v517_v60 = vrot.slane %v515_v52, 4  ;;  %v3214_v52 = vld [vmem:[%s3013_s30 + $0x18] sm:$0xf] }
  0x3c   : > { %v663_v57 = vunpack.c.l.b16 %v321_v53  ;;  %v426_v59 = vrot.slane %v425_v46, 4  ;;  %v528_v63 = vshrl.u32 %v3171_v34, 16  ;;  %v436_v0 = vrot.slane %v435_v54, 4  ;;  %v3300_v40 = vld [vmem:[%s3013_s30 + $0x24] sm:$0xf] }
  0x3d   : > { %v520_v5 = vrot.slane %v518_v55, 5  ;;  %v526_v6 = vrot.slane %v524_v56, 5  ;;  %v534_v7 = vshll.u32 %v3178_v50, 16  ;;  %v611_v30 = vshrl.u32 %v3190_v8, 16  ;;  %v3219_v56 = vld [vmem:[%s3013_s30 + $0x1c] sm:$0xf] }
  0x3e   : > { %v3192_v9 = vpack.c.b16 %v663_v57, %v662_v45  ;;  %v431_v13 = vsel %vm3040_vm3, %v426_v59, %v430_v32  ;;  %v530_v14 = vrot.slane %v528_v63, 4  ;;  %v441_v20 = vsel %vm3040_vm3, %v436_v0, %v440_v49  ;;  %v3222_v57 = vld [vmem:[%s3013_s30 + $0x20] sm:$0x1] }
  0x3f   : > { %v672_v21 = vunpack.c.l.b16 %v431_v13  ;;  %v521_v22 = vor.u32 %v520_v5, %v517_v60  ;;  %v536_v25 = vrot.slane %v534_v7, 5  ;;  %v673_v26 = vunpack.c.l.b16 %v441_v20 }
  0x40   : > { %2570 = vmatmul.msk.bf16.gmra.mxu0 %vm708_vm4, %v3192_v9  ;;  %v531_v27 = vor.u32 %v530_v14, %v526_v6  ;;  %v614_v31 = vshll.u32 %v3190_v8, 16  ;;  %v620_v33 = vshll.u32 %v3197_v16, 16  ;;  %v624_v41 = vshrl.u32 %v3197_v16, 16 }
  0x41   : > { %v522_v32 = vrot.slane %v521_v22, 4  ;;  %v630_v42 = vshll.u32 %v3200_v17, 16  ;;  %v3211_v44 = vpack.c.b16 %v673_v26, %v672_v21  ;;  %v613_v46 = vrot.slane %v611_v30, 4  ;;  %v3234_v26 = vld [vmem:[%s3013_s30 + $0x54] sm:$0xf] }
  0x42   : > { %v532_v45 = vrot.slane %v531_v27, 4  ;;  %v616_v49 = vrot.slane %v614_v31, 5  ;;  %v622_v54 = vrot.slane %v620_v33, 5  ;;  %v626_v55 = vrot.slane %v624_v41, 4  ;;  %v3278_v17 = vld [vmem:[%s3013_s30 + $0xb4] sm:$0xf] }
  0x43   : > { %4124 = vst [vmem:[#allocation8_spill] sm:$0xff] %v3211_v44  ;;  %v527_v53 = vsel %vm3040_vm3, %v522_v32, %v526_v6  ;;  %2575 = vmatmul.msk.bf16.gmra.mxu1 %vm708_vm4, %v3211_v44  ;;  %v632_v0 = vrot.slane %v630_v42, 5  ;;  %v323_v6 = vshrl.u32 %v3214_v52, 16  ;;  %v326_v13 = vshll.u32 %v3214_v52, 16  ;;  %v3239_v32 = vld [vmem:[%s3013_s30 + $0x58] sm:$0xf] }
  0x44   : > { %v537_v59 = vsel %vm3040_vm3, %v532_v45, %v536_v25  ;;  %v680_v60 = vunpack.c.l.b16 %v527_v53  ;;  %v617_v63 = vor.u32 %v616_v49, %v613_v46  ;;  %v627_v7 = vor.u32 %v626_v55, %v622_v54  ;;  %v3244_v46 = vld [vmem:[%s3013_s30 + $0x5c] sm:$0x1]  ;;  %4127 = vst [vmem:[#allocation11_spill] sm:$0xff] %v3278_v17 }
  0x45   : > { %v681_v5 = vunpack.c.l.b16 %v537_v59  ;;  %v332_v20 = vshll.u32 %v3219_v56, 16  ;;  %v336_v21 = vshrl.u32 %v3219_v56, 16  ;;  %v342_v22 = vshll.u32 %v3222_v57, 16 }
  0x46   : > { %v618_v14 = vrot.slane %v617_v63, 4  ;;  %v628_v27 = vrot.slane %v627_v7, 4  ;;  %v325_v30 = vrot.slane %v323_v6, 4  ;;  %v328_v31 = vrot.slane %v326_v13, 5  ;;  %v3254_v7 = vld [vmem:[%s3013_s30 + $0x84] sm:$0xf] }
  0x47   : > { %v3236_v25 = vpack.c.b16 %v681_v5, %v680_v60  ;;  %v334_v41 = vrot.slane %v332_v20, 5  ;;  %v338_v42 = vrot.slane %v336_v21, 4  ;;  %v344_v45 = vrot.slane %v342_v22, 5  ;;  %4125 = vst [vmem:[#allocation9_spill] sm:$0xff] %v3254_v7 }
  0x48   : > { %v623_v33 = vsel %vm3040_vm3, %v618_v14, %v622_v54  ;;  %v633_v49 = vsel %vm3040_vm3, %v628_v27, %v632_v0  ;;  %v329_v55 = vor.u32 %v328_v31, %v325_v30  ;;  %v443_v59 = vshrl.u32 %v3234_v26, 16  ;;  %v3261_v30 = vld [vmem:[%s3013_s30 + $0x88] sm:$0xf] }
  0x49   : > { %2579 = vmatmul.msk.bf16.gmra.mxu2 %vm708_vm4, %v3236_v25  ;;  %v688_v53 = vunpack.c.l.b16 %v623_v33  ;;  %v689_v60 = vunpack.c.l.b16 %v633_v49  ;;  %v339_v63 = vor.u32 %v338_v42, %v334_v41  ;;  %v446_v54 = vshll.u32 %v3234_v26, 16  ;;  %v3266_v49 = vld [vmem:[%s3013_s30 + $0x8c] sm:$0x1] }
  0x4a   : > { %v452_v5 = vshll.u32 %v3239_v32, 16  ;;  %v330_v6 = vrot.slane %v329_v55, 4  ;;  %v445_v13 = vrot.slane %v443_v59, 4  ;;  %v456_v14 = vshrl.u32 %v3239_v32, 16 }
  0x4b   : > { %v462_v0 = vshll.u32 %v3244_v46, 16  ;;  %v3258_v20 = vpack.c.b16 %v689_v60, %v688_v53  ;;  %v340_v21 = vrot.slane %v339_v63, 4  ;;  %v448_v22 = vrot.slane %v446_v54, 5 }
  0x4c   : > { %v454_v27 = vrot.slane %v452_v5, 5  ;;  %v335_v31 = vsel %vm3040_vm3, %v330_v6, %v334_v41  ;;  %v458_v33 = vrot.slane %v456_v14, 4  ;;  %v539_v55 = vshrl.u32 %v3254_v7, 16 }
  0x4d   : > { %4126 = vst [vmem:[#allocation10_spill] sm:$0xff] %v3258_v20  ;;  %v464_v42 = vrot.slane %v462_v0, 5  ;;  %2583 = vmatmul.msk.bf16.gmra.mxu3 %vm708_vm4, %v3258_v20  ;;  %v345_v53 = vsel %vm3040_vm3, %v340_v21, %v344_v45  ;;  %v664_v59 = vunpack.c.l.b16 %v335_v31  ;;  %v449_v60 = vor.u32 %v448_v22, %v445_v13  ;;  %v3283_v22 = vld [vmem:[%s3013_s30 + $0xb8] sm:$0xf] }
  0x4e   : > { %v542_v63 = vshll.u32 %v3254_v7, 16  ;;  %v665_v54 = vunpack.c.l.b16 %v345_v53  ;;  %v459_v41 = vor.u32 %v458_v33, %v454_v27  ;;  %v541_v5 = vrot.slane %v539_v55, 4  ;;  %4128 = vst [vmem:[#allocation12_spill] sm:$0xff] %v3283_v22 }
  0x4f   : > { %v548_v6 = vshll.u32 %v3261_v30, 16  ;;  %v450_v14 = vrot.slane %v449_v60, 4  ;;  %v552_v8 = vshrl.u32 %v3261_v30, 16  ;;  %v558_v20 = vshll.u32 %v3266_v49, 16  ;;  %v3288_v60 = vld [vmem:[%s3013_s30 + $0xbc] sm:$0x1] }
  0x50   : > { %v544_v0 = vrot.slane %v542_v63, 5  ;;  %v3280_v45 = vpack.c.b16 %v665_v54, %v664_v59  ;;  %v460_v21 = vrot.slane %v459_v41, 4  ;;  %4129 = vst [vmem:[#allocation13_spill] sm:$0xff] %v3288_v60  ;;  %v635_v54 = vshrl.u32 %v3278_v17, 16 }
  0x51   : > { %v550_v13 = vrot.slane %v548_v6, 5  ;;  %v455_v31 = vsel %vm3040_vm3, %v450_v14, %v454_v27  ;;  %v554_v55 = vrot.slane %v552_v8, 4  ;;  %v560_v53 = vrot.slane %v558_v20, 5 }
  0x52   : > { %v545_v33 = vor.u32 %v544_v0, %v541_v5  ;;  %2571 = vmatmul.msk.bf16.gmra.mxu0 %vm708_vm4, %v3280_v45  ;;  %v465_v59 = vsel %vm3040_vm3, %v460_v21, %v464_v42  ;;  %v674_v63 = vunpack.c.l.b16 %v455_v31  ;;  %v638_v41 = vshll.u32 %v3278_v17, 16 }
  0x53   : > { %v675_v6 = vunpack.c.l.b16 %v465_v59  ;;  %v555_v5 = vor.u32 %v554_v55, %v550_v13  ;;  %v644_v8 = vshll.u32 %v3283_v22, 16  ;;  %v637_v20 = vrot.slane %v635_v54, 4 }
  0x54   : > { %v546_v27 = vrot.slane %v545_v33, 4  ;;  %v640_v14 = vrot.slane %v638_v41, 5  ;;  %v648_v0 = vshrl.u32 %v3283_v22, 16  ;;  %v654_v16 = vshll.u32 %v3288_v60, 16  ;;  %v3307_v33 = vld [vmem:[%s3013_s30 + $0x28] sm:$0xf] }
  0x55   : > { %v3302_v42 = vpack.c.b16 %v675_v6, %v674_v63  ;;  %v556_v31 = vrot.slane %v555_v5, 4  ;;  %v646_v59 = vrot.slane %v644_v8, 5  ;;  %v1094_v55 = vrot.slane %v3060_v2, 5 }
  0x56   : > { %v551_v21 = vsel %vm3040_vm3, %v546_v27, %v550_v13  ;;  %v641_v54 = vor.u32 %v640_v14, %v637_v20  ;;  %v650_v41 = vrot.slane %v648_v0, 4  ;;  %v656_v6 = vrot.slane %v654_v16, 5 }
  0x57   : > { %4130 = vst [vmem:[#allocation14_spill] sm:$0xff] %v3302_v42  ;;  %v682_v17 = vunpack.c.l.b16 %v551_v21  ;;  %2576 = vmatmul.msk.bf16.gmra.mxu1 %vm708_vm4, %v3302_v42  ;;  %v561_v63 = vsel %vm3040_vm3, %v556_v31, %v560_v53  ;;  %v347_v13 = vshrl.u32 %v3300_v40, 16  ;;  %v350_v27 = vshll.u32 %v3300_v40, 16 }
  0x58   : > { %v683_v5 = vunpack.c.l.b16 %v561_v63  ;;  %v642_v8 = vrot.slane %v641_v54, 4  ;;  %v651_v60 = vor.u32 %v650_v41, %v646_v59  ;;  %v356_v2 = vshll.u32 %v3307_v33, 16  ;;  %v2754_v54 = vld [vmem:[%s4072_s1 + $0xc] sm:$0x3]  ;;  %v2775_v41 = vld [vmem:[%s4072_s1 + $0xe] sm:$0x3] }
  0x59   : > { %v349_v20 = vrot.slane %v347_v13, 4  ;;  %v352_v14 = vrot.slane %v350_v27, 5  ;;  %v360_v0 = vshrl.u32 %v3307_v33, 16  ;;  %v366_v21 = vshll.u32 %v3311_v39, 16 }
  0x5a   : > { %v3322_v22 = vpack.c.b16 %v683_v5, %v682_v17  ;;  %v647_v16 = vsel %vm3040_vm3, %v642_v8, %v646_v59  ;;  %v652_v53 = vrot.slane %v651_v60, 4  ;;  %v358_v31 = vrot.slane %v356_v2, 5  ;;  %v2737_v17 = vld [vmem:[%s4072_s1 + $0xa] sm:$0x3]  ;;  %v2793_v60 = vld [vmem:[%s4072_s1 + $0x10] sm:$0x3] }
  0x5b   : > { %v690_v63 = vunpack.c.l.b16 %v647_v16  ;;  %v353_v13 = vor.u32 %v352_v14, %v349_v20  ;;  %v362_v27 = vrot.slane %v360_v0, 4  ;;  %v368_v7 = vrot.slane %v366_v21, 5 }
  0x5c   : > { %4131 = vst [vmem:[#allocation15_spill] sm:$0xff] %v3322_v22  ;;  %2580 = vmatmul.msk.bf16.gmra.mxu2 %vm708_vm4, %v3322_v22  ;;  %v657_v59 = vsel %vm3040_vm3, %v652_v53, %v656_v6  ;;  %v2665_v5 = vrot.slane %v3050_v61, 9  ;;  %v1091_v0 = vrot.slane %v3057_v1, 5  ;;  %v1864_v21 = vsel %vm757_vm0, %v2754_v54, 0 }
  0x5d   : > { %v691_v8 = vunpack.c.l.b16 %v657_v59  ;;  %v354_v2 = vrot.slane %v353_v13, 4  ;;  %v363_v20 = vor.u32 %v362_v27, %v358_v31  ;;  %v2020_v16 = vsel %vm757_vm0, %v2775_v41, 0  ;;  %1873 = vmatpush.bf16.msra.mxu2 %v1864_v21  ;;  %v2814_v21 = vld [vmem:[%s3013_s30 + $0xc] sm:$0xff] }
  0x5e   : > { %v1730_v22 = vsel %vm757_vm0, %v2737_v17, 0  ;;  %v2160_v6 = vsel %vm757_vm0, %v2793_v60, 0  ;;  %v1092_v27 = vsel %vm3343_vm7, %v2665_v5, %v1091_v0  ;;  %2029 = vmatpush.bf16.msra.mxu3 %v2020_v16  ;;  %v1093_v54 = vrot.slane %v1091_v0, 4 }
  0x5f   : > { %v3352_v53 = vpack.c.b16 %v691_v8, %v690_v63  ;;  %v359_v61 = vsel %vm3040_vm3, %v354_v2, %v358_v31  ;;  %v364_v13 = vrot.slane %v363_v20, 4  ;;  %1739 = vmatpush.bf16.msra.mxu1 %v1730_v22  ;;  %2169 = vmatpush.bf16.msra.mxu0 %v2160_v6  ;;  %v2666_v41 = vrot.slane %v3124_v35, 9  ;;  %v2813_v22 = vld [vmem:[%s3013_s30] sm:$0xff]  ;;  %v3389_v6 = vld [vmem:[%s3013_s30 + $0x18] sm:$0xff] }
  0x60   : > { %v666_v1 = vunpack.c.l.b16 %v359_v61  ;;  %v1203_v31 = vunpack.c.l.b16 %v1092_v27  ;;  %v1098_v17 = vrot.slane %v3131_v43, 5  ;;  %v1101_v60 = vrot.slane %v3134_v48, 5 }
  0x61   : > { %2584 = vmatmul.msk.bf16.gmra.mxu3 %vm708_vm4, %v3352_v53  ;;  %v369_v63 = vsel %vm3040_vm3, %v364_v13, %v368_v7  ;;  %v1095_v5 = vsel %vm3343_vm7, %v1093_v54, %v1094_v55  ;;  %v1105_v16 = vrot.slane %v3219_v56, 5  ;;  %v2667_v61 = vrot.slane %v3214_v52, 9 }
  0x62   : > { %v667_v59 = vunpack.c.l.b16 %v369_v63  ;;  %v1204_v8 = vunpack.c.l.b16 %v1095_v5  ;;  %v1099_v35 = vsel %vm3343_vm7, %v2666_v41, %v1098_v17  ;;  %v1100_v2 = vrot.slane %v1098_v17, 4  ;;  %v3409_v41 = vld [vmem:[%s3013_s30 + $0x24] sm:$0xff] }
  0x63   : > { %v1205_v7 = vunpack.c.l.b16 %v1099_v35  ;;  %v1107_v13 = vrot.slane %v1105_v16, 4  ;;  %v1108_v27 = vrot.slane %v3222_v57, 5  ;;  %v1112_v57 = vrot.slane %v3307_v33, 5 }
  0x64   : > { %v3370_v20 = vpack.c.b16 %v667_v59, %v666_v1  ;;  %v1235_v0 = vpack.c.b16 %v1204_v8, %v1203_v31  ;;  %v1102_v43 = vsel %vm3343_vm7, %v1100_v2, %v1101_v60  ;;  %v2668_v63 = vrot.slane %v3300_v40, 9  ;;  %v3431_v8 = vld [vmem:[%s3013_s30 + $0x30] sm:$0xff] }
  0x65   : > { %v1206_v48 = vunpack.c.l.b16 %v1102_v43  ;;  %v1109_v56 = vsel %vm3343_vm7, %v1107_v13, %v1108_v27  ;;  %v1114_v31 = vrot.slane %v1112_v57, 4  ;;  %v1115_v17 = vrot.slane %v3311_v39, 5  ;;  %v3459_v27 = vld [vmem:[%s3013_s30 + $0x3c] sm:$0xff] }
  0x66   : > { %2572 = vmatmul.msk.bf16.gmra.mxu0 %vm708_vm4, %v3370_v20  ;;  %v1208_v54 = vunpack.c.l.b16 %v1109_v56  ;;  %v1113_v60 = vsel %vm3343_vm7, %v2668_v63, %v1112_v57  ;;  %v1119_v39 = vrot.slane %v3019_v11, 5  ;;  %v2669_v35 = vrot.slane %v3016_v10, 9 }
  0x67   : > { %2649 = vmatmul.msk.bf16.vlgmr.msrb.gmra.mxu1 %vm708_vm4, %v2813_v22  ;;  %v3377_v55 = vpack.c.b16 %v1206_v48, %v1205_v7  ;;  %v1116_v33 = vsel %vm3343_vm7, %v1114_v31, %v1115_v17  ;;  %v1209_v59 = vunpack.c.l.b16 %v1113_v60  ;;  %v1122_v7 = vrot.slane %v3022_v12, 5 }
  0x68   : > { %v1210_v5 = vunpack.c.l.b16 %v1116_v33  ;;  %v1121_v2 = vrot.slane %v1119_v39, 4  ;;  %v1126_v13 = vrot.slane %v3079_v24, 5  ;;  %v2670_v56 = vrot.slane %v3076_v23, 9 }
  0x6a   : > { %v3423_v40 = vpack.c.b16 %v1210_v5, %v1209_v59  ;;  %v1123_v11 = vsel %vm3343_vm7, %v1121_v2, %v1122_v7  ;;  %v1127_v24 = vsel %vm3343_vm7, %v2670_v56, %v1126_v13  ;;  %v1133_v5 = vrot.slane %v3149_v3, 5 }
  0x6b   : > { %v1213_v23 = vunpack.c.l.b16 %v1127_v24  ;;  %v2671_v7 = vrot.slane %v3144_v58, 9  ;;  %v1140_v24 = vrot.slane %v3239_v32, 5 }
  0x6c   : > { %2682 = vmatmul.msk.bf16.vlgmr.msrb.gmra.mxu2 %vm708_vm4, %v1235_v0  ;;  %v1120_v0 = vsel %vm3343_vm7, %v2669_v35, %v1119_v39  ;;  %v3493_v35 = vld [vmem:[%s3013_s30 + $0x48] sm:$0xff] }
  0x6d   : > { %v1211_v48 = vunpack.c.l.b16 %v1120_v0  ;;  %4136 = vst [vmem:[#allocation18_spill] sm:$0xff] %v3493_v35  ;;  %v1135_v0 = vrot.slane %v1133_v5, 4 }
  0x71   : > { %2703 = vmatmul.msk.bf16.vlgmr.msrb.gmra.mxu3 %vm708_vm4, %v2814_v21 }
  0x76   : > { %2720 = vmatmul.msk.bf16.vlgmr.msrb.gmra.mxu0 %vm708_vm4, %v3192_v9  ;;  %v1106_v9 = vsel %vm3343_vm7, %v2667_v61, %v1105_v16 }
  0x77   : > { %2650 = vmatmul.msk.bf16.gmra.mxu1 %vm708_vm4, %v2814_v21  ;;  %v1207_v1 = vunpack.c.l.b16 %v1106_v9  ;;  %v1212_v21 = vunpack.c.l.b16 %v1123_v11  ;;  %v1136_v11 = vrot.slane %v3156_v15, 5 }
  0x79   : > { %v3403_v52 = vpack.c.b16 %v1208_v54, %v1207_v1  ;;  %v3451_v12 = vpack.c.b16 %v1212_v21, %v1211_v48  ;;  %v1128_v1 = vrot.slane %v1126_v13, 4  ;;  %v1129_v54 = vrot.slane %v3084_v29, 5 }
  0x7a   : > { %v1134_v21 = vsel %vm3343_vm7, %v2671_v7, %v1133_v5  ;;  %v1137_v13 = vsel %vm3343_vm7, %v1135_v0, %v1136_v11  ;;  %v2672_v5 = vrot.slane %v3234_v26, 9  ;;  %v1142_v7 = vrot.slane %v1140_v24, 4 }
  0x7b   : > { %v1130_v63 = vsel %vm3343_vm7, %v1128_v1, %v1129_v54  ;;  %v1215_v56 = vunpack.c.l.b16 %v1134_v21  ;;  %v1216_v1 = vunpack.c.l.b16 %v1137_v13  ;;  %v1143_v0 = vrot.slane %v3244_v46, 5 }
  0x7c   : > { %2683 = vmatmul.msk.bf16.gmra.mxu2 %vm708_vm4, %v3377_v55  ;;  %v1214_v60 = vunpack.c.l.b16 %v1130_v63  ;;  %v1141_v32 = vsel %vm3343_vm7, %v2672_v5, %v1140_v24  ;;  %v1147_v5 = vrot.slane %v3031_v19, 5 }
  0x7d   : > { %v3517_v54 = vpack.c.b16 %v1216_v1, %v1215_v56  ;;  %v1144_v13 = vsel %vm3343_vm7, %v1142_v7, %v1143_v0  ;;  %v1217_v56 = vunpack.c.l.b16 %v1141_v32  ;;  %v2938_v32 = vld [vmem:[%s3013_s30 + $0x68] sm:$0x1] }
  0x7e   : > { %v3483_v33 = vpack.c.b16 %v1214_v60, %v1213_v23  ;;  %v3527_v60 = vld [vmem:[%s3013_s30 + $0x54] sm:$0xff]  ;;  %v1218_v46 = vunpack.c.l.b16 %v1144_v13  ;;  %v1150_v13 = vrot.slane %v2938_v32, 5 }
  0x7f   : > { %4139 = vst [vmem:[#allocation21_spill] sm:$0xff] %v3517_v54 }
  0x80   : > { %4140 = vst [vmem:[#allocation22_spill] sm:$0xff] %v3527_v60 }
  0x81   : > { %2704 = vmatmul.msk.bf16.gmra.mxu3 %vm708_vm4, %v3389_v6 }
  0x86   : > { %2721 = vmatmul.msk.bf16.gmra.mxu0 %vm708_vm4, %v3280_v45 }
  0x87   : > { %2651 = vmatmul.msk.bf16.gmra.mxu1 %vm708_vm4, %v3389_v6 }
  0x8c   : > { %2684 = vmatmul.msk.bf16.gmra.mxu2 %vm708_vm4, %v3403_v52 }
  0x91   : > { %2705 = vmatmul.msk.bf16.gmra.mxu3 %vm708_vm4, %v3409_v41 }
  0x96   : > { %2722 = vmatmul.msk.bf16.gmra.mxu0 %vm708_vm4, %v3370_v20 }
  0x97   : > { %2652 = vmatmul.msk.bf16.gmra.mxu1 %vm708_vm4, %v3409_v41 }
  0x9c   : > { %v3426_v22 = vpop.f32.mrf.mxu1  ;;  %2685 = vmatmul.msk.bf16.gmra.mxu2 %vm708_vm4, %v3423_v40 }
  0xa1   : > { %2706 = vmatmul.msk.bf16.gmra.mxu3 %vm708_vm4, %v3431_v8 }
  0xa4   : > { %v3441_v43 = vpop.f32.mrf.mxu1 }
  0xa6   : > { %v3443_v16 = vpop.f32.mrf.mxu2  ;;  %2723 = vmatmul.msk.bf16.gmra.mxu0 %vm708_vm4, %v3052_v62 }
  0xa7   : > { %2653 = vmatmul.msk.bf16.gmra.mxu1 %vm708_vm4, %v3431_v8 }
  0xa9   : > { %v3449_v10 = vpop.f32.mrf.mxu0 }
  0xaa   : > { %v3453_v61 = vpop.f32.mrf.mxu3 }
  0xab   : > { %4134 = vst [vmem:[#allocation16_spill] sm:$0xff] %v3453_v61 }
  0xac   : > { %2686 = vmatmul.msk.bf16.gmra.mxu2 %vm708_vm4, %v3451_v12 }
  0xae   : > { %v3461_v9 = vpop.f32.mrf.mxu1  ;;  %v3465_v57 = vpop.f32.mrf.mxu2 }
  0xb1   : > { %2707 = vmatmul.msk.bf16.gmra.mxu3 %vm708_vm4, %v3459_v27  ;;  %v3473_v31 = vpop.f32.mrf.mxu0 }
  0xb2   : > { %v3475_v17 = vpop.f32.mrf.mxu3 }
  0xb3   : > { %4135 = vst [vmem:[#allocation17_spill] sm:$0xff] %v3475_v17 }
  0xb6   : > { %2724 = vmatmul.msk.bf16.gmra.mxu0 %vm708_vm4, %v3126_v37  ;;  %v3479_v29 = vpop.f32.mrf.mxu1 }
  0xb7   : > { %2654 = vmatmul.msk.bf16.gmra.mxu1 %vm708_vm4, %v3459_v27 }
  0xb9   : > { %v3485_v59 = vpop.f32.mrf.mxu2 }
  0xbc   : > { %2687 = vmatmul.msk.bf16.gmra.mxu2 %vm708_vm4, %v3483_v33 }
  0xbd   : > { %v3488_v39 = vpop.f32.mrf.mxu0 }
  0xbe   : > { %v3495_v2 = vpop.f32.mrf.mxu3 }
  0xbf   : > { %4137 = vst [vmem:[#allocation19_spill] sm:$0xff] %v3495_v2 }
  0xc0   : > { %v3499_v48 = vpop.f32.mrf.mxu1 }
  0xc1   : > { %2708 = vmatmul.msk.bf16.gmra.mxu3 %vm708_vm4, %v3493_v35  ;;  %v3503_v3 = vpop.f32.mrf.mxu2 }
  0xc5   : > { %v3509_v58 = vpop.f32.mrf.mxu0 }
  0xc6   : > { %2725 = vmatmul.msk.bf16.gmra.mxu0 %vm708_vm4, %v3211_v44  ;;  %v3513_v15 = vpop.f32.mrf.mxu3 }
  0xc7   : > { %4138 = vst [vmem:[#allocation20_spill] sm:$0xff] %v3513_v15  ;;  %2655 = vmatmul.msk.bf16.gmra.mxu1 %vm708_vm4, %v3493_v35  ;;  %v3562_v15 = vld [vmem:[%s3013_s30 + $0x60] sm:$0xff] }
  0xc8   : > { %v3520_v63 = vpop.f32.mrf.mxu1  ;;  %4144 = vst [vmem:[#allocation26_spill] sm:$0xff] %v3562_v15 }
  0xcc   : > { %v3522_v23 = vpop.f32.mrf.mxu2  ;;  %2688 = vmatmul.msk.bf16.gmra.mxu2 %vm708_vm4, %v3517_v54 }
  0xcf   : > { %v3531_v11 = vpop.f32.mrf.mxu0 }
  0xd0   : > { %v3533_v21 = vpop.f32.mrf.mxu3 }
  0xd1   : > { %4141 = vst [vmem:[#allocation23_spill] sm:$0xff] %v3533_v21  ;;  %2709 = vmatmul.msk.bf16.gmra.mxu3 %vm708_vm4, %v3527_v60  ;;  %v3549_v21 = vpack.c.b16 %v1218_v46, %v1217_v56 }
  0xd3   : > { %4142 = vst [vmem:[#allocation24_spill] sm:$0xff] %v3549_v21 }
  0xd4   : > { %v3541_v26 = vpop.f32.mrf.mxu1  ;;  %v3543_v1 = vpop.f32.mrf.mxu2 }
  0xd6   : > { %2726 = vmatmul.msk.bf16.gmra.mxu0 %vm708_vm4, %v3302_v42  ;;  %v2939_v42 = vld [vmem:[%s3013_s30 + $0x60] sm:$0xf] }
  0xd7   : > { %2656 = vmatmul.msk.bf16.gmra.mxu1 %vm708_vm4, %v3527_v60  ;;  %v3551_v24 = vpop.f32.mrf.mxu0  ;;  %v2673_v2 = vrot.slane %v2939_v42, 9  ;;  %v1149_v60 = vrot.slane %v1147_v5, 4 }
  0xd8   : > { %v3554_v7 = vpop.f32.mrf.mxu3 }
  0xd9   : > { %4143 = vst [vmem:[#allocation25_spill] sm:$0xff] %v3554_v7  ;;  %v1148_v19 = vsel %vm3343_vm7, %v2673_v2, %v1147_v5  ;;  %v1151_v46 = vsel %vm3343_vm7, %v1149_v60, %v1150_v13  ;;  %v1154_v60 = vrot.slane %v3099_v47, 5 }
  0xda   : > { %v1219_v17 = vunpack.c.l.b16 %v1148_v19  ;;  %v1220_v42 = vunpack.c.l.b16 %v1151_v46  ;;  %v3595_v19 = vld [vmem:[%s3013_s30 + $0x6c] sm:$0xff] }
  0xdc   : > { %2689 = vmatmul.msk.bf16.gmra.mxu2 %vm708_vm4, %v3549_v21  ;;  %v3558_v0 = vpop.f32.mrf.mxu1  ;;  %v3584_v2 = vpack.c.b16 %v1220_v42, %v1219_v17  ;;  %v1156_v17 = vrot.slane %v1154_v60, 4 }
  0xde   : > { %4146 = vst [vmem:[#allocation28_spill] sm:$0xff] %v3584_v2 }
  0xdf   : > { %v3565_v56 = vpop.f32.mrf.mxu2 }
  0xe1   : > { %2710 = vmatmul.msk.bf16.gmra.mxu3 %vm708_vm4, %v3562_v15 }
  0xe3   : > { %v3573_v7 = vpop.f32.mrf.mxu0 }
  0xe4   : > { %v3575_v32 = vpop.f32.mrf.mxu3  ;;  %v990_v21 = vpop.f32.mrf.mxu1 }
  0xe5   : > { %4145 = vst [vmem:[#allocation27_spill] sm:$0xff] %v3575_v32  ;;  %v991_v54 = vadd.f32 %v990_v21, %v3449_v10  ;;  %v1157_v21 = vrot.slane %v3106_v51, 5  ;;  %v2674_v32 = vrot.slane %v3092_v38, 9 }
  0xe6   : > { %2727 = vmatmul.msk.bf16.gmra.mxu0 %vm708_vm4, %v3071_v18 }
  0xe7   : > { %v3580_v44 = vpop.f32.mrf.mxu2  ;;  %2657 = vmatmul.msk.bf16.gmra.mxu1 %vm708_vm4, %v3562_v15  ;;  %v1155_v47 = vsel %vm3343_vm7, %v2674_v32, %v1154_v60 }
  0xe8   : > { %v1221_v61 = vunpack.c.l.b16 %v1155_v47 }
  0xeb   : > { %v3587_v5 = vpop.f32.mrf.mxu0 }
  0xec   : > { %v3589_v13 = vpop.f32.mrf.mxu3  ;;  %2690 = vmatmul.msk.bf16.gmra.mxu2 %vm708_vm4, %v3584_v2  ;;  %v992_v10 = vpop.f32.mrf.mxu1 }
  0xed   : > { %4147 = vst [vmem:[#allocation29_spill] sm:$0xff] %v3589_v13  ;;  %v993_v46 = vadd.f32 %v992_v10, %v3473_v31  ;;  %v1158_v13 = vsel %vm3343_vm7, %v1156_v17, %v1157_v21  ;;  %v1161_v21 = vrot.slane %v3171_v34, 5 }
  0xee   : > { %v1222_v35 = vunpack.c.l.b16 %v1158_v13  ;;  %v1164_v13 = vrot.slane %v3178_v50, 5 }
  0xef   : > { %v1311_v42 = vpop.f32.mrf.mxu2 }
  0xf0   : > { %v1391_v18 = vadd.f32 %v1311_v42, %v991_v54  ;;  %v3612_v10 = vpack.c.b16 %v1222_v35, %v1221_v61  ;;  %v3619_v42 = vld [vmem:[%s3013_s30 + $0x78] sm:$0xff] }
  0xf1   : > { %2711 = vmatmul.msk.bf16.gmra.mxu3 %vm708_vm4, %v3595_v19 }
  0xf3   : > { %v1601_v2 = vpop.f32.mrf.mxu0 }
  0xf4   : > { %v1445_v51 = vpop.f32.mrf.mxu3  ;;  %v995_v15 = vpop.f32.mrf.mxu1 }
  0xf5   : > { %v1525_v31 = vadd.f32 %v1445_v51, %v1391_v18  ;;  %v996_v38 = vadd.f32 %v995_v15, %v3488_v39 }
  0xf6   : > { %2728 = vmatmul.msk.bf16.gmra.mxu0 %vm708_vm4, %v3151_v4 }
  0xf7   : > { %v1313_v54 = vpop.f32.mrf.mxu2  ;;  %2658 = vmatmul.msk.bf16.gmra.mxu1 %vm708_vm4, %v3595_v19  ;;  %v3610_v32 = vadd.f32 %v1601_v2, %v1525_v31  ;;  %v2675_v2 = vrot.slane %v3167_v28, 9 }
  0xf8   : > { %v1392_v60 = vadd.f32 %v1313_v54, %v993_v46  ;;  %v1163_v46 = vrot.slane %v1161_v21, 4 }
  0xf9   : > { %v1162_v50 = vsel %vm3343_vm7, %v2675_v2, %v1161_v21 }
  0xfa   : > { %v1165_v51 = vsel %vm3343_vm7, %v1163_v46, %v1164_v13  ;;  %v1171_v46 = vrot.slane %v3266_v49, 5 }
  0xfb   : > { %v1603_v17 = vpop.f32.mrf.mxu0 }
  0xfc   : > { %v1447_v18 = vpop.f32.mrf.mxu3  ;;  %2691 = vmatmul.msk.bf16.gmra.mxu2 %vm708_vm4, %v3612_v10  ;;  %v997_v39 = vpop.f32.mrf.mxu1 }
  0xfd   : > { %v1526_v15 = vadd.f32 %v1447_v18, %v1392_v60  ;;  %v998_v47 = vadd.f32 %v997_v39, %v3509_v58  ;;  %v1223_v58 = vunpack.c.l.b16 %v1162_v50  ;;  %v1224_v18 = vunpack.c.l.b16 %v1165_v51  ;;  %v3645_v50 = vld [vmem:[%s3013_s30 + $0x84] sm:$0xff] }
  0xff   : > { %v1316_v61 = vpop.f32.mrf.mxu2  ;;  %v3623_v35 = vadd.f32 %v1603_v17, %v1526_v15  ;;  %v3638_v13 = vpack.c.b16 %v1224_v18, %v1223_v58  ;;  %v1168_v15 = vrot.slane %v3261_v30, 5 }
 0x100   : > { %v1393_v34 = vadd.f32 %v1316_v61, %v996_v38 }
 0x101   : > { %2712 = vmatmul.msk.bf16.gmra.mxu3 %vm708_vm4, %v3619_v42 }
 0x103   : > { %v1606_v31 = vpop.f32.mrf.mxu0 }
 0x104   : > { %v1450_v54 = vpop.f32.mrf.mxu3  ;;  %v1000_v60 = vpop.f32.mrf.mxu1 }
 0x105   : > { %v1527_v28 = vadd.f32 %v1450_v54, %v1393_v34  ;;  %v1001_v17 = vadd.f32 %v1000_v60, %v3531_v11 }
 0x106   : > { %2729 = vmatmul.msk.bf16.gmra.mxu0 %vm708_vm4, %v3236_v25 }
 0x107   : > { %v1318_v38 = vpop.f32.mrf.mxu2  ;;  %2659 = vmatmul.msk.bf16.gmra.mxu1 %vm708_vm4, %v3619_v42  ;;  %v3636_v21 = vadd.f32 %v1606_v31, %v1527_v28  ;;  %v4148_v31 = vld [vmem:[#allocation9_spill] sm:$0xff] }
 0x108   : > { %v1394_v39 = vadd.f32 %v1318_v38, %v998_v47  ;;  %v2676_v54 = vrot.slane %v4148_v31, 9  ;;  %v1170_v47 = vrot.slane %v1168_v15, 4 }
 0x10a   : > { %v1169_v49 = vsel %vm3343_vm7, %v2676_v54, %v1168_v15  ;;  %v1172_v18 = vsel %vm3343_vm7, %v1170_v47, %v1171_v46  ;;  %v2940_v54 = vld [vmem:[%s3013_s30 + $0x94] sm:$0xf] }
 0x10b   : > { %v1608_v2 = vpop.f32.mrf.mxu0  ;;  %v1175_v47 = vrot.slane %v2940_v54, 5 }
 0x10c   : > { %v1452_v61 = vpop.f32.mrf.mxu3  ;;  %2692 = vmatmul.msk.bf16.gmra.mxu2 %vm708_vm4, %v3638_v13  ;;  %v1002_v11 = vpop.f32.mrf.mxu1 }
 0x10d   : > { %v1528_v34 = vadd.f32 %v1452_v61, %v1394_v39  ;;  %v1003_v51 = vadd.f32 %v1002_v11, %v3551_v24  ;;  %v1225_v39 = vunpack.c.l.b16 %v1169_v49  ;;  %v1226_v61 = vunpack.c.l.b16 %v1172_v18 }
 0x10f   : > { %v1321_v60 = vpop.f32.mrf.mxu2  ;;  %v3649_v58 = vadd.f32 %v1608_v2, %v1528_v34  ;;  %v3664_v31 = vpack.c.b16 %v1226_v61, %v1225_v39 }
 0x110   : > { %v1395_v30 = vadd.f32 %v1321_v60, %v1001_v17  ;;  %v4150_v17 = vld [vmem:[#allocation15_spill] sm:$0xff] }
 0x111   : > { %4149 = vst [vmem:[#allocation9_spill] sm:$0xff] %v3649_v58  ;;  %2713 = vmatmul.msk.bf16.gmra.mxu3 %vm708_vm4, %v3645_v50 }
 0x112   : > { %4152 = vst [vmem:[#allocation31_spill] sm:$0xff] %v3664_v31 }
 0x113   : > { %v1611_v28 = vpop.f32.mrf.mxu0 }
 0x114   : > { %v1455_v24 = vpop.f32.mrf.mxu3  ;;  %v1005_v38 = vpop.f32.mrf.mxu1 }
 0x115   : > { %v1529_v11 = vadd.f32 %v1455_v24, %v1395_v30  ;;  %v1006_v2 = vadd.f32 %v1005_v38, %v3573_v7  ;;  %v2941_v30 = vld [vmem:[%s3013_s30 + $0x98] sm:$0x1]  ;;  %v3671_v38 = vld [vmem:[%s3013_s30 + $0x90] sm:$0xff] }
 0x116   : > { %2730 = vmatmul.msk.bf16.gmra.mxu0 %vm708_vm4, %v4150_v17  ;;  %v1178_v49 = vrot.slane %v2941_v30, 5  ;;  %4153 = vst [vmem:[#allocation32_spill] sm:$0xff] %v3671_v38 }
 0x117   : > { %v1323_v34 = vpop.f32.mrf.mxu2  ;;  %2660 = vmatmul.msk.bf16.gmra.mxu1 %vm708_vm4, %v3645_v50  ;;  %v3662_v15 = vadd.f32 %v1611_v28, %v1529_v11  ;;  %v2942_v28 = vld [vmem:[%s3013_s30 + $0x90] sm:$0xf] }
 0x118   : > { %v1396_v46 = vadd.f32 %v1323_v34, %v1003_v51  ;;  %v2677_v11 = vrot.slane %v2942_v28, 9  ;;  %v1177_v51 = vrot.slane %v1175_v47, 4 }
 0x119   : > { %4151 = vst [vmem:[#allocation30_spill] sm:$0xff] %v3662_v15 }
 0x11a   : > { %v1176_v54 = vsel %vm3343_vm7, %v2677_v11, %v1175_v47  ;;  %v2943_v11 = vld [vmem:[%s3013_s30 + $0xa0] sm:$0xf] }
 0x11b   : > { %v1613_v60 = vpop.f32.mrf.mxu0 }
 0x11c   : > { %v1457_v7 = vpop.f32.mrf.mxu3  ;;  %2693 = vmatmul.msk.bf16.gmra.mxu2 %vm708_vm4, %v3664_v31  ;;  %v1007_v18 = vpop.f32.mrf.mxu1  ;;  %v2945_v31 = vld [vmem:[%s3013_s30 + $0x9c] sm:$0xf] }
 0x11d   : > { %v1530_v24 = vadd.f32 %v1457_v7, %v1396_v46  ;;  %v1008_v58 = vadd.f32 %v1007_v18, %v3587_v5  ;;  %v1179_v46 = vsel %vm3343_vm7, %v1177_v51, %v1178_v49  ;;  %v1227_v18 = vunpack.c.l.b16 %v1176_v54 }
 0x11e   : > { %v1228_v28 = vunpack.c.l.b16 %v1179_v46  ;;  %v1182_v51 = vrot.slane %v2943_v11, 5  ;;  %v2944_v46 = vld [vmem:[%s3013_s30 + $0xa4] sm:$0x1] }
 0x11f   : > { %v1326_v39 = vpop.f32.mrf.mxu2  ;;  %v3675_v61 = vadd.f32 %v1613_v60, %v1530_v24  ;;  %v4155_v60 = vld [vmem:[#allocation3_spill] sm:$0xff] }
 0x120   : > { %v1397_v34 = vadd.f32 %v1326_v39, %v1006_v2  ;;  %v3689_v49 = vpack.c.b16 %v1228_v28, %v1227_v18 }
 0x121   : > { %4154 = vst [vmem:[#allocation33_spill] sm:$0xff] %v3675_v61  ;;  %2714 = vmatmul.msk.bf16.gmra.mxu3 %vm708_vm4, %v3671_v38 }
 0x122   : > { %4157 = vst [vmem:[#allocation35_spill] sm:$0xff] %v3689_v49 }
 0x123   : > { %v1616_v30 = vpop.f32.mrf.mxu0 }
 0x124   : > { %v1460_v7 = vpop.f32.mrf.mxu3  ;;  %v1010_v5 = vpop.f32.mrf.mxu1 }
 0x125   : > { %v1531_v15 = vadd.f32 %v1460_v7, %v1397_v34  ;;  %v1185_v7 = vrot.slane %v2944_v46, 5 }
 0x126   : > { %2731 = vmatmul.msk.bf16.gmra.mxu0 %vm708_vm4, %v4155_v60  ;;  %v3696_v60 = vld [vmem:[%s3013_s30 + $0x9c] sm:$0xff] }
 0x127   : > { %v1328_v2 = vpop.f32.mrf.mxu2  ;;  %2661 = vmatmul.msk.bf16.gmra.mxu1 %vm708_vm4, %v3671_v38  ;;  %v3687_v47 = vadd.f32 %v1616_v30, %v1531_v15  ;;  %4158 = vst [vmem:[#allocation36_spill] sm:$0xff] %v3696_v60  ;;  %v2678_v38 = vrot.slane %v2945_v31, 9  ;;  %v1184_v15 = vrot.slane %v1182_v51, 4 }
 0x128   : > { %v1398_v24 = vadd.f32 %v1328_v2, %v1008_v58  ;;  %v1011_v58 = vadd.f32 %v1010_v5, %v3426_v22  ;;  %v4160_v5 = vld [vmem:[#allocation4_spill] sm:$0xff] }
 0x129   : > { %4156 = vst [vmem:[#allocation34_spill] sm:$0xff] %v3687_v47  ;;  %v1183_v2 = vsel %vm3343_vm7, %v2678_v38, %v1182_v51 }
 0x12a   : > { %v1229_v31 = vunpack.c.l.b16 %v1183_v2 }
 0x12b   : > { %v1618_v39 = vpop.f32.mrf.mxu0 }
 0x12c   : > { %v1462_v54 = vpop.f32.mrf.mxu3  ;;  %2694 = vmatmul.msk.bf16.gmra.mxu2 %vm708_vm4, %v3689_v49  ;;  %v1012_v34 = vpop.f32.mrf.mxu1 }
 0x12d   : > { %v1532_v61 = vadd.f32 %v1462_v54, %v1398_v24  ;;  %v1186_v24 = vsel %vm3343_vm7, %v1184_v15, %v1185_v7  ;;  %v4163_v15 = vld [vmem:[#allocation6_spill] sm:$0xff] }
 0x12e   : > { %v1230_v47 = vunpack.c.l.b16 %v1186_v24  ;;  %v4164_v24 = vld [vmem:[#allocation7_spill] sm:$0xff] }
 0x12f   : > { %v1331_v30 = vpop.f32.mrf.mxu2  ;;  %v3700_v18 = vadd.f32 %v1618_v39, %v1532_v61  ;;  %v1013_v61 = vadd.f32 %v1012_v34, %v3441_v43  ;;  %v3722_v34 = vld [vmem:[%s3013_s30 + $0xa8] sm:$0xff] }
 0x130   : > { %v1399_v28 = vadd.f32 %v1331_v30, %v1011_v58  ;;  %v3715_v7 = vpack.c.b16 %v1230_v47, %v1229_v31  ;;  %v1189_v58 = vrot.slane %v4163_v15, 5  ;;  %4165 = vst [vmem:[#allocation6_spill] sm:$0xff] %v3722_v34 }
 0x131   : > { %4159 = vst [vmem:[#allocation37_spill] sm:$0xff] %v3700_v18  ;;  %2715 = vmatmul.msk.bf16.gmra.mxu3 %vm708_vm4, %v3696_v60  ;;  %v4166_v18 = vld [vmem:[#allocation5_spill] sm:$0xff] }
 0x132   : > { %4162 = vst [vmem:[#allocation39_spill] sm:$0xff] %v3715_v7 }
 0x133   : > { %v1621_v11 = vpop.f32.mrf.mxu0 }
 0x134   : > { %v1465_v54 = vpop.f32.mrf.mxu3  ;;  %v1015_v46 = vpop.f32.mrf.mxu1 }
 0x135   : > { %v1533_v22 = vadd.f32 %v1465_v54, %v1399_v28  ;;  %v1192_v54 = vrot.slane %v4164_v24, 5 }
 0x136   : > { %2732 = vmatmul.msk.bf16.gmra.mxu0 %vm708_vm4, %v4160_v5  ;;  %v2679_v5 = vrot.slane %v4166_v18, 9 }
 0x137   : > { %v1333_v39 = vpop.f32.mrf.mxu2  ;;  %2662 = vmatmul.msk.bf16.gmra.mxu1 %vm708_vm4, %v3696_v60  ;;  %v3713_v38 = vadd.f32 %v1621_v11, %v1533_v22  ;;  %v1191_v11 = vrot.slane %v1189_v58, 4  ;;  %v1016_v22 = vadd.f32 %v1015_v46, %v3461_v9 }
 0x138   : > { %v1400_v51 = vadd.f32 %v1333_v39, %v1013_v61  ;;  %v1190_v39 = vsel %vm3343_vm7, %v2679_v5, %v1189_v58  ;;  %v3740_v5 = vld [vmem:[%s3013_s30 + $0xc0] sm:$0xf] }
 0x139   : > { %4161 = vst [vmem:[#allocation38_spill] sm:$0xff] %v3713_v38  ;;  %v1231_v24 = vunpack.c.l.b16 %v1190_v39  ;;  %v4168_v38 = vld [vmem:[#allocation10_spill] sm:$0xff]  ;;  %v1558_v39 = vshrl.u32 %v3740_v5, 16 }
 0x13a   : > { %4169 = vst [vmem:[#allocation5_spill] sm:$0xff] %v3740_v5 }
 0x13b   : > { %v1623_v30 = vpop.f32.mrf.mxu0 }
 0x13c   : > { %v1467_v2 = vpop.f32.mrf.mxu3  ;;  %2695 = vmatmul.msk.bf16.gmra.mxu2 %vm708_vm4, %v3715_v7  ;;  %v1017_v28 = vpop.f32.mrf.mxu1 }
 0x13d   : > { %v1534_v43 = vadd.f32 %v1467_v2, %v1400_v51  ;;  %v1193_v51 = vsel %vm3343_vm7, %v1191_v11, %v1192_v54 }
 0x13e   : > { %v1232_v9 = vunpack.c.l.b16 %v1193_v51 }
 0x13f   : > { %v1336_v47 = vpop.f32.mrf.mxu2  ;;  %v3726_v31 = vadd.f32 %v1623_v30, %v1534_v43  ;;  %v1018_v30 = vadd.f32 %v1017_v28, %v3479_v29  ;;  %v1561_v29 = vshll.u32 %v3740_v5, 16 }
 0x140   : > { %v1401_v61 = vadd.f32 %v1336_v47, %v1016_v22  ;;  %v3744_v11 = vpack.c.b16 %v1232_v9, %v1231_v24  ;;  %v3747_v22 = vld [vmem:[%s3013_s30 + $0xc4] sm:$0xf]  ;;  %v4173_v47 = vld [vmem:[#allocation12_spill] sm:$0xff]  ;;  %v4174_v24 = vld [vmem:[#allocation13_spill] sm:$0xff] }
 0x141   : > { %4167 = vst [vmem:[#allocation7_spill] sm:$0xff] %v3726_v31  ;;  %2716 = vmatmul.msk.bf16.gmra.mxu3 %vm708_vm4, %v3722_v34  ;;  %v1567_v28 = vshll.u32 %v3747_v22, 16  ;;  %v1199_v9 = vrot.slane %v4174_v24, 5  ;;  %v1563_v7 = vrot.slane %v1561_v29, 5 }
 0x142   : > { %4171 = vst [vmem:[#allocation41_spill] sm:$0xff] %v3744_v11 }
 0x143   : > { %v1626_v15 = vpop.f32.mrf.mxu0  ;;  %4172 = vst [vmem:[#allocation42_spill] sm:$0xff] %v3747_v22 }
 0x144   : > { %v1470_v18 = vpop.f32.mrf.mxu3  ;;  %v1020_v2 = vpop.f32.mrf.mxu1 }
 0x145   : > { %v1535_v46 = vadd.f32 %v1470_v18, %v1401_v61  ;;  %v1196_v61 = vrot.slane %v4173_v47, 5  ;;  %v1571_v18 = vshrl.u32 %v3747_v22, 16  ;;  %v1021_v5 = vadd.f32 %v1020_v2, %v3499_v48 }
 0x146   : > { %2733 = vmatmul.msk.bf16.gmra.mxu0 %vm708_vm4, %v4168_v38  ;;  %v1560_v38 = vrot.slane %v1558_v39, 4  ;;  %v1569_v22 = vrot.slane %v1567_v28, 5 }
 0x147   : > { %v1338_v43 = vpop.f32.mrf.mxu2  ;;  %2663 = vmatmul.msk.bf16.gmra.mxu1 %vm708_vm4, %v3722_v34  ;;  %v3742_v58 = vadd.f32 %v1626_v15, %v1535_v46  ;;  %v1573_v60 = vrot.slane %v1571_v18, 4 }
 0x148   : > { %v1402_v54 = vadd.f32 %v1338_v43, %v1018_v30  ;;  %v3758_v30 = vld [vmem:[%s3013_s30 + $0xb4] sm:$0xff]  ;;  %v4175_v43 = vld [vmem:[#allocation11_spill] sm:$0xff]  ;;  %v1564_v2 = vor.u32 %v1563_v7, %v1560_v38 }
 0x149   : > { %4170 = vst [vmem:[#allocation40_spill] sm:$0xff] %v3742_v58  ;;  %v2680_v47 = vrot.slane %v4175_v43, 9  ;;  %v1198_v58 = vrot.slane %v1196_v61, 4  ;;  %v1574_v39 = vor.u32 %v1573_v60, %v1569_v22 }
 0x14b   : > { %v1628_v51 = vpop.f32.mrf.mxu0  ;;  %v1575_v38 = vrot.slane %v1574_v39, 4 }
 0x14c   : > { %v1472_v31 = vpop.f32.mrf.mxu3  ;;  %2696 = vmatmul.msk.bf16.gmra.mxu2 %vm708_vm4, %v3744_v11  ;;  %v1022_v15 = vpop.f32.mrf.mxu1  ;;  %v3765_v11 = vld [vmem:[%s3013_s30 + $0xc8] sm:$0x1] }
 0x14d   : > { %v1536_v46 = vadd.f32 %v1472_v31, %v1402_v54  ;;  %v1197_v31 = vsel %vm3343_vm7, %v2680_v47, %v1196_v61  ;;  %v1200_v54 = vsel %vm3343_vm7, %v1198_v58, %v1199_v9  ;;  %v1577_v29 = vshll.u32 %v3765_v11, 16 }
 0x14e   : > { %v1233_v18 = vunpack.c.l.b16 %v1197_v31  ;;  %v1023_v24 = vadd.f32 %v1022_v15, %v3520_v63  ;;  %v1565_v58 = vrot.slane %v1564_v2, 4 }
 0x14f   : > { %v1341_v34 = vpop.f32.mrf.mxu2  ;;  %v3762_v49 = vadd.f32 %v1628_v51, %v1536_v46  ;;  %v1579_v60 = vrot.slane %v1577_v29, 5 }
 0x150   : > { %v1403_v17 = vadd.f32 %v1341_v34, %v1021_v5  ;;  %v1234_v34 = vunpack.c.l.b16 %v1200_v54  ;;  %v3790_v54 = vld [vmem:[%s3013_s30 + $0xc0] sm:$0xff] }
 0x151   : > { %2717 = vmatmul.msk.bf16.gmra.mxu3 %vm708_vm4, %v3758_v30  ;;  %v1580_v63 = vsel %vm3040_vm3, %v1575_v38, %v1579_v60 }
 0x152   : > { %v3781_v46 = vpack.c.b16 %v1234_v34, %v1233_v18  ;;  %v1584_v39 = vunpack.c.l.b16 %v1580_v63 }
 0x153   : > { %v1631_v48 = vpop.f32.mrf.mxu0 }
 0x154   : > { %v1475_v28 = vpop.f32.mrf.mxu3  ;;  %v1025_v51 = vpop.f32.mrf.mxu1 }
 0x155   : > { %v1537_v5 = vadd.f32 %v1475_v28, %v1403_v17  ;;  %v1570_v17 = vsel %vm3040_vm3, %v1565_v58, %v1569_v22 }
 0x156   : > { %2734 = vmatmul.msk.bf16.gmra.mxu0 %vm708_vm4, %v3352_v53  ;;  %v1583_v2 = vunpack.c.l.b16 %v1570_v17 }
 0x157   : > { %v1343_v61 = vpop.f32.mrf.mxu2  ;;  %2664 = vmatmul.msk.bf16.gmra.mxu1 %vm708_vm4, %v3758_v30  ;;  %v3779_v7 = vadd.f32 %v1631_v48, %v1537_v5  ;;  %v1026_v48 = vadd.f32 %v1025_v51, %v3541_v26 }
 0x158   : > { %v1404_v9 = vadd.f32 %v1343_v61, %v1023_v24  ;;  %v3797_v22 = vpack.c.b16 %v1584_v39, %v1583_v2 }
 0x15b   : > { %v1633_v43 = vpop.f32.mrf.mxu0 }
 0x15c   : > { %v1477_v15 = vpop.f32.mrf.mxu3  ;;  %2697 = vmatmul.msk.bf16.gmra.mxu2 %vm708_vm4, %v3781_v46  ;;  %v1027_v47 = vpop.f32.mrf.mxu1 }
 0x15d   : > { %v1538_v31 = vadd.f32 %v1477_v15, %v1404_v9  ;;  %v1028_v26 = vadd.f32 %v1027_v47, %v3558_v0 }
 0x15f   : > { %v1346_v29 = vpop.f32.mrf.mxu2  ;;  %v3793_v28 = vadd.f32 %v1633_v43, %v1538_v31 }
 0x160   : > { %v1405_v18 = vadd.f32 %v1346_v29, %v1026_v48 }
 0x161   : > { %2718 = vmatmul.msk.bf16.gmra.mxu3 %vm708_vm4, %v3790_v54 }
 0x163   : > { %v1636_v34 = vpop.f32.mrf.mxu0 }
 0x164   : > { %v1480_v5 = vpop.f32.mrf.mxu3  ;;  %v1030_v24 = vpop.f32.mrf.mxu1 }
 0x165   : > { %v1539_v61 = vadd.f32 %v1480_v5, %v1405_v18  ;;  %v1031_v63 = vadd.f32 %v1030_v24, %v3443_v16 }
 0x166   : > { %2735 = vmatmul.msk.bf16.gmra.mxu0 %vm708_vm4, %v3797_v22 }
 0x167   : > { %v1348_v51 = vpop.f32.mrf.mxu2  ;;  %2738 = vmatmul.msk.bf16.vlgmr.msra.gmra.mxu1 %vm708_vm4, %v3377_v55  ;;  %v3804_v58 = vadd.f32 %v1636_v34, %v1539_v61 }
 0x168   : > { %v1406_v38 = vadd.f32 %v1348_v51, %v1028_v26 }
 0x16b   : > { %v1638_v60 = vpop.f32.mrf.mxu0 }
 0x16c   : > { %v1482_v9 = vpop.f32.mrf.mxu3  ;;  %2759 = vmatmul.msk.bf16.vlgmr.msra.gmra.mxu2 %vm708_vm4, %v3389_v6  ;;  %v1032_v43 = vpop.f32.mrf.mxu1 }
 0x16d   : > { %v1540_v17 = vadd.f32 %v1482_v9, %v1406_v38  ;;  %v1033_v6 = vadd.f32 %v1032_v43, %v3465_v57 }
 0x16f   : > { %v1351_v15 = vpop.f32.mrf.mxu2  ;;  %v3809_v31 = vadd.f32 %v1638_v60, %v1540_v17 }
 0x170   : > { %v1407_v0 = vadd.f32 %v1351_v15, %v1031_v63 }
 0x171   : > { %2776 = vmatmul.msk.bf16.vlgmr.msra.gmra.mxu3 %vm708_vm4, %v3280_v45 }
 0x173   : > { %v1641_v55 = vpop.f32.mrf.mxu0 }
 0x174   : > { %v1485_v47 = vpop.f32.mrf.mxu3  ;;  %v1035_v48 = vpop.f32.mrf.mxu1 }
 0x175   : > { %v1541_v2 = vadd.f32 %v1485_v47, %v1407_v0  ;;  %v1036_v24 = vadd.f32 %v1035_v48, %v3485_v59 }
 0x176   : > { %2794 = vmatmul.msk.bf16.vlgmr.msra.gmra.mxu0 %vm708_vm4, %v3403_v52 }
 0x177   : > { %v1353_v39 = vpop.f32.mrf.mxu2  ;;  %2739 = vmatmul.msk.bf16.gmra.mxu1 %vm708_vm4, %v3403_v52  ;;  %v3818_v16 = vadd.f32 %v1641_v55, %v1541_v2 }
 0x178   : > { %v1408_v29 = vadd.f32 %v1353_v39, %v1033_v6 }
 0x17b   : > { %v1643_v18 = vpop.f32.mrf.mxu0 }
 0x17c   : > { %v1487_v34 = vpop.f32.mrf.mxu3  ;;  %2760 = vmatmul.msk.bf16.gmra.mxu2 %vm708_vm4, %v3409_v41  ;;  %v1037_v45 = vpop.f32.mrf.mxu1 }
 0x17d   : > { %v1542_v5 = vadd.f32 %v1487_v34, %v1408_v29  ;;  %v1038_v41 = vadd.f32 %v1037_v45, %v3503_v3 }
 0x17f   : > { %v1356_v61 = vpop.f32.mrf.mxu2  ;;  %v3823_v26 = vadd.f32 %v1643_v18, %v1542_v5 }
 0x180   : > { %v1409_v57 = vadd.f32 %v1356_v61, %v1036_v24 }
 0x181   : > { %2777 = vmatmul.msk.bf16.gmra.mxu3 %vm708_vm4, %v3370_v20 }
 0x183   : > { %v1646_v52 = vpop.f32.mrf.mxu0 }
 0x184   : > { %v1490_v51 = vpop.f32.mrf.mxu3  ;;  %v1040_v38 = vpop.f32.mrf.mxu1 }
 0x185   : > { %v1543_v60 = vadd.f32 %v1490_v51, %v1409_v57  ;;  %v1041_v0 = vadd.f32 %v1040_v38, %v3522_v23 }
 0x186   : > { %2795 = vmatmul.msk.bf16.gmra.mxu0 %vm708_vm4, %v3423_v40 }
 0x187   : > { %v1358_v9 = vpop.f32.mrf.mxu2  ;;  %2740 = vmatmul.msk.bf16.gmra.mxu1 %vm708_vm4, %v3423_v40  ;;  %v3832_v59 = vadd.f32 %v1646_v52, %v1543_v60 }
 0x188   : > { %v1410_v43 = vadd.f32 %v1358_v9, %v1038_v41 }
 0x18b   : > { %v1648_v17 = vpop.f32.mrf.mxu0 }
 0x18c   : > { %v1492_v63 = vpop.f32.mrf.mxu3  ;;  %2761 = vmatmul.msk.bf16.gmra.mxu2 %vm708_vm4, %v3431_v8  ;;  %v1042_v20 = vpop.f32.mrf.mxu1 }
 0x18d   : > { %v1544_v15 = vadd.f32 %v1492_v63, %v1410_v43  ;;  %v1043_v8 = vadd.f32 %v1042_v20, %v3543_v1  ;;  %v4176_v43 = vld [vmem:[#allocation18_spill] sm:$0xff]  ;;  %v4177_v63 = vld [vmem:[#allocation16_spill] sm:$0xff] }
 0x18f   : > { %v1361_v55 = vpop.f32.mrf.mxu2  ;;  %v3837_v47 = vadd.f32 %v1648_v17, %v1544_v15 }
 0x190   : > { %v1411_v3 = vadd.f32 %v1361_v55, %v1041_v0  ;;  %v4178_v55 = vld [vmem:[#allocation8_spill] sm:$0xff] }
 0x191   : > { %2778 = vmatmul.msk.bf16.gmra.mxu3 %vm708_vm4, %v3052_v62 }
 0x193   : > { %v1651_v40 = vpop.f32.mrf.mxu0 }
 0x194   : > { %v1495_v48 = vpop.f32.mrf.mxu3  ;;  %v1045_v2 = vpop.f32.mrf.mxu1 }
 0x195   : > { %v1545_v6 = vadd.f32 %v1495_v48, %v1411_v3  ;;  %v1046_v5 = vadd.f32 %v1045_v2, %v3565_v56  ;;  %v4179_v2 = vld [vmem:[#allocation21_spill] sm:$0xff] }
 0x196   : > { %2796 = vmatmul.msk.bf16.gmra.mxu0 %vm708_vm4, %v3451_v12 }
 0x197   : > { %v1363_v39 = vpop.f32.mrf.mxu2  ;;  %2741 = vmatmul.msk.bf16.gmra.mxu1 %vm708_vm4, %v3451_v12  ;;  %v3846_v23 = vadd.f32 %v1651_v40, %v1545_v6  ;;  %v4180_v6 = vld [vmem:[#allocation17_spill] sm:$0xff] }
 0x198   : > { %v1412_v29 = vadd.f32 %v1363_v39, %v1043_v8 }
 0x19b   : > { %v1653_v18 = vpop.f32.mrf.mxu0 }
 0x19c   : > { %v1497_v34 = vpop.f32.mrf.mxu3  ;;  %2762 = vmatmul.msk.bf16.gmra.mxu2 %vm708_vm4, %v3459_v27  ;;  %v1047_v62 = vpop.f32.mrf.mxu1 }
 0x19d   : > { %v1546_v45 = vadd.f32 %v1497_v34, %v1412_v29  ;;  %v1048_v27 = vadd.f32 %v1047_v62, %v3580_v44 }
 0x19f   : > { %v1366_v24 = vpop.f32.mrf.mxu2  ;;  %v3851_v61 = vadd.f32 %v1653_v18, %v1546_v45  ;;  %v4181_v45 = vld [vmem:[#allocation22_spill] sm:$0xff] }
 0x1a0   : > { %v1413_v1 = vadd.f32 %v1366_v24, %v1046_v5 }
 0x1a1   : > { %2779 = vmatmul.msk.bf16.gmra.mxu3 %vm708_vm4, %v3126_v37 }
 0x1a3   : > { %v1656_v12 = vpop.f32.mrf.mxu0 }
 0x1a4   : > { %v1500_v57 = vpop.f32.mrf.mxu3  ;;  %v1050_v52 = vpop.f32.mrf.mxu1 }
 0x1a5   : > { %v1547_v51 = vadd.f32 %v1500_v57, %v1413_v1  ;;  %v1051_v20 = vadd.f32 %v1050_v52, %v4177_v63  ;;  %v4182_v1 = vld [vmem:[#allocation19_spill] sm:$0xff] }
 0x1a6   : > { %2797 = vmatmul.msk.bf16.gmra.mxu0 %vm708_vm4, %v3483_v33 }
 0x1a7   : > { %v1368_v38 = vpop.f32.mrf.mxu2  ;;  %2742 = vmatmul.msk.bf16.gmra.mxu1 %vm708_vm4, %v3483_v33  ;;  %v3860_v56 = vadd.f32 %v1656_v12, %v1547_v51 }
 0x1a8   : > { %v1414_v60 = vadd.f32 %v1368_v38, %v1048_v27  ;;  %v4183_v27 = vld [vmem:[#allocation14_spill] sm:$0xff] }
 0x1ab   : > { %v1658_v41 = vpop.f32.mrf.mxu0 }
 0x1ac   : > { %v1502_v9 = vpop.f32.mrf.mxu3  ;;  %2763 = vmatmul.msk.bf16.gmra.mxu2 %vm708_vm4, %v4176_v43  ;;  %v1052_v37 = vpop.f32.mrf.mxu1  ;;  %v4184_v43 = vld [vmem:[#allocation24_spill] sm:$0xff] }
 0x1ad   : > { %v1548_v17 = vadd.f32 %v1502_v9, %v1414_v60  ;;  %v1053_v8 = vadd.f32 %v1052_v37, %v4180_v6  ;;  %v4185_v37 = vld [vmem:[#allocation20_spill] sm:$0xff] }
 0x1af   : > { %v1371_v15 = vpop.f32.mrf.mxu2  ;;  %v3865_v0 = vadd.f32 %v1658_v41, %v1548_v17 }
 0x1b0   : > { %v1415_v44 = vadd.f32 %v1371_v15, %v1051_v20 }
 0x1b1   : > { %2780 = vmatmul.msk.bf16.gmra.mxu3 %vm708_vm4, %v4178_v55 }
 0x1b3   : > { %v1661_v33 = vpop.f32.mrf.mxu0 }
 0x1b4   : > { %v1505_v3 = vpop.f32.mrf.mxu3  ;;  %v1055_v40 = vpop.f32.mrf.mxu1 }
 0x1b5   : > { %v1549_v48 = vadd.f32 %v1505_v3, %v1415_v44  ;;  %v1056_v12 = vadd.f32 %v1055_v40, %v4182_v1  ;;  %v4190_v1 = vld [vmem:[#allocation25_spill] sm:$0xff] }
 0x1b6   : > { %2798 = vmatmul.msk.bf16.gmra.mxu0 %vm708_vm4, %v4179_v2 }
 0x1b7   : > { %v1373_v39 = vpop.f32.mrf.mxu2  ;;  %2743 = vmatmul.msk.bf16.gmra.mxu1 %vm708_vm4, %v4179_v2  ;;  %v3874_v29 = vadd.f32 %v1661_v33, %v1549_v48  ;;  %v4186_v33 = vld [vmem:[#allocation26_spill] sm:$0xff]  ;;  %v4187_v48 = vld [vmem:[#allocation23_spill] sm:$0xff] }
 0x1b8   : > { %v1416_v18 = vadd.f32 %v1373_v39, %v1053_v8 }
 0x1bb   : > { %v1663_v34 = vpop.f32.mrf.mxu0 }
 0x1bc   : > { %v1507_v62 = vpop.f32.mrf.mxu3  ;;  %2764 = vmatmul.msk.bf16.gmra.mxu2 %vm708_vm4, %v4181_v45  ;;  %v1057_v5 = vpop.f32.mrf.mxu1 }
 0x1bd   : > { %v1550_v24 = vadd.f32 %v1507_v62, %v1416_v18  ;;  %v1058_v17 = vadd.f32 %v1057_v5, %v4185_v37  ;;  %v4188_v18 = vld [vmem:[#allocation2_spill] sm:$0xff] }
 0x1bf   : > { %v1376_v57 = vpop.f32.mrf.mxu2  ;;  %v3879_v52 = vadd.f32 %v1663_v34, %v1550_v24  ;;  %v4189_v24 = vld [vmem:[#allocation28_spill] sm:$0xff] }
 0x1c0   : > { %v1417_v51 = vadd.f32 %v1376_v57, %v1056_v12 }
 0x1c1   : > { %2781 = vmatmul.msk.bf16.gmra.mxu3 %vm708_vm4, %v4183_v27 }
 0x1c3   : > { %v1666_v38 = vpop.f32.mrf.mxu0 }
 0x1c4   : > { %v1510_v60 = vpop.f32.mrf.mxu3  ;;  %v1060_v41 = vpop.f32.mrf.mxu1 }
 0x1c5   : > { %v1551_v9 = vadd.f32 %v1510_v60, %v1417_v51  ;;  %v1061_v2 = vadd.f32 %v1060_v41, %v4187_v48 }
 0x1c6   : > { %2799 = vmatmul.msk.bf16.gmra.mxu0 %vm708_vm4, %v4184_v43 }
 0x1c7   : > { %v1378_v63 = vpop.f32.mrf.mxu2  ;;  %2744 = vmatmul.msk.bf16.gmra.mxu1 %vm708_vm4, %v4184_v43  ;;  %v3888_v20 = vadd.f32 %v1666_v38, %v1551_v9  ;;  %v4191_v43 = vld [vmem:[#allocation27_spill] sm:$0xff] }
 0x1c8   : > { %v1418_v15 = vadd.f32 %v1378_v63, %v1058_v17 }
 0x1cb   : > { %v1668_v44 = vpop.f32.mrf.mxu0 }
 0x1cc   : > { %v1512_v55 = vpop.f32.mrf.mxu3  ;;  %2765 = vmatmul.msk.bf16.gmra.mxu2 %vm708_vm4, %v4186_v33  ;;  %v1062_v3 = vpop.f32.mrf.mxu1 }
 0x1cd   : > { %v1552_v40 = vadd.f32 %v1512_v55, %v1418_v15  ;;  %v1063_v12 = vadd.f32 %v1062_v3, %v4190_v1 }
 0x1cf   : > { %v1381_v6 = vpop.f32.mrf.mxu2  ;;  %v3893_v8 = vadd.f32 %v1668_v44, %v1552_v40  ;;  %v4192_v40 = vld [vmem:[#allocation29_spill] sm:$0xff] }
 0x1d0   : > { %v1419_v39 = vadd.f32 %v1381_v6, %v1061_v2 }
 0x1d1   : > { %2782 = vmatmul.msk.bf16.gmra.mxu3 %vm708_vm4, %v4188_v18 }
 0x1d3   : > { %v1671_v34 = vpop.f32.mrf.mxu0 }
 0x1d4   : > { %v1515_v62 = vpop.f32.mrf.mxu3  ;;  %v1065_v45 = vpop.f32.mrf.mxu1 }
 0x1d5   : > { %v1553_v5 = vadd.f32 %v1515_v62, %v1419_v39  ;;  %v1066_v37 = vadd.f32 %v1065_v45, %v4191_v43 }
 0x1d6   : > { %2800 = vmatmul.msk.bf16.gmra.mxu0 %vm708_vm4, %v4189_v24 }
 0x1d7   : > { %v1383_v57 = vpop.f32.mrf.mxu2  ;;  %2745 = vmatmul.msk.bf16.gmra.mxu1 %vm708_vm4, %v4189_v24  ;;  %v3902_v51 = vadd.f32 %v1671_v34, %v1553_v5 }
 0x1d8   : > { %v1420_v27 = vadd.f32 %v1383_v57, %v1063_v12 }
 0x1db   : > { %v1673_v38 = vpop.f32.mrf.mxu0 }
 0x1dc   : > { %v1517_v60 = vpop.f32.mrf.mxu3  ;;  %2766 = vmatmul.msk.bf16.gmra.mxu2 %vm708_vm4, %v3595_v19  ;;  %v1067_v41 = vpop.f32.mrf.mxu1 }
 0x1dd   : > { %v1554_v9 = vadd.f32 %v1517_v60, %v1420_v27  ;;  %v1068_v19 = vadd.f32 %v1067_v41, %v4192_v40 }
 0x1df   : > { %v1386_v17 = vpop.f32.mrf.mxu2  ;;  %v3907_v63 = vadd.f32 %v1673_v38, %v1554_v9 }
 0x1e0   : > { %v1421_v15 = vadd.f32 %v1386_v17, %v1066_v37 }
 0x1e1   : > { %2783 = vmatmul.msk.bf16.gmra.mxu3 %vm708_vm4, %v3151_v4 }
 0x1e3   : > { %v1676_v44 = vpop.f32.mrf.mxu0 }
 0x1e4   : > { %v1520_v55 = vpop.f32.mrf.mxu3  ;;  %v1741_v33 = vpop.f32.mrf.mxu1 }
 0x1e5   : > { %v1555_v3 = vadd.f32 %v1520_v55, %v1421_v15  ;;  %v1821_v5 = vadd.f32 %v1741_v33, %v3610_v32  ;;  %v4193_v55 = vld [vmem:[#allocation15_spill] sm:$0xff] }
 0x1e6   : > { %2801 = vmatmul.msk.bf16.gmra.mxu0 %vm708_vm4, %v3612_v10 }
 0x1e7   : > { %v1388_v48 = vpop.f32.mrf.mxu2  ;;  %2746 = vmatmul.msk.bf16.gmra.mxu1 %vm708_vm4, %v3612_v10  ;;  %v3916_v2 = vadd.f32 %v1676_v44, %v1555_v3 }
 0x1e8   : > { %v1422_v6 = vadd.f32 %v1388_v48, %v1068_v19  ;;  %v4194_v48 = vld [vmem:[#allocation31_spill] sm:$0xff] }
 0x1eb   : > { %v1678_v39 = vpop.f32.mrf.mxu0 }
 0x1ec   : > { %v1522_v18 = vpop.f32.mrf.mxu3  ;;  %2767 = vmatmul.msk.bf16.gmra.mxu2 %vm708_vm4, %v3619_v42  ;;  %v1743_v4 = vpop.f32.mrf.mxu1 }
 0x1ed   : > { %v1556_v34 = vadd.f32 %v1522_v18, %v1422_v6  ;;  %v1822_v42 = vadd.f32 %v1743_v4, %v3623_v35 }
 0x1ef   : > { %v1875_v62 = vpop.f32.mrf.mxu2  ;;  %v3920_v45 = vadd.f32 %v1678_v39, %v1556_v34  ;;  %v4195_v39 = vld [vmem:[#allocation9_spill] sm:$0xff] }
 0x1f0   : > { %v1955_v24 = vadd.f32 %v1875_v62, %v1821_v5 }
 0x1f1   : > { %2784 = vmatmul.msk.bf16.gmra.mxu3 %vm708_vm4, %v3236_v25 }
 0x1f3   : > { %v2171_v10 = vpop.f32.mrf.mxu0 }
 0x1f4   : > { %v2031_v1 = vpop.f32.mrf.mxu3  ;;  %v1746_v12 = vpop.f32.mrf.mxu1 }
 0x1f5   : > { %v2111_v27 = vadd.f32 %v2031_v1, %v1955_v24  ;;  %v1823_v37 = vadd.f32 %v1746_v12, %v3636_v21  ;;  %v4196_v12 = vld [vmem:[#allocation32_spill] sm:$0xff] }
 0x1f6   : > { %2802 = vmatmul.msk.bf16.gmra.mxu0 %vm708_vm4, %v3638_v13 }
 0x1f7   : > { %v1877_v57 = vpop.f32.mrf.mxu2  ;;  %2747 = vmatmul.msk.bf16.gmra.mxu1 %vm708_vm4, %v3638_v13  ;;  %v2251_v25 = vadd.f32 %v2171_v10, %v2111_v27 }
 0x1f8   : > { %v1956_v38 = vadd.f32 %v1877_v57, %v1822_v42 }
 0x1f9   : > { %v2385_v35 = vmul.f32 %v2251_v25, %v2251_v25 }
 0x1fb   : > { %v2173_v60 = vpop.f32.mrf.mxu0 }
 0x1fc   : > { %v2033_v41 = vpop.f32.mrf.mxu3  ;;  %2768 = vmatmul.msk.bf16.gmra.mxu2 %vm708_vm4, %v3645_v50  ;;  %v1748_v32 = vpop.f32.mrf.mxu1 }
 0x1fd   : > { %v2112_v9 = vadd.f32 %v2033_v41, %v1956_v38  ;;  %v1824_v18 = vadd.f32 %v1748_v32, %v4195_v39  ;;  %v4197_v38 = vld [vmem:[#allocation30_spill] sm:$0xff] }
 0x1ff   : > { %v2252_v43 = vadd.f32 %v2173_v60, %v2112_v9  ;;  %v1880_v17 = vpop.f32.mrf.mxu2 }
 0x200   : > { %v1957_v50 = vadd.f32 %v1880_v17, %v1823_v37 }
 0x201   : > { %v2834_v13 = vpack.c.bf16 %v2252_v43, %v2251_v25  ;;  %v2347_v15 = vadd.f32 %v2252_v43, %v2251_v25  ;;  %v2386_v44 = vmul.f32 %v2252_v43, %v2252_v43  ;;  %2785 = vmatmul.msk.bf16.gmra.mxu3 %vm708_vm4, %v4193_v55  ;;  %v4198_v43 = vld [vmem:[#allocation3_spill] sm:$0xff] }
 0x202   : > { %v4199_v55 = vld [vmem:[#allocation35_spill] sm:$0xff] }
 0x203   : > { %2835 = vst [vmem:[%s3937_s18] sm:$0xff] %v2834_v13   ;;  %v2417_v33 = vadd.f32 %v2386_v44, %v2385_v35  ;;  %v2176_v3 = vpop.f32.mrf.mxu0 }
 0x204   : > { %v2036_v40 = vpop.f32.mrf.mxu3  ;;  %v1751_v21 = vpop.f32.mrf.mxu1 }
 0x205   : > { %v2113_v19 = vadd.f32 %v2036_v40, %v1957_v50  ;;  %v1825_v60 = vadd.f32 %v1751_v21, %v4197_v38 }
 0x206   : > { %2803 = vmatmul.msk.bf16.gmra.mxu0 %vm708_vm4, %v4194_v48 }
 0x207   : > { %v2253_v6 = vadd.f32 %v2176_v3, %v2113_v19  ;;  %v1882_v4 = vpop.f32.mrf.mxu2  ;;  %2748 = vmatmul.msk.bf16.gmra.mxu1 %vm708_vm4, %v4194_v48 }
 0x208   : > { %v1958_v5 = vadd.f32 %v1882_v4, %v1824_v18  ;;  %v4201_v4 = vld [vmem:[#allocation36_spill] sm:$0xff] }
 0x209   : > { %v2348_v34 = vadd.f32 %v2347_v15, %v2253_v6  ;;  %v2387_v62 = vmul.f32 %v2253_v6, %v2253_v6 }
 0x20b   : > { %v2418_v10 = vadd.f32 %v2417_v33, %v2387_v62  ;;  %v2178_v24 = vpop.f32.mrf.mxu0  ;;  %v4200_v33 = vld [vmem:[#allocation33_spill] sm:$0xff] }
 0x20c   : > { %v2038_v1 = vpop.f32.mrf.mxu3  ;;  %2769 = vmatmul.msk.bf16.gmra.mxu2 %vm708_vm4, %v4196_v12  ;;  %v1753_v42 = vpop.f32.mrf.mxu1 }
 0x20d   : > { %v2114_v57 = vadd.f32 %v2038_v1, %v1958_v5  ;;  %v1826_v3 = vadd.f32 %v1753_v42, %v4200_v33 }
 0x20f   : > { %v2254_v27 = vadd.f32 %v2178_v24, %v2114_v57  ;;  %v1885_v25 = vpop.f32.mrf.mxu2 }
 0x210   : > { %v1959_v37 = vadd.f32 %v1885_v25, %v1825_v60 }
 0x211   : > { %v2839_v41 = vpack.c.bf16 %v2254_v27, %v2253_v6  ;;  %v2349_v32 = vadd.f32 %v2348_v34, %v2254_v27  ;;  %v2388_v9 = vmul.f32 %v2254_v27, %v2254_v27  ;;  %2786 = vmatmul.msk.bf16.gmra.mxu3 %vm708_vm4, %v4198_v43  ;;  %v4203_v27 = vld [vmem:[#allocation4_spill] sm:$0xff]  ;;  %v4204_v43 = vld [vmem:[#allocation39_spill] sm:$0xff] }
 0x213   : > { %2911 = vst [vmem:[%s3937_s18 + $0x8] sm:$0xff] %v2839_v41   ;;  %v2419_v17 = vadd.f32 %v2418_v10, %v2388_v9  ;;  %v2181_v35 = vpop.f32.mrf.mxu0  ;;  %v4202_v10 = vld [vmem:[#allocation34_spill] sm:$0xff] }
 0x214   : > { %v2041_v13 = vpop.f32.mrf.mxu3  ;;  %v1756_v15 = vpop.f32.mrf.mxu1 }
 0x215   : > { %v2115_v44 = vadd.f32 %v2041_v13, %v1959_v37  ;;  %v1827_v24 = vadd.f32 %v1756_v15, %v4202_v10 }
 0x216   : > { %2804 = vmatmul.msk.bf16.gmra.mxu0 %vm708_vm4, %v4199_v55 }
 0x217   : > { %v2255_v50 = vadd.f32 %v2181_v35, %v2115_v44  ;;  %v1887_v40 = vpop.f32.mrf.mxu2  ;;  %2749 = vmatmul.msk.bf16.gmra.mxu1 %vm708_vm4, %v4199_v55 }
 0x218   : > { %v1960_v48 = vadd.f32 %v1887_v40, %v1826_v3  ;;  %v4206_v40 = vld [vmem:[#allocation6_spill] sm:$0xff] }
 0x219   : > { %v2350_v21 = vadd.f32 %v2349_v32, %v2255_v50  ;;  %v2389_v19 = vmul.f32 %v2255_v50, %v2255_v50 }
 0x21b   : > { %v2420_v6 = vadd.f32 %v2419_v17, %v2389_v19  ;;  %v2183_v39 = vpop.f32.mrf.mxu0  ;;  %v4205_v17 = vld [vmem:[#allocation37_spill] sm:$0xff] }
 0x21c   : > { %v2043_v18 = vpop.f32.mrf.mxu3  ;;  %2770 = vmatmul.msk.bf16.gmra.mxu2 %vm708_vm4, %v4201_v4  ;;  %v1758_v34 = vpop.f32.mrf.mxu1 }
 0x21d   : > { %v2116_v62 = vadd.f32 %v2043_v18, %v1960_v48  ;;  %v1828_v35 = vadd.f32 %v1758_v34, %v4205_v17 }
 0x21f   : > { %v2256_v5 = vadd.f32 %v2183_v39, %v2116_v62  ;;  %v1890_v1 = vpop.f32.mrf.mxu2 }
 0x220   : > { %v1961_v38 = vadd.f32 %v1890_v1, %v1827_v24 }
 0x221   : > { %v2844_v12 = vpack.c.bf16 %v2256_v5, %v2255_v50  ;;  %v2351_v42 = vadd.f32 %v2350_v21, %v2256_v5  ;;  %v2390_v57 = vmul.f32 %v2256_v5, %v2256_v5  ;;  %2787 = vmatmul.msk.bf16.gmra.mxu3 %vm708_vm4, %v4203_v27  ;;  %v4208_v5 = vld [vmem:[#allocation10_spill] sm:$0xff]  ;;  %v4209_v27 = vld [vmem:[#allocation41_spill] sm:$0xff] }
 0x223   : > { %2912 = vst [vmem:[%s3937_s18 + $0x10] sm:$0xff] %v2844_v12   ;;  %v2421_v60 = vadd.f32 %v2420_v6, %v2390_v57  ;;  %v2186_v25 = vpop.f32.mrf.mxu0  ;;  %v4207_v6 = vld [vmem:[#allocation38_spill] sm:$0xff] }
 0x224   : > { %v2046_v41 = vpop.f32.mrf.mxu3  ;;  %v1761_v32 = vpop.f32.mrf.mxu1 }
 0x225   : > { %v2117_v9 = vadd.f32 %v2046_v41, %v1961_v38  ;;  %v1829_v39 = vadd.f32 %v1761_v32, %v4207_v6 }
 0x226   : > { %2805 = vmatmul.msk.bf16.gmra.mxu0 %vm708_vm4, %v4204_v43 }
 0x227   : > { %v2257_v37 = vadd.f32 %v2186_v25, %v2117_v9  ;;  %v1892_v13 = vpop.f32.mrf.mxu2  ;;  %2750 = vmatmul.msk.bf16.gmra.mxu1 %vm708_vm4, %v4204_v43 }
 0x228   : > { %v1962_v55 = vadd.f32 %v1892_v13, %v1828_v35 }
 0x229   : > { %v2352_v15 = vadd.f32 %v2351_v42, %v2257_v37  ;;  %v2391_v44 = vmul.f32 %v2257_v37, %v2257_v37 }
 0x22b   : > { %v2422_v50 = vadd.f32 %v2421_v60, %v2391_v44  ;;  %v2188_v33 = vpop.f32.mrf.mxu0  ;;  %v4210_v60 = vld [vmem:[#allocation7_spill] sm:$0xff] }
 0x22c   : > { %v2048_v3 = vpop.f32.mrf.mxu3  ;;  %2771 = vmatmul.msk.bf16.gmra.mxu2 %vm708_vm4, %v4206_v40  ;;  %v1763_v21 = vpop.f32.mrf.mxu1 }
 0x22d   : > { %v2118_v19 = vadd.f32 %v2048_v3, %v1962_v55  ;;  %v1830_v25 = vadd.f32 %v1763_v21, %v4210_v60  ;;  %v4211_v55 = vld [vmem:[#allocation40_spill] sm:$0xff] }
 0x22f   : > { %v2258_v48 = vadd.f32 %v2188_v33, %v2118_v19  ;;  %v1895_v18 = vpop.f32.mrf.mxu2 }
 0x230   : > { %v1963_v10 = vadd.f32 %v1895_v18, %v1829_v39 }
 0x231   : > { %v2849_v4 = vpack.c.bf16 %v2258_v48, %v2257_v37  ;;  %v2353_v34 = vadd.f32 %v2352_v15, %v2258_v48  ;;  %v2392_v62 = vmul.f32 %v2258_v48, %v2258_v48  ;;  %2788 = vmatmul.msk.bf16.gmra.mxu3 %vm708_vm4, %v4208_v5  ;;  %v3986_v48 = vld [vmem:[%s3013_s30 + $0xcc] sm:$0xf] }
 0x232   : > { %v1988_v5 = vshrl.u32 %v3986_v48, 16 }
 0x233   : > { %2913 = vst [vmem:[%s3937_s18 + $0x18] sm:$0xff] %v2849_v4   ;;  %v2423_v24 = vadd.f32 %v2422_v50, %v2392_v62  ;;  %v2191_v1 = vpop.f32.mrf.mxu0  ;;  %v3991_v4 = vld [vmem:[%s3013_s30 + $0xd0] sm:$0xf] }
 0x234   : > { %v2051_v12 = vpop.f32.mrf.mxu3  ;;  %v1766_v42 = vpop.f32.mrf.mxu1 }
 0x235   : > { %v2119_v57 = vadd.f32 %v2051_v12, %v1963_v10  ;;  %v1831_v50 = vadd.f32 %v1766_v42, %v4211_v55  ;;  %v1991_v10 = vshll.u32 %v3986_v48, 16  ;;  %v1997_v12 = vshll.u32 %v3991_v4, 16  ;;  %v269_v55 = vld [vmem:[%s3013_s30 + $0xd4] sm:$0x1] }
 0x236   : > { %2806 = vmatmul.msk.bf16.gmra.mxu0 %vm708_vm4, %v4209_v27  ;;  %v2001_v42 = vshrl.u32 %v3991_v4, 16 }
 0x237   : > { %v2259_v38 = vadd.f32 %v2191_v1, %v2119_v57  ;;  %v1897_v41 = vpop.f32.mrf.mxu2  ;;  %2751 = vmatmul.msk.bf16.gmra.mxu1 %vm708_vm4, %v4209_v27 }
 0x238   : > { %v1964_v43 = vadd.f32 %v1897_v41, %v1830_v25  ;;  %v1719_v25 = vrot.slane %v3765_v11, 5  ;;  %v1990_v41 = vrot.slane %v1988_v5, 4 }
 0x239   : > { %v2354_v32 = vadd.f32 %v2353_v34, %v2259_v38  ;;  %v2393_v9 = vmul.f32 %v2259_v38, %v2259_v38 }
 0x23b   : > { %v2424_v37 = vadd.f32 %v2423_v24, %v2393_v9  ;;  %v2193_v17 = vpop.f32.mrf.mxu0 }
 0x23c   : > { %v2053_v35 = vpop.f32.mrf.mxu3  ;;  %2772 = vmatmul.msk.bf16.gmra.mxu2 %vm708_vm4, %v3758_v30  ;;  %v1768_v13 = vpop.f32.mrf.mxu1  ;;  %v4212_v30 = vld [vmem:[#allocation42_spill] sm:$0xff] }
 0x23d   : > { %v2120_v15 = vadd.f32 %v2053_v35, %v1964_v43  ;;  %v1716_v18 = vrot.slane %v4212_v30, 5  ;;  %v1832_v27 = vadd.f32 %v1768_v13, %v3762_v49  ;;  %v2003_v35 = vrot.slane %v2001_v42, 4 }
 0x23f   : > { %v2260_v44 = vadd.f32 %v2193_v17, %v2120_v15  ;;  %v1900_v33 = vpop.f32.mrf.mxu2  ;;  %v1718_v60 = vrot.slane %v1716_v18, 4  ;;  %v1999_v17 = vrot.slane %v1997_v12, 5 }
 0x240   : > { %v1965_v19 = vadd.f32 %v1900_v33, %v1831_v50 }
 0x241   : > { %v2854_v3 = vpack.c.bf16 %v2260_v44, %v2259_v38  ;;  %v2355_v40 = vadd.f32 %v2354_v32, %v2260_v44  ;;  %v2394_v21 = vmul.f32 %v2260_v44, %v2260_v44  ;;  %2789 = vmatmul.msk.bf16.gmra.mxu3 %vm708_vm4, %v3352_v53  ;;  %v4213_v53 = vld [vmem:[#allocation5_spill] sm:$0xff]  ;;  %v1993_v32 = vrot.slane %v1991_v10, 5 }
 0x242   : > { %v2736_v1 = vrot.slane %v4213_v53, 9  ;;  %v1720_v13 = vsel %vm3343_vm7, %v1718_v60, %v1719_v25  ;;  %v2792_v60 = vrot.slane %v3986_v48, 9 }
 0x243   : > { %2914 = vst [vmem:[%s3937_s18 + $0x20] sm:$0xff] %v2854_v3   ;;  %v2425_v6 = vadd.f32 %v2424_v37, %v2394_v21  ;;  %v2196_v39 = vpop.f32.mrf.mxu0  ;;  %v1994_v50 = vor.u32 %v1993_v32, %v1990_v41  ;;  %v2004_v21 = vor.u32 %v2003_v35, %v1999_v17 }
 0x244   : > { %v2056_v34 = vpop.f32.mrf.mxu3  ;;  %v1771_v62 = vpop.f32.mrf.mxu1  ;;  %v1717_v49 = vsel %vm3343_vm7, %v2736_v1, %v1716_v18 }
 0x245   : > { %v2121_v24 = vadd.f32 %v2056_v34, %v1965_v19  ;;  %v1723_v3 = vunpack.c.l.b16 %v1717_v49  ;;  %v2007_v19 = vshll.u32 %v269_v55, 16  ;;  %v1995_v18 = vrot.slane %v1994_v50, 4 }
 0x246   : > { %2807 = vmatmul.msk.bf16.gmra.mxu0 %vm708_vm4, %v3781_v46  ;;  %v2005_v53 = vrot.slane %v2004_v21, 4 }
 0x247   : > { %v2261_v57 = vadd.f32 %v2196_v39, %v2121_v24  ;;  %v1902_v38 = vpop.f32.mrf.mxu2  ;;  %2752 = vmatmul.msk.bf16.gmra.mxu1 %vm708_vm4, %v3781_v46  ;;  %v1833_v39 = vadd.f32 %v1771_v62, %v3779_v7  ;;  %v2009_v1 = vrot.slane %v2007_v19, 5 }
 0x248   : > { %v1966_v37 = vadd.f32 %v1902_v38, %v1832_v27  ;;  %v2146_v27 = vrot.slane %v3991_v4, 5 }
 0x249   : > { %v2356_v9 = vadd.f32 %v2355_v40, %v2261_v57  ;;  %v2395_v43 = vmul.f32 %v2261_v57, %v2261_v57  ;;  %v1724_v40 = vunpack.c.l.b16 %v1720_v13 }
 0x24a   : > { %v2148_v4 = vrot.slane %v2146_v27, 4  ;;  %v2147_v36 = vsel %vm3343_vm7, %v2792_v60, %v2146_v27 }
 0x24b   : > { %v2426_v15 = vadd.f32 %v2425_v6, %v2395_v43  ;;  %v2198_v44 = vpop.f32.mrf.mxu0  ;;  %v1725_v24 = vpack.c.b16 %v1724_v40, %v1723_v3  ;;  %v2830_v43 = vld [vmem:[%s3013_s30 + $0xcc] sm:$0xff]  ;;  %v2153_v50 = vunpack.c.l.b16 %v2147_v36 }
 0x24c   : > { %v2058_v46 = vpop.f32.mrf.mxu3  ;;  %2773 = vmatmul.msk.bf16.gmra.mxu2 %vm708_vm4, %v3790_v54  ;;  %v1773_v11 = vpop.f32.mrf.mxu1 }
 0x24d   : > { %v2122_v33 = vadd.f32 %v2058_v46, %v1966_v37  ;;  %v1834_v41 = vadd.f32 %v1773_v11, %v3793_v28 }
 0x24f   : > { %v2262_v6 = vadd.f32 %v2198_v44, %v2122_v33  ;;  %v1905_v30 = vpop.f32.mrf.mxu2 }
 0x250   : > { %v1967_v54 = vadd.f32 %v1905_v30, %v1833_v39 }
 0x251   : > { %v2859_v34 = vpack.c.bf16 %v2262_v6, %v2261_v57  ;;  %v2357_v5 = vadd.f32 %v2356_v9, %v2262_v6  ;;  %v2396_v10 = vmul.f32 %v2262_v6, %v2262_v6  ;;  %2790 = vmatmul.msk.bf16.gmra.mxu3 %vm708_vm4, %v3797_v22  ;;  %v2000_v57 = vsel %vm3040_vm3, %v1995_v18, %v1999_v17 }
 0x252   : > { %v2010_v22 = vsel %vm3040_vm3, %v2005_v53, %v2009_v1  ;;  %v2149_v9 = vrot.slane %v269_v55, 5  ;;  %v2013_v37 = vunpack.c.l.b16 %v2000_v57 }
 0x253   : > { %2915 = vst [vmem:[%s3937_s18 + $0x28] sm:$0xff] %v2859_v34   ;;  %v2427_v12 = vadd.f32 %v2426_v15, %v2396_v10  ;;  %v2201_v42 = vpop.f32.mrf.mxu0  ;;  %v2014_v44 = vunpack.c.l.b16 %v2010_v22 }
 0x254   : > { %v2061_v38 = vpop.f32.mrf.mxu3  ;;  %v1776_v7 = vpop.f32.mrf.mxu1  ;;  %v2150_v48 = vsel %vm3343_vm7, %v2148_v4, %v2149_v9 }
 0x255   : > { %v2123_v62 = vadd.f32 %v2061_v38, %v1967_v54  ;;  %v2015_v11 = vpack.c.b16 %v2014_v44, %v2013_v37  ;;  %v2154_v33 = vunpack.c.l.b16 %v2150_v48  ;;  %v1835_v40 = vadd.f32 %v1776_v7, %v3804_v58 }
 0x256   : > { %2808 = vmatmul.msk.bf16.gmra.mxu0 %vm708_vm4, %v1725_v24 }
 0x257   : > { %v2263_v25 = vadd.f32 %v2201_v42, %v2123_v62  ;;  %v1907_v32 = vpop.f32.mrf.mxu2  ;;  %2753 = vmatmul.msk.bf16.gmra.mxu1 %vm708_vm4, %v1725_v24  ;;  %v2155_v30 = vpack.c.b16 %v2154_v33, %v2153_v50 }
 0x258   : > { %v1968_v17 = vadd.f32 %v1907_v32, %v1834_v41 }
 0x259   : > { %v2358_v35 = vadd.f32 %v2357_v5, %v2263_v25  ;;  %v2397_v15 = vmul.f32 %v2263_v25, %v2263_v25 }
 0x25b   : > { %v2428_v49 = vadd.f32 %v2427_v12, %v2397_v15  ;;  %v2203_v13 = vpop.f32.mrf.mxu0 }
 0x25c   : > { %v2063_v28 = vpop.f32.mrf.mxu3  ;;  %2774 = vmatmul.msk.bf16.gmra.mxu2 %vm708_vm4, %v2830_v43  ;;  %v1778_v46 = vpop.f32.mrf.mxu1 }
 0x25d   : > { %v2124_v55 = vadd.f32 %v2063_v28, %v1968_v17  ;;  %v1836_v53 = vadd.f32 %v1778_v46, %v3809_v31 }
 0x25f   : > { %v2264_v3 = vadd.f32 %v2203_v13, %v2124_v55  ;;  %v1910_v21 = vpop.f32.mrf.mxu2 }
 0x260   : > { %v1969_v14 = vadd.f32 %v1910_v21, %v1835_v40 }
 0x261   : > { %v2864_v19 = vpack.c.bf16 %v2264_v3, %v2263_v25  ;;  %v2359_v6 = vadd.f32 %v2358_v35, %v2264_v3  ;;  %v2398_v39 = vmul.f32 %v2264_v3, %v2264_v3  ;;  %2791 = vmatmul.msk.bf16.gmra.mxu3 %vm708_vm4, %v2015_v11 }
 0x263   : > { %2916 = vst [vmem:[%s3937_s18 + $0x30] sm:$0xff] %v2864_v19   ;;  %v2429_v18 = vadd.f32 %v2428_v49, %v2398_v39  ;;  %v2206_v34 = vpop.f32.mrf.mxu0 }
 0x264   : > { %v2066_v5 = vpop.f32.mrf.mxu3  ;;  %v1781_v10 = vpop.f32.mrf.mxu1 }
 0x265   : > { %v2125_v54 = vadd.f32 %v2066_v5, %v1969_v14  ;;  %v1837_v60 = vadd.f32 %v1781_v10, %v3818_v16 }
 0x266   : > { %2809 = vmatmul.msk.bf16.gmra.mxu0 %vm708_vm4, %v2155_v30 }
 0x267   : > { %v2265_v24 = vadd.f32 %v2206_v34, %v2125_v54  ;;  %v1912_v58 = vpop.f32.mrf.mxu2 }
 0x268   : > { %v1970_v42 = vadd.f32 %v1912_v58, %v1836_v53 }
 0x269   : > { %v2360_v1 = vadd.f32 %v2359_v6, %v2265_v24  ;;  %v2399_v12 = vmul.f32 %v2265_v24, %v2265_v24 }
 0x26b   : > { %v2430_v27 = vadd.f32 %v2429_v18, %v2399_v12  ;;  %v2208_v38 = vpop.f32.mrf.mxu0 }
 0x26c   : > { %v2068_v7 = vpop.f32.mrf.mxu3  ;;  %v1783_v62 = vpop.f32.mrf.mxu1 }
 0x26d   : > { %v2126_v57 = vadd.f32 %v2068_v7, %v1970_v42  ;;  %v1838_v44 = vadd.f32 %v1783_v62, %v3823_v26 }
 0x26f   : > { %v2266_v22 = vadd.f32 %v2208_v38, %v2126_v57  ;;  %v1915_v25 = vpop.f32.mrf.mxu2 }
 0x270   : > { %v1971_v9 = vadd.f32 %v1915_v25, %v1837_v60 }
 0x271   : > { %v2869_v41 = vpack.c.bf16 %v2266_v22, %v2265_v24  ;;  %v2361_v32 = vadd.f32 %v2360_v1, %v2266_v22  ;;  %v2400_v4 = vmul.f32 %v2266_v22, %v2266_v22 }
 0x273   : > { %2917 = vst [vmem:[%s3937_s18 + $0x38] sm:$0xff] %v2869_v41   ;;  %v2431_v31 = vadd.f32 %v2430_v27, %v2400_v4  ;;  %v2211_v43 = vpop.f32.mrf.mxu0 }
 0x274   : > { %v2071_v37 = vpop.f32.mrf.mxu3  ;;  %v1786_v35 = vpop.f32.mrf.mxu1 }
 0x275   : > { %v2127_v15 = vadd.f32 %v2071_v37, %v1971_v9  ;;  %v1839_v33 = vadd.f32 %v1786_v35, %v3832_v59 }
 0x277   : > { %v2267_v17 = vadd.f32 %v2211_v43, %v2127_v15  ;;  %v1917_v49 = vpop.f32.mrf.mxu2 }
 0x278   : > { %v1972_v48 = vadd.f32 %v1917_v49, %v1838_v44 }
 0x279   : > { %v2362_v13 = vadd.f32 %v2361_v32, %v2267_v17  ;;  %v2401_v36 = vmul.f32 %v2267_v17, %v2267_v17 }
 0x27b   : > { %v2432_v16 = vadd.f32 %v2431_v31, %v2401_v36  ;;  %v2213_v28 = vpop.f32.mrf.mxu0 }
 0x27c   : > { %v2073_v46 = vpop.f32.mrf.mxu3  ;;  %v1788_v55 = vpop.f32.mrf.mxu1 }
 0x27d   : > { %v2128_v11 = vadd.f32 %v2073_v46, %v1972_v48  ;;  %v1840_v5 = vadd.f32 %v1788_v55, %v3837_v47 }
 0x27f   : > { %v2268_v50 = vadd.f32 %v2213_v28, %v2128_v11  ;;  %v1920_v3 = vpop.f32.mrf.mxu2 }
 0x280   : > { %v1973_v6 = vadd.f32 %v1920_v3, %v1839_v33 }
 0x281   : > { %v2874_v40 = vpack.c.bf16 %v2268_v50, %v2267_v17  ;;  %v2363_v21 = vadd.f32 %v2362_v13, %v2268_v50  ;;  %v2402_v19 = vmul.f32 %v2268_v50, %v2268_v50 }
 0x283   : > { %2918 = vst [vmem:[%s3937_s18 + $0x40] sm:$0xff] %v2874_v40   ;;  %v2433_v26 = vadd.f32 %v2432_v16, %v2402_v19  ;;  %v2216_v39 = vpop.f32.mrf.mxu0 }
 0x284   : > { %v2076_v14 = vpop.f32.mrf.mxu3  ;;  %v1791_v30 = vpop.f32.mrf.mxu1 }
 0x285   : > { %v2129_v18 = vadd.f32 %v2076_v14, %v1973_v6  ;;  %v1841_v38 = vadd.f32 %v1791_v30, %v3846_v23 }
 0x287   : > { %v2269_v34 = vadd.f32 %v2216_v39, %v2129_v18  ;;  %v1922_v10 = vpop.f32.mrf.mxu2 }
 0x288   : > { %v1974_v53 = vadd.f32 %v1922_v10, %v1840_v5 }
 0x289   : > { %v2364_v54 = vadd.f32 %v2363_v21, %v2269_v34  ;;  %v2403_v24 = vmul.f32 %v2269_v34, %v2269_v34 }
 0x28b   : > { %v2434_v59 = vadd.f32 %v2433_v26, %v2403_v24  ;;  %v2218_v58 = vpop.f32.mrf.mxu0 }
 0x28c   : > { %v2078_v1 = vpop.f32.mrf.mxu3  ;;  %v1793_v12 = vpop.f32.mrf.mxu1 }
 0x28d   : > { %v2130_v42 = vadd.f32 %v2078_v1, %v1974_v53  ;;  %v1842_v31 = vadd.f32 %v1793_v12, %v3851_v61 }
 0x28f   : > { %v2270_v27 = vadd.f32 %v2218_v58, %v2130_v42  ;;  %v1925_v7 = vpop.f32.mrf.mxu2 }
 0x290   : > { %v1975_v60 = vadd.f32 %v1925_v7, %v1841_v38 }
 0x291   : > { %v2879_v62 = vpack.c.bf16 %v2270_v27, %v2269_v34  ;;  %v2365_v57 = vadd.f32 %v2364_v54, %v2270_v27  ;;  %v2404_v22 = vmul.f32 %v2270_v27, %v2270_v27 }
 0x293   : > { %2919 = vst [vmem:[%s3937_s18 + $0x48] sm:$0xff] %v2879_v62   ;;  %v2435_v47 = vadd.f32 %v2434_v59, %v2404_v22  ;;  %v2221_v25 = vpop.f32.mrf.mxu0 }
 0x294   : > { %v2081_v41 = vpop.f32.mrf.mxu3  ;;  %v1796_v32 = vpop.f32.mrf.mxu1 }
 0x295   : > { %v2131_v4 = vadd.f32 %v2081_v41, %v1975_v60  ;;  %v1843_v48 = vadd.f32 %v1796_v32, %v3860_v56 }
 0x297   : > { %v2271_v9 = vadd.f32 %v2221_v25, %v2131_v4  ;;  %v1927_v43 = vpop.f32.mrf.mxu2 }
 0x298   : > { %v1976_v15 = vadd.f32 %v1927_v43, %v1842_v31 }
 0x299   : > { %v2366_v37 = vadd.f32 %v2365_v57, %v2271_v9  ;;  %v2405_v35 = vmul.f32 %v2271_v9, %v2271_v9 }
 0x29b   : > { %v2436_v23 = vadd.f32 %v2435_v47, %v2405_v35  ;;  %v2223_v17 = vpop.f32.mrf.mxu0 }
 0x29c   : > { %v2083_v44 = vpop.f32.mrf.mxu3  ;;  %v1798_v49 = vpop.f32.mrf.mxu1 }
 0x29d   : > { %v2132_v13 = vadd.f32 %v2083_v44, %v1976_v15  ;;  %v1844_v19 = vadd.f32 %v1798_v49, %v3865_v0 }
 0x29f   : > { %v2272_v36 = vadd.f32 %v2223_v17, %v2132_v13  ;;  %v1930_v16 = vpop.f32.mrf.mxu2 }
 0x2a0   : > { %v1977_v11 = vadd.f32 %v1930_v16, %v1843_v48 }
 0x2a1   : > { %v2884_v28 = vpack.c.bf16 %v2272_v36, %v2271_v9  ;;  %v2367_v46 = vadd.f32 %v2366_v37, %v2272_v36  ;;  %v2406_v55 = vmul.f32 %v2272_v36, %v2272_v36 }
 0x2a3   : > { %2920 = vst [vmem:[%s3937_s18 + $0x50] sm:$0xff] %v2884_v28   ;;  %v2437_v61 = vadd.f32 %v2436_v23, %v2406_v55  ;;  %v2226_v50 = vpop.f32.mrf.mxu0 }
 0x2a4   : > { %v2086_v33 = vpop.f32.mrf.mxu3  ;;  %v1801_v3 = vpop.f32.mrf.mxu1 }
 0x2a5   : > { %v2133_v40 = vadd.f32 %v2086_v33, %v1977_v11  ;;  %v1845_v54 = vadd.f32 %v1801_v3, %v3874_v29 }
 0x2a7   : > { %v2273_v21 = vadd.f32 %v2226_v50, %v2133_v40  ;;  %v1932_v6 = vpop.f32.mrf.mxu2 }
 0x2a8   : > { %v1978_v14 = vadd.f32 %v1932_v6, %v1844_v19 }
 0x2a9   : > { %v2368_v26 = vadd.f32 %v2367_v46, %v2273_v21  ;;  %v2407_v39 = vmul.f32 %v2273_v21, %v2273_v21 }
 0x2ab   : > { %v2438_v56 = vadd.f32 %v2437_v61, %v2407_v39  ;;  %v2228_v30 = vpop.f32.mrf.mxu0 }
 0x2ac   : > { %v2088_v18 = vpop.f32.mrf.mxu3  ;;  %v1803_v34 = vpop.f32.mrf.mxu1 }
 0x2ad   : > { %v2134_v5 = vadd.f32 %v2088_v18, %v1978_v14  ;;  %v1846_v62 = vadd.f32 %v1803_v34, %v3879_v52 }
 0x2af   : > { %v2274_v10 = vadd.f32 %v2228_v30, %v2134_v5  ;;  %v1935_v24 = vpop.f32.mrf.mxu2 }
 0x2b0   : > { %v1979_v1 = vadd.f32 %v1935_v24, %v1845_v54 }
 0x2b1   : > { %v2889_v53 = vpack.c.bf16 %v2274_v10, %v2273_v21  ;;  %v2369_v59 = vadd.f32 %v2368_v26, %v2274_v10  ;;  %v2408_v58 = vmul.f32 %v2274_v10, %v2274_v10 }
 0x2b3   : > { %2921 = vst [vmem:[%s3937_s18 + $0x58] sm:$0xff] %v2889_v53   ;;  %v2439_v0 = vadd.f32 %v2438_v56, %v2408_v58  ;;  %v2231_v12 = vpop.f32.mrf.mxu0 }
 0x2b4   : > { %v2091_v42 = vpop.f32.mrf.mxu3  ;;  %v1806_v27 = vpop.f32.mrf.mxu1 }
 0x2b5   : > { %v2135_v38 = vadd.f32 %v2091_v42, %v1979_v1  ;;  %v1847_v31 = vadd.f32 %v1806_v27, %v3888_v20 }
 0x2b7   : > { %v2275_v7 = vadd.f32 %v2231_v12, %v2135_v38  ;;  %v1937_v57 = vpop.f32.mrf.mxu2 }
 0x2b8   : > { %v1980_v47 = vadd.f32 %v1937_v57, %v1846_v62 }
 0x2b9   : > { %v2370_v22 = vadd.f32 %v2369_v59, %v2275_v7  ;;  %v2409_v60 = vmul.f32 %v2275_v7, %v2275_v7 }
 0x2bb   : > { %v2440_v29 = vadd.f32 %v2439_v0, %v2409_v60  ;;  %v2233_v25 = vpop.f32.mrf.mxu0 }
 0x2bc   : > { %v2093_v41 = vpop.f32.mrf.mxu3  ;;  %v1808_v32 = vpop.f32.mrf.mxu1 }
 0x2bd   : > { %v2136_v4 = vadd.f32 %v2093_v41, %v1980_v47  ;;  %v1848_v48 = vadd.f32 %v1808_v32, %v3893_v8 }
 0x2bf   : > { %v2276_v9 = vadd.f32 %v2233_v25, %v2136_v4  ;;  %v1940_v43 = vpop.f32.mrf.mxu2 }
 0x2c0   : > { %v1981_v23 = vadd.f32 %v1940_v43, %v1847_v31 }
 0x2c1   : > { %v2894_v37 = vpack.c.bf16 %v2276_v9, %v2275_v7  ;;  %v2371_v35 = vadd.f32 %v2370_v22, %v2276_v9  ;;  %v2410_v15 = vmul.f32 %v2276_v9, %v2276_v9 }
 0x2c3   : > { %2922 = vst [vmem:[%s3937_s18 + $0x60] sm:$0xff] %v2894_v37   ;;  %v2441_v52 = vadd.f32 %v2440_v29, %v2410_v15  ;;  %v2236_v17 = vpop.f32.mrf.mxu0 }
 0x2c4   : > { %v2096_v44 = vpop.f32.mrf.mxu3  ;;  %v1811_v13 = vpop.f32.mrf.mxu1 }
 0x2c5   : > { %v2137_v49 = vadd.f32 %v2096_v44, %v1981_v23  ;;  %v1849_v3 = vadd.f32 %v1811_v13, %v3902_v51 }
 0x2c7   : > { %v2277_v36 = vadd.f32 %v2236_v17, %v2137_v49  ;;  %v1942_v16 = vpop.f32.mrf.mxu2 }
 0x2c8   : > { %v1982_v55 = vadd.f32 %v1942_v16, %v1848_v48 }
 0x2c9   : > { %v2372_v28 = vadd.f32 %v2371_v35, %v2277_v36  ;;  %v2411_v46 = vmul.f32 %v2277_v36, %v2277_v36 }
 0x2cb   : > { %v2442_v20 = vadd.f32 %v2441_v52, %v2411_v46  ;;  %v2238_v11 = vpop.f32.mrf.mxu0 }
 0x2cc   : > { %v2098_v61 = vpop.f32.mrf.mxu3  ;;  %v1813_v21 = vpop.f32.mrf.mxu1 }
 0x2cd   : > { %v2138_v50 = vadd.f32 %v2098_v61, %v1982_v55  ;;  %v1850_v34 = vadd.f32 %v1813_v21, %v3907_v63 }
 0x2cf   : > { %v2278_v33 = vadd.f32 %v2238_v11, %v2138_v50  ;;  %v1945_v40 = vpop.f32.mrf.mxu2 }
 0x2d0   : > { %v1983_v39 = vadd.f32 %v1945_v40, %v1849_v3 }
 0x2d1   : > { %v2899_v19 = vpack.c.bf16 %v2278_v33, %v2277_v36  ;;  %v2373_v6 = vadd.f32 %v2372_v28, %v2278_v33  ;;  %v2412_v26 = vmul.f32 %v2278_v33, %v2278_v33 }
 0x2d3   : > { %2923 = vst [vmem:[%s3937_s18 + $0x68] sm:$0xff] %v2899_v19   ;;  %v2443_v8 = vadd.f32 %v2442_v20, %v2412_v26  ;;  %v2241_v14 = vpop.f32.mrf.mxu0 }
 0x2d4   : > { %v2101_v56 = vpop.f32.mrf.mxu3  ;;  %v1816_v51 = vpop.f32.mrf.mxu1 }
 0x2d5   : > { %v2139_v30 = vadd.f32 %v2101_v56, %v1983_v39  ;;  %v1851_v12 = vadd.f32 %v1816_v51, %v3916_v2 }
 0x2d7   : > { %v2279_v18 = vadd.f32 %v2241_v14, %v2139_v30  ;;  %v1947_v5 = vpop.f32.mrf.mxu2 }
 0x2d8   : > { %v1984_v24 = vadd.f32 %v1947_v5, %v1850_v34 }
 0x2d9   : > { %v2374_v10 = vadd.f32 %v2373_v6, %v2279_v18  ;;  %v2413_v54 = vmul.f32 %v2279_v18, %v2279_v18 }
 0x2db   : > { %v2444_v53 = vadd.f32 %v2443_v8, %v2413_v54  ;;  %v2243_v59 = vpop.f32.mrf.mxu0 }
 0x2dc   : > { %v2103_v58 = vpop.f32.mrf.mxu3  ;;  %v1818_v57 = vpop.f32.mrf.mxu1 }
 0x2dd   : > { %v2140_v1 = vadd.f32 %v2103_v58, %v1984_v24  ;;  %v1852_v25 = vadd.f32 %v1818_v57, %v3920_v45 }
 0x2df   : > { %v2280_v0 = vadd.f32 %v2243_v59, %v2140_v1  ;;  %v1950_v42 = vpop.f32.mrf.mxu2 }
 0x2e0   : > { %v1985_v62 = vadd.f32 %v1950_v42, %v1851_v12 }
 0x2e1   : > { %v2904_v27 = vpack.c.bf16 %v2280_v0, %v2279_v18  ;;  %v2375_v38 = vadd.f32 %v2374_v10, %v2280_v0  ;;  %v2414_v7 = vmul.f32 %v2280_v0, %v2280_v0 }
 0x2e3   : > { %2924 = vst [vmem:[%s3937_s18 + $0x70] sm:$0xff] %v2904_v27   ;;  %v2445_v63 = vadd.f32 %v2444_v53, %v2414_v7  ;;  %v2246_v22 = vpop.f32.mrf.mxu0 }
 0x2e4   : > { %v2106_v60 = vpop.f32.mrf.mxu3 }
 0x2e5   : > { %v2141_v47 = vadd.f32 %v2106_v60, %v1985_v62 }
 0x2e7   : > { %v2281_v29 = vadd.f32 %v2246_v22, %v2141_v47  ;;  %v1952_v41 = vpop.f32.mrf.mxu2 }
 0x2e8   : > { %v1986_v9 = vadd.f32 %v1952_v41, %v1852_v25 }
 0x2e9   : > { %v2376_v32 = vadd.f32 %v2375_v38, %v2281_v29  ;;  %v2415_v4 = vmul.f32 %v2281_v29, %v2281_v29 }
 0x2eb   : > { %v2446_v2 = vadd.f32 %v2445_v63, %v2415_v4  ;;  %v2248_v37 = vpop.f32.mrf.mxu0 }
 0x2ec   : > { %v2108_v31 = vpop.f32.mrf.mxu3 }
 0x2ed   : > { %v2142_v43 = vadd.f32 %v2108_v31, %v1986_v9 }
 0x2ef   : > { %v2282_v35 = vadd.f32 %v2248_v37, %v2142_v43 }
 0x2f1   : > { %v2909_v15 = vpack.c.bf16 %v2282_v35, %v2281_v29  ;;  %v2377_v23 = vadd.f32 %v2376_v32, %v2282_v35  ;;  %v2416_v52 = vmul.f32 %v2282_v35, %v2282_v35 }
 0x2f3   : > { %2925 = vst [vmem:[%s3937_s18 + $0x78] sm:$0xff] %v2909_v15   ;;  %v2378_v17 = vrot.slane %v2377_v23, 4  ;;  %v2447_v44 = vadd.f32 %v2446_v2, %v2416_v52 }
 0x2f5   : > { %v2379_v49 = vadd.f32 %v2378_v17, %v2377_v23  ;;  %v2448_v13 = vrot.slane %v2447_v44, 4 }
 0x2f7   : > { %v2380_v45 = vrot.slane %v2379_v49, 2  ;;  %v2449_v36 = vadd.f32 %v2448_v13, %v2447_v44 }
 0x2f9   : > { %v2381_v48 = vadd.f32 %v2380_v45, %v2379_v49  ;;  %v2450_v16 = vrot.slane %v2449_v36, 2 }
 0x2fb   : > { %v2382_v28 = vrot.slane %v2381_v48, 1  ;;  %v2451_v46 = vadd.f32 %v2450_v16, %v2449_v36 }
 0x2fd   : > { %v2383_v55 = vadd.f32 %v2382_v28, %v2381_v48  ;;  %v2452_v20 = vrot.slane %v2451_v46, 1 }
 0x2ff   : > { %2384 = vst [vmem:[%s211_s21] sm:$0x1] %v2383_v55  ;;  %v2453_v11 = vadd.f32 %v2452_v20, %v2451_v46 }
 0x301   : > { %2454 = vst [vmem:[%s214_s24] sm:$0x1] %v2453_v11 }
 0x302 PF: > { %s15_s15 = sadd.s32 1, %s2952_s15  }
 0x303   : > { %p12_p4 = scmp.ge.s32.totalorder %s15_s15, 4  }
 0x305   :  { %14 = sbr.rel (!%p12_p4) target bundleno = 1 (0x1), region = 90 }

// kernel: basic_block_forward.9
= control target key start
LH: loop header
LB: loop body
LE: loop exit
PB: predicated region body
PF: predicated region fallthrough
CT: control target
= control target key end

     0   :  { %s1788_s0 = inlined_call_operand.vmem [shape: bf16[512,128], index: 0, kind: input, shape index: {}]   ;;  %s1789_s1 = inlined_call_operand.vmem [shape: f32[1,128], index: 1, kind: input, shape index: {}]   ;;  %s1790_s2 = inlined_call_operand.vmem [shape: f32[1,128], index: 2, kind: input, shape index: {}]   ;;  %s1791_s3 = inlined_call_operand.vmem [shape: bf16[512,128], index: 3, kind: input, shape index: {}]   ;;  %s1792_s4 = inlined_call_operand.vmem [shape: f32[1,128], index: 4, kind: input, shape index: {}]   ;;  %s1793_s5 = inlined_call_operand.vmem [shape: f32[1,128], index: 5, kind: input, shape index: {}]   ;;  %s1794_s6 = inlined_call_operand.vmem [shape: f32[512,128], index: 6, kind: output, shape index: {}]  }
   0x1   :  { %v748_v0 = vld [vmem:[%s1788_s0] sm:$0xff]   ;;  %v1003_v11 = vld [vmem:[%s1788_s0 + $0x8] sm:$0xff]   ;;  %v1004_v17 = vld [vmem:[%s1788_s0 + $0x10] sm:$0xff]  }
   0x2   :  { %v1114_v1 = vld [vmem:[%s1789_s1] ss:$0 sm:$0xff]  ;;  %v749_v2 = vunpack.c.l.bf16 %v748_v0  ;;  %v750_v5 = vunpack.c.h.bf16 %v748_v0  ;;  %v1034_v12 = vld [vmem:[%s1791_s3 + $0x8] sm:$0xff]   ;;  %v753_v15 = vunpack.c.l.bf16 %v1003_v11  ;;  %v1035_v18 = vld [vmem:[%s1791_s3 + $0x10] sm:$0xff]   ;;  %v754_v22 = vunpack.c.h.bf16 %v1003_v11 }
   0x3   :  { %v1119_v3 = vld [vmem:[%s1790_s2] ss:$0 sm:$0xff]  ;;  %v881_v16 = vunpack.c.l.bf16 %v1034_v12  ;;  %v882_v23 = vunpack.c.h.bf16 %v1034_v12  ;;  %v757_v26 = vunpack.c.l.bf16 %v1004_v17  ;;  %v885_v27 = vunpack.c.l.bf16 %v1035_v18  ;;  %v1005_v32 = vld [vmem:[%s1788_s0 + $0x18] sm:$0xff]  }
   0x4   :  { %v876_v4 = vld [vmem:[%s1791_s3] sm:$0xff]   ;;  %v155_v9 = vmul.f32 %v1114_v1, %v749_v2  ;;  %v156_v10 = vmul.f32 %v1114_v1, %v750_v5  ;;  %v157_v24 = vmul.f32 %v1114_v1, %v753_v15  ;;  %v158_v30 = vmul.f32 %v1114_v1, %v754_v22  ;;  %v1036_v45 = vld [vmem:[%s1791_s3 + $0x18] sm:$0xff]  }
   0x5   :  { %v877_v6 = vunpack.c.l.bf16 %v876_v4  ;;  %v1127_v7 = vld [vmem:[%s1792_s4] ss:$0 sm:$0xff]  ;;  %v878_v8 = vunpack.c.h.bf16 %v876_v4  ;;  %v159_v34 = vmul.f32 %v1114_v1, %v757_v26  ;;  %v758_v36 = vunpack.c.h.bf16 %v1004_v17 }
   0x6   :  { %v223_v19 = vadd.f32 %v1119_v3, %v155_v9  ;;  %v1149_v20 = vld [vmem:[%s1793_s5] ss:$0 sm:$0xff]  ;;  %v224_v21 = vadd.f32 %v1119_v3, %v156_v10  ;;  %v421_v25 = vmul.f32 %v1127_v7, %v881_v16  ;;  %v422_v31 = vmul.f32 %v1127_v7, %v882_v23  ;;  %v1038_v16 = vld [vmem:[%s1791_s3 + $0x28] sm:$0xff]  }
   0x7   :  { %v419_v13 = vmul.f32 %v1127_v7, %v877_v6  ;;  %v420_v14 = vmul.f32 %v1127_v7, %v878_v8  ;;  %v225_v33 = vadd.f32 %v1119_v3, %v157_v24  ;;  %v423_v35 = vmul.f32 %v1127_v7, %v885_v27  ;;  %v1006_v58 = vld [vmem:[%s1788_s0 + $0x20] sm:$0xff]   ;;  %v1007_v6 = vld [vmem:[%s1788_s0 + $0x28] sm:$0xff]  }
   0x8   :  { %v226_v39 = vadd.f32 %v1119_v3, %v158_v30  ;;  %v886_v40 = vunpack.c.h.bf16 %v1035_v18  ;;  %v227_v42 = vadd.f32 %v1119_v3, %v159_v34  ;;  %v160_v43 = vmul.f32 %v1114_v1, %v758_v36  ;;  %v1037_v59 = vld [vmem:[%s1791_s3 + $0x20] sm:$0xff]   ;;  %v1008_v30 = vld [vmem:[%s1788_s0 + $0x30] sm:$0xff]  }
   0x9   :  { %v483_v28 = vadd.f32 %v419_v13, %v223_v19  ;;  %v484_v29 = vadd.f32 %v420_v14, %v224_v21  ;;  %v485_v41 = vadd.f32 %v421_v25, %v225_v33  ;;  %v761_v44 = vunpack.c.l.bf16 %v1005_v32 }
   0xa   :  { %v486_v48 = vadd.f32 %v422_v31, %v226_v39  ;;  %v424_v49 = vmul.f32 %v1127_v7, %v886_v40  ;;  %v487_v51 = vadd.f32 %v423_v35, %v227_v42  ;;  %v228_v52 = vadd.f32 %v1119_v3, %v160_v43  ;;  %v1039_v35 = vld [vmem:[%s1791_s3 + $0x30] sm:$0xff]  }
   0xb   :  { %v551_v37 = vadd.f32 %v1149_v20, %v483_v28  ;;  %v552_v38 = vadd.f32 %v1149_v20, %v484_v29  ;;  %v553_v50 = vadd.f32 %v1149_v20, %v485_v41  ;;  %v161_v53 = vmul.f32 %v1114_v1, %v761_v44 }
   0xc   :  { %v554_v54 = vadd.f32 %v1149_v20, %v486_v48  ;;  %v889_v55 = vunpack.c.l.bf16 %v1036_v45  ;;  %v762_v56 = vunpack.c.h.bf16 %v1005_v32  ;;  %v890_v57 = vunpack.c.h.bf16 %v1036_v45 }
   0xd   :  { %v615_v46 = vmax.f32 %v551_v37, 0.0  ;;  %v616_v47 = vmax.f32 %v552_v38, 0.0  ;;  %v617_v60 = vmax.f32 %v553_v50, 0.0  ;;  %v555_v61 = vadd.f32 %v1149_v20, %v487_v51 }
   0xe   :  { %v488_v62 = vadd.f32 %v424_v49, %v228_v52  ;;  %v229_v63 = vadd.f32 %v1119_v3, %v161_v53  ;;  %v618_v0 = vmax.f32 %v554_v54, 0.0  ;;  %v425_v2 = vmul.f32 %v1127_v7, %v889_v55  ;;  %v1009_v52 = vld [vmem:[%s1788_s0 + $0x38] sm:$0xff]  }
   0xf   :  { %679 = vst [vmem:[%s1794_s6] sm:$0xff] %v615_v46  ;;  %v162_v4 = vmul.f32 %v1114_v1, %v762_v56  ;;  %v426_v5 = vmul.f32 %v1127_v7, %v890_v57  ;;  %v619_v8 = vmax.f32 %v555_v61, 0.0  ;;  %v765_v10 = vunpack.c.l.bf16 %v1006_v58  ;;  %v1040_v53 = vld [vmem:[%s1791_s3 + $0x38] sm:$0xff]  }
  0x10   :  { %680 = vst [vmem:[%s1794_s6 + $0x8] sm:$0xff] %v616_v47  ;;  %v556_v9 = vadd.f32 %v1149_v20, %v488_v62  ;;  %v893_v11 = vunpack.c.l.bf16 %v1037_v59  ;;  %v489_v12 = vadd.f32 %v425_v2, %v229_v63  ;;  %v766_v14 = vunpack.c.h.bf16 %v1006_v58  ;;  %v1010_v62 = vld [vmem:[%s1788_s0 + $0x40] sm:$0xff]  }
  0x11   :  { %681 = vst [vmem:[%s1794_s6 + $0x10] sm:$0xff] %v617_v60  ;;  %v230_v13 = vadd.f32 %v1119_v3, %v162_v4  ;;  %v894_v15 = vunpack.c.h.bf16 %v1037_v59  ;;  %v163_v18 = vmul.f32 %v1114_v1, %v765_v10  ;;  %v769_v21 = vunpack.c.l.bf16 %v1007_v6  ;;  %v1041_v10 = vld [vmem:[%s1791_s3 + $0x40] sm:$0xff]  }
  0x12   :  { %682 = vst [vmem:[%s1794_s6 + $0x18] sm:$0xff] %v618_v0  ;;  %v620_v17 = vmax.f32 %v556_v9, 0.0  ;;  %v427_v19 = vmul.f32 %v1127_v7, %v893_v11  ;;  %v557_v22 = vadd.f32 %v1149_v20, %v489_v12  ;;  %v164_v24 = vmul.f32 %v1114_v1, %v766_v14 }
  0x13   :  { %683 = vst [vmem:[%s1794_s6 + $0x20] sm:$0xff] %v619_v8  ;;  %v490_v23 = vadd.f32 %v426_v5, %v230_v13  ;;  %v428_v25 = vmul.f32 %v1127_v7, %v894_v15  ;;  %v231_v26 = vadd.f32 %v1119_v3, %v163_v18  ;;  %v165_v27 = vmul.f32 %v1114_v1, %v769_v21 }
  0x14   :  { %684 = vst [vmem:[%s1794_s6 + $0x28] sm:$0xff] %v620_v17  ;;  %v897_v28 = vunpack.c.l.bf16 %v1038_v16  ;;  %v770_v29 = vunpack.c.h.bf16 %v1007_v6  ;;  %v621_v31 = vmax.f32 %v557_v22, 0.0  ;;  %v232_v33 = vadd.f32 %v1119_v3, %v164_v24  ;;  %v1011_v24 = vld [vmem:[%s1788_s0 + $0x48] sm:$0xff]  }
  0x15   :  { %v558_v32 = vadd.f32 %v1149_v20, %v490_v23  ;;  %v898_v34 = vunpack.c.h.bf16 %v1038_v16  ;;  %v491_v36 = vadd.f32 %v427_v19, %v231_v26  ;;  %v233_v37 = vadd.f32 %v1119_v3, %v165_v27 }
  0x16   :  { %v429_v38 = vmul.f32 %v1127_v7, %v897_v28  ;;  %v166_v39 = vmul.f32 %v1114_v1, %v770_v29  ;;  %685 = vst [vmem:[%s1794_s6 + $0x30] sm:$0xff] %v621_v31  ;;  %v492_v41 = vadd.f32 %v428_v25, %v232_v33  ;;  %v773_v43 = vunpack.c.l.bf16 %v1008_v30  ;;  %v1042_v29 = vld [vmem:[%s1791_s3 + $0x48] sm:$0xff]  }
  0x17   :  { %v622_v40 = vmax.f32 %v558_v32, 0.0  ;;  %v430_v42 = vmul.f32 %v1127_v7, %v898_v34  ;;  %v559_v44 = vadd.f32 %v1149_v20, %v491_v36  ;;  %v901_v47 = vunpack.c.l.bf16 %v1039_v35 }
  0x18   :  { %v493_v45 = vadd.f32 %v429_v38, %v233_v37  ;;  %v234_v46 = vadd.f32 %v1119_v3, %v166_v39  ;;  %v560_v48 = vadd.f32 %v1149_v20, %v492_v41  ;;  %v167_v49 = vmul.f32 %v1114_v1, %v773_v43 }
  0x19   :  { %686 = vst [vmem:[%s1794_s6 + $0x38] sm:$0xff] %v622_v40  ;;  %v774_v50 = vunpack.c.h.bf16 %v1008_v30  ;;  %v902_v51 = vunpack.c.h.bf16 %v1039_v35  ;;  %v623_v54 = vmax.f32 %v559_v44, 0.0  ;;  %v431_v57 = vmul.f32 %v1127_v7, %v901_v47  ;;  %v1043_v47 = vld [vmem:[%s1791_s3 + $0x50] sm:$0xff]  }
  0x1a   :  { %v561_v55 = vadd.f32 %v1149_v20, %v493_v45  ;;  %v494_v56 = vadd.f32 %v430_v42, %v234_v46  ;;  %v624_v58 = vmax.f32 %v560_v48, 0.0  ;;  %v235_v59 = vadd.f32 %v1119_v3, %v167_v49  ;;  %v1012_v46 = vld [vmem:[%s1788_s0 + $0x50] sm:$0xff]  }
  0x1b   :  { %v168_v60 = vmul.f32 %v1114_v1, %v774_v50  ;;  %v432_v61 = vmul.f32 %v1127_v7, %v902_v51  ;;  %687 = vst [vmem:[%s1794_s6 + $0x40] sm:$0xff] %v623_v54  ;;  %v777_v2 = vunpack.c.l.bf16 %v1009_v52  ;;  %v905_v4 = vunpack.c.l.bf16 %v1040_v53 }
  0x1c   :  { %v625_v63 = vmax.f32 %v561_v55, 0.0  ;;  %v562_v0 = vadd.f32 %v1149_v20, %v494_v56  ;;  %688 = vst [vmem:[%s1794_s6 + $0x48] sm:$0xff] %v624_v58  ;;  %v495_v5 = vadd.f32 %v431_v57, %v235_v59  ;;  %v778_v8 = vunpack.c.h.bf16 %v1009_v52  ;;  %v1013_v56 = vld [vmem:[%s1788_s0 + $0x58] sm:$0xff]  }
  0x1d   :  { %v236_v6 = vadd.f32 %v1119_v3, %v168_v60  ;;  %v906_v9 = vunpack.c.h.bf16 %v1040_v53  ;;  %v169_v12 = vmul.f32 %v1114_v1, %v777_v2  ;;  %v433_v13 = vmul.f32 %v1127_v7, %v905_v4  ;;  %v1044_v2 = vld [vmem:[%s1791_s3 + $0x58] sm:$0xff]  }
  0x1e   :  { %689 = vst [vmem:[%s1794_s6 + $0x50] sm:$0xff] %v625_v63  ;;  %v626_v11 = vmax.f32 %v562_v0, 0.0  ;;  %v781_v14 = vunpack.c.l.bf16 %v1010_v62  ;;  %v563_v15 = vadd.f32 %v1149_v20, %v495_v5  ;;  %v170_v17 = vmul.f32 %v1114_v1, %v778_v8 }
  0x1f   :  { %v496_v16 = vadd.f32 %v432_v61, %v236_v6  ;;  %v434_v18 = vmul.f32 %v1127_v7, %v906_v9  ;;  %v237_v19 = vadd.f32 %v1119_v3, %v169_v12  ;;  %v909_v22 = vunpack.c.l.bf16 %v1041_v10 }
  0x20   :  { %690 = vst [vmem:[%s1794_s6 + $0x58] sm:$0xff] %v626_v11  ;;  %v171_v21 = vmul.f32 %v1114_v1, %v781_v14  ;;  %v782_v23 = vunpack.c.h.bf16 %v1010_v62  ;;  %v627_v25 = vmax.f32 %v563_v15, 0.0  ;;  %v238_v27 = vadd.f32 %v1119_v3, %v170_v17  ;;  %v1014_v17 = vld [vmem:[%s1788_s0 + $0x60] sm:$0xff]  }
  0x21   :  { %v564_v26 = vadd.f32 %v1149_v20, %v496_v16  ;;  %v910_v28 = vunpack.c.h.bf16 %v1041_v10  ;;  %v497_v30 = vadd.f32 %v433_v13, %v237_v19  ;;  %v435_v32 = vmul.f32 %v1127_v7, %v909_v22 }
  0x22   :  { %v239_v31 = vadd.f32 %v1119_v3, %v171_v21  ;;  %v172_v33 = vmul.f32 %v1114_v1, %v782_v23  ;;  %691 = vst [vmem:[%s1794_s6 + $0x60] sm:$0xff] %v627_v25  ;;  %v498_v35 = vadd.f32 %v434_v18, %v238_v27  ;;  %v785_v37 = vunpack.c.l.bf16 %v1011_v24  ;;  %v1045_v23 = vld [vmem:[%s1791_s3 + $0x60] sm:$0xff]  }
  0x23   :  { %v628_v34 = vmax.f32 %v564_v26, 0.0  ;;  %v436_v36 = vmul.f32 %v1127_v7, %v910_v28  ;;  %v565_v38 = vadd.f32 %v1149_v20, %v497_v30  ;;  %v913_v41 = vunpack.c.l.bf16 %v1042_v29 }
  0x24   :  { %v499_v39 = vadd.f32 %v435_v32, %v239_v31  ;;  %v240_v40 = vadd.f32 %v1119_v3, %v172_v33  ;;  %v566_v42 = vadd.f32 %v1149_v20, %v498_v35  ;;  %v173_v43 = vmul.f32 %v1114_v1, %v785_v37 }
  0x25   :  { %692 = vst [vmem:[%s1794_s6 + $0x68] sm:$0xff] %v628_v34  ;;  %v786_v44 = vunpack.c.h.bf16 %v1011_v24  ;;  %v914_v45 = vunpack.c.h.bf16 %v1042_v29  ;;  %v629_v48 = vmax.f32 %v565_v38, 0.0  ;;  %v437_v51 = vmul.f32 %v1127_v7, %v913_v41  ;;  %v1046_v41 = vld [vmem:[%s1791_s3 + $0x68] sm:$0xff]  }
  0x26   :  { %v567_v49 = vadd.f32 %v1149_v20, %v499_v39  ;;  %v500_v50 = vadd.f32 %v436_v36, %v240_v40  ;;  %v630_v52 = vmax.f32 %v566_v42, 0.0  ;;  %v241_v53 = vadd.f32 %v1119_v3, %v173_v43  ;;  %v1015_v40 = vld [vmem:[%s1788_s0 + $0x68] sm:$0xff]  }
  0x27   :  { %v174_v54 = vmul.f32 %v1114_v1, %v786_v44  ;;  %v438_v55 = vmul.f32 %v1127_v7, %v914_v45  ;;  %693 = vst [vmem:[%s1794_s6 + $0x70] sm:$0xff] %v629_v48  ;;  %v789_v59 = vunpack.c.l.bf16 %v1012_v46  ;;  %v917_v60 = vunpack.c.l.bf16 %v1043_v47 }
  0x28   :  { %v631_v57 = vmax.f32 %v567_v49, 0.0  ;;  %v568_v58 = vadd.f32 %v1149_v20, %v500_v50  ;;  %694 = vst [vmem:[%s1794_s6 + $0x78] sm:$0xff] %v630_v52  ;;  %v501_v61 = vadd.f32 %v437_v51, %v241_v53  ;;  %v790_v63 = vunpack.c.h.bf16 %v1012_v46  ;;  %v1016_v50 = vld [vmem:[%s1788_s0 + $0x70] sm:$0xff]  }
  0x29   :  { %v242_v62 = vadd.f32 %v1119_v3, %v174_v54  ;;  %v918_v0 = vunpack.c.h.bf16 %v1043_v47  ;;  %v175_v5 = vmul.f32 %v1114_v1, %v789_v59  ;;  %v439_v6 = vmul.f32 %v1127_v7, %v917_v60  ;;  %v1047_v59 = vld [vmem:[%s1791_s3 + $0x70] sm:$0xff]  }
  0x2a   :  { %695 = vst [vmem:[%s1794_s6 + $0x80] sm:$0xff] %v631_v57  ;;  %v632_v4 = vmax.f32 %v568_v58, 0.0  ;;  %v793_v8 = vunpack.c.l.bf16 %v1013_v56  ;;  %v569_v9 = vadd.f32 %v1149_v20, %v501_v61  ;;  %v176_v11 = vmul.f32 %v1114_v1, %v790_v63 }
  0x2b   :  { %v502_v10 = vadd.f32 %v438_v55, %v242_v62  ;;  %v440_v12 = vmul.f32 %v1127_v7, %v918_v0  ;;  %v243_v13 = vadd.f32 %v1119_v3, %v175_v5  ;;  %v921_v15 = vunpack.c.l.bf16 %v1044_v2 }
  0x2c   :  { %696 = vst [vmem:[%s1794_s6 + $0x88] sm:$0xff] %v632_v4  ;;  %v177_v14 = vmul.f32 %v1114_v1, %v793_v8  ;;  %v794_v16 = vunpack.c.h.bf16 %v1013_v56  ;;  %v633_v18 = vmax.f32 %v569_v9, 0.0  ;;  %v244_v21 = vadd.f32 %v1119_v3, %v176_v11  ;;  %v1017_v11 = vld [vmem:[%s1788_s0 + $0x78] sm:$0xff]  }
  0x2d   :  { %v570_v19 = vadd.f32 %v1149_v20, %v502_v10  ;;  %v922_v22 = vunpack.c.h.bf16 %v1044_v2  ;;  %v503_v24 = vadd.f32 %v439_v6, %v243_v13  ;;  %v441_v26 = vmul.f32 %v1127_v7, %v921_v15 }
  0x2e   :  { %v245_v25 = vadd.f32 %v1119_v3, %v177_v14  ;;  %v178_v27 = vmul.f32 %v1114_v1, %v794_v16  ;;  %697 = vst [vmem:[%s1794_s6 + $0x90] sm:$0xff] %v633_v18  ;;  %v504_v29 = vadd.f32 %v440_v12, %v244_v21  ;;  %v797_v31 = vunpack.c.l.bf16 %v1014_v17  ;;  %v1048_v16 = vld [vmem:[%s1791_s3 + $0x78] sm:$0xff]  }
  0x2f   :  { %v634_v28 = vmax.f32 %v570_v19, 0.0  ;;  %v442_v30 = vmul.f32 %v1127_v7, %v922_v22  ;;  %v571_v32 = vadd.f32 %v1149_v20, %v503_v24  ;;  %v925_v35 = vunpack.c.l.bf16 %v1045_v23 }
  0x30   :  { %v505_v33 = vadd.f32 %v441_v26, %v245_v25  ;;  %v246_v34 = vadd.f32 %v1119_v3, %v178_v27  ;;  %v572_v36 = vadd.f32 %v1149_v20, %v504_v29  ;;  %v179_v37 = vmul.f32 %v1114_v1, %v797_v31 }
  0x31   :  { %698 = vst [vmem:[%s1794_s6 + $0x98] sm:$0xff] %v634_v28  ;;  %v798_v38 = vunpack.c.h.bf16 %v1014_v17  ;;  %v926_v39 = vunpack.c.h.bf16 %v1045_v23  ;;  %v635_v42 = vmax.f32 %v571_v32, 0.0  ;;  %v443_v45 = vmul.f32 %v1127_v7, %v925_v35  ;;  %v1049_v35 = vld [vmem:[%s1791_s3 + $0x80] sm:$0xff]  }
  0x32   :  { %v573_v43 = vadd.f32 %v1149_v20, %v505_v33  ;;  %v506_v44 = vadd.f32 %v442_v30, %v246_v34  ;;  %v636_v46 = vmax.f32 %v572_v36, 0.0  ;;  %v247_v47 = vadd.f32 %v1119_v3, %v179_v37  ;;  %v1018_v34 = vld [vmem:[%s1788_s0 + $0x80] sm:$0xff]  }
  0x33   :  { %v180_v48 = vmul.f32 %v1114_v1, %v798_v38  ;;  %v444_v49 = vmul.f32 %v1127_v7, %v926_v39  ;;  %699 = vst [vmem:[%s1794_s6 + $0xa0] sm:$0xff] %v635_v42  ;;  %v801_v53 = vunpack.c.l.bf16 %v1015_v40  ;;  %v929_v54 = vunpack.c.l.bf16 %v1046_v41 }
  0x34   :  { %v637_v51 = vmax.f32 %v573_v43, 0.0  ;;  %v574_v52 = vadd.f32 %v1149_v20, %v506_v44  ;;  %700 = vst [vmem:[%s1794_s6 + $0xa8] sm:$0xff] %v636_v46  ;;  %v507_v55 = vadd.f32 %v443_v45, %v247_v47  ;;  %v802_v57 = vunpack.c.h.bf16 %v1015_v40  ;;  %v1019_v44 = vld [vmem:[%s1788_s0 + $0x88] sm:$0xff]  }
  0x35   :  { %v248_v56 = vadd.f32 %v1119_v3, %v180_v48  ;;  %v930_v58 = vunpack.c.h.bf16 %v1046_v41  ;;  %v181_v61 = vmul.f32 %v1114_v1, %v801_v53  ;;  %v445_v62 = vmul.f32 %v1127_v7, %v929_v54  ;;  %v1050_v53 = vld [vmem:[%s1791_s3 + $0x88] sm:$0xff]  }
  0x36   :  { %701 = vst [vmem:[%s1794_s6 + $0xb0] sm:$0xff] %v637_v51  ;;  %v638_v60 = vmax.f32 %v574_v52, 0.0  ;;  %v805_v63 = vunpack.c.l.bf16 %v1016_v50  ;;  %v575_v0 = vadd.f32 %v1149_v20, %v507_v55  ;;  %v182_v4 = vmul.f32 %v1114_v1, %v802_v57 }
  0x37   :  { %v508_v2 = vadd.f32 %v444_v49, %v248_v56  ;;  %v446_v5 = vmul.f32 %v1127_v7, %v930_v58  ;;  %v249_v6 = vadd.f32 %v1119_v3, %v181_v61  ;;  %v933_v9 = vunpack.c.l.bf16 %v1047_v59 }
  0x38   :  { %702 = vst [vmem:[%s1794_s6 + $0xb8] sm:$0xff] %v638_v60  ;;  %v183_v8 = vmul.f32 %v1114_v1, %v805_v63  ;;  %v806_v10 = vunpack.c.h.bf16 %v1016_v50  ;;  %v639_v12 = vmax.f32 %v575_v0, 0.0  ;;  %v250_v14 = vadd.f32 %v1119_v3, %v182_v4  ;;  %v1020_v4 = vld [vmem:[%s1788_s0 + $0x90] sm:$0xff]  }
  0x39   :  { %v576_v13 = vadd.f32 %v1149_v20, %v508_v2  ;;  %v934_v15 = vunpack.c.h.bf16 %v1047_v59  ;;  %v509_v17 = vadd.f32 %v445_v62, %v249_v6  ;;  %v447_v19 = vmul.f32 %v1127_v7, %v933_v9 }
  0x3a   :  { %v251_v18 = vadd.f32 %v1119_v3, %v183_v8  ;;  %v184_v21 = vmul.f32 %v1114_v1, %v806_v10  ;;  %703 = vst [vmem:[%s1794_s6 + $0xc0] sm:$0xff] %v639_v12  ;;  %v510_v23 = vadd.f32 %v446_v5, %v250_v14  ;;  %v809_v25 = vunpack.c.l.bf16 %v1017_v11  ;;  %v1051_v10 = vld [vmem:[%s1791_s3 + $0x90] sm:$0xff]  }
  0x3b   :  { %v640_v22 = vmax.f32 %v576_v13, 0.0  ;;  %v448_v24 = vmul.f32 %v1127_v7, %v934_v15  ;;  %v577_v26 = vadd.f32 %v1149_v20, %v509_v17  ;;  %v937_v29 = vunpack.c.l.bf16 %v1048_v16 }
  0x3c   :  { %v511_v27 = vadd.f32 %v447_v19, %v251_v18  ;;  %v252_v28 = vadd.f32 %v1119_v3, %v184_v21  ;;  %v578_v30 = vadd.f32 %v1149_v20, %v510_v23  ;;  %v185_v31 = vmul.f32 %v1114_v1, %v809_v25 }
  0x3d   :  { %704 = vst [vmem:[%s1794_s6 + $0xc8] sm:$0xff] %v640_v22  ;;  %v810_v32 = vunpack.c.h.bf16 %v1017_v11  ;;  %v938_v33 = vunpack.c.h.bf16 %v1048_v16  ;;  %v641_v36 = vmax.f32 %v577_v26, 0.0  ;;  %v449_v39 = vmul.f32 %v1127_v7, %v937_v29  ;;  %v1052_v29 = vld [vmem:[%s1791_s3 + $0x98] sm:$0xff]  }
  0x3e   :  { %v579_v37 = vadd.f32 %v1149_v20, %v511_v27  ;;  %v512_v38 = vadd.f32 %v448_v24, %v252_v28  ;;  %v642_v40 = vmax.f32 %v578_v30, 0.0  ;;  %v253_v41 = vadd.f32 %v1119_v3, %v185_v31  ;;  %v1021_v28 = vld [vmem:[%s1788_s0 + $0x98] sm:$0xff]  }
  0x3f   :  { %v186_v42 = vmul.f32 %v1114_v1, %v810_v32  ;;  %v450_v43 = vmul.f32 %v1127_v7, %v938_v33  ;;  %705 = vst [vmem:[%s1794_s6 + $0xd0] sm:$0xff] %v641_v36  ;;  %v813_v47 = vunpack.c.l.bf16 %v1018_v34  ;;  %v941_v48 = vunpack.c.l.bf16 %v1049_v35 }
  0x40   :  { %v643_v45 = vmax.f32 %v579_v37, 0.0  ;;  %v580_v46 = vadd.f32 %v1149_v20, %v512_v38  ;;  %706 = vst [vmem:[%s1794_s6 + $0xd8] sm:$0xff] %v642_v40  ;;  %v513_v49 = vadd.f32 %v449_v39, %v253_v41  ;;  %v814_v51 = vunpack.c.h.bf16 %v1018_v34  ;;  %v1022_v38 = vld [vmem:[%s1788_s0 + $0xa0] sm:$0xff]  }
  0x41   :  { %v254_v50 = vadd.f32 %v1119_v3, %v186_v42  ;;  %v942_v52 = vunpack.c.h.bf16 %v1049_v35  ;;  %v187_v55 = vmul.f32 %v1114_v1, %v813_v47  ;;  %v451_v56 = vmul.f32 %v1127_v7, %v941_v48  ;;  %v1053_v47 = vld [vmem:[%s1791_s3 + $0xa0] sm:$0xff]  }
  0x42   :  { %707 = vst [vmem:[%s1794_s6 + $0xe0] sm:$0xff] %v643_v45  ;;  %v644_v54 = vmax.f32 %v580_v46, 0.0  ;;  %v817_v57 = vunpack.c.l.bf16 %v1019_v44  ;;  %v581_v58 = vadd.f32 %v1149_v20, %v513_v49  ;;  %v188_v60 = vmul.f32 %v1114_v1, %v814_v51 }
  0x43   :  { %v514_v59 = vadd.f32 %v450_v43, %v254_v50  ;;  %v452_v61 = vmul.f32 %v1127_v7, %v942_v52  ;;  %v255_v62 = vadd.f32 %v1119_v3, %v187_v55  ;;  %v945_v0 = vunpack.c.l.bf16 %v1050_v53 }
  0x44   :  { %708 = vst [vmem:[%s1794_s6 + $0xe8] sm:$0xff] %v644_v54  ;;  %v189_v63 = vmul.f32 %v1114_v1, %v817_v57  ;;  %v818_v2 = vunpack.c.h.bf16 %v1019_v44  ;;  %v645_v5 = vmax.f32 %v581_v58, 0.0  ;;  %v256_v8 = vadd.f32 %v1119_v3, %v188_v60  ;;  %v1023_v60 = vld [vmem:[%s1788_s0 + $0xa8] sm:$0xff]  }
  0x45   :  { %v582_v6 = vadd.f32 %v1149_v20, %v514_v59  ;;  %v946_v9 = vunpack.c.h.bf16 %v1050_v53  ;;  %v515_v11 = vadd.f32 %v451_v56, %v255_v62  ;;  %v453_v13 = vmul.f32 %v1127_v7, %v945_v0 }
  0x46   :  { %v257_v12 = vadd.f32 %v1119_v3, %v189_v63  ;;  %v190_v14 = vmul.f32 %v1114_v1, %v818_v2  ;;  %709 = vst [vmem:[%s1794_s6 + $0xf0] sm:$0xff] %v645_v5  ;;  %v516_v16 = vadd.f32 %v452_v61, %v256_v8  ;;  %v821_v18 = vunpack.c.l.bf16 %v1020_v4  ;;  %v1054_v2 = vld [vmem:[%s1791_s3 + $0xa8] sm:$0xff]  }
  0x47   :  { %v646_v15 = vmax.f32 %v582_v6, 0.0  ;;  %v454_v17 = vmul.f32 %v1127_v7, %v946_v9  ;;  %v583_v19 = vadd.f32 %v1149_v20, %v515_v11  ;;  %v949_v23 = vunpack.c.l.bf16 %v1051_v10 }
  0x48   :  { %v517_v21 = vadd.f32 %v453_v13, %v257_v12  ;;  %v258_v22 = vadd.f32 %v1119_v3, %v190_v14  ;;  %v584_v24 = vadd.f32 %v1149_v20, %v516_v16  ;;  %v191_v25 = vmul.f32 %v1114_v1, %v821_v18 }
  0x49   :  { %710 = vst [vmem:[%s1794_s6 + $0xf8] sm:$0xff] %v646_v15  ;;  %v822_v26 = vunpack.c.h.bf16 %v1020_v4  ;;  %v950_v27 = vunpack.c.h.bf16 %v1051_v10  ;;  %v647_v30 = vmax.f32 %v583_v19, 0.0  ;;  %v455_v33 = vmul.f32 %v1127_v7, %v949_v23  ;;  %v1055_v23 = vld [vmem:[%s1791_s3 + $0xb0] sm:$0xff]  }
  0x4a   :  { %v585_v31 = vadd.f32 %v1149_v20, %v517_v21  ;;  %v518_v32 = vadd.f32 %v454_v17, %v258_v22  ;;  %v648_v34 = vmax.f32 %v584_v24, 0.0  ;;  %v259_v35 = vadd.f32 %v1119_v3, %v191_v25  ;;  %v1024_v22 = vld [vmem:[%s1788_s0 + $0xb0] sm:$0xff]  }
  0x4b   :  { %v192_v36 = vmul.f32 %v1114_v1, %v822_v26  ;;  %v456_v37 = vmul.f32 %v1127_v7, %v950_v27  ;;  %711 = vst [vmem:[%s1794_s6 + $0x100] sm:$0xff] %v647_v30  ;;  %v825_v41 = vunpack.c.l.bf16 %v1021_v28  ;;  %v953_v42 = vunpack.c.l.bf16 %v1052_v29 }
  0x4c   :  { %v649_v39 = vmax.f32 %v585_v31, 0.0  ;;  %v586_v40 = vadd.f32 %v1149_v20, %v518_v32  ;;  %712 = vst [vmem:[%s1794_s6 + $0x108] sm:$0xff] %v648_v34  ;;  %v519_v43 = vadd.f32 %v455_v33, %v259_v35  ;;  %v826_v45 = vunpack.c.h.bf16 %v1021_v28  ;;  %v1025_v32 = vld [vmem:[%s1788_s0 + $0xb8] sm:$0xff]  }
  0x4d   :  { %v260_v44 = vadd.f32 %v1119_v3, %v192_v36  ;;  %v954_v46 = vunpack.c.h.bf16 %v1052_v29  ;;  %v193_v49 = vmul.f32 %v1114_v1, %v825_v41  ;;  %v457_v50 = vmul.f32 %v1127_v7, %v953_v42  ;;  %v1056_v41 = vld [vmem:[%s1791_s3 + $0xb8] sm:$0xff]  }
  0x4e   :  { %713 = vst [vmem:[%s1794_s6 + $0x110] sm:$0xff] %v649_v39  ;;  %v650_v48 = vmax.f32 %v586_v40, 0.0  ;;  %v829_v51 = vunpack.c.l.bf16 %v1022_v38  ;;  %v587_v52 = vadd.f32 %v1149_v20, %v519_v43  ;;  %v194_v54 = vmul.f32 %v1114_v1, %v826_v45 }
  0x4f   :  { %v520_v53 = vadd.f32 %v456_v37, %v260_v44  ;;  %v458_v55 = vmul.f32 %v1127_v7, %v954_v46  ;;  %v261_v56 = vadd.f32 %v1119_v3, %v193_v49  ;;  %v957_v58 = vunpack.c.l.bf16 %v1053_v47 }
  0x50   :  { %714 = vst [vmem:[%s1794_s6 + $0x118] sm:$0xff] %v650_v48  ;;  %v195_v57 = vmul.f32 %v1114_v1, %v829_v51  ;;  %v830_v59 = vunpack.c.h.bf16 %v1022_v38  ;;  %v651_v61 = vmax.f32 %v587_v52, 0.0  ;;  %v262_v63 = vadd.f32 %v1119_v3, %v194_v54  ;;  %v1026_v54 = vld [vmem:[%s1788_s0 + $0xc0] sm:$0xff]  }
  0x51   :  { %v588_v62 = vadd.f32 %v1149_v20, %v520_v53  ;;  %v958_v0 = vunpack.c.h.bf16 %v1053_v47  ;;  %v521_v4 = vadd.f32 %v457_v50, %v261_v56  ;;  %v459_v6 = vmul.f32 %v1127_v7, %v957_v58 }
  0x52   :  { %v263_v5 = vadd.f32 %v1119_v3, %v195_v57  ;;  %v196_v8 = vmul.f32 %v1114_v1, %v830_v59  ;;  %715 = vst [vmem:[%s1794_s6 + $0x120] sm:$0xff] %v651_v61  ;;  %v522_v10 = vadd.f32 %v458_v55, %v262_v63  ;;  %v833_v12 = vunpack.c.l.bf16 %v1023_v60  ;;  %v1057_v59 = vld [vmem:[%s1791_s3 + $0xc0] sm:$0xff]  }
  0x53   :  { %v652_v9 = vmax.f32 %v588_v62, 0.0  ;;  %v460_v11 = vmul.f32 %v1127_v7, %v958_v0  ;;  %v589_v13 = vadd.f32 %v1149_v20, %v521_v4  ;;  %v961_v16 = vunpack.c.l.bf16 %v1054_v2 }
  0x54   :  { %v523_v14 = vadd.f32 %v459_v6, %v263_v5  ;;  %v264_v15 = vadd.f32 %v1119_v3, %v196_v8  ;;  %v590_v17 = vadd.f32 %v1149_v20, %v522_v10  ;;  %v197_v18 = vmul.f32 %v1114_v1, %v833_v12 }
  0x55   :  { %716 = vst [vmem:[%s1794_s6 + $0x128] sm:$0xff] %v652_v9  ;;  %v834_v19 = vunpack.c.h.bf16 %v1023_v60  ;;  %v962_v21 = vunpack.c.h.bf16 %v1054_v2  ;;  %v653_v24 = vmax.f32 %v589_v13, 0.0  ;;  %v461_v27 = vmul.f32 %v1127_v7, %v961_v16  ;;  %v1058_v16 = vld [vmem:[%s1791_s3 + $0xc8] sm:$0xff]  }
  0x56   :  { %v591_v25 = vadd.f32 %v1149_v20, %v523_v14  ;;  %v524_v26 = vadd.f32 %v460_v11, %v264_v15  ;;  %v654_v28 = vmax.f32 %v590_v17, 0.0  ;;  %v265_v29 = vadd.f32 %v1119_v3, %v197_v18  ;;  %v1027_v15 = vld [vmem:[%s1788_s0 + $0xc8] sm:$0xff]  }
  0x57   :  { %v198_v30 = vmul.f32 %v1114_v1, %v834_v19  ;;  %v462_v31 = vmul.f32 %v1127_v7, %v962_v21  ;;  %717 = vst [vmem:[%s1794_s6 + $0x130] sm:$0xff] %v653_v24  ;;  %v837_v35 = vunpack.c.l.bf16 %v1024_v22  ;;  %v965_v36 = vunpack.c.l.bf16 %v1055_v23 }
  0x58   :  { %v655_v33 = vmax.f32 %v591_v25, 0.0  ;;  %v592_v34 = vadd.f32 %v1149_v20, %v524_v26  ;;  %718 = vst [vmem:[%s1794_s6 + $0x138] sm:$0xff] %v654_v28  ;;  %v525_v37 = vadd.f32 %v461_v27, %v265_v29  ;;  %v838_v39 = vunpack.c.h.bf16 %v1024_v22  ;;  %v1028_v26 = vld [vmem:[%s1788_s0 + $0xd0] sm:$0xff]  }
  0x59   :  { %v266_v38 = vadd.f32 %v1119_v3, %v198_v30  ;;  %v966_v40 = vunpack.c.h.bf16 %v1055_v23  ;;  %v199_v43 = vmul.f32 %v1114_v1, %v837_v35  ;;  %v463_v44 = vmul.f32 %v1127_v7, %v965_v36  ;;  %v1059_v35 = vld [vmem:[%s1791_s3 + $0xd0] sm:$0xff]  }
  0x5a   :  { %719 = vst [vmem:[%s1794_s6 + $0x140] sm:$0xff] %v655_v33  ;;  %v656_v42 = vmax.f32 %v592_v34, 0.0  ;;  %v841_v45 = vunpack.c.l.bf16 %v1025_v32  ;;  %v593_v46 = vadd.f32 %v1149_v20, %v525_v37  ;;  %v200_v48 = vmul.f32 %v1114_v1, %v838_v39 }
  0x5b   :  { %v526_v47 = vadd.f32 %v462_v31, %v266_v38  ;;  %v464_v49 = vmul.f32 %v1127_v7, %v966_v40  ;;  %v267_v50 = vadd.f32 %v1119_v3, %v199_v43  ;;  %v969_v52 = vunpack.c.l.bf16 %v1056_v41 }
  0x5c   :  { %720 = vst [vmem:[%s1794_s6 + $0x148] sm:$0xff] %v656_v42  ;;  %v201_v51 = vmul.f32 %v1114_v1, %v841_v45  ;;  %v842_v53 = vunpack.c.h.bf16 %v1025_v32  ;;  %v657_v55 = vmax.f32 %v593_v46, 0.0  ;;  %v268_v57 = vadd.f32 %v1119_v3, %v200_v48  ;;  %v1029_v48 = vld [vmem:[%s1788_s0 + $0xd8] sm:$0xff]  }
  0x5d   :  { %v594_v56 = vadd.f32 %v1149_v20, %v526_v47  ;;  %v970_v58 = vunpack.c.h.bf16 %v1056_v41  ;;  %v527_v60 = vadd.f32 %v463_v44, %v267_v50  ;;  %v465_v62 = vmul.f32 %v1127_v7, %v969_v52  ;;  %v1060_v52 = vld [vmem:[%s1791_s3 + $0xd8] sm:$0xff]  }
  0x5e   :  { %v269_v61 = vadd.f32 %v1119_v3, %v201_v51  ;;  %v202_v63 = vmul.f32 %v1114_v1, %v842_v53  ;;  %721 = vst [vmem:[%s1794_s6 + $0x150] sm:$0xff] %v657_v55  ;;  %v528_v2 = vadd.f32 %v464_v49, %v268_v57  ;;  %v845_v5 = vunpack.c.l.bf16 %v1026_v54  ;;  %v1661_v55 = vld [vmem:[%s1792_s4] ss:$0 sm:$0xff] }
  0x5f   :  { %v658_v0 = vmax.f32 %v594_v56, 0.0  ;;  %v466_v4 = vmul.f32 %v1127_v7, %v970_v58  ;;  %v595_v6 = vadd.f32 %v1149_v20, %v527_v60  ;;  %v973_v10 = vunpack.c.l.bf16 %v1057_v59 }
  0x60   :  { %v529_v8 = vadd.f32 %v465_v62, %v269_v61  ;;  %v270_v9 = vadd.f32 %v1119_v3, %v202_v63  ;;  %v596_v11 = vadd.f32 %v1149_v20, %v528_v2  ;;  %v203_v12 = vmul.f32 %v1114_v1, %v845_v5  ;;  %v1672_v61 = vld [vmem:[%s1793_s5] ss:$0 sm:$0xff] }
  0x61   :  { %722 = vst [vmem:[%s1794_s6 + $0x158] sm:$0xff] %v658_v0  ;;  %v846_v13 = vunpack.c.h.bf16 %v1026_v54  ;;  %v974_v14 = vunpack.c.h.bf16 %v1057_v59  ;;  %v659_v17 = vmax.f32 %v595_v6, 0.0  ;;  %v467_v21 = vmul.f32 %v1127_v7, %v973_v10  ;;  %v1061_v10 = vld [vmem:[%s1791_s3 + $0xe0] sm:$0xff]  }
  0x62   :  { %v597_v18 = vadd.f32 %v1149_v20, %v529_v8  ;;  %v530_v19 = vadd.f32 %v466_v4, %v270_v9  ;;  %v660_v22 = vmax.f32 %v596_v11, 0.0  ;;  %v271_v23 = vadd.f32 %v1119_v3, %v203_v12  ;;  %v1030_v9 = vld [vmem:[%s1788_s0 + $0xe0] sm:$0xff]  }
  0x63   :  { %v204_v24 = vmul.f32 %v1114_v1, %v846_v13  ;;  %v468_v25 = vmul.f32 %v1127_v7, %v974_v14  ;;  %723 = vst [vmem:[%s1794_s6 + $0x160] sm:$0xff] %v659_v17  ;;  %v849_v29 = vunpack.c.l.bf16 %v1027_v15  ;;  %v977_v30 = vunpack.c.l.bf16 %v1058_v16 }
  0x64   :  { %v661_v27 = vmax.f32 %v597_v18, 0.0  ;;  %v598_v28 = vadd.f32 %v1149_v20, %v530_v19  ;;  %724 = vst [vmem:[%s1794_s6 + $0x168] sm:$0xff] %v660_v22  ;;  %v531_v31 = vadd.f32 %v467_v21, %v271_v23  ;;  %v850_v33 = vunpack.c.h.bf16 %v1027_v15  ;;  %v1031_v19 = vld [vmem:[%s1788_s0 + $0xe8] sm:$0xff]  }
  0x65   :  { %v272_v32 = vadd.f32 %v1119_v3, %v204_v24  ;;  %v978_v34 = vunpack.c.h.bf16 %v1058_v16  ;;  %v205_v37 = vmul.f32 %v1114_v1, %v849_v29  ;;  %v469_v38 = vmul.f32 %v1127_v7, %v977_v30  ;;  %v1635_v3 = vld [vmem:[%s1789_s1] ss:$0 sm:$0xff]  ;;  %v1062_v29 = vld [vmem:[%s1791_s3 + $0xe8] sm:$0xff]  }
  0x66   :  { %725 = vst [vmem:[%s1794_s6 + $0x170] sm:$0xff] %v661_v27  ;;  %v662_v36 = vmax.f32 %v598_v28, 0.0  ;;  %v853_v39 = vunpack.c.l.bf16 %v1028_v26  ;;  %v599_v40 = vadd.f32 %v1149_v20, %v531_v31  ;;  %v206_v42 = vmul.f32 %v1635_v3, %v850_v33  ;;  %v1645_v1 = vld [vmem:[%s1790_s2] ss:$0 sm:$0xff] }
  0x67   :  { %v532_v41 = vadd.f32 %v468_v25, %v272_v32  ;;  %v470_v43 = vmul.f32 %v1127_v7, %v978_v34  ;;  %v273_v44 = vadd.f32 %v1645_v1, %v205_v37  ;;  %v981_v46 = vunpack.c.l.bf16 %v1059_v35 }
  0x68   :  { %726 = vst [vmem:[%s1794_s6 + $0x178] sm:$0xff] %v662_v36  ;;  %v207_v45 = vmul.f32 %v1635_v3, %v853_v39  ;;  %v854_v47 = vunpack.c.h.bf16 %v1028_v26  ;;  %v663_v7 = vmax.f32 %v599_v40, 0.0  ;;  %v274_v50 = vadd.f32 %v1645_v1, %v206_v42  ;;  %v1032_v42 = vld [vmem:[%s1788_s0 + $0xf0] sm:$0xff]  }
  0x69   :  { %v600_v49 = vadd.f32 %v1149_v20, %v532_v41  ;;  %v982_v51 = vunpack.c.h.bf16 %v1059_v35  ;;  %v533_v53 = vadd.f32 %v469_v38, %v273_v44  ;;  %v471_v56 = vmul.f32 %v1661_v55, %v981_v46 }
  0x6a   :  { %v275_v54 = vadd.f32 %v1645_v1, %v207_v45  ;;  %v208_v57 = vmul.f32 %v1635_v3, %v854_v47  ;;  %727 = vst [vmem:[%s1794_s6 + $0x180] sm:$0xff] %v663_v7  ;;  %v534_v58 = vadd.f32 %v470_v43, %v274_v50  ;;  %v857_v60 = vunpack.c.l.bf16 %v1029_v48  ;;  %v1063_v47 = vld [vmem:[%s1791_s3 + $0xf0] sm:$0xff]  }
  0x6b   :  { %v664_v20 = vmax.f32 %v600_v49, 0.0  ;;  %v472_v59 = vmul.f32 %v1661_v55, %v982_v51  ;;  %v601_v62 = vadd.f32 %v1672_v61, %v533_v53  ;;  %v985_v2 = vunpack.c.l.bf16 %v1060_v52 }
  0x6c   :  { %v535_v63 = vadd.f32 %v471_v56, %v275_v54  ;;  %v276_v0 = vadd.f32 %v1645_v1, %v208_v57  ;;  %v602_v4 = vadd.f32 %v1672_v61, %v534_v58  ;;  %v209_v5 = vmul.f32 %v1635_v3, %v857_v60 }
  0x6d   :  { %728 = vst [vmem:[%s1794_s6 + $0x188] sm:$0xff] %v664_v20  ;;  %v858_v6 = vunpack.c.h.bf16 %v1029_v48  ;;  %v986_v8 = vunpack.c.h.bf16 %v1060_v52  ;;  %v665_v11 = vmax.f32 %v601_v62, 0.0  ;;  %v473_v14 = vmul.f32 %v1661_v55, %v985_v2  ;;  %v1064_v2 = vld [vmem:[%s1791_s3 + $0xf8] sm:$0xff]  }
  0x6e   :  { %v603_v12 = vadd.f32 %v1672_v61, %v535_v63  ;;  %v536_v13 = vadd.f32 %v472_v59, %v276_v0  ;;  %v666_v15 = vmax.f32 %v602_v4, 0.0  ;;  %v277_v16 = vadd.f32 %v1645_v1, %v209_v5  ;;  %v1033_v0 = vld [vmem:[%s1788_s0 + $0xf8] sm:$0xff]  }
  0x6f   :  { %v210_v17 = vmul.f32 %v1635_v3, %v858_v6  ;;  %v474_v18 = vmul.f32 %v1661_v55, %v986_v8  ;;  %729 = vst [vmem:[%s1794_s6 + $0x190] sm:$0xff] %v665_v11  ;;  %v861_v23 = vunpack.c.l.bf16 %v1030_v9  ;;  %v989_v24 = vunpack.c.l.bf16 %v1061_v10 }
  0x70   :  { %v667_v21 = vmax.f32 %v603_v12, 0.0  ;;  %v604_v22 = vadd.f32 %v1672_v61, %v536_v13  ;;  %730 = vst [vmem:[%s1794_s6 + $0x198] sm:$0xff] %v666_v15  ;;  %v537_v25 = vadd.f32 %v473_v14, %v277_v16  ;;  %v862_v27 = vunpack.c.h.bf16 %v1030_v9 }
  0x71   :  { %v278_v26 = vadd.f32 %v1645_v1, %v210_v17  ;;  %v990_v28 = vunpack.c.h.bf16 %v1061_v10  ;;  %v211_v31 = vmul.f32 %v1635_v3, %v861_v23  ;;  %v475_v32 = vmul.f32 %v1661_v55, %v989_v24 }
  0x72   :  { %731 = vst [vmem:[%s1794_s6 + $0x1a0] sm:$0xff] %v667_v21  ;;  %v668_v30 = vmax.f32 %v604_v22, 0.0  ;;  %v865_v33 = vunpack.c.l.bf16 %v1031_v19  ;;  %v605_v34 = vadd.f32 %v1672_v61, %v537_v25  ;;  %v212_v36 = vmul.f32 %v1635_v3, %v862_v27 }
  0x73   :  { %v538_v35 = vadd.f32 %v474_v18, %v278_v26  ;;  %v476_v37 = vmul.f32 %v1661_v55, %v990_v28  ;;  %v279_v38 = vadd.f32 %v1645_v1, %v211_v31  ;;  %v993_v40 = vunpack.c.l.bf16 %v1062_v29 }
  0x74   :  { %732 = vst [vmem:[%s1794_s6 + $0x1a8] sm:$0xff] %v668_v30  ;;  %v213_v39 = vmul.f32 %v1635_v3, %v865_v33  ;;  %v866_v41 = vunpack.c.h.bf16 %v1031_v19  ;;  %v669_v43 = vmax.f32 %v605_v34, 0.0  ;;  %v280_v45 = vadd.f32 %v1645_v1, %v212_v36 }
  0x75   :  { %v606_v44 = vadd.f32 %v1672_v61, %v538_v35  ;;  %v994_v46 = vunpack.c.h.bf16 %v1062_v29  ;;  %v539_v48 = vadd.f32 %v475_v32, %v279_v38  ;;  %v477_v49 = vmul.f32 %v1661_v55, %v993_v40 }
  0x76   :  { %v281_v7 = vadd.f32 %v1645_v1, %v213_v39  ;;  %v214_v50 = vmul.f32 %v1635_v3, %v866_v41  ;;  %733 = vst [vmem:[%s1794_s6 + $0x1b0] sm:$0xff] %v669_v43  ;;  %v540_v52 = vadd.f32 %v476_v37, %v280_v45  ;;  %v869_v54 = vunpack.c.l.bf16 %v1032_v42 }
  0x77   :  { %v670_v51 = vmax.f32 %v606_v44, 0.0  ;;  %v478_v53 = vmul.f32 %v1661_v55, %v994_v46  ;;  %v607_v56 = vadd.f32 %v1672_v61, %v539_v48  ;;  %v997_v58 = vunpack.c.l.bf16 %v1063_v47 }
  0x78   :  { %v541_v57 = vadd.f32 %v477_v49, %v281_v7  ;;  %v282_v20 = vadd.f32 %v1645_v1, %v214_v50  ;;  %v608_v59 = vadd.f32 %v1672_v61, %v540_v52  ;;  %v215_v60 = vmul.f32 %v1635_v3, %v869_v54 }
  0x79   :  { %734 = vst [vmem:[%s1794_s6 + $0x1b8] sm:$0xff] %v670_v51  ;;  %v870_v62 = vunpack.c.h.bf16 %v1032_v42  ;;  %v998_v63 = vunpack.c.h.bf16 %v1063_v47  ;;  %v671_v4 = vmax.f32 %v607_v56, 0.0  ;;  %v479_v8 = vmul.f32 %v1661_v55, %v997_v58 }
  0x7a   :  { %v609_v5 = vadd.f32 %v1672_v61, %v541_v57  ;;  %v542_v6 = vadd.f32 %v478_v53, %v282_v20  ;;  %v672_v9 = vmax.f32 %v608_v59, 0.0  ;;  %v283_v10 = vadd.f32 %v1645_v1, %v215_v60 }
  0x7b   :  { %v216_v11 = vmul.f32 %v1635_v3, %v870_v62  ;;  %v480_v12 = vmul.f32 %v1661_v55, %v998_v63  ;;  %735 = vst [vmem:[%s1794_s6 + $0x1c0] sm:$0xff] %v671_v4  ;;  %v873_v15 = vunpack.c.l.bf16 %v1033_v0  ;;  %v1001_v16 = vunpack.c.l.bf16 %v1064_v2 }
  0x7c   :  { %v673_v13 = vmax.f32 %v609_v5, 0.0  ;;  %v610_v14 = vadd.f32 %v1672_v61, %v542_v6  ;;  %736 = vst [vmem:[%s1794_s6 + $0x1c8] sm:$0xff] %v672_v9  ;;  %v543_v17 = vadd.f32 %v479_v8, %v283_v10  ;;  %v874_v19 = vunpack.c.h.bf16 %v1033_v0 }
  0x7d   :  { %v284_v18 = vadd.f32 %v1645_v1, %v216_v11  ;;  %v1002_v21 = vunpack.c.h.bf16 %v1064_v2  ;;  %v217_v23 = vmul.f32 %v1635_v3, %v873_v15  ;;  %v481_v24 = vmul.f32 %v1661_v55, %v1001_v16 }
  0x7e   :  { %737 = vst [vmem:[%s1794_s6 + $0x1d0] sm:$0xff] %v673_v13  ;;  %v674_v22 = vmax.f32 %v610_v14, 0.0  ;;  %v611_v25 = vadd.f32 %v1672_v61, %v543_v17  ;;  %v218_v27 = vmul.f32 %v1635_v3, %v874_v19 }
  0x7f   :  { %v544_v26 = vadd.f32 %v480_v12, %v284_v18  ;;  %v482_v28 = vmul.f32 %v1661_v55, %v1002_v21  ;;  %v285_v29 = vadd.f32 %v1645_v1, %v217_v23 }
  0x80   :  { %738 = vst [vmem:[%s1794_s6 + $0x1d8] sm:$0xff] %v674_v22  ;;  %v675_v30 = vmax.f32 %v611_v25, 0.0  ;;  %v286_v32 = vadd.f32 %v1645_v1, %v218_v27 }
  0x81   :  { %v612_v31 = vadd.f32 %v1672_v61, %v544_v26  ;;  %v545_v33 = vadd.f32 %v481_v24, %v285_v29 }
  0x82   :  { %739 = vst [vmem:[%s1794_s6 + $0x1e0] sm:$0xff] %v675_v30  ;;  %v546_v3 = vadd.f32 %v482_v28, %v286_v32 }
  0x83   :  { %v676_v34 = vmax.f32 %v612_v31, 0.0  ;;  %v613_v55 = vadd.f32 %v1672_v61, %v545_v33 }
  0x84   :  { %v614_v35 = vadd.f32 %v1672_v61, %v546_v3 }
  0x85   :  { %740 = vst [vmem:[%s1794_s6 + $0x1e8] sm:$0xff] %v676_v34  ;;  %v677_v36 = vmax.f32 %v613_v55, 0.0 }
  0x86   :  { %v678_v37 = vmax.f32 %v614_v35, 0.0 }
  0x87   :  { %741 = vst [vmem:[%s1794_s6 + $0x1f0] sm:$0xff] %v677_v36 }
  0x88   :  { %742 = vst [vmem:[%s1794_s6 + $0x1f8] sm:$0xff] %v678_v37 }

// kernel: basic_block_forward.7
= control target key start
LH: loop header
LB: loop body
LE: loop exit
PB: predicated region body
PF: predicated region fallthrough
CT: control target
= control target key end

     0   :  { %s2979_s15 = smov 0   ;;  %s4071_s0 = inlined_call_operand.vmem [shape: bf16[2,18,18,8], index: 0, kind: input, shape index: {}]   ;;  %s4072_s1 = inlined_call_operand.vmem [shape: bf16[9,8,128], index: 1, kind: input, shape index: {}]   ;;  %s4073_s2 = inlined_call_operand.vmem [shape: bf16[2,256,128], index: 2, kind: output, shape index: {0}]   ;;  %s4074_s3 = inlined_call_operand.vmem [shape: f32[2,1,128], index: 3, kind: output, shape index: {1}]   ;;  %s4075_s4 = inlined_call_operand.vmem [shape: f32[2,1,128], index: 4, kind: output, shape index: {2}]  }
   0x1 LB: > { %s2560_s16 = sadd.s32 4294967295, %s2952_s15   ;;  %p2564_p0 = scmp.ge.s32.totalorder %s2952_s15, 1  ;;  %s2952_s15 = sphi %s2979_s15, %s15_s15  }
   0x2   : > { %p167_p1 = scmp.lt.s32.totalorder %s2952_s15, 3 }
   0x4   : > { %p168_p2 = pnand %p2564_p0, %p167_p1 }
   0x6   : > { %171 = sbr.rel (%p168_p2) target bundleno = 770 (0x302), region = 28 }
   0xb   : > { %v2568_v0 = vld [vmem:[%s4072_s1 + $0x4] sm:$0xf]  ;;  %vm757_vm0 = vcmask 1043456   ;;  %p199_p3 = scmp.lt.s32.totalorder %s2560_s16, 1  ;;  %v2681_v2 = vld [vmem:[%s4072_s1 + $0x8] sm:$0xf] }
   0xc   : > { %v759_v1 = vsel %vm757_vm0, %v2568_v0, 0  ;;  %v1300_v3 = vsel %vm757_vm0, %v2681_v2, 0  ;;  %v2698_v4 = vld [vmem:[%s4072_s1 + $0xc] sm:$0xf]  ;;  %v270_v5 = vld [vmem:[%s4072_s1] sm:$0xf] }
   0xd   : > { %2926 = vmatpush.bf16.msra.mxu1 %v759_v1  ;;  %2927 = vmatpush.bf16.msra.mxu2 %v759_v1  ;;  %s4215_s16 = smov (!%p199_p3, %s2560_s16), 1  ;;  %v2719_v6 = vld [vmem:[%s4072_s1 + $0x10] sm:$0xf]  ;;  %v1434_v7 = vsel %vm757_vm0, %v2698_v4, 0  ;;  %v979_v8 = vsel %vm757_vm0, %v270_v5, 0  ;;  %vm708_vm4 = vcmask 64512  }
   0xe   : > { %2928 = vmatpush.bf16.msra.mxu3 %v759_v1  ;;  %768 = vmatpush.bf16.msra.mxu0 %v759_v1  ;;  %s2929_s27 = smul.u32 216, %s4215_s16  ;;  %v1590_v9 = vsel %vm757_vm0, %v2719_v6, 0  ;;  %vm271_vm1 = vsmask.f32 3328  ;;  %vm272_vm2 = vsmask.f32 7440  ;;  %s211_s21 = scalar_lea.vmem %s4074_s3, %s4215_s16 }
   0xf   : > { %vm3040_vm3 = vmor %vm271_vm1, %vm272_vm2  ;;  %vm1086_vm5 = vcmask 1042432   ;;  %vm1087_vm6 = vcmask 1046532   ;;  %s2812_s13 = sshll.u32 %s4215_s16, 7  ;;  %s214_s24 = scalar_lea.vmem %s4075_s4, %s4215_s16 }
  0x10   : > { %s3013_s30 = scalar_lea.vmem %s4071_s0, %s2929_s27  ;;  %vm3343_vm7 = vmor %vm1086_vm5, %vm1087_vm6  ;;  %s3937_s18 = scalar_lea.vmem %s4073_s2, %s2812_s13 }
  0x11   : > { %1309 = vmatpush.bf16.msrb.mxu2 %v1300_v3  ;;  %988 = vmatpush.bf16.msrb.mxu1 %v979_v8  ;;  %v3016_v10 = vld [vmem:[%s3013_s30 + $0x30] sm:$0xf]  ;;  %v3019_v11 = vld [vmem:[%s3013_s30 + $0x34] sm:$0xf]  ;;  %v3022_v12 = vld [vmem:[%s3013_s30 + $0x38] sm:$0x1] }
  0x12   : > { %1443 = vmatpush.bf16.msrb.mxu3 %v1434_v7  ;;  %1599 = vmatpush.bf16.msrb.mxu0 %v1590_v9  ;;  %v371_v13 = vshrl.u32 %v3016_v10, 16  ;;  %v374_v14 = vshll.u32 %v3016_v10, 16  ;;  %v380_v15 = vshll.u32 %v3019_v11, 16  ;;  %v384_v16 = vshrl.u32 %v3019_v11, 16  ;;  %v240_v17 = vld [vmem:[%s3013_s30 + $0x60] sm:$0xf] }
  0x13   : > { %v390_v18 = vshll.u32 %v3022_v12, 16  ;;  %v3031_v19 = vld [vmem:[%s3013_s30 + $0x64] sm:$0xf]  ;;  %v242_v20 = vld [vmem:[%s3013_s30 + $0x68] sm:$0x1]  ;;  %v467_v21 = vshrl.u32 %v240_v17, 16 }
  0x14   : > { %v373_v22 = vrot.slane %v371_v13, 4  ;;  %v376_v23 = vrot.slane %v374_v14, 5  ;;  %v382_v24 = vrot.slane %v380_v15, 5  ;;  %v386_v25 = vrot.slane %v384_v16, 4  ;;  %v252_v26 = vld [vmem:[%s3013_s30 + $0x90] sm:$0xf] }
  0x15   : > { %v392_v27 = vrot.slane %v390_v18, 5  ;;  %v469_v28 = vrot.slane %v467_v21, 4  ;;  %v470_v29 = vshll.u32 %v240_v17, 16  ;;  %v476_v30 = vshll.u32 %v3031_v19, 16  ;;  %v253_v35 = vld [vmem:[%s3013_s30 + $0x94] sm:$0xf] }
  0x16   : > { %v377_v31 = vor.u32 %v376_v23, %v373_v22  ;;  %v387_v32 = vor.u32 %v386_v25, %v382_v24  ;;  %v480_v33 = vshrl.u32 %v3031_v19, 16  ;;  %v486_v34 = vshll.u32 %v242_v20, 16  ;;  %v254_v45 = vld [vmem:[%s3013_s30 + $0x98] sm:$0x1]  ;;  %v3050_v61 = vld [vmem:[%s3013_s30] sm:$0xf] }
  0x17   : > { %v472_v37 = vrot.slane %v470_v29, 5  ;;  %v478_v38 = vrot.slane %v476_v30, 5  ;;  %v563_v39 = vshrl.u32 %v252_v26, 16  ;;  %v566_v47 = vshll.u32 %v252_v26, 16  ;;  %v3057_v1 = vld [vmem:[%s3013_s30 + $0x4] sm:$0xf] }
  0x18   : > { %v378_v40 = vrot.slane %v377_v31, 4  ;;  %v388_v41 = vrot.slane %v387_v32, 4  ;;  %v482_v42 = vrot.slane %v480_v33, 4  ;;  %v488_v43 = vrot.slane %v486_v34, 5  ;;  %v3060_v2 = vld [vmem:[%s3013_s30 + $0x8] sm:$0x1] }
  0x19   : > { %v473_v44 = vor.u32 %v472_v37, %v469_v28  ;;  %v565_v46 = vrot.slane %v563_v39, 4  ;;  %v572_v48 = vshll.u32 %v253_v35, 16  ;;  %v576_v52 = vshrl.u32 %v253_v35, 16  ;;  %v3076_v23 = vld [vmem:[%s3013_s30 + $0x3c] sm:$0xf] }
  0x1a   : > { %v383_v49 = vsel %vm3040_vm3, %v378_v40, %v382_v24  ;;  %v393_v50 = vsel %vm3040_vm3, %v388_v41, %v392_v27  ;;  %v483_v51 = vor.u32 %v482_v42, %v478_v38  ;;  %v568_v56 = vrot.slane %v566_v47, 5  ;;  %v3079_v24 = vld [vmem:[%s3013_s30 + $0x40] sm:$0xf]  ;;  %v3084_v29 = vld [vmem:[%s3013_s30 + $0x44] sm:$0x1] }
  0x1b   : > { %v668_v53 = vunpack.c.l.b16 %v383_v49  ;;  %v669_v54 = vunpack.c.l.b16 %v393_v50  ;;  %v474_v55 = vrot.slane %v473_v44, 4  ;;  %v574_v58 = vrot.slane %v572_v48, 5  ;;  %v3099_v47 = vld [vmem:[%s3013_s30 + $0x70] sm:$0xf] }
  0x1c   : > { %v484_v57 = vrot.slane %v483_v51, 4  ;;  %v578_v59 = vrot.slane %v576_v52, 4  ;;  %v582_v60 = vshll.u32 %v254_v45, 16  ;;  %v569_v0 = vor.u32 %v568_v56, %v565_v46  ;;  %v3106_v51 = vld [vmem:[%s3013_s30 + $0x74] sm:$0x1] }
  0x1d   : > { %v3052_v62 = vpack.c.b16 %v669_v54, %v668_v53  ;;  %v479_v63 = vsel %vm3040_vm3, %v474_v55, %v478_v38  ;;  %v275_v9 = vshrl.u32 %v3050_v61, 16  ;;  %v278_v13 = vshll.u32 %v3050_v61, 16  ;;  %v3092_v38 = vld [vmem:[%s3013_s30 + $0x6c] sm:$0xf] }
  0x1e   : > { %v489_v3 = vsel %vm3040_vm3, %v484_v57, %v488_v43  ;;  %v676_v4 = vunpack.c.l.b16 %v479_v63  ;;  %v579_v5 = vor.u32 %v578_v59, %v574_v58  ;;  %v584_v6 = vrot.slane %v582_v60, 5 }
  0x1f   : > { %2573 = vmatmul.msk.bf16.vlgmr.msra.gmra.mxu1 %vm708_vm4, %v3052_v62  ;;  %v677_v7 = vunpack.c.l.b16 %v489_v3  ;;  %v570_v8 = vrot.slane %v569_v0, 4  ;;  %v284_v15 = vshll.u32 %v3057_v1, 16  ;;  %v288_v16 = vshrl.u32 %v3057_v1, 16 }
  0x20   : > { %v580_v14 = vrot.slane %v579_v5, 4  ;;  %v294_v17 = vshll.u32 %v3060_v2, 16  ;;  %v277_v21 = vrot.slane %v275_v9, 4  ;;  %v280_v22 = vrot.slane %v278_v13, 5  ;;  %v255_v5 = vld [vmem:[%s3013_s30 + $0x9c] sm:$0xf] }
  0x21   : > { %v3071_v18 = vpack.c.b16 %v677_v7, %v676_v4  ;;  %v575_v20 = vsel %vm3040_vm3, %v570_v8, %v574_v58  ;;  %v286_v27 = vrot.slane %v284_v15, 5  ;;  %v290_v28 = vrot.slane %v288_v16, 4  ;;  %v256_v9 = vld [vmem:[%s3013_s30 + $0xa0] sm:$0xf] }
  0x22   : > { %v585_v25 = vsel %vm3040_vm3, %v580_v14, %v584_v6  ;;  %v684_v26 = vunpack.c.l.b16 %v575_v20  ;;  %v281_v31 = vor.u32 %v280_v22, %v277_v21  ;;  %v296_v32 = vrot.slane %v294_v17, 5  ;;  %v257_v17 = vld [vmem:[%s3013_s30 + $0xa4] sm:$0x1] }
  0x23   : > { %4118 = vst [vmem:[#allocation2_spill] sm:$0xff] %v3071_v18  ;;  %2577 = vmatmul.msk.bf16.vlgmr.msra.gmra.mxu2 %vm708_vm4, %v3071_v18  ;;  %v685_v30 = vunpack.c.l.b16 %v585_v25  ;;  %v291_v33 = vor.u32 %v290_v28, %v286_v27  ;;  %v395_v34 = vshrl.u32 %v3076_v23, 16  ;;  %v398_v35 = vshll.u32 %v3076_v23, 16 }
  0x24   : > { %v404_v37 = vshll.u32 %v3079_v24, 16  ;;  %v282_v40 = vrot.slane %v281_v31, 4  ;;  %v408_v41 = vshrl.u32 %v3079_v24, 16  ;;  %v414_v42 = vshll.u32 %v3084_v29, 16 }
  0x25   : > { %v3094_v39 = vpack.c.b16 %v685_v30, %v684_v26  ;;  %v292_v43 = vrot.slane %v291_v33, 4  ;;  %v397_v44 = vrot.slane %v395_v34, 4  ;;  %v400_v45 = vrot.slane %v398_v35, 5  ;;  %v3124_v35 = vld [vmem:[%s3013_s30 + $0xc] sm:$0xf] }
  0x26   : > { %v406_v46 = vrot.slane %v404_v37, 5  ;;  %v287_v48 = vsel %vm3040_vm3, %v282_v40, %v286_v27  ;;  %v410_v49 = vrot.slane %v408_v41, 4  ;;  %v416_v50 = vrot.slane %v414_v42, 5 }
  0x27   : > { %4119 = vst [vmem:[#allocation3_spill] sm:$0xff] %v3094_v39  ;;  %2581 = vmatmul.msk.bf16.vlgmr.msra.gmra.mxu3 %vm708_vm4, %v3094_v39  ;;  %v491_v52 = vshrl.u32 %v3092_v38, 16  ;;  %v297_v53 = vsel %vm3040_vm3, %v292_v43, %v296_v32  ;;  %v660_v54 = vunpack.c.l.b16 %v287_v48  ;;  %v401_v55 = vor.u32 %v400_v45, %v397_v44  ;;  %v3131_v43 = vld [vmem:[%s3013_s30 + $0x10] sm:$0xf]  ;;  %v3134_v48 = vld [vmem:[%s3013_s30 + $0x14] sm:$0x1] }
  0x28   : > { %v494_v56 = vshll.u32 %v3092_v38, 16  ;;  %v661_v57 = vunpack.c.l.b16 %v297_v53  ;;  %v411_v58 = vor.u32 %v410_v49, %v406_v46  ;;  %v500_v60 = vshll.u32 %v3099_v47, 16  ;;  %v3311_v39 = vld [vmem:[%s3013_s30 + $0x2c] sm:$0x1] }
  0x29   : > { %v493_v59 = vrot.slane %v491_v52, 4  ;;  %v402_v63 = vrot.slane %v401_v55, 4  ;;  %v504_v3 = vshrl.u32 %v3099_v47, 16  ;;  %v510_v4 = vshll.u32 %v3106_v51, 16 }
  0x2a   : > { %v496_v0 = vrot.slane %v494_v56, 5  ;;  %v692_v6 = vpack.c.b16 %v661_v57, %v660_v54  ;;  %v412_v7 = vrot.slane %v411_v58, 4  ;;  %v502_v8 = vrot.slane %v500_v60, 5  ;;  %v3144_v58 = vld [vmem:[%s3013_s30 + $0x48] sm:$0xf] }
  0x2b   : > { %v407_v13 = vsel %vm3040_vm3, %v402_v63, %v406_v46  ;;  %v506_v15 = vrot.slane %v504_v3, 4  ;;  %v512_v16 = vrot.slane %v510_v4, 5  ;;  %v587_v22 = vshrl.u32 %v255_v5, 16  ;;  %v3149_v3 = vld [vmem:[%s3013_s30 + $0x4c] sm:$0xf] }
  0x2c   : > { %v497_v14 = vor.u32 %v496_v0, %v493_v59  ;;  %2569 = vmatmul.msk.bf16.vlgmr.msra.gmra.mxu0 %vm708_vm4, %v692_v6  ;;  %v417_v20 = vsel %vm3040_vm3, %v412_v7, %v416_v50  ;;  %v670_v21 = vunpack.c.l.b16 %v407_v13  ;;  %v590_v25 = vshll.u32 %v255_v5, 16 }
  0x2d   : > { %v671_v26 = vunpack.c.l.b16 %v417_v20  ;;  %v507_v28 = vor.u32 %v506_v15, %v502_v8  ;;  %v596_v30 = vshll.u32 %v256_v9, 16  ;;  %v589_v31 = vrot.slane %v587_v22, 4  ;;  %v3156_v15 = vld [vmem:[%s3013_s30 + $0x50] sm:$0x1] }
  0x2e   : > { %v498_v27 = vrot.slane %v497_v14, 4  ;;  %v592_v32 = vrot.slane %v590_v25, 5  ;;  %v600_v33 = vshrl.u32 %v256_v9, 16  ;;  %v606_v34 = vshll.u32 %v257_v17, 16 }
  0x2f   : > { %v3126_v37 = vpack.c.b16 %v671_v26, %v670_v21  ;;  %v508_v41 = vrot.slane %v507_v28, 4  ;;  %v598_v42 = vrot.slane %v596_v30, 5  ;;  %v299_v52 = vshrl.u32 %v3124_v35, 16  ;;  %v3167_v28 = vld [vmem:[%s3013_s30 + $0x78] sm:$0xf] }
  0x30   : > { %v503_v40 = vsel %vm3040_vm3, %v498_v27, %v502_v8  ;;  %v593_v45 = vor.u32 %v592_v32, %v589_v31  ;;  %v602_v46 = vrot.slane %v600_v33, 4  ;;  %v608_v50 = vrot.slane %v606_v34, 5  ;;  %v3171_v34 = vld [vmem:[%s3013_s30 + $0x7c] sm:$0xf] }
  0x31   : > { %v678_v44 = vunpack.c.l.b16 %v503_v40  ;;  %2574 = vmatmul.msk.bf16.gmra.mxu1 %vm708_vm4, %v3126_v37  ;;  %v513_v49 = vsel %vm3040_vm3, %v508_v41, %v512_v16  ;;  %v302_v53 = vshll.u32 %v3124_v35, 16  ;;  %v308_v57 = vshll.u32 %v3131_v43, 16 }
  0x32   : > { %v679_v54 = vunpack.c.l.b16 %v513_v49  ;;  %v594_v55 = vrot.slane %v593_v45, 4  ;;  %v603_v56 = vor.u32 %v602_v46, %v598_v42  ;;  %v301_v59 = vrot.slane %v299_v52, 4 }
  0x33   : > { %v304_v60 = vrot.slane %v302_v53, 5  ;;  %v312_v63 = vshrl.u32 %v3131_v43, 16  ;;  %v318_v0 = vshll.u32 %v3134_v48, 16  ;;  %v310_v7 = vrot.slane %v308_v57, 5 }
  0x34   : > { %v3151_v4 = vpack.c.b16 %v679_v54, %v678_v44  ;;  %v599_v5 = vsel %vm3040_vm3, %v594_v55, %v598_v42  ;;  %v604_v6 = vrot.slane %v603_v56, 4  ;;  %v419_v17 = vshrl.u32 %v3144_v58, 16 }
  0x35   : > { %v686_v8 = vunpack.c.l.b16 %v599_v5  ;;  %v305_v9 = vor.u32 %v304_v60, %v301_v59  ;;  %v314_v13 = vrot.slane %v312_v63, 4  ;;  %v320_v14 = vrot.slane %v318_v0, 5 }
  0x36   : > { %2578 = vmatmul.msk.bf16.gmra.mxu2 %vm708_vm4, %v3151_v4  ;;  %v609_v16 = vsel %vm3040_vm3, %v604_v6, %v608_v50  ;;  %v422_v20 = vshll.u32 %v3144_v58, 16  ;;  %v428_v21 = vshll.u32 %v3149_v3, 16  ;;  %v432_v27 = vshrl.u32 %v3149_v3, 16  ;;  %v3178_v50 = vld [vmem:[%s3013_s30 + $0x80] sm:$0x1] }
  0x37   : > { %v687_v22 = vunpack.c.l.b16 %v609_v16  ;;  %v306_v25 = vrot.slane %v305_v9, 4  ;;  %v315_v26 = vor.u32 %v314_v13, %v310_v7  ;;  %v421_v30 = vrot.slane %v419_v17, 4  ;;  %v3197_v16 = vld [vmem:[%s3013_s30 + $0xac] sm:$0xf]  ;;  %v3200_v17 = vld [vmem:[%s3013_s30 + $0xb0] sm:$0x1] }
  0x38   : > { %v424_v31 = vrot.slane %v422_v20, 5  ;;  %v430_v32 = vrot.slane %v428_v21, 5  ;;  %v438_v33 = vshll.u32 %v3156_v15, 16  ;;  %v434_v44 = vrot.slane %v432_v27, 4  ;;  %4122 = vst [vmem:[#allocation6_spill] sm:$0xff] %v3197_v16 }
  0x39   : > { %v3173_v40 = vpack.c.b16 %v687_v22, %v686_v8  ;;  %v311_v41 = vsel %vm3040_vm3, %v306_v25, %v310_v7  ;;  %v316_v42 = vrot.slane %v315_v26, 4  ;;  %v515_v52 = vshrl.u32 %v3167_v28, 16  ;;  %v3190_v8 = vld [vmem:[%s3013_s30 + $0xa8] sm:$0xf]  ;;  %4123 = vst [vmem:[#allocation7_spill] sm:$0xff] %v3200_v17 }
  0x3a   : > { %v662_v45 = vunpack.c.l.b16 %v311_v41  ;;  %v425_v46 = vor.u32 %v424_v31, %v421_v30  ;;  %v440_v49 = vrot.slane %v438_v33, 5  ;;  %v435_v54 = vor.u32 %v434_v44, %v430_v32  ;;  %4121 = vst [vmem:[#allocation5_spill] sm:$0xff] %v3190_v8 }
  0x3b   : > { %4120 = vst [vmem:[#allocation4_spill] sm:$0xff] %v3173_v40  ;;  %2582 = vmatmul.msk.bf16.gmra.mxu3 %vm708_vm4, %v3173_v40  ;;  %v321_v53 = vsel %vm3040_vm3, %v316_v42, %v320_v14  ;;  %v518_v55 = vshll.u32 %v3167_v28, 16  ;;  %v524_v56 = vshll.u32 %v3171_v34, 16  ;;  %v517_v60 = vrot.slane %v515_v52, 4  ;;  %v3214_v52 = vld [vmem:[%s3013_s30 + $0x18] sm:$0xf] }
  0x3c   : > { %v663_v57 = vunpack.c.l.b16 %v321_v53  ;;  %v426_v59 = vrot.slane %v425_v46, 4  ;;  %v528_v63 = vshrl.u32 %v3171_v34, 16  ;;  %v436_v0 = vrot.slane %v435_v54, 4  ;;  %v3300_v40 = vld [vmem:[%s3013_s30 + $0x24] sm:$0xf] }
  0x3d   : > { %v520_v5 = vrot.slane %v518_v55, 5  ;;  %v526_v6 = vrot.slane %v524_v56, 5  ;;  %v534_v7 = vshll.u32 %v3178_v50, 16  ;;  %v611_v30 = vshrl.u32 %v3190_v8, 16  ;;  %v3219_v56 = vld [vmem:[%s3013_s30 + $0x1c] sm:$0xf] }
  0x3e   : > { %v3192_v9 = vpack.c.b16 %v663_v57, %v662_v45  ;;  %v431_v13 = vsel %vm3040_vm3, %v426_v59, %v430_v32  ;;  %v530_v14 = vrot.slane %v528_v63, 4  ;;  %v441_v20 = vsel %vm3040_vm3, %v436_v0, %v440_v49  ;;  %v3222_v57 = vld [vmem:[%s3013_s30 + $0x20] sm:$0x1] }
  0x3f   : > { %v672_v21 = vunpack.c.l.b16 %v431_v13  ;;  %v521_v22 = vor.u32 %v520_v5, %v517_v60  ;;  %v536_v25 = vrot.slane %v534_v7, 5  ;;  %v673_v26 = vunpack.c.l.b16 %v441_v20 }
  0x40   : > { %2570 = vmatmul.msk.bf16.gmra.mxu0 %vm708_vm4, %v3192_v9  ;;  %v531_v27 = vor.u32 %v530_v14, %v526_v6  ;;  %v614_v31 = vshll.u32 %v3190_v8, 16  ;;  %v620_v33 = vshll.u32 %v3197_v16, 16  ;;  %v624_v41 = vshrl.u32 %v3197_v16, 16 }
  0x41   : > { %v522_v32 = vrot.slane %v521_v22, 4  ;;  %v630_v42 = vshll.u32 %v3200_v17, 16  ;;  %v3211_v44 = vpack.c.b16 %v673_v26, %v672_v21  ;;  %v613_v46 = vrot.slane %v611_v30, 4  ;;  %v3234_v26 = vld [vmem:[%s3013_s30 + $0x54] sm:$0xf] }
  0x42   : > { %v532_v45 = vrot.slane %v531_v27, 4  ;;  %v616_v49 = vrot.slane %v614_v31, 5  ;;  %v622_v54 = vrot.slane %v620_v33, 5  ;;  %v626_v55 = vrot.slane %v624_v41, 4  ;;  %v3278_v17 = vld [vmem:[%s3013_s30 + $0xb4] sm:$0xf] }
  0x43   : > { %4124 = vst [vmem:[#allocation8_spill] sm:$0xff] %v3211_v44  ;;  %v527_v53 = vsel %vm3040_vm3, %v522_v32, %v526_v6  ;;  %2575 = vmatmul.msk.bf16.gmra.mxu1 %vm708_vm4, %v3211_v44  ;;  %v632_v0 = vrot.slane %v630_v42, 5  ;;  %v323_v6 = vshrl.u32 %v3214_v52, 16  ;;  %v326_v13 = vshll.u32 %v3214_v52, 16  ;;  %v3239_v32 = vld [vmem:[%s3013_s30 + $0x58] sm:$0xf] }
  0x44   : > { %v537_v59 = vsel %vm3040_vm3, %v532_v45, %v536_v25  ;;  %v680_v60 = vunpack.c.l.b16 %v527_v53  ;;  %v617_v63 = vor.u32 %v616_v49, %v613_v46  ;;  %v627_v7 = vor.u32 %v626_v55, %v622_v54  ;;  %v3244_v46 = vld [vmem:[%s3013_s30 + $0x5c] sm:$0x1]  ;;  %4127 = vst [vmem:[#allocation11_spill] sm:$0xff] %v3278_v17 }
  0x45   : > { %v681_v5 = vunpack.c.l.b16 %v537_v59  ;;  %v332_v20 = vshll.u32 %v3219_v56, 16  ;;  %v336_v21 = vshrl.u32 %v3219_v56, 16  ;;  %v342_v22 = vshll.u32 %v3222_v57, 16 }
  0x46   : > { %v618_v14 = vrot.slane %v617_v63, 4  ;;  %v628_v27 = vrot.slane %v627_v7, 4  ;;  %v325_v30 = vrot.slane %v323_v6, 4  ;;  %v328_v31 = vrot.slane %v326_v13, 5  ;;  %v3254_v7 = vld [vmem:[%s3013_s30 + $0x84] sm:$0xf] }
  0x47   : > { %v3236_v25 = vpack.c.b16 %v681_v5, %v680_v60  ;;  %v334_v41 = vrot.slane %v332_v20, 5  ;;  %v338_v42 = vrot.slane %v336_v21, 4  ;;  %v344_v45 = vrot.slane %v342_v22, 5  ;;  %4125 = vst [vmem:[#allocation9_spill] sm:$0xff] %v3254_v7 }
  0x48   : > { %v623_v33 = vsel %vm3040_vm3, %v618_v14, %v622_v54  ;;  %v633_v49 = vsel %vm3040_vm3, %v628_v27, %v632_v0  ;;  %v329_v55 = vor.u32 %v328_v31, %v325_v30  ;;  %v443_v59 = vshrl.u32 %v3234_v26, 16  ;;  %v3261_v30 = vld [vmem:[%s3013_s30 + $0x88] sm:$0xf] }
  0x49   : > { %2579 = vmatmul.msk.bf16.gmra.mxu2 %vm708_vm4, %v3236_v25  ;;  %v688_v53 = vunpack.c.l.b16 %v623_v33  ;;  %v689_v60 = vunpack.c.l.b16 %v633_v49  ;;  %v339_v63 = vor.u32 %v338_v42, %v334_v41  ;;  %v446_v54 = vshll.u32 %v3234_v26, 16  ;;  %v3266_v49 = vld [vmem:[%s3013_s30 + $0x8c] sm:$0x1] }
  0x4a   : > { %v452_v5 = vshll.u32 %v3239_v32, 16  ;;  %v330_v6 = vrot.slane %v329_v55, 4  ;;  %v445_v13 = vrot.slane %v443_v59, 4  ;;  %v456_v14 = vshrl.u32 %v3239_v32, 16 }
  0x4b   : > { %v462_v0 = vshll.u32 %v3244_v46, 16  ;;  %v3258_v20 = vpack.c.b16 %v689_v60, %v688_v53  ;;  %v340_v21 = vrot.slane %v339_v63, 4  ;;  %v448_v22 = vrot.slane %v446_v54, 5 }
  0x4c   : > { %v454_v27 = vrot.slane %v452_v5, 5  ;;  %v335_v31 = vsel %vm3040_vm3, %v330_v6, %v334_v41  ;;  %v458_v33 = vrot.slane %v456_v14, 4  ;;  %v539_v55 = vshrl.u32 %v3254_v7, 16 }
  0x4d   : > { %4126 = vst [vmem:[#allocation10_spill] sm:$0xff] %v3258_v20  ;;  %v464_v42 = vrot.slane %v462_v0, 5  ;;  %2583 = vmatmul.msk.bf16.gmra.mxu3 %vm708_vm4, %v3258_v20  ;;  %v345_v53 = vsel %vm3040_vm3, %v340_v21, %v344_v45  ;;  %v664_v59 = vunpack.c.l.b16 %v335_v31  ;;  %v449_v60 = vor.u32 %v448_v22, %v445_v13  ;;  %v3283_v22 = vld [vmem:[%s3013_s30 + $0xb8] sm:$0xf] }
  0x4e   : > { %v542_v63 = vshll.u32 %v3254_v7, 16  ;;  %v665_v54 = vunpack.c.l.b16 %v345_v53  ;;  %v459_v41 = vor.u32 %v458_v33, %v454_v27  ;;  %v541_v5 = vrot.slane %v539_v55, 4  ;;  %4128 = vst [vmem:[#allocation12_spill] sm:$0xff] %v3283_v22 }
  0x4f   : > { %v548_v6 = vshll.u32 %v3261_v30, 16  ;;  %v450_v14 = vrot.slane %v449_v60, 4  ;;  %v552_v8 = vshrl.u32 %v3261_v30, 16  ;;  %v558_v20 = vshll.u32 %v3266_v49, 16  ;;  %v3288_v60 = vld [vmem:[%s3013_s30 + $0xbc] sm:$0x1] }
  0x50   : > { %v544_v0 = vrot.slane %v542_v63, 5  ;;  %v3280_v45 = vpack.c.b16 %v665_v54, %v664_v59  ;;  %v460_v21 = vrot.slane %v459_v41, 4  ;;  %4129 = vst [vmem:[#allocation13_spill] sm:$0xff] %v3288_v60  ;;  %v635_v54 = vshrl.u32 %v3278_v17, 16 }
  0x51   : > { %v550_v13 = vrot.slane %v548_v6, 5  ;;  %v455_v31 = vsel %vm3040_vm3, %v450_v14, %v454_v27  ;;  %v554_v55 = vrot.slane %v552_v8, 4  ;;  %v560_v53 = vrot.slane %v558_v20, 5 }
  0x52   : > { %v545_v33 = vor.u32 %v544_v0, %v541_v5  ;;  %2571 = vmatmul.msk.bf16.gmra.mxu0 %vm708_vm4, %v3280_v45  ;;  %v465_v59 = vsel %vm3040_vm3, %v460_v21, %v464_v42  ;;  %v674_v63 = vunpack.c.l.b16 %v455_v31  ;;  %v638_v41 = vshll.u32 %v3278_v17, 16 }
  0x53   : > { %v675_v6 = vunpack.c.l.b16 %v465_v59  ;;  %v555_v5 = vor.u32 %v554_v55, %v550_v13  ;;  %v644_v8 = vshll.u32 %v3283_v22, 16  ;;  %v637_v20 = vrot.slane %v635_v54, 4 }
  0x54   : > { %v546_v27 = vrot.slane %v545_v33, 4  ;;  %v640_v14 = vrot.slane %v638_v41, 5  ;;  %v648_v0 = vshrl.u32 %v3283_v22, 16  ;;  %v654_v16 = vshll.u32 %v3288_v60, 16  ;;  %v3307_v33 = vld [vmem:[%s3013_s30 + $0x28] sm:$0xf] }
  0x55   : > { %v3302_v42 = vpack.c.b16 %v675_v6, %v674_v63  ;;  %v556_v31 = vrot.slane %v555_v5, 4  ;;  %v646_v59 = vrot.slane %v644_v8, 5  ;;  %v1094_v55 = vrot.slane %v3060_v2, 5 }
  0x56   : > { %v551_v21 = vsel %vm3040_vm3, %v546_v27, %v550_v13  ;;  %v641_v54 = vor.u32 %v640_v14, %v637_v20  ;;  %v650_v41 = vrot.slane %v648_v0, 4  ;;  %v656_v6 = vrot.slane %v654_v16, 5 }
  0x57   : > { %4130 = vst [vmem:[#allocation14_spill] sm:$0xff] %v3302_v42  ;;  %v682_v17 = vunpack.c.l.b16 %v551_v21  ;;  %2576 = vmatmul.msk.bf16.gmra.mxu1 %vm708_vm4, %v3302_v42  ;;  %v561_v63 = vsel %vm3040_vm3, %v556_v31, %v560_v53  ;;  %v347_v13 = vshrl.u32 %v3300_v40, 16  ;;  %v350_v27 = vshll.u32 %v3300_v40, 16 }
  0x58   : > { %v683_v5 = vunpack.c.l.b16 %v561_v63  ;;  %v642_v8 = vrot.slane %v641_v54, 4  ;;  %v651_v60 = vor.u32 %v650_v41, %v646_v59  ;;  %v356_v2 = vshll.u32 %v3307_v33, 16  ;;  %v2754_v54 = vld [vmem:[%s4072_s1 + $0x18] sm:$0xf]  ;;  %v2775_v41 = vld [vmem:[%s4072_s1 + $0x1c] sm:$0xf] }
  0x59   : > { %v349_v20 = vrot.slane %v347_v13, 4  ;;  %v352_v14 = vrot.slane %v350_v27, 5  ;;  %v360_v0 = vshrl.u32 %v3307_v33, 16  ;;  %v366_v21 = vshll.u32 %v3311_v39, 16 }
  0x5a   : > { %v3322_v22 = vpack.c.b16 %v683_v5, %v682_v17  ;;  %v647_v16 = vsel %vm3040_vm3, %v642_v8, %v646_v59  ;;  %v652_v53 = vrot.slane %v651_v60, 4  ;;  %v358_v31 = vrot.slane %v356_v2, 5  ;;  %v2737_v17 = vld [vmem:[%s4072_s1 + $0x14] sm:$0xf]  ;;  %v2793_v60 = vld [vmem:[%s4072_s1 + $0x20] sm:$0xf] }
  0x5b   : > { %v690_v63 = vunpack.c.l.b16 %v647_v16  ;;  %v353_v13 = vor.u32 %v352_v14, %v349_v20  ;;  %v362_v27 = vrot.slane %v360_v0, 4  ;;  %v368_v7 = vrot.slane %v366_v21, 5 }
  0x5c   : > { %4131 = vst [vmem:[#allocation15_spill] sm:$0xff] %v3322_v22  ;;  %2580 = vmatmul.msk.bf16.gmra.mxu2 %vm708_vm4, %v3322_v22  ;;  %v657_v59 = vsel %vm3040_vm3, %v652_v53, %v656_v6  ;;  %v2665_v5 = vrot.slane %v3050_v61, 9  ;;  %v1091_v0 = vrot.slane %v3057_v1, 5  ;;  %v1864_v21 = vsel %vm757_vm0, %v2754_v54, 0 }
  0x5d   : > { %v691_v8 = vunpack.c.l.b16 %v657_v59  ;;  %v354_v2 = vrot.slane %v353_v13, 4  ;;  %v363_v20 = vor.u32 %v362_v27, %v358_v31  ;;  %v2020_v16 = vsel %vm757_vm0, %v2775_v41, 0  ;;  %1873 = vmatpush.bf16.msra.mxu2 %v1864_v21  ;;  %v2814_v21 = vld [vmem:[%s3013_s30 + $0xc] sm:$0xff] }
  0x5e   : > { %v1730_v22 = vsel %vm757_vm0, %v2737_v17, 0  ;;  %v2160_v6 = vsel %vm757_vm0, %v2793_v60, 0  ;;  %v1092_v27 = vsel %vm3343_vm7, %v2665_v5, %v1091_v0  ;;  %2029 = vmatpush.bf16.msra.mxu3 %v2020_v16  ;;  %v1093_v54 = vrot.slane %v1091_v0, 4 }
  0x5f   : > { %v3352_v53 = vpack.c.b16 %v691_v8, %v690_v63  ;;  %v359_v61 = vsel %vm3040_vm3, %v354_v2, %v358_v31  ;;  %v364_v13 = vrot.slane %v363_v20, 4  ;;  %1739 = vmatpush.bf16.msra.mxu1 %v1730_v22  ;;  %2169 = vmatpush.bf16.msra.mxu0 %v2160_v6  ;;  %v2666_v41 = vrot.slane %v3124_v35, 9  ;;  %v2813_v22 = vld [vmem:[%s3013_s30] sm:$0xff]  ;;  %v3389_v6 = vld [vmem:[%s3013_s30 + $0x18] sm:$0xff] }
  0x60   : > { %v666_v1 = vunpack.c.l.b16 %v359_v61  ;;  %v1203_v31 = vunpack.c.l.b16 %v1092_v27  ;;  %v1098_v17 = vrot.slane %v3131_v43, 5  ;;  %v1101_v60 = vrot.slane %v3134_v48, 5 }
  0x61   : > { %2584 = vmatmul.msk.bf16.gmra.mxu3 %vm708_vm4, %v3352_v53  ;;  %v369_v63 = vsel %vm3040_vm3, %v364_v13, %v368_v7  ;;  %v1095_v5 = vsel %vm3343_vm7, %v1093_v54, %v1094_v55  ;;  %v1105_v16 = vrot.slane %v3219_v56, 5  ;;  %v2667_v61 = vrot.slane %v3214_v52, 9 }
  0x62   : > { %v667_v59 = vunpack.c.l.b16 %v369_v63  ;;  %v1204_v8 = vunpack.c.l.b16 %v1095_v5  ;;  %v1099_v35 = vsel %vm3343_vm7, %v2666_v41, %v1098_v17  ;;  %v1100_v2 = vrot.slane %v1098_v17, 4  ;;  %v3409_v41 = vld [vmem:[%s3013_s30 + $0x24] sm:$0xff] }
  0x63   : > { %v1205_v7 = vunpack.c.l.b16 %v1099_v35  ;;  %v1107_v13 = vrot.slane %v1105_v16, 4  ;;  %v1108_v27 = vrot.slane %v3222_v57, 5  ;;  %v1112_v57 = vrot.slane %v3307_v33, 5 }
  0x64   : > { %v3370_v20 = vpack.c.b16 %v667_v59, %v666_v1  ;;  %v1235_v0 = vpack.c.b16 %v1204_v8, %v1203_v31  ;;  %v1102_v43 = vsel %vm3343_vm7, %v1100_v2, %v1101_v60  ;;  %v2668_v63 = vrot.slane %v3300_v40, 9  ;;  %v3431_v8 = vld [vmem:[%s3013_s30 + $0x30] sm:$0xff] }
  0x65   : > { %v1206_v48 = vunpack.c.l.b16 %v1102_v43  ;;  %v1109_v56 = vsel %vm3343_vm7, %v1107_v13, %v1108_v27  ;;  %v1114_v31 = vrot.slane %v1112_v57, 4  ;;  %v1115_v17 = vrot.slane %v3311_v39, 5  ;;  %v3459_v27 = vld [vmem:[%s3013_s30 + $0x3c] sm:$0xff] }
  0x66   : > { %2572 = vmatmul.msk.bf16.gmra.mxu0 %vm708_vm4, %v3370_v20  ;;  %v1208_v54 = vunpack.c.l.b16 %v1109_v56  ;;  %v1113_v60 = vsel %vm3343_vm7, %v2668_v63, %v1112_v57  ;;  %v1119_v39 = vrot.slane %v3019_v11, 5  ;;  %v2669_v35 = vrot.slane %v3016_v10, 9 }
  0x67   : > { %2649 = vmatmul.msk.bf16.vlgmr.msrb.gmra.mxu1 %vm708_vm4, %v2813_v22  ;;  %v3377_v55 = vpack.c.b16 %v1206_v48, %v1205_v7  ;;  %v1116_v33 = vsel %vm3343_vm7, %v1114_v31, %v1115_v17  ;;  %v1209_v59 = vunpack.c.l.b16 %v1113_v60  ;;  %v1122_v7 = vrot.slane %v3022_v12, 5 }
  0x68   : > { %v1210_v5 = vunpack.c.l.b16 %v1116_v33  ;;  %v1121_v2 = vrot.slane %v1119_v39, 4  ;;  %v1126_v13 = vrot.slane %v3079_v24, 5  ;;  %v2670_v56 = vrot.slane %v3076_v23, 9 }
  0x6a   : > { %v3423_v40 = vpack.c.b16 %v1210_v5, %v1209_v59  ;;  %v1123_v11 = vsel %vm3343_vm7, %v1121_v2, %v1122_v7  ;;  %v1127_v24 = vsel %vm3343_vm7, %v2670_v56, %v1126_v13  ;;  %v1133_v5 = vrot.slane %v3149_v3, 5 }
  0x6b   : > { %v1213_v23 = vunpack.c.l.b16 %v1127_v24  ;;  %v2671_v7 = vrot.slane %v3144_v58, 9  ;;  %v1140_v24 = vrot.slane %v3239_v32, 5 }
  0x6c   : > { %2682 = vmatmul.msk.bf16.vlgmr.msrb.gmra.mxu2 %vm708_vm4, %v1235_v0  ;;  %v1120_v0 = vsel %vm3343_vm7, %v2669_v35, %v1119_v39  ;;  %v3493_v35 = vld [vmem:[%s3013_s30 + $0x48] sm:$0xff] }
  0x6d   : > { %v1211_v48 = vunpack.c.l.b16 %v1120_v0  ;;  %4136 = vst [vmem:[#allocation18_spill] sm:$0xff] %v3493_v35  ;;  %v1135_v0 = vrot.slane %v1133_v5, 4 }
  0x71   : > { %2703 = vmatmul.msk.bf16.vlgmr.msrb.gmra.mxu3 %vm708_vm4, %v2814_v21 }
  0x76   : > { %2720 = vmatmul.msk.bf16.vlgmr.msrb.gmra.mxu0 %vm708_vm4, %v3192_v9  ;;  %v1106_v9 = vsel %vm3343_vm7, %v2667_v61, %v1105_v16 }
  0x77   : > { %2650 = vmatmul.msk.bf16.gmra.mxu1 %vm708_vm4, %v2814_v21  ;;  %v1207_v1 = vunpack.c.l.b16 %v1106_v9  ;;  %v1212_v21 = vunpack.c.l.b16 %v1123_v11  ;;  %v1136_v11 = vrot.slane %v3156_v15, 5 }
  0x79   : > { %v3403_v52 = vpack.c.b16 %v1208_v54, %v1207_v1  ;;  %v3451_v12 = vpack.c.b16 %v1212_v21, %v1211_v48  ;;  %v1128_v1 = vrot.slane %v1126_v13, 4  ;;  %v1129_v54 = vrot.slane %v3084_v29, 5 }
  0x7a   : > { %v1134_v21 = vsel %vm3343_vm7, %v2671_v7, %v1133_v5  ;;  %v1137_v13 = vsel %vm3343_vm7, %v1135_v0, %v1136_v11  ;;  %v2672_v5 = vrot.slane %v3234_v26, 9  ;;  %v1142_v7 = vrot.slane %v1140_v24, 4 }
  0x7b   : > { %v1130_v63 = vsel %vm3343_vm7, %v1128_v1, %v1129_v54  ;;  %v1215_v56 = vunpack.c.l.b16 %v1134_v21  ;;  %v1216_v1 = vunpack.c.l.b16 %v1137_v13  ;;  %v1143_v0 = vrot.slane %v3244_v46, 5 }
  0x7c   : > { %2683 = vmatmul.msk.bf16.gmra.mxu2 %vm708_vm4, %v3377_v55  ;;  %v1214_v60 = vunpack.c.l.b16 %v1130_v63  ;;  %v1141_v32 = vsel %vm3343_vm7, %v2672_v5, %v1140_v24  ;;  %v1147_v5 = vrot.slane %v3031_v19, 5 }
  0x7d   : > { %v3517_v54 = vpack.c.b16 %v1216_v1, %v1215_v56  ;;  %v1144_v13 = vsel %vm3343_vm7, %v1142_v7, %v1143_v0  ;;  %v1217_v56 = vunpack.c.l.b16 %v1141_v32  ;;  %v2938_v32 = vld [vmem:[%s3013_s30 + $0x68] sm:$0x1] }
  0x7e   : > { %v3483_v33 = vpack.c.b16 %v1214_v60, %v1213_v23  ;;  %v3527_v60 = vld [vmem:[%s3013_s30 + $0x54] sm:$0xff]  ;;  %v1218_v46 = vunpack.c.l.b16 %v1144_v13  ;;  %v1150_v13 = vrot.slane %v2938_v32, 5 }
  0x7f   : > { %4139 = vst [vmem:[#allocation21_spill] sm:$0xff] %v3517_v54 }
  0x80   : > { %4140 = vst [vmem:[#allocation22_spill] sm:$0xff] %v3527_v60 }
  0x81   : > { %2704 = vmatmul.msk.bf16.gmra.mxu3 %vm708_vm4, %v3389_v6 }
  0x86   : > { %2721 = vmatmul.msk.bf16.gmra.mxu0 %vm708_vm4, %v3280_v45 }
  0x87   : > { %2651 = vmatmul.msk.bf16.gmra.mxu1 %vm708_vm4, %v3389_v6 }
  0x8c   : > { %2684 = vmatmul.msk.bf16.gmra.mxu2 %vm708_vm4, %v3403_v52 }
  0x91   : > { %2705 = vmatmul.msk.bf16.gmra.mxu3 %vm708_vm4, %v3409_v41 }
  0x96   : > { %2722 = vmatmul.msk.bf16.gmra.mxu0 %vm708_vm4, %v3370_v20 }
  0x97   : > { %2652 = vmatmul.msk.bf16.gmra.mxu1 %vm708_vm4, %v3409_v41 }
  0x9c   : > { %v3426_v22 = vpop.f32.mrf.mxu1  ;;  %2685 = vmatmul.msk.bf16.gmra.mxu2 %vm708_vm4, %v3423_v40 }
  0xa1   : > { %2706 = vmatmul.msk.bf16.gmra.mxu3 %vm708_vm4, %v3431_v8 }
  0xa4   : > { %v3441_v43 = vpop.f32.mrf.mxu1 }
  0xa6   : > { %v3443_v16 = vpop.f32.mrf.mxu2  ;;  %2723 = vmatmul.msk.bf16.gmra.mxu0 %vm708_vm4, %v3052_v62 }
  0xa7   : > { %2653 = vmatmul.msk.bf16.gmra.mxu1 %vm708_vm4, %v3431_v8 }
  0xa9   : > { %v3449_v10 = vpop.f32.mrf.mxu0 }
  0xaa   : > { %v3453_v61 = vpop.f32.mrf.mxu3 }
  0xab   : > { %4134 = vst [vmem:[#allocation16_spill] sm:$0xff] %v3453_v61 }
  0xac   : > { %2686 = vmatmul.msk.bf16.gmra.mxu2 %vm708_vm4, %v3451_v12 }
  0xae   : > { %v3461_v9 = vpop.f32.mrf.mxu1  ;;  %v3465_v57 = vpop.f32.mrf.mxu2 }
  0xb1   : > { %2707 = vmatmul.msk.bf16.gmra.mxu3 %vm708_vm4, %v3459_v27  ;;  %v3473_v31 = vpop.f32.mrf.mxu0 }
  0xb2   : > { %v3475_v17 = vpop.f32.mrf.mxu3 }
  0xb3   : > { %4135 = vst [vmem:[#allocation17_spill] sm:$0xff] %v3475_v17 }
  0xb6   : > { %2724 = vmatmul.msk.bf16.gmra.mxu0 %vm708_vm4, %v3126_v37  ;;  %v3479_v29 = vpop.f32.mrf.mxu1 }
  0xb7   : > { %2654 = vmatmul.msk.bf16.gmra.mxu1 %vm708_vm4, %v3459_v27 }
  0xb9   : > { %v3485_v59 = vpop.f32.mrf.mxu2 }
  0xbc   : > { %2687 = vmatmul.msk.bf16.gmra.mxu2 %vm708_vm4, %v3483_v33 }
  0xbd   : > { %v3488_v39 = vpop.f32.mrf.mxu0 }
  0xbe   : > { %v3495_v2 = vpop.f32.mrf.mxu3 }
  0xbf   : > { %4137 = vst [vmem:[#allocation19_spill] sm:$0xff] %v3495_v2 }
  0xc0   : > { %v3499_v48 = vpop.f32.mrf.mxu1 }
  0xc1   : > { %2708 = vmatmul.msk.bf16.gmra.mxu3 %vm708_vm4, %v3493_v35  ;;  %v3503_v3 = vpop.f32.mrf.mxu2 }
  0xc5   : > { %v3509_v58 = vpop.f32.mrf.mxu0 }
  0xc6   : > { %2725 = vmatmul.msk.bf16.gmra.mxu0 %vm708_vm4, %v3211_v44  ;;  %v3513_v15 = vpop.f32.mrf.mxu3 }
  0xc7   : > { %4138 = vst [vmem:[#allocation20_spill] sm:$0xff] %v3513_v15  ;;  %2655 = vmatmul.msk.bf16.gmra.mxu1 %vm708_vm4, %v3493_v35  ;;  %v3562_v15 = vld [vmem:[%s3013_s30 + $0x60] sm:$0xff] }
  0xc8   : > { %v3520_v63 = vpop.f32.mrf.mxu1  ;;  %4144 = vst [vmem:[#allocation26_spill] sm:$0xff] %v3562_v15 }
  0xcc   : > { %v3522_v23 = vpop.f32.mrf.mxu2  ;;  %2688 = vmatmul.msk.bf16.gmra.mxu2 %vm708_vm4, %v3517_v54 }
  0xcf   : > { %v3531_v11 = vpop.f32.mrf.mxu0 }
  0xd0   : > { %v3533_v21 = vpop.f32.mrf.mxu3 }
  0xd1   : > { %4141 = vst [vmem:[#allocation23_spill] sm:$0xff] %v3533_v21  ;;  %2709 = vmatmul.msk.bf16.gmra.mxu3 %vm708_vm4, %v3527_v60  ;;  %v3549_v21 = vpack.c.b16 %v1218_v46, %v1217_v56 }
  0xd3   : > { %4142 = vst [vmem:[#allocation24_spill] sm:$0xff] %v3549_v21 }
  0xd4   : > { %v3541_v26 = vpop.f32.mrf.mxu1  ;;  %v3543_v1 = vpop.f32.mrf.mxu2 }
  0xd6   : > { %2726 = vmatmul.msk.bf16.gmra.mxu0 %vm708_vm4, %v3302_v42  ;;  %v2939_v42 = vld [vmem:[%s3013_s30 + $0x60] sm:$0xf] }
  0xd7   : > { %2656 = vmatmul.msk.bf16.gmra.mxu1 %vm708_vm4, %v3527_v60  ;;  %v3551_v24 = vpop.f32.mrf.mxu0  ;;  %v2673_v2 = vrot.slane %v2939_v42, 9  ;;  %v1149_v60 = vrot.slane %v1147_v5, 4 }
  0xd8   : > { %v3554_v7 = vpop.f32.mrf.mxu3 }
  0xd9   : > { %4143 = vst [vmem:[#allocation25_spill] sm:$0xff] %v3554_v7  ;;  %v1148_v19 = vsel %vm3343_vm7, %v2673_v2, %v1147_v5  ;;  %v1151_v46 = vsel %vm3343_vm7, %v1149_v60, %v1150_v13  ;;  %v1154_v60 = vrot.slane %v3099_v47, 5 }
  0xda   : > { %v1219_v17 = vunpack.c.l.b16 %v1148_v19  ;;  %v1220_v42 = vunpack.c.l.b16 %v1151_v46  ;;  %v3595_v19 = vld [vmem:[%s3013_s30 + $0x6c] sm:$0xff] }
  0xdc   : > { %2689 = vmatmul.msk.bf16.gmra.mxu2 %vm708_vm4, %v3549_v21  ;;  %v3558_v0 = vpop.f32.mrf.mxu1  ;;  %v3584_v2 = vpack.c.b16 %v1220_v42, %v1219_v17  ;;  %v1156_v17 = vrot.slane %v1154_v60, 4 }
  0xde   : > { %4146 = vst [vmem:[#allocation28_spill] sm:$0xff] %v3584_v2 }
  0xdf   : > { %v3565_v56 = vpop.f32.mrf.mxu2 }
  0xe1   : > { %2710 = vmatmul.msk.bf16.gmra.mxu3 %vm708_vm4, %v3562_v15 }
  0xe3   : > { %v3573_v7 = vpop.f32.mrf.mxu0 }
  0xe4   : > { %v3575_v32 = vpop.f32.mrf.mxu3  ;;  %v990_v21 = vpop.f32.mrf.mxu1 }
  0xe5   : > { %4145 = vst [vmem:[#allocation27_spill] sm:$0xff] %v3575_v32  ;;  %v991_v54 = vadd.f32 %v990_v21, %v3449_v10  ;;  %v1157_v21 = vrot.slane %v3106_v51, 5  ;;  %v2674_v32 = vrot.slane %v3092_v38, 9 }
  0xe6   : > { %2727 = vmatmul.msk.bf16.gmra.mxu0 %vm708_vm4, %v3071_v18 }
  0xe7   : > { %v3580_v44 = vpop.f32.mrf.mxu2  ;;  %2657 = vmatmul.msk.bf16.gmra.mxu1 %vm708_vm4, %v3562_v15  ;;  %v1155_v47 = vsel %vm3343_vm7, %v2674_v32, %v1154_v60 }
  0xe8   : > { %v1221_v61 = vunpack.c.l.b16 %v1155_v47 }
  0xeb   : > { %v3587_v5 = vpop.f32.mrf.mxu0 }
  0xec   : > { %v3589_v13 = vpop.f32.mrf.mxu3  ;;  %2690 = vmatmul.msk.bf16.gmra.mxu2 %vm708_vm4, %v3584_v2  ;;  %v992_v10 = vpop.f32.mrf.mxu1 }
  0xed   : > { %4147 = vst [vmem:[#allocation29_spill] sm:$0xff] %v3589_v13  ;;  %v993_v46 = vadd.f32 %v992_v10, %v3473_v31  ;;  %v1158_v13 = vsel %vm3343_vm7, %v1156_v17, %v1157_v21  ;;  %v1161_v21 = vrot.slane %v3171_v34, 5 }
  0xee   : > { %v1222_v35 = vunpack.c.l.b16 %v1158_v13  ;;  %v1164_v13 = vrot.slane %v3178_v50, 5 }
  0xef   : > { %v1311_v42 = vpop.f32.mrf.mxu2 }
  0xf0   : > { %v1391_v18 = vadd.f32 %v1311_v42, %v991_v54  ;;  %v3612_v10 = vpack.c.b16 %v1222_v35, %v1221_v61  ;;  %v3619_v42 = vld [vmem:[%s3013_s30 + $0x78] sm:$0xff] }
  0xf1   : > { %2711 = vmatmul.msk.bf16.gmra.mxu3 %vm708_vm4, %v3595_v19 }
  0xf3   : > { %v1601_v2 = vpop.f32.mrf.mxu0 }
  0xf4   : > { %v1445_v51 = vpop.f32.mrf.mxu3  ;;  %v995_v15 = vpop.f32.mrf.mxu1 }
  0xf5   : > { %v1525_v31 = vadd.f32 %v1445_v51, %v1391_v18  ;;  %v996_v38 = vadd.f32 %v995_v15, %v3488_v39 }
  0xf6   : > { %2728 = vmatmul.msk.bf16.gmra.mxu0 %vm708_vm4, %v3151_v4 }
  0xf7   : > { %v1313_v54 = vpop.f32.mrf.mxu2  ;;  %2658 = vmatmul.msk.bf16.gmra.mxu1 %vm708_vm4, %v3595_v19  ;;  %v3610_v32 = vadd.f32 %v1601_v2, %v1525_v31  ;;  %v2675_v2 = vrot.slane %v3167_v28, 9 }
  0xf8   : > { %v1392_v60 = vadd.f32 %v1313_v54, %v993_v46  ;;  %v1163_v46 = vrot.slane %v1161_v21, 4 }
  0xf9   : > { %v1162_v50 = vsel %vm3343_vm7, %v2675_v2, %v1161_v21 }
  0xfa   : > { %v1165_v51 = vsel %vm3343_vm7, %v1163_v46, %v1164_v13  ;;  %v1171_v46 = vrot.slane %v3266_v49, 5 }
  0xfb   : > { %v1603_v17 = vpop.f32.mrf.mxu0 }
  0xfc   : > { %v1447_v18 = vpop.f32.mrf.mxu3  ;;  %2691 = vmatmul.msk.bf16.gmra.mxu2 %vm708_vm4, %v3612_v10  ;;  %v997_v39 = vpop.f32.mrf.mxu1 }
  0xfd   : > { %v1526_v15 = vadd.f32 %v1447_v18, %v1392_v60  ;;  %v998_v47 = vadd.f32 %v997_v39, %v3509_v58  ;;  %v1223_v58 = vunpack.c.l.b16 %v1162_v50  ;;  %v1224_v18 = vunpack.c.l.b16 %v1165_v51  ;;  %v3645_v50 = vld [vmem:[%s3013_s30 + $0x84] sm:$0xff] }
  0xff   : > { %v1316_v61 = vpop.f32.mrf.mxu2  ;;  %v3623_v35 = vadd.f32 %v1603_v17, %v1526_v15  ;;  %v3638_v13 = vpack.c.b16 %v1224_v18, %v1223_v58  ;;  %v1168_v15 = vrot.slane %v3261_v30, 5 }
 0x100   : > { %v1393_v34 = vadd.f32 %v1316_v61, %v996_v38 }
 0x101   : > { %2712 = vmatmul.msk.bf16.gmra.mxu3 %vm708_vm4, %v3619_v42 }
 0x103   : > { %v1606_v31 = vpop.f32.mrf.mxu0 }
 0x104   : > { %v1450_v54 = vpop.f32.mrf.mxu3  ;;  %v1000_v60 = vpop.f32.mrf.mxu1 }
 0x105   : > { %v1527_v28 = vadd.f32 %v1450_v54, %v1393_v34  ;;  %v1001_v17 = vadd.f32 %v1000_v60, %v3531_v11 }
 0x106   : > { %2729 = vmatmul.msk.bf16.gmra.mxu0 %vm708_vm4, %v3236_v25 }
 0x107   : > { %v1318_v38 = vpop.f32.mrf.mxu2  ;;  %2659 = vmatmul.msk.bf16.gmra.mxu1 %vm708_vm4, %v3619_v42  ;;  %v3636_v21 = vadd.f32 %v1606_v31, %v1527_v28  ;;  %v4148_v31 = vld [vmem:[#allocation9_spill] sm:$0xff] }
 0x108   : > { %v1394_v39 = vadd.f32 %v1318_v38, %v998_v47  ;;  %v2676_v54 = vrot.slane %v4148_v31, 9  ;;  %v1170_v47 = vrot.slane %v1168_v15, 4 }
 0x10a   : > { %v1169_v49 = vsel %vm3343_vm7, %v2676_v54, %v1168_v15  ;;  %v1172_v18 = vsel %vm3343_vm7, %v1170_v47, %v1171_v46  ;;  %v2940_v54 = vld [vmem:[%s3013_s30 + $0x94] sm:$0xf] }
 0x10b   : > { %v1608_v2 = vpop.f32.mrf.mxu0  ;;  %v1175_v47 = vrot.slane %v2940_v54, 5 }
 0x10c   : > { %v1452_v61 = vpop.f32.mrf.mxu3  ;;  %2692 = vmatmul.msk.bf16.gmra.mxu2 %vm708_vm4, %v3638_v13  ;;  %v1002_v11 = vpop.f32.mrf.mxu1 }
 0x10d   : > { %v1528_v34 = vadd.f32 %v1452_v61, %v1394_v39  ;;  %v1003_v51 = vadd.f32 %v1002_v11, %v3551_v24  ;;  %v1225_v39 = vunpack.c.l.b16 %v1169_v49  ;;  %v1226_v61 = vunpack.c.l.b16 %v1172_v18 }
 0x10f   : > { %v1321_v60 = vpop.f32.mrf.mxu2  ;;  %v3649_v58 = vadd.f32 %v1608_v2, %v1528_v34  ;;  %v3664_v31 = vpack.c.b16 %v1226_v61, %v1225_v39 }
 0x110   : > { %v1395_v30 = vadd.f32 %v1321_v60, %v1001_v17  ;;  %v4150_v17 = vld [vmem:[#allocation15_spill] sm:$0xff] }
 0x111   : > { %4149 = vst [vmem:[#allocation9_spill] sm:$0xff] %v3649_v58  ;;  %2713 = vmatmul.msk.bf16.gmra.mxu3 %vm708_vm4, %v3645_v50 }
 0x112   : > { %4152 = vst [vmem:[#allocation31_spill] sm:$0xff] %v3664_v31 }
 0x113   : > { %v1611_v28 = vpop.f32.mrf.mxu0 }
 0x114   : > { %v1455_v24 = vpop.f32.mrf.mxu3  ;;  %v1005_v38 = vpop.f32.mrf.mxu1 }
 0x115   : > { %v1529_v11 = vadd.f32 %v1455_v24, %v1395_v30  ;;  %v1006_v2 = vadd.f32 %v1005_v38, %v3573_v7  ;;  %v2941_v30 = vld [vmem:[%s3013_s30 + $0x98] sm:$0x1]  ;;  %v3671_v38 = vld [vmem:[%s3013_s30 + $0x90] sm:$0xff] }
 0x116   : > { %2730 = vmatmul.msk.bf16.gmra.mxu0 %vm708_vm4, %v4150_v17  ;;  %v1178_v49 = vrot.slane %v2941_v30, 5  ;;  %4153 = vst [vmem:[#allocation32_spill] sm:$0xff] %v3671_v38 }
 0x117   : > { %v1323_v34 = vpop.f32.mrf.mxu2  ;;  %2660 = vmatmul.msk.bf16.gmra.mxu1 %vm708_vm4, %v3645_v50  ;;  %v3662_v15 = vadd.f32 %v1611_v28, %v1529_v11  ;;  %v2942_v28 = vld [vmem:[%s3013_s30 + $0x90] sm:$0xf] }
 0x118   : > { %v1396_v46 = vadd.f32 %v1323_v34, %v1003_v51  ;;  %v2677_v11 = vrot.slane %v2942_v28, 9  ;;  %v1177_v51 = vrot.slane %v1175_v47, 4 }
 0x119   : > { %4151 = vst [vmem:[#allocation30_spill] sm:$0xff] %v3662_v15 }
 0x11a   : > { %v1176_v54 = vsel %vm3343_vm7, %v2677_v11, %v1175_v47  ;;  %v2943_v11 = vld [vmem:[%s3013_s30 + $0xa0] sm:$0xf] }
 0x11b   : > { %v1613_v60 = vpop.f32.mrf.mxu0 }
 0x11c   : > { %v1457_v7 = vpop.f32.mrf.mxu3  ;;  %2693 = vmatmul.msk.bf16.gmra.mxu2 %vm708_vm4, %v3664_v31  ;;  %v1007_v18 = vpop.f32.mrf.mxu1  ;;  %v2945_v31 = vld [vmem:[%s3013_s30 + $0x9c] sm:$0xf] }
 0x11d   : > { %v1530_v24 = vadd.f32 %v1457_v7, %v1396_v46  ;;  %v1008_v58 = vadd.f32 %v1007_v18, %v3587_v5  ;;  %v1179_v46 = vsel %vm3343_vm7, %v1177_v51, %v1178_v49  ;;  %v1227_v18 = vunpack.c.l.b16 %v1176_v54 }
 0x11e   : > { %v1228_v28 = vunpack.c.l.b16 %v1179_v46  ;;  %v1182_v51 = vrot.slane %v2943_v11, 5  ;;  %v2944_v46 = vld [vmem:[%s3013_s30 + $0xa4] sm:$0x1] }
 0x11f   : > { %v1326_v39 = vpop.f32.mrf.mxu2  ;;  %v3675_v61 = vadd.f32 %v1613_v60, %v1530_v24  ;;  %v4155_v60 = vld [vmem:[#allocation3_spill] sm:$0xff] }
 0x120   : > { %v1397_v34 = vadd.f32 %v1326_v39, %v1006_v2  ;;  %v3689_v49 = vpack.c.b16 %v1228_v28, %v1227_v18 }
 0x121   : > { %4154 = vst [vmem:[#allocation33_spill] sm:$0xff] %v3675_v61  ;;  %2714 = vmatmul.msk.bf16.gmra.mxu3 %vm708_vm4, %v3671_v38 }
 0x122   : > { %4157 = vst [vmem:[#allocation35_spill] sm:$0xff] %v3689_v49 }
 0x123   : > { %v1616_v30 = vpop.f32.mrf.mxu0 }
 0x124   : > { %v1460_v7 = vpop.f32.mrf.mxu3  ;;  %v1010_v5 = vpop.f32.mrf.mxu1 }
 0x125   : > { %v1531_v15 = vadd.f32 %v1460_v7, %v1397_v34  ;;  %v1185_v7 = vrot.slane %v2944_v46, 5 }
 0x126   : > { %2731 = vmatmul.msk.bf16.gmra.mxu0 %vm708_vm4, %v4155_v60  ;;  %v3696_v60 = vld [vmem:[%s3013_s30 + $0x9c] sm:$0xff] }
 0x127   : > { %v1328_v2 = vpop.f32.mrf.mxu2  ;;  %2661 = vmatmul.msk.bf16.gmra.mxu1 %vm708_vm4, %v3671_v38  ;;  %v3687_v47 = vadd.f32 %v1616_v30, %v1531_v15  ;;  %4158 = vst [vmem:[#allocation36_spill] sm:$0xff] %v3696_v60  ;;  %v2678_v38 = vrot.slane %v2945_v31, 9  ;;  %v1184_v15 = vrot.slane %v1182_v51, 4 }
 0x128   : > { %v1398_v24 = vadd.f32 %v1328_v2, %v1008_v58  ;;  %v1011_v58 = vadd.f32 %v1010_v5, %v3426_v22  ;;  %v4160_v5 = vld [vmem:[#allocation4_spill] sm:$0xff] }
 0x129   : > { %4156 = vst [vmem:[#allocation34_spill] sm:$0xff] %v3687_v47  ;;  %v1183_v2 = vsel %vm3343_vm7, %v2678_v38, %v1182_v51 }
 0x12a   : > { %v1229_v31 = vunpack.c.l.b16 %v1183_v2 }
 0x12b   : > { %v1618_v39 = vpop.f32.mrf.mxu0 }
 0x12c   : > { %v1462_v54 = vpop.f32.mrf.mxu3  ;;  %2694 = vmatmul.msk.bf16.gmra.mxu2 %vm708_vm4, %v3689_v49  ;;  %v1012_v34 = vpop.f32.mrf.mxu1 }
 0x12d   : > { %v1532_v61 = vadd.f32 %v1462_v54, %v1398_v24  ;;  %v1186_v24 = vsel %vm3343_vm7, %v1184_v15, %v1185_v7  ;;  %v4163_v15 = vld [vmem:[#allocation6_spill] sm:$0xff] }
 0x12e   : > { %v1230_v47 = vunpack.c.l.b16 %v1186_v24  ;;  %v4164_v24 = vld [vmem:[#allocation7_spill] sm:$0xff] }
 0x12f   : > { %v1331_v30 = vpop.f32.mrf.mxu2  ;;  %v3700_v18 = vadd.f32 %v1618_v39, %v1532_v61  ;;  %v1013_v61 = vadd.f32 %v1012_v34, %v3441_v43  ;;  %v3722_v34 = vld [vmem:[%s3013_s30 + $0xa8] sm:$0xff] }
 0x130   : > { %v1399_v28 = vadd.f32 %v1331_v30, %v1011_v58  ;;  %v3715_v7 = vpack.c.b16 %v1230_v47, %v1229_v31  ;;  %v1189_v58 = vrot.slane %v4163_v15, 5  ;;  %4165 = vst [vmem:[#allocation6_spill] sm:$0xff] %v3722_v34 }
 0x131   : > { %4159 = vst [vmem:[#allocation37_spill] sm:$0xff] %v3700_v18  ;;  %2715 = vmatmul.msk.bf16.gmra.mxu3 %vm708_vm4, %v3696_v60  ;;  %v4166_v18 = vld [vmem:[#allocation5_spill] sm:$0xff] }
 0x132   : > { %4162 = vst [vmem:[#allocation39_spill] sm:$0xff] %v3715_v7 }
 0x133   : > { %v1621_v11 = vpop.f32.mrf.mxu0 }
 0x134   : > { %v1465_v54 = vpop.f32.mrf.mxu3  ;;  %v1015_v46 = vpop.f32.mrf.mxu1 }
 0x135   : > { %v1533_v22 = vadd.f32 %v1465_v54, %v1399_v28  ;;  %v1192_v54 = vrot.slane %v4164_v24, 5 }
 0x136   : > { %2732 = vmatmul.msk.bf16.gmra.mxu0 %vm708_vm4, %v4160_v5  ;;  %v2679_v5 = vrot.slane %v4166_v18, 9 }
 0x137   : > { %v1333_v39 = vpop.f32.mrf.mxu2  ;;  %2662 = vmatmul.msk.bf16.gmra.mxu1 %vm708_vm4, %v3696_v60  ;;  %v3713_v38 = vadd.f32 %v1621_v11, %v1533_v22  ;;  %v1191_v11 = vrot.slane %v1189_v58, 4  ;;  %v1016_v22 = vadd.f32 %v1015_v46, %v3461_v9 }
 0x138   : > { %v1400_v51 = vadd.f32 %v1333_v39, %v1013_v61  ;;  %v1190_v39 = vsel %vm3343_vm7, %v2679_v5, %v1189_v58  ;;  %v3740_v5 = vld [vmem:[%s3013_s30 + $0xc0] sm:$0xf] }
 0x139   : > { %4161 = vst [vmem:[#allocation38_spill] sm:$0xff] %v3713_v38  ;;  %v1231_v24 = vunpack.c.l.b16 %v1190_v39  ;;  %v4168_v38 = vld [vmem:[#allocation10_spill] sm:$0xff]  ;;  %v1558_v39 = vshrl.u32 %v3740_v5, 16 }
 0x13a   : > { %4169 = vst [vmem:[#allocation5_spill] sm:$0xff] %v3740_v5 }
 0x13b   : > { %v1623_v30 = vpop.f32.mrf.mxu0 }
 0x13c   : > { %v1467_v2 = vpop.f32.mrf.mxu3  ;;  %2695 = vmatmul.msk.bf16.gmra.mxu2 %vm708_vm4, %v3715_v7  ;;  %v1017_v28 = vpop.f32.mrf.mxu1 }
 0x13d   : > { %v1534_v43 = vadd.f32 %v1467_v2, %v1400_v51  ;;  %v1193_v51 = vsel %vm3343_vm7, %v1191_v11, %v1192_v54 }
 0x13e   : > { %v1232_v9 = vunpack.c.l.b16 %v1193_v51 }
 0x13f   : > { %v1336_v47 = vpop.f32.mrf.mxu2  ;;  %v3726_v31 = vadd.f32 %v1623_v30, %v1534_v43  ;;  %v1018_v30 = vadd.f32 %v1017_v28, %v3479_v29  ;;  %v1561_v29 = vshll.u32 %v3740_v5, 16 }
 0x140   : > { %v1401_v61 = vadd.f32 %v1336_v47, %v1016_v22  ;;  %v3744_v11 = vpack.c.b16 %v1232_v9, %v1231_v24  ;;  %v3747_v22 = vld [vmem:[%s3013_s30 + $0xc4] sm:$0xf]  ;;  %v4173_v47 = vld [vmem:[#allocation12_spill] sm:$0xff]  ;;  %v4174_v24 = vld [vmem:[#allocation13_spill] sm:$0xff] }
 0x141   : > { %4167 = vst [vmem:[#allocation7_spill] sm:$0xff] %v3726_v31  ;;  %2716 = vmatmul.msk.bf16.gmra.mxu3 %vm708_vm4, %v3722_v34  ;;  %v1567_v28 = vshll.u32 %v3747_v22, 16  ;;  %v1199_v9 = vrot.slane %v4174_v24, 5  ;;  %v1563_v7 = vrot.slane %v1561_v29, 5 }
 0x142   : > { %4171 = vst [vmem:[#allocation41_spill] sm:$0xff] %v3744_v11 }
 0x143   : > { %v1626_v15 = vpop.f32.mrf.mxu0  ;;  %4172 = vst [vmem:[#allocation42_spill] sm:$0xff] %v3747_v22 }
 0x144   : > { %v1470_v18 = vpop.f32.mrf.mxu3  ;;  %v1020_v2 = vpop.f32.mrf.mxu1 }
 0x145   : > { %v1535_v46 = vadd.f32 %v1470_v18, %v1401_v61  ;;  %v1196_v61 = vrot.slane %v4173_v47, 5  ;;  %v1571_v18 = vshrl.u32 %v3747_v22, 16  ;;  %v1021_v5 = vadd.f32 %v1020_v2, %v3499_v48 }
 0x146   : > { %2733 = vmatmul.msk.bf16.gmra.mxu0 %vm708_vm4, %v4168_v38  ;;  %v1560_v38 = vrot.slane %v1558_v39, 4  ;;  %v1569_v22 = vrot.slane %v1567_v28, 5 }
 0x147   : > { %v1338_v43 = vpop.f32.mrf.mxu2  ;;  %2663 = vmatmul.msk.bf16.gmra.mxu1 %vm708_vm4, %v3722_v34  ;;  %v3742_v58 = vadd.f32 %v1626_v15, %v1535_v46  ;;  %v1573_v60 = vrot.slane %v1571_v18, 4 }
 0x148   : > { %v1402_v54 = vadd.f32 %v1338_v43, %v1018_v30  ;;  %v3758_v30 = vld [vmem:[%s3013_s30 + $0xb4] sm:$0xff]  ;;  %v4175_v43 = vld [vmem:[#allocation11_spill] sm:$0xff]  ;;  %v1564_v2 = vor.u32 %v1563_v7, %v1560_v38 }
 0x149   : > { %4170 = vst [vmem:[#allocation40_spill] sm:$0xff] %v3742_v58  ;;  %v2680_v47 = vrot.slane %v4175_v43, 9  ;;  %v1198_v58 = vrot.slane %v1196_v61, 4  ;;  %v1574_v39 = vor.u32 %v1573_v60, %v1569_v22 }
 0x14b   : > { %v1628_v51 = vpop.f32.mrf.mxu0  ;;  %v1575_v38 = vrot.slane %v1574_v39, 4 }
 0x14c   : > { %v1472_v31 = vpop.f32.mrf.mxu3  ;;  %2696 = vmatmul.msk.bf16.gmra.mxu2 %vm708_vm4, %v3744_v11  ;;  %v1022_v15 = vpop.f32.mrf.mxu1  ;;  %v3765_v11 = vld [vmem:[%s3013_s30 + $0xc8] sm:$0x1] }
 0x14d   : > { %v1536_v46 = vadd.f32 %v1472_v31, %v1402_v54  ;;  %v1197_v31 = vsel %vm3343_vm7, %v2680_v47, %v1196_v61  ;;  %v1200_v54 = vsel %vm3343_vm7, %v1198_v58, %v1199_v9  ;;  %v1577_v29 = vshll.u32 %v3765_v11, 16 }
 0x14e   : > { %v1233_v18 = vunpack.c.l.b16 %v1197_v31  ;;  %v1023_v24 = vadd.f32 %v1022_v15, %v3520_v63  ;;  %v1565_v58 = vrot.slane %v1564_v2, 4 }
 0x14f   : > { %v1341_v34 = vpop.f32.mrf.mxu2  ;;  %v3762_v49 = vadd.f32 %v1628_v51, %v1536_v46  ;;  %v1579_v60 = vrot.slane %v1577_v29, 5 }
 0x150   : > { %v1403_v17 = vadd.f32 %v1341_v34, %v1021_v5  ;;  %v1234_v34 = vunpack.c.l.b16 %v1200_v54  ;;  %v3790_v54 = vld [vmem:[%s3013_s30 + $0xc0] sm:$0xff] }
 0x151   : > { %2717 = vmatmul.msk.bf16.gmra.mxu3 %vm708_vm4, %v3758_v30  ;;  %v1580_v63 = vsel %vm3040_vm3, %v1575_v38, %v1579_v60 }
 0x152   : > { %v3781_v46 = vpack.c.b16 %v1234_v34, %v1233_v18  ;;  %v1584_v39 = vunpack.c.l.b16 %v1580_v63 }
 0x153   : > { %v1631_v48 = vpop.f32.mrf.mxu0 }
 0x154   : > { %v1475_v28 = vpop.f32.mrf.mxu3  ;;  %v1025_v51 = vpop.f32.mrf.mxu1 }
 0x155   : > { %v1537_v5 = vadd.f32 %v1475_v28, %v1403_v17  ;;  %v1570_v17 = vsel %vm3040_vm3, %v1565_v58, %v1569_v22 }
 0x156   : > { %2734 = vmatmul.msk.bf16.gmra.mxu0 %vm708_vm4, %v3352_v53  ;;  %v1583_v2 = vunpack.c.l.b16 %v1570_v17 }
 0x157   : > { %v1343_v61 = vpop.f32.mrf.mxu2  ;;  %2664 = vmatmul.msk.bf16.gmra.mxu1 %vm708_vm4, %v3758_v30  ;;  %v3779_v7 = vadd.f32 %v1631_v48, %v1537_v5  ;;  %v1026_v48 = vadd.f32 %v1025_v51, %v3541_v26 }
 0x158   : > { %v1404_v9 = vadd.f32 %v1343_v61, %v1023_v24  ;;  %v3797_v22 = vpack.c.b16 %v1584_v39, %v1583_v2 }
 0x15b   : > { %v1633_v43 = vpop.f32.mrf.mxu0 }
 0x15c   : > { %v1477_v15 = vpop.f32.mrf.mxu3  ;;  %2697 = vmatmul.msk.bf16.gmra.mxu2 %vm708_vm4, %v3781_v46  ;;  %v1027_v47 = vpop.f32.mrf.mxu1 }
 0x15d   : > { %v1538_v31 = vadd.f32 %v1477_v15, %v1404_v9  ;;  %v1028_v26 = vadd.f32 %v1027_v47, %v3558_v0 }
 0x15f   : > { %v1346_v29 = vpop.f32.mrf.mxu2  ;;  %v3793_v28 = vadd.f32 %v1633_v43, %v1538_v31 }
 0x160   : > { %v1405_v18 = vadd.f32 %v1346_v29, %v1026_v48 }
 0x161   : > { %2718 = vmatmul.msk.bf16.gmra.mxu3 %vm708_vm4, %v3790_v54 }
 0x163   : > { %v1636_v34 = vpop.f32.mrf.mxu0 }
 0x164   : > { %v1480_v5 = vpop.f32.mrf.mxu3  ;;  %v1030_v24 = vpop.f32.mrf.mxu1 }
 0x165   : > { %v1539_v61 = vadd.f32 %v1480_v5, %v1405_v18  ;;  %v1031_v63 = vadd.f32 %v1030_v24, %v3443_v16 }
 0x166   : > { %2735 = vmatmul.msk.bf16.gmra.mxu0 %vm708_vm4, %v3797_v22 }
 0x167   : > { %v1348_v51 = vpop.f32.mrf.mxu2  ;;  %2738 = vmatmul.msk.bf16.vlgmr.msra.gmra.mxu1 %vm708_vm4, %v3377_v55  ;;  %v3804_v58 = vadd.f32 %v1636_v34, %v1539_v61 }
 0x168   : > { %v1406_v38 = vadd.f32 %v1348_v51, %v1028_v26 }
 0x16b   : > { %v1638_v60 = vpop.f32.mrf.mxu0 }
 0x16c   : > { %v1482_v9 = vpop.f32.mrf.mxu3  ;;  %2759 = vmatmul.msk.bf16.vlgmr.msra.gmra.mxu2 %vm708_vm4, %v3389_v6  ;;  %v1032_v43 = vpop.f32.mrf.mxu1 }
 0x16d   : > { %v1540_v17 = vadd.f32 %v1482_v9, %v1406_v38  ;;  %v1033_v6 = vadd.f32 %v1032_v43, %v3465_v57 }
 0x16f   : > { %v1351_v15 = vpop.f32.mrf.mxu2  ;;  %v3809_v31 = vadd.f32 %v1638_v60, %v1540_v17 }
 0x170   : > { %v1407_v0 = vadd.f32 %v1351_v15, %v1031_v63 }
 0x171   : > { %2776 = vmatmul.msk.bf16.vlgmr.msra.gmra.mxu3 %vm708_vm4, %v3280_v45 }
 0x173   : > { %v1641_v55 = vpop.f32.mrf.mxu0 }
 0x174   : > { %v1485_v47 = vpop.f32.mrf.mxu3  ;;  %v1035_v48 = vpop.f32.mrf.mxu1 }
 0x175   : > { %v1541_v2 = vadd.f32 %v1485_v47, %v1407_v0  ;;  %v1036_v24 = vadd.f32 %v1035_v48, %v3485_v59 }
 0x176   : > { %2794 = vmatmul.msk.bf16.vlgmr.msra.gmra.mxu0 %vm708_vm4, %v3403_v52 }
 0x177   : > { %v1353_v39 = vpop.f32.mrf.mxu2  ;;  %2739 = vmatmul.msk.bf16.gmra.mxu1 %vm708_vm4, %v3403_v52  ;;  %v3818_v16 = vadd.f32 %v1641_v55, %v1541_v2 }
 0x178   : > { %v1408_v29 = vadd.f32 %v1353_v39, %v1033_v6 }
 0x17b   : > { %v1643_v18 = vpop.f32.mrf.mxu0 }
 0x17c   : > { %v1487_v34 = vpop.f32.mrf.mxu3  ;;  %2760 = vmatmul.msk.bf16.gmra.mxu2 %vm708_vm4, %v3409_v41  ;;  %v1037_v45 = vpop.f32.mrf.mxu1 }
 0x17d   : > { %v1542_v5 = vadd.f32 %v1487_v34, %v1408_v29  ;;  %v1038_v41 = vadd.f32 %v1037_v45, %v3503_v3 }
 0x17f   : > { %v1356_v61 = vpop.f32.mrf.mxu2  ;;  %v3823_v26 = vadd.f32 %v1643_v18, %v1542_v5 }
 0x180   : > { %v1409_v57 = vadd.f32 %v1356_v61, %v1036_v24 }
 0x181   : > { %2777 = vmatmul.msk.bf16.gmra.mxu3 %vm708_vm4, %v3370_v20 }
 0x183   : > { %v1646_v52 = vpop.f32.mrf.mxu0 }
 0x184   : > { %v1490_v51 = vpop.f32.mrf.mxu3  ;;  %v1040_v38 = vpop.f32.mrf.mxu1 }
 0x185   : > { %v1543_v60 = vadd.f32 %v1490_v51, %v1409_v57  ;;  %v1041_v0 = vadd.f32 %v1040_v38, %v3522_v23 }
 0x186   : > { %2795 = vmatmul.msk.bf16.gmra.mxu0 %vm708_vm4, %v3423_v40 }
 0x187   : > { %v1358_v9 = vpop.f32.mrf.mxu2  ;;  %2740 = vmatmul.msk.bf16.gmra.mxu1 %vm708_vm4, %v3423_v40  ;;  %v3832_v59 = vadd.f32 %v1646_v52, %v1543_v60 }
 0x188   : > { %v1410_v43 = vadd.f32 %v1358_v9, %v1038_v41 }
 0x18b   : > { %v1648_v17 = vpop.f32.mrf.mxu0 }
 0x18c   : > { %v1492_v63 = vpop.f32.mrf.mxu3  ;;  %2761 = vmatmul.msk.bf16.gmra.mxu2 %vm708_vm4, %v3431_v8  ;;  %v1042_v20 = vpop.f32.mrf.mxu1 }
 0x18d   : > { %v1544_v15 = vadd.f32 %v1492_v63, %v1410_v43  ;;  %v1043_v8 = vadd.f32 %v1042_v20, %v3543_v1  ;;  %v4176_v43 = vld [vmem:[#allocation18_spill] sm:$0xff]  ;;  %v4177_v63 = vld [vmem:[#allocation16_spill] sm:$0xff] }
 0x18f   : > { %v1361_v55 = vpop.f32.mrf.mxu2  ;;  %v3837_v47 = vadd.f32 %v1648_v17, %v1544_v15 }
 0x190   : > { %v1411_v3 = vadd.f32 %v1361_v55, %v1041_v0  ;;  %v4178_v55 = vld [vmem:[#allocation8_spill] sm:$0xff] }
 0x191   : > { %2778 = vmatmul.msk.bf16.gmra.mxu3 %vm708_vm4, %v3052_v62 }
 0x193   : > { %v1651_v40 = vpop.f32.mrf.mxu0 }
 0x194   : > { %v1495_v48 = vpop.f32.mrf.mxu3  ;;  %v1045_v2 = vpop.f32.mrf.mxu1 }
 0x195   : > { %v1545_v6 = vadd.f32 %v1495_v48, %v1411_v3  ;;  %v1046_v5 = vadd.f32 %v1045_v2, %v3565_v56  ;;  %v4179_v2 = vld [vmem:[#allocation21_spill] sm:$0xff] }
 0x196   : > { %2796 = vmatmul.msk.bf16.gmra.mxu0 %vm708_vm4, %v3451_v12 }
 0x197   : > { %v1363_v39 = vpop.f32.mrf.mxu2  ;;  %2741 = vmatmul.msk.bf16.gmra.mxu1 %vm708_vm4, %v3451_v12  ;;  %v3846_v23 = vadd.f32 %v1651_v40, %v1545_v6  ;;  %v4180_v6 = vld [vmem:[#allocation17_spill] sm:$0xff] }
 0x198   : > { %v1412_v29 = vadd.f32 %v1363_v39, %v1043_v8 }
 0x19b   : > { %v1653_v18 = vpop.f32.mrf.mxu0 }
 0x19c   : > { %v1497_v34 = vpop.f32.mrf.mxu3  ;;  %2762 = vmatmul.msk.bf16.gmra.mxu2 %vm708_vm4, %v3459_v27  ;;  %v1047_v62 = vpop.f32.mrf.mxu1 }
 0x19d   : > { %v1546_v45 = vadd.f32 %v1497_v34, %v1412_v29  ;;  %v1048_v27 = vadd.f32 %v1047_v62, %v3580_v44 }
 0x19f   : > { %v1366_v24 = vpop.f32.mrf.mxu2  ;;  %v3851_v61 = vadd.f32 %v1653_v18, %v1546_v45  ;;  %v4181_v45 = vld [vmem:[#allocation22_spill] sm:$0xff] }
 0x1a0   : > { %v1413_v1 = vadd.f32 %v1366_v24, %v1046_v5 }
 0x1a1   : > { %2779 = vmatmul.msk.bf16.gmra.mxu3 %vm708_vm4, %v3126_v37 }
 0x1a3   : > { %v1656_v12 = vpop.f32.mrf.mxu0 }
 0x1a4   : > { %v1500_v57 = vpop.f32.mrf.mxu3  ;;  %v1050_v52 = vpop.f32.mrf.mxu1 }
 0x1a5   : > { %v1547_v51 = vadd.f32 %v1500_v57, %v1413_v1  ;;  %v1051_v20 = vadd.f32 %v1050_v52, %v4177_v63  ;;  %v4182_v1 = vld [vmem:[#allocation19_spill] sm:$0xff] }
 0x1a6   : > { %2797 = vmatmul.msk.bf16.gmra.mxu0 %vm708_vm4, %v3483_v33 }
 0x1a7   : > { %v1368_v38 = vpop.f32.mrf.mxu2  ;;  %2742 = vmatmul.msk.bf16.gmra.mxu1 %vm708_vm4, %v3483_v33  ;;  %v3860_v56 = vadd.f32 %v1656_v12, %v1547_v51 }
 0x1a8   : > { %v1414_v60 = vadd.f32 %v1368_v38, %v1048_v27  ;;  %v4183_v27 = vld [vmem:[#allocation14_spill] sm:$0xff] }
 0x1ab   : > { %v1658_v41 = vpop.f32.mrf.mxu0 }
 0x1ac   : > { %v1502_v9 = vpop.f32.mrf.mxu3  ;;  %2763 = vmatmul.msk.bf16.gmra.mxu2 %vm708_vm4, %v4176_v43  ;;  %v1052_v37 = vpop.f32.mrf.mxu1  ;;  %v4184_v43 = vld [vmem:[#allocation24_spill] sm:$0xff] }
 0x1ad   : > { %v1548_v17 = vadd.f32 %v1502_v9, %v1414_v60  ;;  %v1053_v8 = vadd.f32 %v1052_v37, %v4180_v6  ;;  %v4185_v37 = vld [vmem:[#allocation20_spill] sm:$0xff] }
 0x1af   : > { %v1371_v15 = vpop.f32.mrf.mxu2  ;;  %v3865_v0 = vadd.f32 %v1658_v41, %v1548_v17 }
 0x1b0   : > { %v1415_v44 = vadd.f32 %v1371_v15, %v1051_v20 }
 0x1b1   : > { %2780 = vmatmul.msk.bf16.gmra.mxu3 %vm708_vm4, %v4178_v55 }
 0x1b3   : > { %v1661_v33 = vpop.f32.mrf.mxu0 }
 0x1b4   : > { %v1505_v3 = vpop.f32.mrf.mxu3  ;;  %v1055_v40 = vpop.f32.mrf.mxu1 }
 0x1b5   : > { %v1549_v48 = vadd.f32 %v1505_v3, %v1415_v44  ;;  %v1056_v12 = vadd.f32 %v1055_v40, %v4182_v1  ;;  %v4190_v1 = vld [vmem:[#allocation25_spill] sm:$0xff] }
 0x1b6   : > { %2798 = vmatmul.msk.bf16.gmra.mxu0 %vm708_vm4, %v4179_v2 }
 0x1b7   : > { %v1373_v39 = vpop.f32.mrf.mxu2  ;;  %2743 = vmatmul.msk.bf16.gmra.mxu1 %vm708_vm4, %v4179_v2  ;;  %v3874_v29 = vadd.f32 %v1661_v33, %v1549_v48  ;;  %v4186_v33 = vld [vmem:[#allocation26_spill] sm:$0xff]  ;;  %v4187_v48 = vld [vmem:[#allocation23_spill] sm:$0xff] }
 0x1b8   : > { %v1416_v18 = vadd.f32 %v1373_v39, %v1053_v8 }
 0x1bb   : > { %v1663_v34 = vpop.f32.mrf.mxu0 }
 0x1bc   : > { %v1507_v62 = vpop.f32.mrf.mxu3  ;;  %2764 = vmatmul.msk.bf16.gmra.mxu2 %vm708_vm4, %v4181_v45  ;;  %v1057_v5 = vpop.f32.mrf.mxu1 }
 0x1bd   : > { %v1550_v24 = vadd.f32 %v1507_v62, %v1416_v18  ;;  %v1058_v17 = vadd.f32 %v1057_v5, %v4185_v37  ;;  %v4188_v18 = vld [vmem:[#allocation2_spill] sm:$0xff] }
 0x1bf   : > { %v1376_v57 = vpop.f32.mrf.mxu2  ;;  %v3879_v52 = vadd.f32 %v1663_v34, %v1550_v24  ;;  %v4189_v24 = vld [vmem:[#allocation28_spill] sm:$0xff] }
 0x1c0   : > { %v1417_v51 = vadd.f32 %v1376_v57, %v1056_v12 }
 0x1c1   : > { %2781 = vmatmul.msk.bf16.gmra.mxu3 %vm708_vm4, %v4183_v27 }
 0x1c3   : > { %v1666_v38 = vpop.f32.mrf.mxu0 }
 0x1c4   : > { %v1510_v60 = vpop.f32.mrf.mxu3  ;;  %v1060_v41 = vpop.f32.mrf.mxu1 }
 0x1c5   : > { %v1551_v9 = vadd.f32 %v1510_v60, %v1417_v51  ;;  %v1061_v2 = vadd.f32 %v1060_v41, %v4187_v48 }
 0x1c6   : > { %2799 = vmatmul.msk.bf16.gmra.mxu0 %vm708_vm4, %v4184_v43 }
 0x1c7   : > { %v1378_v63 = vpop.f32.mrf.mxu2  ;;  %2744 = vmatmul.msk.bf16.gmra.mxu1 %vm708_vm4, %v4184_v43  ;;  %v3888_v20 = vadd.f32 %v1666_v38, %v1551_v9  ;;  %v4191_v43 = vld [vmem:[#allocation27_spill] sm:$0xff] }
 0x1c8   : > { %v1418_v15 = vadd.f32 %v1378_v63, %v1058_v17 }
 0x1cb   : > { %v1668_v44 = vpop.f32.mrf.mxu0 }
 0x1cc   : > { %v1512_v55 = vpop.f32.mrf.mxu3  ;;  %2765 = vmatmul.msk.bf16.gmra.mxu2 %vm708_vm4, %v4186_v33  ;;  %v1062_v3 = vpop.f32.mrf.mxu1 }
 0x1cd   : > { %v1552_v40 = vadd.f32 %v1512_v55, %v1418_v15  ;;  %v1063_v12 = vadd.f32 %v1062_v3, %v4190_v1 }
 0x1cf   : > { %v1381_v6 = vpop.f32.mrf.mxu2  ;;  %v3893_v8 = vadd.f32 %v1668_v44, %v1552_v40  ;;  %v4192_v40 = vld [vmem:[#allocation29_spill] sm:$0xff] }
 0x1d0   : > { %v1419_v39 = vadd.f32 %v1381_v6, %v1061_v2 }
 0x1d1   : > { %2782 = vmatmul.msk.bf16.gmra.mxu3 %vm708_vm4, %v4188_v18 }
 0x1d3   : > { %v1671_v34 = vpop.f32.mrf.mxu0 }
 0x1d4   : > { %v1515_v62 = vpop.f32.mrf.mxu3  ;;  %v1065_v45 = vpop.f32.mrf.mxu1 }
 0x1d5   : > { %v1553_v5 = vadd.f32 %v1515_v62, %v1419_v39  ;;  %v1066_v37 = vadd.f32 %v1065_v45, %v4191_v43 }
 0x1d6   : > { %2800 = vmatmul.msk.bf16.gmra.mxu0 %vm708_vm4, %v4189_v24 }
 0x1d7   : > { %v1383_v57 = vpop.f32.mrf.mxu2  ;;  %2745 = vmatmul.msk.bf16.gmra.mxu1 %vm708_vm4, %v4189_v24  ;;  %v3902_v51 = vadd.f32 %v1671_v34, %v1553_v5 }
 0x1d8   : > { %v1420_v27 = vadd.f32 %v1383_v57, %v1063_v12 }
 0x1db   : > { %v1673_v38 = vpop.f32.mrf.mxu0 }
 0x1dc   : > { %v1517_v60 = vpop.f32.mrf.mxu3  ;;  %2766 = vmatmul.msk.bf16.gmra.mxu2 %vm708_vm4, %v3595_v19  ;;  %v1067_v41 = vpop.f32.mrf.mxu1 }
 0x1dd   : > { %v1554_v9 = vadd.f32 %v1517_v60, %v1420_v27  ;;  %v1068_v19 = vadd.f32 %v1067_v41, %v4192_v40 }
 0x1df   : > { %v1386_v17 = vpop.f32.mrf.mxu2  ;;  %v3907_v63 = vadd.f32 %v1673_v38, %v1554_v9 }
 0x1e0   : > { %v1421_v15 = vadd.f32 %v1386_v17, %v1066_v37 }
 0x1e1   : > { %2783 = vmatmul.msk.bf16.gmra.mxu3 %vm708_vm4, %v3151_v4 }
 0x1e3   : > { %v1676_v44 = vpop.f32.mrf.mxu0 }
 0x1e4   : > { %v1520_v55 = vpop.f32.mrf.mxu3  ;;  %v1741_v33 = vpop.f32.mrf.mxu1 }
 0x1e5   : > { %v1555_v3 = vadd.f32 %v1520_v55, %v1421_v15  ;;  %v1821_v5 = vadd.f32 %v1741_v33, %v3610_v32  ;;  %v4193_v55 = vld [vmem:[#allocation15_spill] sm:$0xff] }
 0x1e6   : > { %2801 = vmatmul.msk.bf16.gmra.mxu0 %vm708_vm4, %v3612_v10 }
 0x1e7   : > { %v1388_v48 = vpop.f32.mrf.mxu2  ;;  %2746 = vmatmul.msk.bf16.gmra.mxu1 %vm708_vm4, %v3612_v10  ;;  %v3916_v2 = vadd.f32 %v1676_v44, %v1555_v3 }
 0x1e8   : > { %v1422_v6 = vadd.f32 %v1388_v48, %v1068_v19  ;;  %v4194_v48 = vld [vmem:[#allocation31_spill] sm:$0xff] }
 0x1eb   : > { %v1678_v39 = vpop.f32.mrf.mxu0 }
 0x1ec   : > { %v1522_v18 = vpop.f32.mrf.mxu3  ;;  %2767 = vmatmul.msk.bf16.gmra.mxu2 %vm708_vm4, %v3619_v42  ;;  %v1743_v4 = vpop.f32.mrf.mxu1 }
 0x1ed   : > { %v1556_v34 = vadd.f32 %v1522_v18, %v1422_v6  ;;  %v1822_v42 = vadd.f32 %v1743_v4, %v3623_v35 }
 0x1ef   : > { %v1875_v62 = vpop.f32.mrf.mxu2  ;;  %v3920_v45 = vadd.f32 %v1678_v39, %v1556_v34  ;;  %v4195_v39 = vld [vmem:[#allocation9_spill] sm:$0xff] }
 0x1f0   : > { %v1955_v24 = vadd.f32 %v1875_v62, %v1821_v5 }
 0x1f1   : > { %2784 = vmatmul.msk.bf16.gmra.mxu3 %vm708_vm4, %v3236_v25 }
 0x1f3   : > { %v2171_v10 = vpop.f32.mrf.mxu0 }
 0x1f4   : > { %v2031_v1 = vpop.f32.mrf.mxu3  ;;  %v1746_v12 = vpop.f32.mrf.mxu1 }
 0x1f5   : > { %v2111_v27 = vadd.f32 %v2031_v1, %v1955_v24  ;;  %v1823_v37 = vadd.f32 %v1746_v12, %v3636_v21  ;;  %v4196_v12 = vld [vmem:[#allocation32_spill] sm:$0xff] }
 0x1f6   : > { %2802 = vmatmul.msk.bf16.gmra.mxu0 %vm708_vm4, %v3638_v13 }
 0x1f7   : > { %v1877_v57 = vpop.f32.mrf.mxu2  ;;  %2747 = vmatmul.msk.bf16.gmra.mxu1 %vm708_vm4, %v3638_v13  ;;  %v2251_v25 = vadd.f32 %v2171_v10, %v2111_v27 }
 0x1f8   : > { %v1956_v38 = vadd.f32 %v1877_v57, %v1822_v42 }
 0x1f9   : > { %v2385_v35 = vmul.f32 %v2251_v25, %v2251_v25 }
 0x1fb   : > { %v2173_v60 = vpop.f32.mrf.mxu0 }
 0x1fc   : > { %v2033_v41 = vpop.f32.mrf.mxu3  ;;  %2768 = vmatmul.msk.bf16.gmra.mxu2 %vm708_vm4, %v3645_v50  ;;  %v1748_v32 = vpop.f32.mrf.mxu1 }
 0x1fd   : > { %v2112_v9 = vadd.f32 %v2033_v41, %v1956_v38  ;;  %v1824_v18 = vadd.f32 %v1748_v32, %v4195_v39  ;;  %v4197_v38 = vld [vmem:[#allocation30_spill] sm:$0xff] }
 0x1ff   : > { %v2252_v43 = vadd.f32 %v2173_v60, %v2112_v9  ;;  %v1880_v17 = vpop.f32.mrf.mxu2 }
 0x200   : > { %v1957_v50 = vadd.f32 %v1880_v17, %v1823_v37 }
 0x201   : > { %v2834_v13 = vpack.c.bf16 %v2252_v43, %v2251_v25  ;;  %v2347_v15 = vadd.f32 %v2252_v43, %v2251_v25  ;;  %v2386_v44 = vmul.f32 %v2252_v43, %v2252_v43  ;;  %2785 = vmatmul.msk.bf16.gmra.mxu3 %vm708_vm4, %v4193_v55  ;;  %v4198_v43 = vld [vmem:[#allocation3_spill] sm:$0xff] }
 0x202   : > { %v4199_v55 = vld [vmem:[#allocation35_spill] sm:$0xff] }
 0x203   : > { %2835 = vst [vmem:[%s3937_s18] sm:$0xff] %v2834_v13   ;;  %v2417_v33 = vadd.f32 %v2386_v44, %v2385_v35  ;;  %v2176_v3 = vpop.f32.mrf.mxu0 }
 0x204   : > { %v2036_v40 = vpop.f32.mrf.mxu3  ;;  %v1751_v21 = vpop.f32.mrf.mxu1 }
 0x205   : > { %v2113_v19 = vadd.f32 %v2036_v40, %v1957_v50  ;;  %v1825_v60 = vadd.f32 %v1751_v21, %v4197_v38 }
 0x206   : > { %2803 = vmatmul.msk.bf16.gmra.mxu0 %vm708_vm4, %v4194_v48 }
 0x207   : > { %v2253_v6 = vadd.f32 %v2176_v3, %v2113_v19  ;;  %v1882_v4 = vpop.f32.mrf.mxu2  ;;  %2748 = vmatmul.msk.bf16.gmra.mxu1 %vm708_vm4, %v4194_v48 }
 0x208   : > { %v1958_v5 = vadd.f32 %v1882_v4, %v1824_v18  ;;  %v4201_v4 = vld [vmem:[#allocation36_spill] sm:$0xff] }
 0x209   : > { %v2348_v34 = vadd.f32 %v2347_v15, %v2253_v6  ;;  %v2387_v62 = vmul.f32 %v2253_v6, %v2253_v6 }
 0x20b   : > { %v2418_v10 = vadd.f32 %v2417_v33, %v2387_v62  ;;  %v2178_v24 = vpop.f32.mrf.mxu0  ;;  %v4200_v33 = vld [vmem:[#allocation33_spill] sm:$0xff] }
 0x20c   : > { %v2038_v1 = vpop.f32.mrf.mxu3  ;;  %2769 = vmatmul.msk.bf16.gmra.mxu2 %vm708_vm4, %v4196_v12  ;;  %v1753_v42 = vpop.f32.mrf.mxu1 }
 0x20d   : > { %v2114_v57 = vadd.f32 %v2038_v1, %v1958_v5  ;;  %v1826_v3 = vadd.f32 %v1753_v42, %v4200_v33 }
 0x20f   : > { %v2254_v27 = vadd.f32 %v2178_v24, %v2114_v57  ;;  %v1885_v25 = vpop.f32.mrf.mxu2 }
 0x210   : > { %v1959_v37 = vadd.f32 %v1885_v25, %v1825_v60 }
 0x211   : > { %v2839_v41 = vpack.c.bf16 %v2254_v27, %v2253_v6  ;;  %v2349_v32 = vadd.f32 %v2348_v34, %v2254_v27  ;;  %v2388_v9 = vmul.f32 %v2254_v27, %v2254_v27  ;;  %2786 = vmatmul.msk.bf16.gmra.mxu3 %vm708_vm4, %v4198_v43  ;;  %v4203_v27 = vld [vmem:[#allocation4_spill] sm:$0xff]  ;;  %v4204_v43 = vld [vmem:[#allocation39_spill] sm:$0xff] }
 0x213   : > { %2911 = vst [vmem:[%s3937_s18 + $0x8] sm:$0xff] %v2839_v41   ;;  %v2419_v17 = vadd.f32 %v2418_v10, %v2388_v9  ;;  %v2181_v35 = vpop.f32.mrf.mxu0  ;;  %v4202_v10 = vld [vmem:[#allocation34_spill] sm:$0xff] }
 0x214   : > { %v2041_v13 = vpop.f32.mrf.mxu3  ;;  %v1756_v15 = vpop.f32.mrf.mxu1 }
 0x215   : > { %v2115_v44 = vadd.f32 %v2041_v13, %v1959_v37  ;;  %v1827_v24 = vadd.f32 %v1756_v15, %v4202_v10 }
 0x216   : > { %2804 = vmatmul.msk.bf16.gmra.mxu0 %vm708_vm4, %v4199_v55 }
 0x217   : > { %v2255_v50 = vadd.f32 %v2181_v35, %v2115_v44  ;;  %v1887_v40 = vpop.f32.mrf.mxu2  ;;  %2749 = vmatmul.msk.bf16.gmra.mxu1 %vm708_vm4, %v4199_v55 }
 0x218   : > { %v1960_v48 = vadd.f32 %v1887_v40, %v1826_v3  ;;  %v4206_v40 = vld [vmem:[#allocation6_spill] sm:$0xff] }
 0x219   : > { %v2350_v21 = vadd.f32 %v2349_v32, %v2255_v50  ;;  %v2389_v19 = vmul.f32 %v2255_v50, %v2255_v50 }
 0x21b   : > { %v2420_v6 = vadd.f32 %v2419_v17, %v2389_v19  ;;  %v2183_v39 = vpop.f32.mrf.mxu0  ;;  %v4205_v17 = vld [vmem:[#allocation37_spill] sm:$0xff] }
 0x21c   : > { %v2043_v18 = vpop.f32.mrf.mxu3  ;;  %2770 = vmatmul.msk.bf16.gmra.mxu2 %vm708_vm4, %v4201_v4  ;;  %v1758_v34 = vpop.f32.mrf.mxu1 }
 0x21d   : > { %v2116_v62 = vadd.f32 %v2043_v18, %v1960_v48  ;;  %v1828_v35 = vadd.f32 %v1758_v34, %v4205_v17 }
 0x21f   : > { %v2256_v5 = vadd.f32 %v2183_v39, %v2116_v62  ;;  %v1890_v1 = vpop.f32.mrf.mxu2 }
 0x220   : > { %v1961_v38 = vadd.f32 %v1890_v1, %v1827_v24 }
 0x221   : > { %v2844_v12 = vpack.c.bf16 %v2256_v5, %v2255_v50  ;;  %v2351_v42 = vadd.f32 %v2350_v21, %v2256_v5  ;;  %v2390_v57 = vmul.f32 %v2256_v5, %v2256_v5  ;;  %2787 = vmatmul.msk.bf16.gmra.mxu3 %vm708_vm4, %v4203_v27  ;;  %v4208_v5 = vld [vmem:[#allocation10_spill] sm:$0xff]  ;;  %v4209_v27 = vld [vmem:[#allocation41_spill] sm:$0xff] }
 0x223   : > { %2912 = vst [vmem:[%s3937_s18 + $0x10] sm:$0xff] %v2844_v12   ;;  %v2421_v60 = vadd.f32 %v2420_v6, %v2390_v57  ;;  %v2186_v25 = vpop.f32.mrf.mxu0  ;;  %v4207_v6 = vld [vmem:[#allocation38_spill] sm:$0xff] }
 0x224   : > { %v2046_v41 = vpop.f32.mrf.mxu3  ;;  %v1761_v32 = vpop.f32.mrf.mxu1 }
 0x225   : > { %v2117_v9 = vadd.f32 %v2046_v41, %v1961_v38  ;;  %v1829_v39 = vadd.f32 %v1761_v32, %v4207_v6 }
 0x226   : > { %2805 = vmatmul.msk.bf16.gmra.mxu0 %vm708_vm4, %v4204_v43 }
 0x227   : > { %v2257_v37 = vadd.f32 %v2186_v25, %v2117_v9  ;;  %v1892_v13 = vpop.f32.mrf.mxu2  ;;  %2750 = vmatmul.msk.bf16.gmra.mxu1 %vm708_vm4, %v4204_v43 }
 0x228   : > { %v1962_v55 = vadd.f32 %v1892_v13, %v1828_v35 }
 0x229   : > { %v2352_v15 = vadd.f32 %v2351_v42, %v2257_v37  ;;  %v2391_v44 = vmul.f32 %v2257_v37, %v2257_v37 }
 0x22b   : > { %v2422_v50 = vadd.f32 %v2421_v60, %v2391_v44  ;;  %v2188_v33 = vpop.f32.mrf.mxu0  ;;  %v4210_v60 = vld [vmem:[#allocation7_spill] sm:$0xff] }
 0x22c   : > { %v2048_v3 = vpop.f32.mrf.mxu3  ;;  %2771 = vmatmul.msk.bf16.gmra.mxu2 %vm708_vm4, %v4206_v40  ;;  %v1763_v21 = vpop.f32.mrf.mxu1 }
 0x22d   : > { %v2118_v19 = vadd.f32 %v2048_v3, %v1962_v55  ;;  %v1830_v25 = vadd.f32 %v1763_v21, %v4210_v60  ;;  %v4211_v55 = vld [vmem:[#allocation40_spill] sm:$0xff] }
 0x22f   : > { %v2258_v48 = vadd.f32 %v2188_v33, %v2118_v19  ;;  %v1895_v18 = vpop.f32.mrf.mxu2 }
 0x230   : > { %v1963_v10 = vadd.f32 %v1895_v18, %v1829_v39 }
 0x231   : > { %v2849_v4 = vpack.c.bf16 %v2258_v48, %v2257_v37  ;;  %v2353_v34 = vadd.f32 %v2352_v15, %v2258_v48  ;;  %v2392_v62 = vmul.f32 %v2258_v48, %v2258_v48  ;;  %2788 = vmatmul.msk.bf16.gmra.mxu3 %vm708_vm4, %v4208_v5  ;;  %v3986_v48 = vld [vmem:[%s3013_s30 + $0xcc] sm:$0xf] }
 0x232   : > { %v1988_v5 = vshrl.u32 %v3986_v48, 16 }
 0x233   : > { %2913 = vst [vmem:[%s3937_s18 + $0x18] sm:$0xff] %v2849_v4   ;;  %v2423_v24 = vadd.f32 %v2422_v50, %v2392_v62  ;;  %v2191_v1 = vpop.f32.mrf.mxu0  ;;  %v3991_v4 = vld [vmem:[%s3013_s30 + $0xd0] sm:$0xf] }
 0x234   : > { %v2051_v12 = vpop.f32.mrf.mxu3  ;;  %v1766_v42 = vpop.f32.mrf.mxu1 }
 0x235   : > { %v2119_v57 = vadd.f32 %v2051_v12, %v1963_v10  ;;  %v1831_v50 = vadd.f32 %v1766_v42, %v4211_v55  ;;  %v1991_v10 = vshll.u32 %v3986_v48, 16  ;;  %v1997_v12 = vshll.u32 %v3991_v4, 16  ;;  %v269_v55 = vld [vmem:[%s3013_s30 + $0xd4] sm:$0x1] }
 0x236   : > { %2806 = vmatmul.msk.bf16.gmra.mxu0 %vm708_vm4, %v4209_v27  ;;  %v2001_v42 = vshrl.u32 %v3991_v4, 16 }
 0x237   : > { %v2259_v38 = vadd.f32 %v2191_v1, %v2119_v57  ;;  %v1897_v41 = vpop.f32.mrf.mxu2  ;;  %2751 = vmatmul.msk.bf16.gmra.mxu1 %vm708_vm4, %v4209_v27 }
 0x238   : > { %v1964_v43 = vadd.f32 %v1897_v41, %v1830_v25  ;;  %v1719_v25 = vrot.slane %v3765_v11, 5  ;;  %v1990_v41 = vrot.slane %v1988_v5, 4 }
 0x239   : > { %v2354_v32 = vadd.f32 %v2353_v34, %v2259_v38  ;;  %v2393_v9 = vmul.f32 %v2259_v38, %v2259_v38 }
 0x23b   : > { %v2424_v37 = vadd.f32 %v2423_v24, %v2393_v9  ;;  %v2193_v17 = vpop.f32.mrf.mxu0 }
 0x23c   : > { %v2053_v35 = vpop.f32.mrf.mxu3  ;;  %2772 = vmatmul.msk.bf16.gmra.mxu2 %vm708_vm4, %v3758_v30  ;;  %v1768_v13 = vpop.f32.mrf.mxu1  ;;  %v4212_v30 = vld [vmem:[#allocation42_spill] sm:$0xff] }
 0x23d   : > { %v2120_v15 = vadd.f32 %v2053_v35, %v1964_v43  ;;  %v1716_v18 = vrot.slane %v4212_v30, 5  ;;  %v1832_v27 = vadd.f32 %v1768_v13, %v3762_v49  ;;  %v2003_v35 = vrot.slane %v2001_v42, 4 }
 0x23f   : > { %v2260_v44 = vadd.f32 %v2193_v17, %v2120_v15  ;;  %v1900_v33 = vpop.f32.mrf.mxu2  ;;  %v1718_v60 = vrot.slane %v1716_v18, 4  ;;  %v1999_v17 = vrot.slane %v1997_v12, 5 }
 0x240   : > { %v1965_v19 = vadd.f32 %v1900_v33, %v1831_v50 }
 0x241   : > { %v2854_v3 = vpack.c.bf16 %v2260_v44, %v2259_v38  ;;  %v2355_v40 = vadd.f32 %v2354_v32, %v2260_v44  ;;  %v2394_v21 = vmul.f32 %v2260_v44, %v2260_v44  ;;  %2789 = vmatmul.msk.bf16.gmra.mxu3 %vm708_vm4, %v3352_v53  ;;  %v4213_v53 = vld [vmem:[#allocation5_spill] sm:$0xff]  ;;  %v1993_v32 = vrot.slane %v1991_v10, 5 }
 0x242   : > { %v2736_v1 = vrot.slane %v4213_v53, 9  ;;  %v1720_v13 = vsel %vm3343_vm7, %v1718_v60, %v1719_v25  ;;  %v2792_v60 = vrot.slane %v3986_v48, 9 }
 0x243   : > { %2914 = vst [vmem:[%s3937_s18 + $0x20] sm:$0xff] %v2854_v3   ;;  %v2425_v6 = vadd.f32 %v2424_v37, %v2394_v21  ;;  %v2196_v39 = vpop.f32.mrf.mxu0  ;;  %v1994_v50 = vor.u32 %v1993_v32, %v1990_v41  ;;  %v2004_v21 = vor.u32 %v2003_v35, %v1999_v17 }
 0x244   : > { %v2056_v34 = vpop.f32.mrf.mxu3  ;;  %v1771_v62 = vpop.f32.mrf.mxu1  ;;  %v1717_v49 = vsel %vm3343_vm7, %v2736_v1, %v1716_v18 }
 0x245   : > { %v2121_v24 = vadd.f32 %v2056_v34, %v1965_v19  ;;  %v1723_v3 = vunpack.c.l.b16 %v1717_v49  ;;  %v2007_v19 = vshll.u32 %v269_v55, 16  ;;  %v1995_v18 = vrot.slane %v1994_v50, 4 }
 0x246   : > { %2807 = vmatmul.msk.bf16.gmra.mxu0 %vm708_vm4, %v3781_v46  ;;  %v2005_v53 = vrot.slane %v2004_v21, 4 }
 0x247   : > { %v2261_v57 = vadd.f32 %v2196_v39, %v2121_v24  ;;  %v1902_v38 = vpop.f32.mrf.mxu2  ;;  %2752 = vmatmul.msk.bf16.gmra.mxu1 %vm708_vm4, %v3781_v46  ;;  %v1833_v39 = vadd.f32 %v1771_v62, %v3779_v7  ;;  %v2009_v1 = vrot.slane %v2007_v19, 5 }
 0x248   : > { %v1966_v37 = vadd.f32 %v1902_v38, %v1832_v27  ;;  %v2146_v27 = vrot.slane %v3991_v4, 5 }
 0x249   : > { %v2356_v9 = vadd.f32 %v2355_v40, %v2261_v57  ;;  %v2395_v43 = vmul.f32 %v2261_v57, %v2261_v57  ;;  %v1724_v40 = vunpack.c.l.b16 %v1720_v13 }
 0x24a   : > { %v2148_v4 = vrot.slane %v2146_v27, 4  ;;  %v2147_v36 = vsel %vm3343_vm7, %v2792_v60, %v2146_v27 }
 0x24b   : > { %v2426_v15 = vadd.f32 %v2425_v6, %v2395_v43  ;;  %v2198_v44 = vpop.f32.mrf.mxu0  ;;  %v1725_v24 = vpack.c.b16 %v1724_v40, %v1723_v3  ;;  %v2830_v43 = vld [vmem:[%s3013_s30 + $0xcc] sm:$0xff]  ;;  %v2153_v50 = vunpack.c.l.b16 %v2147_v36 }
 0x24c   : > { %v2058_v46 = vpop.f32.mrf.mxu3  ;;  %2773 = vmatmul.msk.bf16.gmra.mxu2 %vm708_vm4, %v3790_v54  ;;  %v1773_v11 = vpop.f32.mrf.mxu1 }
 0x24d   : > { %v2122_v33 = vadd.f32 %v2058_v46, %v1966_v37  ;;  %v1834_v41 = vadd.f32 %v1773_v11, %v3793_v28 }
 0x24f   : > { %v2262_v6 = vadd.f32 %v2198_v44, %v2122_v33  ;;  %v1905_v30 = vpop.f32.mrf.mxu2 }
 0x250   : > { %v1967_v54 = vadd.f32 %v1905_v30, %v1833_v39 }
 0x251   : > { %v2859_v34 = vpack.c.bf16 %v2262_v6, %v2261_v57  ;;  %v2357_v5 = vadd.f32 %v2356_v9, %v2262_v6  ;;  %v2396_v10 = vmul.f32 %v2262_v6, %v2262_v6  ;;  %2790 = vmatmul.msk.bf16.gmra.mxu3 %vm708_vm4, %v3797_v22  ;;  %v2000_v57 = vsel %vm3040_vm3, %v1995_v18, %v1999_v17 }
 0x252   : > { %v2010_v22 = vsel %vm3040_vm3, %v2005_v53, %v2009_v1  ;;  %v2149_v9 = vrot.slane %v269_v55, 5  ;;  %v2013_v37 = vunpack.c.l.b16 %v2000_v57 }
 0x253   : > { %2915 = vst [vmem:[%s3937_s18 + $0x28] sm:$0xff] %v2859_v34   ;;  %v2427_v12 = vadd.f32 %v2426_v15, %v2396_v10  ;;  %v2201_v42 = vpop.f32.mrf.mxu0  ;;  %v2014_v44 = vunpack.c.l.b16 %v2010_v22 }
 0x254   : > { %v2061_v38 = vpop.f32.mrf.mxu3  ;;  %v1776_v7 = vpop.f32.mrf.mxu1  ;;  %v2150_v48 = vsel %vm3343_vm7, %v2148_v4, %v2149_v9 }
 0x255   : > { %v2123_v62 = vadd.f32 %v2061_v38, %v1967_v54  ;;  %v2015_v11 = vpack.c.b16 %v2014_v44, %v2013_v37  ;;  %v2154_v33 = vunpack.c.l.b16 %v2150_v48  ;;  %v1835_v40 = vadd.f32 %v1776_v7, %v3804_v58 }
 0x256   : > { %2808 = vmatmul.msk.bf16.gmra.mxu0 %vm708_vm4, %v1725_v24 }
 0x257   : > { %v2263_v25 = vadd.f32 %v2201_v42, %v2123_v62  ;;  %v1907_v32 = vpop.f32.mrf.mxu2  ;;  %2753 = vmatmul.msk.bf16.gmra.mxu1 %vm708_vm4, %v1725_v24  ;;  %v2155_v30 = vpack.c.b16 %v2154_v33, %v2153_v50 }
 0x258   : > { %v1968_v17 = vadd.f32 %v1907_v32, %v1834_v41 }
 0x259   : > { %v2358_v35 = vadd.f32 %v2357_v5, %v2263_v25  ;;  %v2397_v15 = vmul.f32 %v2263_v25, %v2263_v25 }
 0x25b   : > { %v2428_v49 = vadd.f32 %v2427_v12, %v2397_v15  ;;  %v2203_v13 = vpop.f32.mrf.mxu0 }
 0x25c   : > { %v2063_v28 = vpop.f32.mrf.mxu3  ;;  %2774 = vmatmul.msk.bf16.gmra.mxu2 %vm708_vm4, %v2830_v43  ;;  %v1778_v46 = vpop.f32.mrf.mxu1 }
 0x25d   : > { %v2124_v55 = vadd.f32 %v2063_v28, %v1968_v17  ;;  %v1836_v53 = vadd.f32 %v1778_v46, %v3809_v31 }
 0x25f   : > { %v2264_v3 = vadd.f32 %v2203_v13, %v2124_v55  ;;  %v1910_v21 = vpop.f32.mrf.mxu2 }
 0x260   : > { %v1969_v14 = vadd.f32 %v1910_v21, %v1835_v40 }
 0x261   : > { %v2864_v19 = vpack.c.bf16 %v2264_v3, %v2263_v25  ;;  %v2359_v6 = vadd.f32 %v2358_v35, %v2264_v3  ;;  %v2398_v39 = vmul.f32 %v2264_v3, %v2264_v3  ;;  %2791 = vmatmul.msk.bf16.gmra.mxu3 %vm708_vm4, %v2015_v11 }
 0x263   : > { %2916 = vst [vmem:[%s3937_s18 + $0x30] sm:$0xff] %v2864_v19   ;;  %v2429_v18 = vadd.f32 %v2428_v49, %v2398_v39  ;;  %v2206_v34 = vpop.f32.mrf.mxu0 }
 0x264   : > { %v2066_v5 = vpop.f32.mrf.mxu3  ;;  %v1781_v10 = vpop.f32.mrf.mxu1 }
 0x265   : > { %v2125_v54 = vadd.f32 %v2066_v5, %v1969_v14  ;;  %v1837_v60 = vadd.f32 %v1781_v10, %v3818_v16 }
 0x266   : > { %2809 = vmatmul.msk.bf16.gmra.mxu0 %vm708_vm4, %v2155_v30 }
 0x267   : > { %v2265_v24 = vadd.f32 %v2206_v34, %v2125_v54  ;;  %v1912_v58 = vpop.f32.mrf.mxu2 }
 0x268   : > { %v1970_v42 = vadd.f32 %v1912_v58, %v1836_v53 }
 0x269   : > { %v2360_v1 = vadd.f32 %v2359_v6, %v2265_v24  ;;  %v2399_v12 = vmul.f32 %v2265_v24, %v2265_v24 }
 0x26b   : > { %v2430_v27 = vadd.f32 %v2429_v18, %v2399_v12  ;;  %v2208_v38 = vpop.f32.mrf.mxu0 }
 0x26c   : > { %v2068_v7 = vpop.f32.mrf.mxu3  ;;  %v1783_v62 = vpop.f32.mrf.mxu1 }
 0x26d   : > { %v2126_v57 = vadd.f32 %v2068_v7, %v1970_v42  ;;  %v1838_v44 = vadd.f32 %v1783_v62, %v3823_v26 }
 0x26f   : > { %v2266_v22 = vadd.f32 %v2208_v38, %v2126_v57  ;;  %v1915_v25 = vpop.f32.mrf.mxu2 }
 0x270   : > { %v1971_v9 = vadd.f32 %v1915_v25, %v1837_v60 }
 0x271   : > { %v2869_v41 = vpack.c.bf16 %v2266_v22, %v2265_v24  ;;  %v2361_v32 = vadd.f32 %v2360_v1, %v2266_v22  ;;  %v2400_v4 = vmul.f32 %v2266_v22, %v2266_v22 }
 0x273   : > { %2917 = vst [vmem:[%s3937_s18 + $0x38] sm:$0xff] %v2869_v41   ;;  %v2431_v31 = vadd.f32 %v2430_v27, %v2400_v4  ;;  %v2211_v43 = vpop.f32.mrf.mxu0 }
 0x274   : > { %v2071_v37 = vpop.f32.mrf.mxu3  ;;  %v1786_v35 = vpop.f32.mrf.mxu1 }
 0x275   : > { %v2127_v15 = vadd.f32 %v2071_v37, %v1971_v9  ;;  %v1839_v33 = vadd.f32 %v1786_v35, %v3832_v59 }
 0x277   : > { %v2267_v17 = vadd.f32 %v2211_v43, %v2127_v15  ;;  %v1917_v49 = vpop.f32.mrf.mxu2 }
 0x278   : > { %v1972_v48 = vadd.f32 %v1917_v49, %v1838_v44 }
 0x279   : > { %v2362_v13 = vadd.f32 %v2361_v32, %v2267_v17  ;;  %v2401_v36 = vmul.f32 %v2267_v17, %v2267_v17 }
 0x27b   : > { %v2432_v16 = vadd.f32 %v2431_v31, %v2401_v36  ;;  %v2213_v28 = vpop.f32.mrf.mxu0 }
 0x27c   : > { %v2073_v46 = vpop.f32.mrf.mxu3  ;;  %v1788_v55 = vpop.f32.mrf.mxu1 }
 0x27d   : > { %v2128_v11 = vadd.f32 %v2073_v46, %v1972_v48  ;;  %v1840_v5 = vadd.f32 %v1788_v55, %v3837_v47 }
 0x27f   : > { %v2268_v50 = vadd.f32 %v2213_v28, %v2128_v11  ;;  %v1920_v3 = vpop.f32.mrf.mxu2 }
 0x280   : > { %v1973_v6 = vadd.f32 %v1920_v3, %v1839_v33 }
 0x281   : > { %v2874_v40 = vpack.c.bf16 %v2268_v50, %v2267_v17  ;;  %v2363_v21 = vadd.f32 %v2362_v13, %v2268_v50  ;;  %v2402_v19 = vmul.f32 %v2268_v50, %v2268_v50 }
 0x283   : > { %2918 = vst [vmem:[%s3937_s18 + $0x40] sm:$0xff] %v2874_v40   ;;  %v2433_v26 = vadd.f32 %v2432_v16, %v2402_v19  ;;  %v2216_v39 = vpop.f32.mrf.mxu0 }
 0x284   : > { %v2076_v14 = vpop.f32.mrf.mxu3  ;;  %v1791_v30 = vpop.f32.mrf.mxu1 }
 0x285   : > { %v2129_v18 = vadd.f32 %v2076_v14, %v1973_v6  ;;  %v1841_v38 = vadd.f32 %v1791_v30, %v3846_v23 }
 0x287   : > { %v2269_v34 = vadd.f32 %v2216_v39, %v2129_v18  ;;  %v1922_v10 = vpop.f32.mrf.mxu2 }
 0x288   : > { %v1974_v53 = vadd.f32 %v1922_v10, %v1840_v5 }
 0x289   : > { %v2364_v54 = vadd.f32 %v2363_v21, %v2269_v34  ;;  %v2403_v24 = vmul.f32 %v2269_v34, %v2269_v34 }
 0x28b   : > { %v2434_v59 = vadd.f32 %v2433_v26, %v2403_v24  ;;  %v2218_v58 = vpop.f32.mrf.mxu0 }
 0x28c   : > { %v2078_v1 = vpop.f32.mrf.mxu3  ;;  %v1793_v12 = vpop.f32.mrf.mxu1 }
 0x28d   : > { %v2130_v42 = vadd.f32 %v2078_v1, %v1974_v53  ;;  %v1842_v31 = vadd.f32 %v1793_v12, %v3851_v61 }
 0x28f   : > { %v2270_v27 = vadd.f32 %v2218_v58, %v2130_v42  ;;  %v1925_v7 = vpop.f32.mrf.mxu2 }
 0x290   : > { %v1975_v60 = vadd.f32 %v1925_v7, %v1841_v38 }
 0x291   : > { %v2879_v62 = vpack.c.bf16 %v2270_v27, %v2269_v34  ;;  %v2365_v57 = vadd.f32 %v2364_v54, %v2270_v27  ;;  %v2404_v22 = vmul.f32 %v2270_v27, %v2270_v27 }
 0x293   : > { %2919 = vst [vmem:[%s3937_s18 + $0x48] sm:$0xff] %v2879_v62   ;;  %v2435_v47 = vadd.f32 %v2434_v59, %v2404_v22  ;;  %v2221_v25 = vpop.f32.mrf.mxu0 }
 0x294   : > { %v2081_v41 = vpop.f32.mrf.mxu3  ;;  %v1796_v32 = vpop.f32.mrf.mxu1 }
 0x295   : > { %v2131_v4 = vadd.f32 %v2081_v41, %v1975_v60  ;;  %v1843_v48 = vadd.f32 %v1796_v32, %v3860_v56 }
 0x297   : > { %v2271_v9 = vadd.f32 %v2221_v25, %v2131_v4  ;;  %v1927_v43 = vpop.f32.mrf.mxu2 }
 0x298   : > { %v1976_v15 = vadd.f32 %v1927_v43, %v1842_v31 }
 0x299   : > { %v2366_v37 = vadd.f32 %v2365_v57, %v2271_v9  ;;  %v2405_v35 = vmul.f32 %v2271_v9, %v2271_v9 }
 0x29b   : > { %v2436_v23 = vadd.f32 %v2435_v47, %v2405_v35  ;;  %v2223_v17 = vpop.f32.mrf.mxu0 }
 0x29c   : > { %v2083_v44 = vpop.f32.mrf.mxu3  ;;  %v1798_v49 = vpop.f32.mrf.mxu1 }
 0x29d   : > { %v2132_v13 = vadd.f32 %v2083_v44, %v1976_v15  ;;  %v1844_v19 = vadd.f32 %v1798_v49, %v3865_v0 }
 0x29f   : > { %v2272_v36 = vadd.f32 %v2223_v17, %v2132_v13  ;;  %v1930_v16 = vpop.f32.mrf.mxu2 }
 0x2a0   : > { %v1977_v11 = vadd.f32 %v1930_v16, %v1843_v48 }
 0x2a1   : > { %v2884_v28 = vpack.c.bf16 %v2272_v36, %v2271_v9  ;;  %v2367_v46 = vadd.f32 %v2366_v37, %v2272_v36  ;;  %v2406_v55 = vmul.f32 %v2272_v36, %v2272_v36 }
 0x2a3   : > { %2920 = vst [vmem:[%s3937_s18 + $0x50] sm:$0xff] %v2884_v28   ;;  %v2437_v61 = vadd.f32 %v2436_v23, %v2406_v55  ;;  %v2226_v50 = vpop.f32.mrf.mxu0 }
 0x2a4   : > { %v2086_v33 = vpop.f32.mrf.mxu3  ;;  %v1801_v3 = vpop.f32.mrf.mxu1 }
 0x2a5   : > { %v2133_v40 = vadd.f32 %v2086_v33, %v1977_v11  ;;  %v1845_v54 = vadd.f32 %v1801_v3, %v3874_v29 }
 0x2a7   : > { %v2273_v21 = vadd.f32 %v2226_v50, %v2133_v40  ;;  %v1932_v6 = vpop.f32.mrf.mxu2 }
 0x2a8   : > { %v1978_v14 = vadd.f32 %v1932_v6, %v1844_v19 }
 0x2a9   : > { %v2368_v26 = vadd.f32 %v2367_v46, %v2273_v21  ;;  %v2407_v39 = vmul.f32 %v2273_v21, %v2273_v21 }
 0x2ab   : > { %v2438_v56 = vadd.f32 %v2437_v61, %v2407_v39  ;;  %v2228_v30 = vpop.f32.mrf.mxu0 }
 0x2ac   : > { %v2088_v18 = vpop.f32.mrf.mxu3  ;;  %v1803_v34 = vpop.f32.mrf.mxu1 }
 0x2ad   : > { %v2134_v5 = vadd.f32 %v2088_v18, %v1978_v14  ;;  %v1846_v62 = vadd.f32 %v1803_v34, %v3879_v52 }
 0x2af   : > { %v2274_v10 = vadd.f32 %v2228_v30, %v2134_v5  ;;  %v1935_v24 = vpop.f32.mrf.mxu2 }
 0x2b0   : > { %v1979_v1 = vadd.f32 %v1935_v24, %v1845_v54 }
 0x2b1   : > { %v2889_v53 = vpack.c.bf16 %v2274_v10, %v2273_v21  ;;  %v2369_v59 = vadd.f32 %v2368_v26, %v2274_v10  ;;  %v2408_v58 = vmul.f32 %v2274_v10, %v2274_v10 }
 0x2b3   : > { %2921 = vst [vmem:[%s3937_s18 + $0x58] sm:$0xff] %v2889_v53   ;;  %v2439_v0 = vadd.f32 %v2438_v56, %v2408_v58  ;;  %v2231_v12 = vpop.f32.mrf.mxu0 }
 0x2b4   : > { %v2091_v42 = vpop.f32.mrf.mxu3  ;;  %v1806_v27 = vpop.f32.mrf.mxu1 }
 0x2b5   : > { %v2135_v38 = vadd.f32 %v2091_v42, %v1979_v1  ;;  %v1847_v31 = vadd.f32 %v1806_v27, %v3888_v20 }
 0x2b7   : > { %v2275_v7 = vadd.f32 %v2231_v12, %v2135_v38  ;;  %v1937_v57 = vpop.f32.mrf.mxu2 }
 0x2b8   : > { %v1980_v47 = vadd.f32 %v1937_v57, %v1846_v62 }
 0x2b9   : > { %v2370_v22 = vadd.f32 %v2369_v59, %v2275_v7  ;;  %v2409_v60 = vmul.f32 %v2275_v7, %v2275_v7 }
 0x2bb   : > { %v2440_v29 = vadd.f32 %v2439_v0, %v2409_v60  ;;  %v2233_v25 = vpop.f32.mrf.mxu0 }
 0x2bc   : > { %v2093_v41 = vpop.f32.mrf.mxu3  ;;  %v1808_v32 = vpop.f32.mrf.mxu1 }
 0x2bd   : > { %v2136_v4 = vadd.f32 %v2093_v41, %v1980_v47  ;;  %v1848_v48 = vadd.f32 %v1808_v32, %v3893_v8 }
 0x2bf   : > { %v2276_v9 = vadd.f32 %v2233_v25, %v2136_v4  ;;  %v1940_v43 = vpop.f32.mrf.mxu2 }
 0x2c0   : > { %v1981_v23 = vadd.f32 %v1940_v43, %v1847_v31 }
 0x2c1   : > { %v2894_v37 = vpack.c.bf16 %v2276_v9, %v2275_v7  ;;  %v2371_v35 = vadd.f32 %v2370_v22, %v2276_v9  ;;  %v2410_v15 = vmul.f32 %v2276_v9, %v2276_v9 }
 0x2c3   : > { %2922 = vst [vmem:[%s3937_s18 + $0x60] sm:$0xff] %v2894_v37   ;;  %v2441_v52 = vadd.f32 %v2440_v29, %v2410_v15  ;;  %v2236_v17 = vpop.f32.mrf.mxu0 }
 0x2c4   : > { %v2096_v44 = vpop.f32.mrf.mxu3  ;;  %v1811_v13 = vpop.f32.mrf.mxu1 }
 0x2c5   : > { %v2137_v49 = vadd.f32 %v2096_v44, %v1981_v23  ;;  %v1849_v3 = vadd.f32 %v1811_v13, %v3902_v51 }
 0x2c7   : > { %v2277_v36 = vadd.f32 %v2236_v17, %v2137_v49  ;;  %v1942_v16 = vpop.f32.mrf.mxu2 }
 0x2c8   : > { %v1982_v55 = vadd.f32 %v1942_v16, %v1848_v48 }
 0x2c9   : > { %v2372_v28 = vadd.f32 %v2371_v35, %v2277_v36  ;;  %v2411_v46 = vmul.f32 %v2277_v36, %v2277_v36 }
 0x2cb   : > { %v2442_v20 = vadd.f32 %v2441_v52, %v2411_v46  ;;  %v2238_v11 = vpop.f32.mrf.mxu0 }
 0x2cc   : > { %v2098_v61 = vpop.f32.mrf.mxu3  ;;  %v1813_v21 = vpop.f32.mrf.mxu1 }
 0x2cd   : > { %v2138_v50 = vadd.f32 %v2098_v61, %v1982_v55  ;;  %v1850_v34 = vadd.f32 %v1813_v21, %v3907_v63 }
 0x2cf   : > { %v2278_v33 = vadd.f32 %v2238_v11, %v2138_v50  ;;  %v1945_v40 = vpop.f32.mrf.mxu2 }
 0x2d0   : > { %v1983_v39 = vadd.f32 %v1945_v40, %v1849_v3 }
 0x2d1   : > { %v2899_v19 = vpack.c.bf16 %v2278_v33, %v2277_v36  ;;  %v2373_v6 = vadd.f32 %v2372_v28, %v2278_v33  ;;  %v2412_v26 = vmul.f32 %v2278_v33, %v2278_v33 }
 0x2d3   : > { %2923 = vst [vmem:[%s3937_s18 + $0x68] sm:$0xff] %v2899_v19   ;;  %v2443_v8 = vadd.f32 %v2442_v20, %v2412_v26  ;;  %v2241_v14 = vpop.f32.mrf.mxu0 }
 0x2d4   : > { %v2101_v56 = vpop.f32.mrf.mxu3  ;;  %v1816_v51 = vpop.f32.mrf.mxu1 }
 0x2d5   : > { %v2139_v30 = vadd.f32 %v2101_v56, %v1983_v39  ;;  %v1851_v12 = vadd.f32 %v1816_v51, %v3916_v2 }
 0x2d7   : > { %v2279_v18 = vadd.f32 %v2241_v14, %v2139_v30  ;;  %v1947_v5 = vpop.f32.mrf.mxu2 }
 0x2d8   : > { %v1984_v24 = vadd.f32 %v1947_v5, %v1850_v34 }
 0x2d9   : > { %v2374_v10 = vadd.f32 %v2373_v6, %v2279_v18  ;;  %v2413_v54 = vmul.f32 %v2279_v18, %v2279_v18 }
 0x2db   : > { %v2444_v53 = vadd.f32 %v2443_v8, %v2413_v54  ;;  %v2243_v59 = vpop.f32.mrf.mxu0 }
 0x2dc   : > { %v2103_v58 = vpop.f32.mrf.mxu3  ;;  %v1818_v57 = vpop.f32.mrf.mxu1 }
 0x2dd   : > { %v2140_v1 = vadd.f32 %v2103_v58, %v1984_v24  ;;  %v1852_v25 = vadd.f32 %v1818_v57, %v3920_v45 }
 0x2df   : > { %v2280_v0 = vadd.f32 %v2243_v59, %v2140_v1  ;;  %v1950_v42 = vpop.f32.mrf.mxu2 }
 0x2e0   : > { %v1985_v62 = vadd.f32 %v1950_v42, %v1851_v12 }
 0x2e1   : > { %v2904_v27 = vpack.c.bf16 %v2280_v0, %v2279_v18  ;;  %v2375_v38 = vadd.f32 %v2374_v10, %v2280_v0  ;;  %v2414_v7 = vmul.f32 %v2280_v0, %v2280_v0 }
 0x2e3   : > { %2924 = vst [vmem:[%s3937_s18 + $0x70] sm:$0xff] %v2904_v27   ;;  %v2445_v63 = vadd.f32 %v2444_v53, %v2414_v7  ;;  %v2246_v22 = vpop.f32.mrf.mxu0 }
 0x2e4   : > { %v2106_v60 = vpop.f32.mrf.mxu3 }
 0x2e5   : > { %v2141_v47 = vadd.f32 %v2106_v60, %v1985_v62 }
 0x2e7   : > { %v2281_v29 = vadd.f32 %v2246_v22, %v2141_v47  ;;  %v1952_v41 = vpop.f32.mrf.mxu2 }
 0x2e8   : > { %v1986_v9 = vadd.f32 %v1952_v41, %v1852_v25 }
 0x2e9   : > { %v2376_v32 = vadd.f32 %v2375_v38, %v2281_v29  ;;  %v2415_v4 = vmul.f32 %v2281_v29, %v2281_v29 }
 0x2eb   : > { %v2446_v2 = vadd.f32 %v2445_v63, %v2415_v4  ;;  %v2248_v37 = vpop.f32.mrf.mxu0 }
 0x2ec   : > { %v2108_v31 = vpop.f32.mrf.mxu3 }
 0x2ed   : > { %v2142_v43 = vadd.f32 %v2108_v31, %v1986_v9 }
 0x2ef   : > { %v2282_v35 = vadd.f32 %v2248_v37, %v2142_v43 }
 0x2f1   : > { %v2909_v15 = vpack.c.bf16 %v2282_v35, %v2281_v29  ;;  %v2377_v23 = vadd.f32 %v2376_v32, %v2282_v35  ;;  %v2416_v52 = vmul.f32 %v2282_v35, %v2282_v35 }
 0x2f3   : > { %2925 = vst [vmem:[%s3937_s18 + $0x78] sm:$0xff] %v2909_v15   ;;  %v2378_v17 = vrot.slane %v2377_v23, 4  ;;  %v2447_v44 = vadd.f32 %v2446_v2, %v2416_v52 }
 0x2f5   : > { %v2379_v49 = vadd.f32 %v2378_v17, %v2377_v23  ;;  %v2448_v13 = vrot.slane %v2447_v44, 4 }
 0x2f7   : > { %v2380_v45 = vrot.slane %v2379_v49, 2  ;;  %v2449_v36 = vadd.f32 %v2448_v13, %v2447_v44 }
 0x2f9   : > { %v2381_v48 = vadd.f32 %v2380_v45, %v2379_v49  ;;  %v2450_v16 = vrot.slane %v2449_v36, 2 }
 0x2fb   : > { %v2382_v28 = vrot.slane %v2381_v48, 1  ;;  %v2451_v46 = vadd.f32 %v2450_v16, %v2449_v36 }
 0x2fd   : > { %v2383_v55 = vadd.f32 %v2382_v28, %v2381_v48  ;;  %v2452_v20 = vrot.slane %v2451_v46, 1 }
 0x2ff   : > { %2384 = vst [vmem:[%s211_s21] sm:$0x1] %v2383_v55  ;;  %v2453_v11 = vadd.f32 %v2452_v20, %v2451_v46 }
 0x301   : > { %2454 = vst [vmem:[%s214_s24] sm:$0x1] %v2453_v11 }
 0x302 PF: > { %s15_s15 = sadd.s32 1, %s2952_s15  }
 0x303   : > { %p12_p4 = scmp.ge.s32.totalorder %s15_s15, 4  }
 0x305   :  { %14 = sbr.rel (!%p12_p4) target bundleno = 1 (0x1), region = 90 }

</bundles_post_ra>
